<compile_context>
chip_gen: v6e
topology: v6e:2x2x1
jax: 0.10.0
libtpu: 0.0.40
codegen_flags: <defaults>
</compile_context>

<pallas_src>
import numpy as np

import jax
import jax.numpy as jnp
from jax.experimental import pallas as pl
from jax.experimental.pallas import tpu as pltpu


CIN_PAD = 8       # pad the 1-channel input to 8 lanes
COUT_PAD = 128    # lane-dense final-conv output slab (channel 0 valid)


# ----------------------------------------------------------------------------
# Constant 0/1 matrices (built with numpy at trace time; exact in bf16)
# ----------------------------------------------------------------------------
def _shift_mats(H, W):
    # m[k] @ x_flat == x shifted by tap k (k = kh*3 + kw), zero at the border.
    HW = H * W
    r = np.arange(HW)
    h, w = r // W, r % W
    m = np.zeros((9, HW, HW), np.float32)
    k = 0
    for dy in (-1, 0, 1):
        for dx in (-1, 0, 1):
            hs, ws = h + dy, w + dx
            ok = (hs >= 0) & (hs < H) & (ws >= 0) & (ws < W)
            m[k, r[ok], (hs * W + ws)[ok]] = 1.0
            k += 1
    return m


def _pool_mats(H, W):
    # m[k] @ y_flat == candidate k (k = dy*2 + dx) of each 2x2 window.
    Ho, Wo = H // 2, W // 2
    r = np.arange(Ho * Wo)
    ho, wo = r // Wo, r % Wo
    m = np.zeros((4, Ho * Wo, H * W), np.float32)
    k = 0
    for dy in (0, 1):
        for dx in (0, 1):
            m[k, r, (2 * ho + dy) * W + (2 * wo + dx)] = 1.0
            k += 1
    return m


def _upsample_mats(H, W):
    # m[k] scatters the (H*W) grid into the (2H*2W) grid at offset (p, q),
    # k = p*2 + q — matches the (Cin, 2, 2, Cout) reshape of ConvTranspose2d.
    HW = H * W
    r = np.arange(HW)
    h, w = r // W, r % W
    m = np.zeros((4, 4 * HW, HW), np.float32)
    k = 0
    for p in (0, 1):
        for q in (0, 1):
            m[k, (2 * h + p) * (2 * W) + (2 * w + q), r] = 1.0
            k += 1
    return m


# ----------------------------------------------------------------------------
# The fused Pallas kernel (one image per grid step)
# ----------------------------------------------------------------------------
def _unet_kernel(x_ref, t16_ref, t8_ref, t4_ref, s16_ref, s8_ref, u22_ref,
                 w1_ref, b1_ref, w2_ref, b2_ref, w3_ref, b3_ref,
                 wu_ref, bu_ref, wd_ref, bd_ref, wf_ref, bf_ref, out_ref):
    f32, bf16 = jnp.float32, jnp.bfloat16

    def conv3x3(act_bf, t_ref, wblk_ref, b_ref):
        # act_bf: (R, Cin) bf16.  wblk_ref: (Cin, 9*Cout) bf16 with tap-major
        # Cout-wide column blocks.  One lane-dense matmul produces all nine
        # per-tap partial products Z; the 3x3 spatial gather is then nine
        # accumulating, Cout-lane-dense MXU matmuls with the exact 0/1 shift
        # matrices — no lane concat, no per-tap casts, one f32 accumulator.
        cout = b_ref.shape[-1]
        z = jnp.dot(act_bf, wblk_ref[...], preferred_element_type=f32)
        zb = z.astype(bf16)                                # single cast/layer
        acc = jnp.dot(t_ref[0], zb[:, :cout], preferred_element_type=f32)
        for k in range(1, 9):
            acc = acc + jnp.dot(t_ref[k], zb[:, k * cout:(k + 1) * cout],
                                preferred_element_type=f32)
        # f32 bias + ReLU epilogue, then one cast for the next MXU consumer.
        return jnp.maximum(acc + b_ref[...], 0.0).astype(bf16)   # (R, Cout)

    def maxpool2x2(y_bf, s_ref):
        # Exact 0/1 row-selection matmuls (f32 accumulation of bf16 values is
        # exact), 4-way max on the VPU; the final downcast is exact because
        # every candidate is already a bf16-representable value.
        c = [jnp.dot(s_ref[j], y_bf, preferred_element_type=f32)
             for j in range(4)]
        m = jnp.maximum(jnp.maximum(c[0], c[1]), jnp.maximum(c[2], c[3]))
        return m.astype(jnp.bfloat16)                      # (R/4, C) bf16

    x = x_ref[0]                                           # (256, 8) bf16
    y1 = conv3x3(x, t16_ref, w1_ref, b1_ref)               # (256,  64) bf16
    p1 = maxpool2x2(y1, s16_ref)                           # ( 64,  64) bf16
    y2 = conv3x3(p1, t8_ref, w2_ref, b2_ref)               # ( 64, 128) bf16
    p2 = maxpool2x2(y2, s8_ref)                            # ( 16, 128) bf16
    y3 = conv3x3(p2, t4_ref, w3_ref, b3_ref)               # ( 16, 256) bf16

    # ConvTranspose2d(256->128, k=2, s=2): one matmul to (16, 4*128), then four
    # exact 0/1 scatter matmuls accumulated in f32 into the (64, 128) layout.
    z = jnp.dot(y3, wu_ref[...], preferred_element_type=f32).astype(bf16)
    cu = bu_ref.shape[-1]                                  # 128
    up = jnp.dot(u22_ref[0], z[:, :cu], preferred_element_type=f32)
    for j in range(1, 4):
        up = up + jnp.dot(u22_ref[j], z[:, j * cu:(j + 1) * cu],
                          preferred_element_type=f32)
    up = jnp.maximum(up + bu_ref[...], 0.0).astype(bf16)   # (64, 128) bf16

    yd = conv3x3(up, t8_ref, wd_ref, bd_ref)               # (64,  64) bf16
    out = jnp.dot(yd, wf_ref[...], preferred_element_type=f32) + bf_ref[...]
    out_ref[0] = out.astype(out_ref.dtype)                 # (64, 128) bf16 slab


# ----------------------------------------------------------------------------
# Wrapper: weight re-layout + single pallas_call
# ----------------------------------------------------------------------------
def _prep_conv_w_blocked(w, cin_pad=None):
    # torch (Cout, Cin, kh, kw) -> (Cin[_pad], kh*kw*Cout): column block k
    # (k = kh_i*3 + kw_i, matching _shift_mats tap order) holds W_k (Cin, Cout).
    cout, cin, kh, kw = w.shape
    wm = jnp.transpose(w, (1, 2, 3, 0)).reshape(cin, kh * kw * cout)
    if cin_pad is not None and cin_pad > cin:
        wm = jnp.pad(wm, ((0, cin_pad - cin), (0, 0)))
    return wm


def unet_forward(x_nchw, p):
    N, _, H, W = x_nchw.shape                              # (N, 1, 16, 16)
    bf16, f32 = jnp.bfloat16, jnp.float32

    # Constant shift / pool / scatter matrices (exact 0/1 values).
    t16 = jnp.asarray(_shift_mats(H, W), bf16)             # (9, 256, 256)
    t8 = jnp.asarray(_shift_mats(H // 2, W // 2), bf16)    # (9,  64,  64)
    t4 = jnp.asarray(_shift_mats(H // 4, W // 4), bf16)    # (9,  16,  16)
    s16 = jnp.asarray(_pool_mats(H, W), bf16)              # (4,  64, 256)
    s8 = jnp.asarray(_pool_mats(H // 2, W // 2), bf16)     # (4,  16,  64)
    u22 = jnp.asarray(_upsample_mats(H // 4, W // 4), bf16)  # (4, 64, 16)

    # Weights -> blocked matmul layouts (Cin, 9*Cout) in bf16; biases stay f32.
    w1 = _prep_conv_w_blocked(p["w1"], CIN_PAD).astype(bf16)   # (  8,  576)
    w2 = _prep_conv_w_blocked(p["w2"]).astype(bf16)            # ( 64, 1152)
    w3 = _prep_conv_w_blocked(p["w3"]).astype(bf16)            # (128, 2304)
    wd = _prep_conv_w_blocked(p["wd"]).astype(bf16)            # (128,  576)
    cin_u, cout_u = p["wu"].shape[0], p["wu"].shape[1]
    wu = (jnp.transpose(p["wu"], (0, 2, 3, 1))
          .reshape(cin_u, 4 * cout_u).astype(bf16))            # (256,  512)
    wf = jnp.pad(p["wf"].reshape(1, -1).T,
                 ((0, 0), (0, COUT_PAD - 1))).astype(bf16)     # ( 64,  128)
    b1 = p["b1"].reshape(1, -1).astype(f32)
    b2 = p["b2"].reshape(1, -1).astype(f32)
    b3 = p["b3"].reshape(1, -1).astype(f32)
    bu = p["bu"].reshape(1, -1).astype(f32)
    bd = p["bd"].reshape(1, -1).astype(f32)
    bfin = jnp.pad(p["bf"].reshape(1, -1),
                   ((0, 0), (0, COUT_PAD - 1))).astype(f32)    # (1, 128)

    # Input: NCHW -> (N, H*W, CIN_PAD) bf16 (channel 0 real, rest zero).
    x = jnp.transpose(x_nchw, (0, 2, 3, 1)).reshape(N, H * W, 1)
    x = jnp.pad(x, ((0, 0), (0, 0), (0, CIN_PAD - 1))).astype(bf16)

    consts_and_weights = [t16, t8, t4, s16, s8, u22,
                          w1, b1, w2, b2, w3, b3, wu, bu, wd, bd, wf, bfin]

    def whole(a):  # full-array block, constant index map -> fetched once
        return pl.BlockSpec(a.shape, lambda n: (0,) * a.ndim)

    Ho, Wo = H // 2, W // 2
    out = pl.pallas_call(
        _unet_kernel,
        out_shape=jax.ShapeDtypeStruct((N, Ho * Wo, COUT_PAD), bf16),
        grid=(N,),
        in_specs=[pl.BlockSpec((1, H * W, CIN_PAD), lambda n: (n, 0, 0))]
                 + [whole(a) for a in consts_and_weights],
        out_specs=pl.BlockSpec((1, Ho * Wo, COUT_PAD), lambda n: (n, 0, 0)),
        compiler_params=pltpu.CompilerParams(
            dimension_semantics=("parallel",)),
    )(x, *consts_and_weights)

    out = out[..., :1].astype(f32).reshape(N, Ho, Wo, 1)   # channel 0 valid
    return jnp.transpose(out, (0, 3, 1, 2))                # NCHW (N, 1, 8, 8)


# ----------------------------------------------------------------------------
# Deterministic parameter init (PyTorch-style uniform bounds, synthetic)
# ----------------------------------------------------------------------------
def init_params(key):
    def conv_init(k, cout, cin, kh, kw):
        k1, k2 = jax.random.split(k)
        bound = 1.0 / (cin * kh * kw) ** 0.5
        w = jax.random.uniform(k1, (cout, cin, kh, kw), jnp.float32,
                               -bound, bound)
        b = jax.random.uniform(k2, (cout,), jnp.float32, -bound, bound)
        return w, b

    def convT_init(k, cin, cout, kh, kw):
        k1, k2 = jax.random.split(k)
        bound = 1.0 / (cout * kh * kw) ** 0.5
        w = jax.random.uniform(k1, (cin, cout, kh, kw), jnp.float32,
                               -bound, bound)
        b = jax.random.uniform(k2, (cout,), jnp.float32, -bound, bound)
        return w, b

    ks = jax.random.split(key, 6)
    p = {}
    p["w1"], p["b1"] = conv_init(ks[0], 64, 1, 3, 3)      # enc_conv1
    p["w2"], p["b2"] = conv_init(ks[1], 128, 64, 3, 3)    # enc_conv2
    p["w3"], p["b3"] = conv_init(ks[2], 256, 128, 3, 3)   # bottleneck
    p["wu"], p["bu"] = convT_init(ks[3], 256, 128, 2, 2)  # up_conv
    p["wd"], p["bd"] = conv_init(ks[4], 64, 128, 3, 3)    # dec_conv
    p["wf"], p["bf"] = conv_init(ks[5], 1, 64, 1, 1)      # final_conv
    return p


# ----------------------------------------------------------------------------
# Pure-JAX f32 reference (for correctness check)
# ----------------------------------------------------------------------------
def ref_forward(x_nchw, p):
    x = jnp.transpose(x_nchw, (0, 2, 3, 1)).astype(jnp.float32)

    def conv(x, w, b, relu):
        wh = jnp.transpose(w, (2, 3, 1, 0))  # HWIO
        y = jax.lax.conv_general_dilated(
            x, wh, (1, 1), "SAME",
            dimension_numbers=("NHWC", "HWIO", "NHWC")) + b
        return jnp.maximum(y, 0.0) if relu else y

    def pool(x):
        return jax.lax.reduce_window(x, -jnp.inf, jax.lax.max,
                                     (1, 2, 2, 1), (1, 2, 2, 1), "VALID")

    def convT(x, w, b):
        N, H, W, _ = x.shape
        Cout = w.shape[1]
        y = jnp.einsum("nhwc,copq->nhpwqo", x, w).reshape(
            N, 2 * H, 2 * W, Cout) + b
        return jnp.maximum(y, 0.0)

    x1 = conv(x, p["w1"], p["b1"], True)
    x2 = conv(pool(x1), p["w2"], p["b2"], True)
    bn = conv(pool(x2), p["w3"], p["b3"], True)
    up = convT(bn, p["wu"], p["bu"])
    dec = conv(up, p["wd"], p["bd"], True)
    out = conv(dec, p["wf"], p["bf"], False)
    return jnp.transpose(out, (0, 3, 1, 2))


if __name__ == "__main__":
    key = jax.random.PRNGKey(0)
    kx, kp = jax.random.split(key)
    x = jax.random.normal(kx, (2, 1, 16, 16), jnp.float32)  # NCHW, 1 channel
    params = init_params(kp)

    out = jax.jit(unet_forward)(x, params)
    out = jax.block_until_ready(out)

    assert out.shape == (2, 1, 8, 8), out.shape
    ref = ref_forward(x, params)
    err = float(jnp.max(jnp.abs(out - ref)))
    # bf16 matmul inputs / bf16 inter-layer activations / bf16 per-tap partial
    # sums with f32 accumulation -> slightly loose absolute tolerance.
    assert err < 3e-2, f"max abs err {err}"
    print("KERNEL_OK")
</pallas_src>

<mosaic_0001>
module attributes {stable_mosaic.version = 11 : i64} {
  func.func @_unet_kernel(%arg0: i32, %arg1: memref<1x256x8xbf16, #tpu.memory_space<vmem>>, %arg2: memref<9x256x256xbf16, #tpu.memory_space<vmem>>, %arg3: memref<9x64x64xbf16, #tpu.memory_space<vmem>>, %arg4: memref<9x16x16xbf16, #tpu.memory_space<vmem>>, %arg5: memref<4x64x256xbf16, #tpu.memory_space<vmem>>, %arg6: memref<4x16x64xbf16, #tpu.memory_space<vmem>>, %arg7: memref<4x64x16xbf16, #tpu.memory_space<vmem>>, %arg8: memref<8x576xbf16, #tpu.memory_space<vmem>>, %arg9: memref<1x64xf32, #tpu.memory_space<vmem>>, %arg10: memref<64x1152xbf16, #tpu.memory_space<vmem>>, %arg11: memref<1x128xf32, #tpu.memory_space<vmem>>, %arg12: memref<128x2304xbf16, #tpu.memory_space<vmem>>, %arg13: memref<1x256xf32, #tpu.memory_space<vmem>>, %arg14: memref<256x512xbf16, #tpu.memory_space<vmem>>, %arg15: memref<1x128xf32, #tpu.memory_space<vmem>>, %arg16: memref<128x576xbf16, #tpu.memory_space<vmem>>, %arg17: memref<1x64xf32, #tpu.memory_space<vmem>>, %arg18: memref<64x128xbf16, #tpu.memory_space<vmem>>, %arg19: memref<1x128xf32, #tpu.memory_space<vmem>>, %arg20: memref<1x64x128xbf16, #tpu.memory_space<vmem>>) attributes {dimension_semantics = [#tpu.dimension_semantics<parallel>], iteration_bounds = array<i64: 2>, scalar_prefetch = 0 : i64, scratch_operands = 0 : i64, tpu.core_type = #tpu.core_type<tc>, window_params = [{transform_indices = @transform_0, window_bounds = array<i64: 1, 256, 8>}, {pipeline_mode = #tpu.pipeline_mode<synchronous>, transform_indices = @transform_1, window_bounds = array<i64: 9, 256, 256>}, {pipeline_mode = #tpu.pipeline_mode<synchronous>, transform_indices = @transform_2, window_bounds = array<i64: 9, 64, 64>}, {pipeline_mode = #tpu.pipeline_mode<synchronous>, transform_indices = @transform_3, window_bounds = array<i64: 9, 16, 16>}, {pipeline_mode = #tpu.pipeline_mode<synchronous>, transform_indices = @transform_4, window_bounds = array<i64: 4, 64, 256>}, {pipeline_mode = #tpu.pipeline_mode<synchronous>, transform_indices = @transform_5, window_bounds = array<i64: 4, 16, 64>}, {pipeline_mode = #tpu.pipeline_mode<synchronous>, transform_indices = @transform_6, window_bounds = array<i64: 4, 64, 16>}, {pipeline_mode = #tpu.pipeline_mode<synchronous>, transform_indices = @transform_7, window_bounds = array<i64: 8, 576>}, {pipeline_mode = #tpu.pipeline_mode<synchronous>, transform_indices = @transform_8, window_bounds = array<i64: 1, 64>}, {pipeline_mode = #tpu.pipeline_mode<synchronous>, transform_indices = @transform_9, window_bounds = array<i64: 64, 1152>}, {pipeline_mode = #tpu.pipeline_mode<synchronous>, transform_indices = @transform_10, window_bounds = array<i64: 1, 128>}, {pipeline_mode = #tpu.pipeline_mode<synchronous>, transform_indices = @transform_11, window_bounds = array<i64: 128, 2304>}, {pipeline_mode = #tpu.pipeline_mode<synchronous>, transform_indices = @transform_12, window_bounds = array<i64: 1, 256>}, {pipeline_mode = #tpu.pipeline_mode<synchronous>, transform_indices = @transform_13, window_bounds = array<i64: 256, 512>}, {pipeline_mode = #tpu.pipeline_mode<synchronous>, transform_indices = @transform_14, window_bounds = array<i64: 1, 128>}, {pipeline_mode = #tpu.pipeline_mode<synchronous>, transform_indices = @transform_15, window_bounds = array<i64: 128, 576>}, {pipeline_mode = #tpu.pipeline_mode<synchronous>, transform_indices = @transform_16, window_bounds = array<i64: 1, 64>}, {pipeline_mode = #tpu.pipeline_mode<synchronous>, transform_indices = @transform_17, window_bounds = array<i64: 64, 128>}, {pipeline_mode = #tpu.pipeline_mode<synchronous>, transform_indices = @transform_18, window_bounds = array<i64: 1, 128>}, {transform_indices = @transform_19, window_bounds = array<i64: 1, 64, 128>}]} {
    %c0 = arith.constant 0 : index
    %c0_0 = arith.constant 0 : index
    %c0_1 = arith.constant 0 : index
    %0 = vector.load %arg1[%c0, %c0_0, %c0_1] : memref<1x256x8xbf16, #tpu.memory_space<vmem>>, vector<1x256x8xbf16>
    %1 = vector.shape_cast %0 : vector<1x256x8xbf16> to vector<256x8xbf16>
    %c0_2 = arith.constant 0 : index
    %c0_3 = arith.constant 0 : index
    %2 = vector.load %arg8[%c0_2, %c0_3] : memref<8x576xbf16, #tpu.memory_space<vmem>>, vector<8x576xbf16>
    %cst = arith.constant dense<0.000000e+00> : vector<256x576xf32>
    %3 = tpu.matmul %1, %2, %cst {dimension_numbers = #tpu.dot_dimension_numbers<[1], [0], [0], [1], [0, 0, 1, 1], [], []>} : vector<256x8xbf16>, vector<8x576xbf16>, vector<256x576xf32> -> vector<256x576xf32>
    %4 = arith.truncf %3 : vector<256x576xf32> to vector<256x576xbf16>
    %c0_4 = arith.constant 0 : index
    %c0_5 = arith.constant 0 : index
    %c0_6 = arith.constant 0 : index
    %5 = vector.load %arg2[%c0_4, %c0_5, %c0_6] : memref<9x256x256xbf16, #tpu.memory_space<vmem>>, vector<1x256x256xbf16>
    %6 = vector.shape_cast %5 : vector<1x256x256xbf16> to vector<256x256xbf16>
    %7 = vector.extract_strided_slice %4 {offsets = [0, 0], sizes = [256, 64], strides = [1, 1]} : vector<256x576xbf16> to vector<256x64xbf16>
    %cst_7 = arith.constant dense<0.000000e+00> : vector<256x64xf32>
    %8 = tpu.matmul %6, %7, %cst_7 {dimension_numbers = #tpu.dot_dimension_numbers<[1], [0], [0], [1], [0, 0, 1, 1], [], []>} : vector<256x256xbf16>, vector<256x64xbf16>, vector<256x64xf32> -> vector<256x64xf32>
    %c1 = arith.constant 1 : index
    %c0_8 = arith.constant 0 : index
    %c0_9 = arith.constant 0 : index
    %9 = vector.load %arg2[%c1, %c0_8, %c0_9] : memref<9x256x256xbf16, #tpu.memory_space<vmem>>, vector<1x256x256xbf16>
    %10 = vector.shape_cast %9 : vector<1x256x256xbf16> to vector<256x256xbf16>
    %11 = vector.extract_strided_slice %4 {offsets = [0, 64], sizes = [256, 64], strides = [1, 1]} : vector<256x576xbf16> to vector<256x64xbf16>
    %cst_10 = arith.constant dense<0.000000e+00> : vector<256x64xf32>
    %12 = tpu.matmul %10, %11, %cst_10 {dimension_numbers = #tpu.dot_dimension_numbers<[1], [0], [0], [1], [0, 0, 1, 1], [], []>} : vector<256x256xbf16>, vector<256x64xbf16>, vector<256x64xf32> -> vector<256x64xf32>
    %13 = arith.addf %8, %12 : vector<256x64xf32>
    %c2 = arith.constant 2 : index
    %c0_11 = arith.constant 0 : index
    %c0_12 = arith.constant 0 : index
    %14 = vector.load %arg2[%c2, %c0_11, %c0_12] : memref<9x256x256xbf16, #tpu.memory_space<vmem>>, vector<1x256x256xbf16>
    %15 = vector.shape_cast %14 : vector<1x256x256xbf16> to vector<256x256xbf16>
    %16 = vector.extract_strided_slice %4 {offsets = [0, 128], sizes = [256, 64], strides = [1, 1]} : vector<256x576xbf16> to vector<256x64xbf16>
    %cst_13 = arith.constant dense<0.000000e+00> : vector<256x64xf32>
    %17 = tpu.matmul %15, %16, %cst_13 {dimension_numbers = #tpu.dot_dimension_numbers<[1], [0], [0], [1], [0, 0, 1, 1], [], []>} : vector<256x256xbf16>, vector<256x64xbf16>, vector<256x64xf32> -> vector<256x64xf32>
    %18 = arith.addf %13, %17 : vector<256x64xf32>
    %c3 = arith.constant 3 : index
    %c0_14 = arith.constant 0 : index
    %c0_15 = arith.constant 0 : index
    %19 = vector.load %arg2[%c3, %c0_14, %c0_15] : memref<9x256x256xbf16, #tpu.memory_space<vmem>>, vector<1x256x256xbf16>
    %20 = vector.shape_cast %19 : vector<1x256x256xbf16> to vector<256x256xbf16>
    %21 = vector.extract_strided_slice %4 {offsets = [0, 192], sizes = [256, 64], strides = [1, 1]} : vector<256x576xbf16> to vector<256x64xbf16>
    %cst_16 = arith.constant dense<0.000000e+00> : vector<256x64xf32>
    %22 = tpu.matmul %20, %21, %cst_16 {dimension_numbers = #tpu.dot_dimension_numbers<[1], [0], [0], [1], [0, 0, 1, 1], [], []>} : vector<256x256xbf16>, vector<256x64xbf16>, vector<256x64xf32> -> vector<256x64xf32>
    %23 = arith.addf %18, %22 : vector<256x64xf32>
    %c4 = arith.constant 4 : index
    %c0_17 = arith.constant 0 : index
    %c0_18 = arith.constant 0 : index
    %24 = vector.load %arg2[%c4, %c0_17, %c0_18] : memref<9x256x256xbf16, #tpu.memory_space<vmem>>, vector<1x256x256xbf16>
    %25 = vector.shape_cast %24 : vector<1x256x256xbf16> to vector<256x256xbf16>
    %26 = vector.extract_strided_slice %4 {offsets = [0, 256], sizes = [256, 64], strides = [1, 1]} : vector<256x576xbf16> to vector<256x64xbf16>
    %cst_19 = arith.constant dense<0.000000e+00> : vector<256x64xf32>
    %27 = tpu.matmul %25, %26, %cst_19 {dimension_numbers = #tpu.dot_dimension_numbers<[1], [0], [0], [1], [0, 0, 1, 1], [], []>} : vector<256x256xbf16>, vector<256x64xbf16>, vector<256x64xf32> -> vector<256x64xf32>
    %28 = arith.addf %23, %27 : vector<256x64xf32>
    %c5 = arith.constant 5 : index
    %c0_20 = arith.constant 0 : index
    %c0_21 = arith.constant 0 : index
    %29 = vector.load %arg2[%c5, %c0_20, %c0_21] : memref<9x256x256xbf16, #tpu.memory_space<vmem>>, vector<1x256x256xbf16>
    %30 = vector.shape_cast %29 : vector<1x256x256xbf16> to vector<256x256xbf16>
    %31 = vector.extract_strided_slice %4 {offsets = [0, 320], sizes = [256, 64], strides = [1, 1]} : vector<256x576xbf16> to vector<256x64xbf16>
    %cst_22 = arith.constant dense<0.000000e+00> : vector<256x64xf32>
    %32 = tpu.matmul %30, %31, %cst_22 {dimension_numbers = #tpu.dot_dimension_numbers<[1], [0], [0], [1], [0, 0, 1, 1], [], []>} : vector<256x256xbf16>, vector<256x64xbf16>, vector<256x64xf32> -> vector<256x64xf32>
    %33 = arith.addf %28, %32 : vector<256x64xf32>
    %c6 = arith.constant 6 : index
    %c0_23 = arith.constant 0 : index
    %c0_24 = arith.constant 0 : index
    %34 = vector.load %arg2[%c6, %c0_23, %c0_24] : memref<9x256x256xbf16, #tpu.memory_space<vmem>>, vector<1x256x256xbf16>
    %35 = vector.shape_cast %34 : vector<1x256x256xbf16> to vector<256x256xbf16>
    %36 = vector.extract_strided_slice %4 {offsets = [0, 384], sizes = [256, 64], strides = [1, 1]} : vector<256x576xbf16> to vector<256x64xbf16>
    %cst_25 = arith.constant dense<0.000000e+00> : vector<256x64xf32>
    %37 = tpu.matmul %35, %36, %cst_25 {dimension_numbers = #tpu.dot_dimension_numbers<[1], [0], [0], [1], [0, 0, 1, 1], [], []>} : vector<256x256xbf16>, vector<256x64xbf16>, vector<256x64xf32> -> vector<256x64xf32>
    %38 = arith.addf %33, %37 : vector<256x64xf32>
    %c7 = arith.constant 7 : index
    %c0_26 = arith.constant 0 : index
    %c0_27 = arith.constant 0 : index
    %39 = vector.load %arg2[%c7, %c0_26, %c0_27] : memref<9x256x256xbf16, #tpu.memory_space<vmem>>, vector<1x256x256xbf16>
    %40 = vector.shape_cast %39 : vector<1x256x256xbf16> to vector<256x256xbf16>
    %41 = vector.extract_strided_slice %4 {offsets = [0, 448], sizes = [256, 64], strides = [1, 1]} : vector<256x576xbf16> to vector<256x64xbf16>
    %cst_28 = arith.constant dense<0.000000e+00> : vector<256x64xf32>
    %42 = tpu.matmul %40, %41, %cst_28 {dimension_numbers = #tpu.dot_dimension_numbers<[1], [0], [0], [1], [0, 0, 1, 1], [], []>} : vector<256x256xbf16>, vector<256x64xbf16>, vector<256x64xf32> -> vector<256x64xf32>
    %43 = arith.addf %38, %42 : vector<256x64xf32>
    %c8 = arith.constant 8 : index
    %c0_29 = arith.constant 0 : index
    %c0_30 = arith.constant 0 : index
    %44 = vector.load %arg2[%c8, %c0_29, %c0_30] : memref<9x256x256xbf16, #tpu.memory_space<vmem>>, vector<1x256x256xbf16>
    %45 = vector.shape_cast %44 : vector<1x256x256xbf16> to vector<256x256xbf16>
    %46 = vector.extract_strided_slice %4 {offsets = [0, 512], sizes = [256, 64], strides = [1, 1]} : vector<256x576xbf16> to vector<256x64xbf16>
    %cst_31 = arith.constant dense<0.000000e+00> : vector<256x64xf32>
    %47 = tpu.matmul %45, %46, %cst_31 {dimension_numbers = #tpu.dot_dimension_numbers<[1], [0], [0], [1], [0, 0, 1, 1], [], []>} : vector<256x256xbf16>, vector<256x64xbf16>, vector<256x64xf32> -> vector<256x64xf32>
    %48 = arith.addf %43, %47 : vector<256x64xf32>
    %c0_32 = arith.constant 0 : index
    %c0_33 = arith.constant 0 : index
    %49 = vector.load %arg9[%c0_32, %c0_33] : memref<1x64xf32, #tpu.memory_space<vmem>>, vector<1x64xf32>
    %50 = vector.broadcast %49 : vector<1x64xf32> to vector<256x64xf32>
    %51 = arith.addf %48, %50 : vector<256x64xf32>
    %cst_34 = arith.constant 0.000000e+00 : f32
    %52 = vector.broadcast %cst_34 : f32 to vector<256x64xf32>
    %53 = arith.maximumf %51, %52 : vector<256x64xf32>
    %54 = arith.truncf %53 : vector<256x64xf32> to vector<256x64xbf16>
    %c0_35 = arith.constant 0 : index
    %c0_36 = arith.constant 0 : index
    %c0_37 = arith.constant 0 : index
    %55 = vector.load %arg5[%c0_35, %c0_36, %c0_37] : memref<4x64x256xbf16, #tpu.memory_space<vmem>>, vector<1x64x256xbf16>
    %56 = vector.shape_cast %55 : vector<1x64x256xbf16> to vector<64x256xbf16>
    %cst_38 = arith.constant dense<0.000000e+00> : vector<64x64xf32>
    %57 = tpu.matmul %56, %54, %cst_38 {dimension_numbers = #tpu.dot_dimension_numbers<[1], [0], [0], [1], [0, 0, 1, 1], [], []>} : vector<64x256xbf16>, vector<256x64xbf16>, vector<64x64xf32> -> vector<64x64xf32>
    %c1_39 = arith.constant 1 : index
    %c0_40 = arith.constant 0 : index
    %c0_41 = arith.constant 0 : index
    %58 = vector.load %arg5[%c1_39, %c0_40, %c0_41] : memref<4x64x256xbf16, #tpu.memory_space<vmem>>, vector<1x64x256xbf16>
    %59 = vector.shape_cast %58 : vector<1x64x256xbf16> to vector<64x256xbf16>
    %cst_42 = arith.constant dense<0.000000e+00> : vector<64x64xf32>
    %60 = tpu.matmul %59, %54, %cst_42 {dimension_numbers = #tpu.dot_dimension_numbers<[1], [0], [0], [1], [0, 0, 1, 1], [], []>} : vector<64x256xbf16>, vector<256x64xbf16>, vector<64x64xf32> -> vector<64x64xf32>
    %c2_43 = arith.constant 2 : index
    %c0_44 = arith.constant 0 : index
    %c0_45 = arith.constant 0 : index
    %61 = vector.load %arg5[%c2_43, %c0_44, %c0_45] : memref<4x64x256xbf16, #tpu.memory_space<vmem>>, vector<1x64x256xbf16>
    %62 = vector.shape_cast %61 : vector<1x64x256xbf16> to vector<64x256xbf16>
    %cst_46 = arith.constant dense<0.000000e+00> : vector<64x64xf32>
    %63 = tpu.matmul %62, %54, %cst_46 {dimension_numbers = #tpu.dot_dimension_numbers<[1], [0], [0], [1], [0, 0, 1, 1], [], []>} : vector<64x256xbf16>, vector<256x64xbf16>, vector<64x64xf32> -> vector<64x64xf32>
    %c3_47 = arith.constant 3 : index
    %c0_48 = arith.constant 0 : index
    %c0_49 = arith.constant 0 : index
    %64 = vector.load %arg5[%c3_47, %c0_48, %c0_49] : memref<4x64x256xbf16, #tpu.memory_space<vmem>>, vector<1x64x256xbf16>
    %65 = vector.shape_cast %64 : vector<1x64x256xbf16> to vector<64x256xbf16>
    %cst_50 = arith.constant dense<0.000000e+00> : vector<64x64xf32>
    %66 = tpu.matmul %65, %54, %cst_50 {dimension_numbers = #tpu.dot_dimension_numbers<[1], [0], [0], [1], [0, 0, 1, 1], [], []>} : vector<64x256xbf16>, vector<256x64xbf16>, vector<64x64xf32> -> vector<64x64xf32>
    %67 = arith.maximumf %57, %60 : vector<64x64xf32>
    %68 = arith.maximumf %63, %66 : vector<64x64xf32>
    %69 = arith.maximumf %67, %68 : vector<64x64xf32>
    %70 = arith.truncf %69 : vector<64x64xf32> to vector<64x64xbf16>
    %c0_51 = arith.constant 0 : index
    %c0_52 = arith.constant 0 : index
    %71 = vector.load %arg10[%c0_51, %c0_52] : memref<64x1152xbf16, #tpu.memory_space<vmem>>, vector<64x1152xbf16>
    %cst_53 = arith.constant dense<0.000000e+00> : vector<64x1152xf32>
    %72 = tpu.matmul %70, %71, %cst_53 {dimension_numbers = #tpu.dot_dimension_numbers<[1], [0], [0], [1], [0, 0, 1, 1], [], []>} : vector<64x64xbf16>, vector<64x1152xbf16>, vector<64x1152xf32> -> vector<64x1152xf32>
    %73 = arith.truncf %72 : vector<64x1152xf32> to vector<64x1152xbf16>
    %c0_54 = arith.constant 0 : index
    %c0_55 = arith.constant 0 : index
    %c0_56 = arith.constant 0 : index
    %74 = vector.load %arg3[%c0_54, %c0_55, %c0_56] : memref<9x64x64xbf16, #tpu.memory_space<vmem>>, vector<1x64x64xbf16>
    %75 = vector.shape_cast %74 : vector<1x64x64xbf16> to vector<64x64xbf16>
    %76 = vector.extract_strided_slice %73 {offsets = [0, 0], sizes = [64, 128], strides = [1, 1]} : vector<64x1152xbf16> to vector<64x128xbf16>
    %cst_57 = arith.constant dense<0.000000e+00> : vector<64x128xf32>
    %77 = tpu.matmul %75, %76, %cst_57 {dimension_numbers = #tpu.dot_dimension_numbers<[1], [0], [0], [1], [0, 0, 1, 1], [], []>} : vector<64x64xbf16>, vector<64x128xbf16>, vector<64x128xf32> -> vector<64x128xf32>
    %c1_58 = arith.constant 1 : index
    %c0_59 = arith.constant 0 : index
    %c0_60 = arith.constant 0 : index
    %78 = vector.load %arg3[%c1_58, %c0_59, %c0_60] : memref<9x64x64xbf16, #tpu.memory_space<vmem>>, vector<1x64x64xbf16>
    %79 = vector.shape_cast %78 : vector<1x64x64xbf16> to vector<64x64xbf16>
    %80 = vector.extract_strided_slice %73 {offsets = [0, 128], sizes = [64, 128], strides = [1, 1]} : vector<64x1152xbf16> to vector<64x128xbf16>
    %cst_61 = arith.constant dense<0.000000e+00> : vector<64x128xf32>
    %81 = tpu.matmul %79, %80, %cst_61 {dimension_numbers = #tpu.dot_dimension_numbers<[1], [0], [0], [1], [0, 0, 1, 1], [], []>} : vector<64x64xbf16>, vector<64x128xbf16>, vector<64x128xf32> -> vector<64x128xf32>
    %82 = arith.addf %77, %81 : vector<64x128xf32>
    %c2_62 = arith.constant 2 : index
    %c0_63 = arith.constant 0 : index
    %c0_64 = arith.constant 0 : index
    %83 = vector.load %arg3[%c2_62, %c0_63, %c0_64] : memref<9x64x64xbf16, #tpu.memory_space<vmem>>, vector<1x64x64xbf16>
    %84 = vector.shape_cast %83 : vector<1x64x64xbf16> to vector<64x64xbf16>
    %85 = vector.extract_strided_slice %73 {offsets = [0, 256], sizes = [64, 128], strides = [1, 1]} : vector<64x1152xbf16> to vector<64x128xbf16>
    %cst_65 = arith.constant dense<0.000000e+00> : vector<64x128xf32>
    %86 = tpu.matmul %84, %85, %cst_65 {dimension_numbers = #tpu.dot_dimension_numbers<[1], [0], [0], [1], [0, 0, 1, 1], [], []>} : vector<64x64xbf16>, vector<64x128xbf16>, vector<64x128xf32> -> vector<64x128xf32>
    %87 = arith.addf %82, %86 : vector<64x128xf32>
    %c3_66 = arith.constant 3 : index
    %c0_67 = arith.constant 0 : index
    %c0_68 = arith.constant 0 : index
    %88 = vector.load %arg3[%c3_66, %c0_67, %c0_68] : memref<9x64x64xbf16, #tpu.memory_space<vmem>>, vector<1x64x64xbf16>
    %89 = vector.shape_cast %88 : vector<1x64x64xbf16> to vector<64x64xbf16>
    %90 = vector.extract_strided_slice %73 {offsets = [0, 384], sizes = [64, 128], strides = [1, 1]} : vector<64x1152xbf16> to vector<64x128xbf16>
    %cst_69 = arith.constant dense<0.000000e+00> : vector<64x128xf32>
    %91 = tpu.matmul %89, %90, %cst_69 {dimension_numbers = #tpu.dot_dimension_numbers<[1], [0], [0], [1], [0, 0, 1, 1], [], []>} : vector<64x64xbf16>, vector<64x128xbf16>, vector<64x128xf32> -> vector<64x128xf32>
    %92 = arith.addf %87, %91 : vector<64x128xf32>
    %c4_70 = arith.constant 4 : index
    %c0_71 = arith.constant 0 : index
    %c0_72 = arith.constant 0 : index
    %93 = vector.load %arg3[%c4_70, %c0_71, %c0_72] : memref<9x64x64xbf16, #tpu.memory_space<vmem>>, vector<1x64x64xbf16>
    %94 = vector.shape_cast %93 : vector<1x64x64xbf16> to vector<64x64xbf16>
    %95 = vector.extract_strided_slice %73 {offsets = [0, 512], sizes = [64, 128], strides = [1, 1]} : vector<64x1152xbf16> to vector<64x128xbf16>
    %cst_73 = arith.constant dense<0.000000e+00> : vector<64x128xf32>
    %96 = tpu.matmul %94, %95, %cst_73 {dimension_numbers = #tpu.dot_dimension_numbers<[1], [0], [0], [1], [0, 0, 1, 1], [], []>} : vector<64x64xbf16>, vector<64x128xbf16>, vector<64x128xf32> -> vector<64x128xf32>
    %97 = arith.addf %92, %96 : vector<64x128xf32>
    %c5_74 = arith.constant 5 : index
    %c0_75 = arith.constant 0 : index
    %c0_76 = arith.constant 0 : index
    %98 = vector.load %arg3[%c5_74, %c0_75, %c0_76] : memref<9x64x64xbf16, #tpu.memory_space<vmem>>, vector<1x64x64xbf16>
    %99 = vector.shape_cast %98 : vector<1x64x64xbf16> to vector<64x64xbf16>
    %100 = vector.extract_strided_slice %73 {offsets = [0, 640], sizes = [64, 128], strides = [1, 1]} : vector<64x1152xbf16> to vector<64x128xbf16>
    %cst_77 = arith.constant dense<0.000000e+00> : vector<64x128xf32>
    %101 = tpu.matmul %99, %100, %cst_77 {dimension_numbers = #tpu.dot_dimension_numbers<[1], [0], [0], [1], [0, 0, 1, 1], [], []>} : vector<64x64xbf16>, vector<64x128xbf16>, vector<64x128xf32> -> vector<64x128xf32>
    %102 = arith.addf %97, %101 : vector<64x128xf32>
    %c6_78 = arith.constant 6 : index
    %c0_79 = arith.constant 0 : index
    %c0_80 = arith.constant 0 : index
    %103 = vector.load %arg3[%c6_78, %c0_79, %c0_80] : memref<9x64x64xbf16, #tpu.memory_space<vmem>>, vector<1x64x64xbf16>
    %104 = vector.shape_cast %103 : vector<1x64x64xbf16> to vector<64x64xbf16>
    %105 = vector.extract_strided_slice %73 {offsets = [0, 768], sizes = [64, 128], strides = [1, 1]} : vector<64x1152xbf16> to vector<64x128xbf16>
    %cst_81 = arith.constant dense<0.000000e+00> : vector<64x128xf32>
    %106 = tpu.matmul %104, %105, %cst_81 {dimension_numbers = #tpu.dot_dimension_numbers<[1], [0], [0], [1], [0, 0, 1, 1], [], []>} : vector<64x64xbf16>, vector<64x128xbf16>, vector<64x128xf32> -> vector<64x128xf32>
    %107 = arith.addf %102, %106 : vector<64x128xf32>
    %c7_82 = arith.constant 7 : index
    %c0_83 = arith.constant 0 : index
    %c0_84 = arith.constant 0 : index
    %108 = vector.load %arg3[%c7_82, %c0_83, %c0_84] : memref<9x64x64xbf16, #tpu.memory_space<vmem>>, vector<1x64x64xbf16>
    %109 = vector.shape_cast %108 : vector<1x64x64xbf16> to vector<64x64xbf16>
    %110 = vector.extract_strided_slice %73 {offsets = [0, 896], sizes = [64, 128], strides = [1, 1]} : vector<64x1152xbf16> to vector<64x128xbf16>
    %cst_85 = arith.constant dense<0.000000e+00> : vector<64x128xf32>
    %111 = tpu.matmul %109, %110, %cst_85 {dimension_numbers = #tpu.dot_dimension_numbers<[1], [0], [0], [1], [0, 0, 1, 1], [], []>} : vector<64x64xbf16>, vector<64x128xbf16>, vector<64x128xf32> -> vector<64x128xf32>
    %112 = arith.addf %107, %111 : vector<64x128xf32>
    %c8_86 = arith.constant 8 : index
    %c0_87 = arith.constant 0 : index
    %c0_88 = arith.constant 0 : index
    %113 = vector.load %arg3[%c8_86, %c0_87, %c0_88] : memref<9x64x64xbf16, #tpu.memory_space<vmem>>, vector<1x64x64xbf16>
    %114 = vector.shape_cast %113 : vector<1x64x64xbf16> to vector<64x64xbf16>
    %115 = vector.extract_strided_slice %73 {offsets = [0, 1024], sizes = [64, 128], strides = [1, 1]} : vector<64x1152xbf16> to vector<64x128xbf16>
    %cst_89 = arith.constant dense<0.000000e+00> : vector<64x128xf32>
    %116 = tpu.matmul %114, %115, %cst_89 {dimension_numbers = #tpu.dot_dimension_numbers<[1], [0], [0], [1], [0, 0, 1, 1], [], []>} : vector<64x64xbf16>, vector<64x128xbf16>, vector<64x128xf32> -> vector<64x128xf32>
    %117 = arith.addf %112, %116 : vector<64x128xf32>
    %c0_90 = arith.constant 0 : index
    %c0_91 = arith.constant 0 : index
    %118 = vector.load %arg11[%c0_90, %c0_91] : memref<1x128xf32, #tpu.memory_space<vmem>>, vector<1x128xf32>
    %119 = vector.broadcast %118 : vector<1x128xf32> to vector<64x128xf32>
    %120 = arith.addf %117, %119 : vector<64x128xf32>
    %cst_92 = arith.constant 0.000000e+00 : f32
    %121 = vector.broadcast %cst_92 : f32 to vector<64x128xf32>
    %122 = arith.maximumf %120, %121 : vector<64x128xf32>
    %123 = arith.truncf %122 : vector<64x128xf32> to vector<64x128xbf16>
    %c0_93 = arith.constant 0 : index
    %c0_94 = arith.constant 0 : index
    %c0_95 = arith.constant 0 : index
    %124 = vector.load %arg6[%c0_93, %c0_94, %c0_95] : memref<4x16x64xbf16, #tpu.memory_space<vmem>>, vector<1x16x64xbf16>
    %125 = vector.shape_cast %124 : vector<1x16x64xbf16> to vector<16x64xbf16>
    %cst_96 = arith.constant dense<0.000000e+00> : vector<16x128xf32>
    %126 = tpu.matmul %125, %123, %cst_96 {dimension_numbers = #tpu.dot_dimension_numbers<[1], [0], [0], [1], [0, 0, 1, 1], [], []>} : vector<16x64xbf16>, vector<64x128xbf16>, vector<16x128xf32> -> vector<16x128xf32>
    %c1_97 = arith.constant 1 : index
    %c0_98 = arith.constant 0 : index
    %c0_99 = arith.constant 0 : index
    %127 = vector.load %arg6[%c1_97, %c0_98, %c0_99] : memref<4x16x64xbf16, #tpu.memory_space<vmem>>, vector<1x16x64xbf16>
    %128 = vector.shape_cast %127 : vector<1x16x64xbf16> to vector<16x64xbf16>
    %cst_100 = arith.constant dense<0.000000e+00> : vector<16x128xf32>
    %129 = tpu.matmul %128, %123, %cst_100 {dimension_numbers = #tpu.dot_dimension_numbers<[1], [0], [0], [1], [0, 0, 1, 1], [], []>} : vector<16x64xbf16>, vector<64x128xbf16>, vector<16x128xf32> -> vector<16x128xf32>
    %c2_101 = arith.constant 2 : index
    %c0_102 = arith.constant 0 : index
    %c0_103 = arith.constant 0 : index
    %130 = vector.load %arg6[%c2_101, %c0_102, %c0_103] : memref<4x16x64xbf16, #tpu.memory_space<vmem>>, vector<1x16x64xbf16>
    %131 = vector.shape_cast %130 : vector<1x16x64xbf16> to vector<16x64xbf16>
    %cst_104 = arith.constant dense<0.000000e+00> : vector<16x128xf32>
    %132 = tpu.matmul %131, %123, %cst_104 {dimension_numbers = #tpu.dot_dimension_numbers<[1], [0], [0], [1], [0, 0, 1, 1], [], []>} : vector<16x64xbf16>, vector<64x128xbf16>, vector<16x128xf32> -> vector<16x128xf32>
    %c3_105 = arith.constant 3 : index
    %c0_106 = arith.constant 0 : index
    %c0_107 = arith.constant 0 : index
    %133 = vector.load %arg6[%c3_105, %c0_106, %c0_107] : memref<4x16x64xbf16, #tpu.memory_space<vmem>>, vector<1x16x64xbf16>
    %134 = vector.shape_cast %133 : vector<1x16x64xbf16> to vector<16x64xbf16>
    %cst_108 = arith.constant dense<0.000000e+00> : vector<16x128xf32>
    %135 = tpu.matmul %134, %123, %cst_108 {dimension_numbers = #tpu.dot_dimension_numbers<[1], [0], [0], [1], [0, 0, 1, 1], [], []>} : vector<16x64xbf16>, vector<64x128xbf16>, vector<16x128xf32> -> vector<16x128xf32>
    %136 = arith.maximumf %126, %129 : vector<16x128xf32>
    %137 = arith.maximumf %132, %135 : vector<16x128xf32>
    %138 = arith.maximumf %136, %137 : vector<16x128xf32>
    %139 = arith.truncf %138 : vector<16x128xf32> to vector<16x128xbf16>
    %c0_109 = arith.constant 0 : index
    %c0_110 = arith.constant 0 : index
    %140 = vector.load %arg12[%c0_109, %c0_110] : memref<128x2304xbf16, #tpu.memory_space<vmem>>, vector<128x2304xbf16>
    %cst_111 = arith.constant dense<0.000000e+00> : vector<16x2304xf32>
    %141 = tpu.matmul %139, %140, %cst_111 {dimension_numbers = #tpu.dot_dimension_numbers<[1], [0], [0], [1], [0, 0, 1, 1], [], []>} : vector<16x128xbf16>, vector<128x2304xbf16>, vector<16x2304xf32> -> vector<16x2304xf32>
    %142 = arith.truncf %141 : vector<16x2304xf32> to vector<16x2304xbf16>
    %c0_112 = arith.constant 0 : index
    %c0_113 = arith.constant 0 : index
    %c0_114 = arith.constant 0 : index
    %143 = vector.load %arg4[%c0_112, %c0_113, %c0_114] : memref<9x16x16xbf16, #tpu.memory_space<vmem>>, vector<1x16x16xbf16>
    %144 = vector.shape_cast %143 : vector<1x16x16xbf16> to vector<16x16xbf16>
    %145 = vector.extract_strided_slice %142 {offsets = [0, 0], sizes = [16, 256], strides = [1, 1]} : vector<16x2304xbf16> to vector<16x256xbf16>
    %cst_115 = arith.constant dense<0.000000e+00> : vector<16x256xf32>
    %146 = tpu.matmul %144, %145, %cst_115 {dimension_numbers = #tpu.dot_dimension_numbers<[1], [0], [0], [1], [0, 0, 1, 1], [], []>} : vector<16x16xbf16>, vector<16x256xbf16>, vector<16x256xf32> -> vector<16x256xf32>
    %c1_116 = arith.constant 1 : index
    %c0_117 = arith.constant 0 : index
    %c0_118 = arith.constant 0 : index
    %147 = vector.load %arg4[%c1_116, %c0_117, %c0_118] : memref<9x16x16xbf16, #tpu.memory_space<vmem>>, vector<1x16x16xbf16>
    %148 = vector.shape_cast %147 : vector<1x16x16xbf16> to vector<16x16xbf16>
    %149 = vector.extract_strided_slice %142 {offsets = [0, 256], sizes = [16, 256], strides = [1, 1]} : vector<16x2304xbf16> to vector<16x256xbf16>
    %cst_119 = arith.constant dense<0.000000e+00> : vector<16x256xf32>
    %150 = tpu.matmul %148, %149, %cst_119 {dimension_numbers = #tpu.dot_dimension_numbers<[1], [0], [0], [1], [0, 0, 1, 1], [], []>} : vector<16x16xbf16>, vector<16x256xbf16>, vector<16x256xf32> -> vector<16x256xf32>
    %151 = arith.addf %146, %150 : vector<16x256xf32>
    %c2_120 = arith.constant 2 : index
    %c0_121 = arith.constant 0 : index
    %c0_122 = arith.constant 0 : index
    %152 = vector.load %arg4[%c2_120, %c0_121, %c0_122] : memref<9x16x16xbf16, #tpu.memory_space<vmem>>, vector<1x16x16xbf16>
    %153 = vector.shape_cast %152 : vector<1x16x16xbf16> to vector<16x16xbf16>
    %154 = vector.extract_strided_slice %142 {offsets = [0, 512], sizes = [16, 256], strides = [1, 1]} : vector<16x2304xbf16> to vector<16x256xbf16>
    %cst_123 = arith.constant dense<0.000000e+00> : vector<16x256xf32>
    %155 = tpu.matmul %153, %154, %cst_123 {dimension_numbers = #tpu.dot_dimension_numbers<[1], [0], [0], [1], [0, 0, 1, 1], [], []>} : vector<16x16xbf16>, vector<16x256xbf16>, vector<16x256xf32> -> vector<16x256xf32>
    %156 = arith.addf %151, %155 : vector<16x256xf32>
    %c3_124 = arith.constant 3 : index
    %c0_125 = arith.constant 0 : index
    %c0_126 = arith.constant 0 : index
    %157 = vector.load %arg4[%c3_124, %c0_125, %c0_126] : memref<9x16x16xbf16, #tpu.memory_space<vmem>>, vector<1x16x16xbf16>
    %158 = vector.shape_cast %157 : vector<1x16x16xbf16> to vector<16x16xbf16>
    %159 = vector.extract_strided_slice %142 {offsets = [0, 768], sizes = [16, 256], strides = [1, 1]} : vector<16x2304xbf16> to vector<16x256xbf16>
    %cst_127 = arith.constant dense<0.000000e+00> : vector<16x256xf32>
    %160 = tpu.matmul %158, %159, %cst_127 {dimension_numbers = #tpu.dot_dimension_numbers<[1], [0], [0], [1], [0, 0, 1, 1], [], []>} : vector<16x16xbf16>, vector<16x256xbf16>, vector<16x256xf32> -> vector<16x256xf32>
    %161 = arith.addf %156, %160 : vector<16x256xf32>
    %c4_128 = arith.constant 4 : index
    %c0_129 = arith.constant 0 : index
    %c0_130 = arith.constant 0 : index
    %162 = vector.load %arg4[%c4_128, %c0_129, %c0_130] : memref<9x16x16xbf16, #tpu.memory_space<vmem>>, vector<1x16x16xbf16>
    %163 = vector.shape_cast %162 : vector<1x16x16xbf16> to vector<16x16xbf16>
    %164 = vector.extract_strided_slice %142 {offsets = [0, 1024], sizes = [16, 256], strides = [1, 1]} : vector<16x2304xbf16> to vector<16x256xbf16>
    %cst_131 = arith.constant dense<0.000000e+00> : vector<16x256xf32>
    %165 = tpu.matmul %163, %164, %cst_131 {dimension_numbers = #tpu.dot_dimension_numbers<[1], [0], [0], [1], [0, 0, 1, 1], [], []>} : vector<16x16xbf16>, vector<16x256xbf16>, vector<16x256xf32> -> vector<16x256xf32>
    %166 = arith.addf %161, %165 : vector<16x256xf32>
    %c5_132 = arith.constant 5 : index
    %c0_133 = arith.constant 0 : index
    %c0_134 = arith.constant 0 : index
    %167 = vector.load %arg4[%c5_132, %c0_133, %c0_134] : memref<9x16x16xbf16, #tpu.memory_space<vmem>>, vector<1x16x16xbf16>
    %168 = vector.shape_cast %167 : vector<1x16x16xbf16> to vector<16x16xbf16>
    %169 = vector.extract_strided_slice %142 {offsets = [0, 1280], sizes = [16, 256], strides = [1, 1]} : vector<16x2304xbf16> to vector<16x256xbf16>
    %cst_135 = arith.constant dense<0.000000e+00> : vector<16x256xf32>
    %170 = tpu.matmul %168, %169, %cst_135 {dimension_numbers = #tpu.dot_dimension_numbers<[1], [0], [0], [1], [0, 0, 1, 1], [], []>} : vector<16x16xbf16>, vector<16x256xbf16>, vector<16x256xf32> -> vector<16x256xf32>
    %171 = arith.addf %166, %170 : vector<16x256xf32>
    %c6_136 = arith.constant 6 : index
    %c0_137 = arith.constant 0 : index
    %c0_138 = arith.constant 0 : index
    %172 = vector.load %arg4[%c6_136, %c0_137, %c0_138] : memref<9x16x16xbf16, #tpu.memory_space<vmem>>, vector<1x16x16xbf16>
    %173 = vector.shape_cast %172 : vector<1x16x16xbf16> to vector<16x16xbf16>
    %174 = vector.extract_strided_slice %142 {offsets = [0, 1536], sizes = [16, 256], strides = [1, 1]} : vector<16x2304xbf16> to vector<16x256xbf16>
    %cst_139 = arith.constant dense<0.000000e+00> : vector<16x256xf32>
    %175 = tpu.matmul %173, %174, %cst_139 {dimension_numbers = #tpu.dot_dimension_numbers<[1], [0], [0], [1], [0, 0, 1, 1], [], []>} : vector<16x16xbf16>, vector<16x256xbf16>, vector<16x256xf32> -> vector<16x256xf32>
    %176 = arith.addf %171, %175 : vector<16x256xf32>
    %c7_140 = arith.constant 7 : index
    %c0_141 = arith.constant 0 : index
    %c0_142 = arith.constant 0 : index
    %177 = vector.load %arg4[%c7_140, %c0_141, %c0_142] : memref<9x16x16xbf16, #tpu.memory_space<vmem>>, vector<1x16x16xbf16>
    %178 = vector.shape_cast %177 : vector<1x16x16xbf16> to vector<16x16xbf16>
    %179 = vector.extract_strided_slice %142 {offsets = [0, 1792], sizes = [16, 256], strides = [1, 1]} : vector<16x2304xbf16> to vector<16x256xbf16>
    %cst_143 = arith.constant dense<0.000000e+00> : vector<16x256xf32>
    %180 = tpu.matmul %178, %179, %cst_143 {dimension_numbers = #tpu.dot_dimension_numbers<[1], [0], [0], [1], [0, 0, 1, 1], [], []>} : vector<16x16xbf16>, vector<16x256xbf16>, vector<16x256xf32> -> vector<16x256xf32>
    %181 = arith.addf %176, %180 : vector<16x256xf32>
    %c8_144 = arith.constant 8 : index
    %c0_145 = arith.constant 0 : index
    %c0_146 = arith.constant 0 : index
    %182 = vector.load %arg4[%c8_144, %c0_145, %c0_146] : memref<9x16x16xbf16, #tpu.memory_space<vmem>>, vector<1x16x16xbf16>
    %183 = vector.shape_cast %182 : vector<1x16x16xbf16> to vector<16x16xbf16>
    %184 = vector.extract_strided_slice %142 {offsets = [0, 2048], sizes = [16, 256], strides = [1, 1]} : vector<16x2304xbf16> to vector<16x256xbf16>
    %cst_147 = arith.constant dense<0.000000e+00> : vector<16x256xf32>
    %185 = tpu.matmul %183, %184, %cst_147 {dimension_numbers = #tpu.dot_dimension_numbers<[1], [0], [0], [1], [0, 0, 1, 1], [], []>} : vector<16x16xbf16>, vector<16x256xbf16>, vector<16x256xf32> -> vector<16x256xf32>
    %186 = arith.addf %181, %185 : vector<16x256xf32>
    %c0_148 = arith.constant 0 : index
    %c0_149 = arith.constant 0 : index
    %187 = vector.load %arg13[%c0_148, %c0_149] : memref<1x256xf32, #tpu.memory_space<vmem>>, vector<1x256xf32>
    %188 = vector.broadcast %187 : vector<1x256xf32> to vector<16x256xf32>
    %189 = arith.addf %186, %188 : vector<16x256xf32>
    %cst_150 = arith.constant 0.000000e+00 : f32
    %190 = vector.broadcast %cst_150 : f32 to vector<16x256xf32>
    %191 = arith.maximumf %189, %190 : vector<16x256xf32>
    %192 = arith.truncf %191 : vector<16x256xf32> to vector<16x256xbf16>
    %c0_151 = arith.constant 0 : index
    %c0_152 = arith.constant 0 : index
    %193 = vector.load %arg14[%c0_151, %c0_152] : memref<256x512xbf16, #tpu.memory_space<vmem>>, vector<256x512xbf16>
    %cst_153 = arith.constant dense<0.000000e+00> : vector<16x512xf32>
    %194 = tpu.matmul %192, %193, %cst_153 {dimension_numbers = #tpu.dot_dimension_numbers<[1], [0], [0], [1], [0, 0, 1, 1], [], []>} : vector<16x256xbf16>, vector<256x512xbf16>, vector<16x512xf32> -> vector<16x512xf32>
    %195 = arith.truncf %194 : vector<16x512xf32> to vector<16x512xbf16>
    %c0_154 = arith.constant 0 : index
    %c0_155 = arith.constant 0 : index
    %c0_156 = arith.constant 0 : index
    %196 = vector.load %arg7[%c0_154, %c0_155, %c0_156] : memref<4x64x16xbf16, #tpu.memory_space<vmem>>, vector<1x64x16xbf16>
    %197 = vector.shape_cast %196 : vector<1x64x16xbf16> to vector<64x16xbf16>
    %198 = vector.extract_strided_slice %195 {offsets = [0, 0], sizes = [16, 128], strides = [1, 1]} : vector<16x512xbf16> to vector<16x128xbf16>
    %cst_157 = arith.constant dense<0.000000e+00> : vector<64x128xf32>
    %199 = tpu.matmul %197, %198, %cst_157 {dimension_numbers = #tpu.dot_dimension_numbers<[1], [0], [0], [1], [0, 0, 1, 1], [], []>} : vector<64x16xbf16>, vector<16x128xbf16>, vector<64x128xf32> -> vector<64x128xf32>
    %c1_158 = arith.constant 1 : index
    %c0_159 = arith.constant 0 : index
    %c0_160 = arith.constant 0 : index
    %200 = vector.load %arg7[%c1_158, %c0_159, %c0_160] : memref<4x64x16xbf16, #tpu.memory_space<vmem>>, vector<1x64x16xbf16>
    %201 = vector.shape_cast %200 : vector<1x64x16xbf16> to vector<64x16xbf16>
    %202 = vector.extract_strided_slice %195 {offsets = [0, 128], sizes = [16, 128], strides = [1, 1]} : vector<16x512xbf16> to vector<16x128xbf16>
    %cst_161 = arith.constant dense<0.000000e+00> : vector<64x128xf32>
    %203 = tpu.matmul %201, %202, %cst_161 {dimension_numbers = #tpu.dot_dimension_numbers<[1], [0], [0], [1], [0, 0, 1, 1], [], []>} : vector<64x16xbf16>, vector<16x128xbf16>, vector<64x128xf32> -> vector<64x128xf32>
    %204 = arith.addf %199, %203 : vector<64x128xf32>
    %c2_162 = arith.constant 2 : index
    %c0_163 = arith.constant 0 : index
    %c0_164 = arith.constant 0 : index
    %205 = vector.load %arg7[%c2_162, %c0_163, %c0_164] : memref<4x64x16xbf16, #tpu.memory_space<vmem>>, vector<1x64x16xbf16>
    %206 = vector.shape_cast %205 : vector<1x64x16xbf16> to vector<64x16xbf16>
    %207 = vector.extract_strided_slice %195 {offsets = [0, 256], sizes = [16, 128], strides = [1, 1]} : vector<16x512xbf16> to vector<16x128xbf16>
    %cst_165 = arith.constant dense<0.000000e+00> : vector<64x128xf32>
    %208 = tpu.matmul %206, %207, %cst_165 {dimension_numbers = #tpu.dot_dimension_numbers<[1], [0], [0], [1], [0, 0, 1, 1], [], []>} : vector<64x16xbf16>, vector<16x128xbf16>, vector<64x128xf32> -> vector<64x128xf32>
    %209 = arith.addf %204, %208 : vector<64x128xf32>
    %c3_166 = arith.constant 3 : index
    %c0_167 = arith.constant 0 : index
    %c0_168 = arith.constant 0 : index
    %210 = vector.load %arg7[%c3_166, %c0_167, %c0_168] : memref<4x64x16xbf16, #tpu.memory_space<vmem>>, vector<1x64x16xbf16>
    %211 = vector.shape_cast %210 : vector<1x64x16xbf16> to vector<64x16xbf16>
    %212 = vector.extract_strided_slice %195 {offsets = [0, 384], sizes = [16, 128], strides = [1, 1]} : vector<16x512xbf16> to vector<16x128xbf16>
    %cst_169 = arith.constant dense<0.000000e+00> : vector<64x128xf32>
    %213 = tpu.matmul %211, %212, %cst_169 {dimension_numbers = #tpu.dot_dimension_numbers<[1], [0], [0], [1], [0, 0, 1, 1], [], []>} : vector<64x16xbf16>, vector<16x128xbf16>, vector<64x128xf32> -> vector<64x128xf32>
    %214 = arith.addf %209, %213 : vector<64x128xf32>
    %c0_170 = arith.constant 0 : index
    %c0_171 = arith.constant 0 : index
    %215 = vector.load %arg15[%c0_170, %c0_171] : memref<1x128xf32, #tpu.memory_space<vmem>>, vector<1x128xf32>
    %216 = vector.broadcast %215 : vector<1x128xf32> to vector<64x128xf32>
    %217 = arith.addf %214, %216 : vector<64x128xf32>
    %cst_172 = arith.constant 0.000000e+00 : f32
    %218 = vector.broadcast %cst_172 : f32 to vector<64x128xf32>
    %219 = arith.maximumf %217, %218 : vector<64x128xf32>
    %220 = arith.truncf %219 : vector<64x128xf32> to vector<64x128xbf16>
    %c0_173 = arith.constant 0 : index
    %c0_174 = arith.constant 0 : index
    %221 = vector.load %arg16[%c0_173, %c0_174] : memref<128x576xbf16, #tpu.memory_space<vmem>>, vector<128x576xbf16>
    %cst_175 = arith.constant dense<0.000000e+00> : vector<64x576xf32>
    %222 = tpu.matmul %220, %221, %cst_175 {dimension_numbers = #tpu.dot_dimension_numbers<[1], [0], [0], [1], [0, 0, 1, 1], [], []>} : vector<64x128xbf16>, vector<128x576xbf16>, vector<64x576xf32> -> vector<64x576xf32>
    %223 = arith.truncf %222 : vector<64x576xf32> to vector<64x576xbf16>
    %c0_176 = arith.constant 0 : index
    %c0_177 = arith.constant 0 : index
    %c0_178 = arith.constant 0 : index
    %224 = vector.load %arg3[%c0_176, %c0_177, %c0_178] : memref<9x64x64xbf16, #tpu.memory_space<vmem>>, vector<1x64x64xbf16>
    %225 = vector.shape_cast %224 : vector<1x64x64xbf16> to vector<64x64xbf16>
    %226 = vector.extract_strided_slice %223 {offsets = [0, 0], sizes = [64, 64], strides = [1, 1]} : vector<64x576xbf16> to vector<64x64xbf16>
    %cst_179 = arith.constant dense<0.000000e+00> : vector<64x64xf32>
    %227 = tpu.matmul %225, %226, %cst_179 {dimension_numbers = #tpu.dot_dimension_numbers<[1], [0], [0], [1], [0, 0, 1, 1], [], []>} : vector<64x64xbf16>, vector<64x64xbf16>, vector<64x64xf32> -> vector<64x64xf32>
    %c1_180 = arith.constant 1 : index
    %c0_181 = arith.constant 0 : index
    %c0_182 = arith.constant 0 : index
    %228 = vector.load %arg3[%c1_180, %c0_181, %c0_182] : memref<9x64x64xbf16, #tpu.memory_space<vmem>>, vector<1x64x64xbf16>
    %229 = vector.shape_cast %228 : vector<1x64x64xbf16> to vector<64x64xbf16>
    %230 = vector.extract_strided_slice %223 {offsets = [0, 64], sizes = [64, 64], strides = [1, 1]} : vector<64x576xbf16> to vector<64x64xbf16>
    %cst_183 = arith.constant dense<0.000000e+00> : vector<64x64xf32>
    %231 = tpu.matmul %229, %230, %cst_183 {dimension_numbers = #tpu.dot_dimension_numbers<[1], [0], [0], [1], [0, 0, 1, 1], [], []>} : vector<64x64xbf16>, vector<64x64xbf16>, vector<64x64xf32> -> vector<64x64xf32>
    %232 = arith.addf %227, %231 : vector<64x64xf32>
    %c2_184 = arith.constant 2 : index
    %c0_185 = arith.constant 0 : index
    %c0_186 = arith.constant 0 : index
    %233 = vector.load %arg3[%c2_184, %c0_185, %c0_186] : memref<9x64x64xbf16, #tpu.memory_space<vmem>>, vector<1x64x64xbf16>
    %234 = vector.shape_cast %233 : vector<1x64x64xbf16> to vector<64x64xbf16>
    %235 = vector.extract_strided_slice %223 {offsets = [0, 128], sizes = [64, 64], strides = [1, 1]} : vector<64x576xbf16> to vector<64x64xbf16>
    %cst_187 = arith.constant dense<0.000000e+00> : vector<64x64xf32>
    %236 = tpu.matmul %234, %235, %cst_187 {dimension_numbers = #tpu.dot_dimension_numbers<[1], [0], [0], [1], [0, 0, 1, 1], [], []>} : vector<64x64xbf16>, vector<64x64xbf16>, vector<64x64xf32> -> vector<64x64xf32>
    %237 = arith.addf %232, %236 : vector<64x64xf32>
    %c3_188 = arith.constant 3 : index
    %c0_189 = arith.constant 0 : index
    %c0_190 = arith.constant 0 : index
    %238 = vector.load %arg3[%c3_188, %c0_189, %c0_190] : memref<9x64x64xbf16, #tpu.memory_space<vmem>>, vector<1x64x64xbf16>
    %239 = vector.shape_cast %238 : vector<1x64x64xbf16> to vector<64x64xbf16>
    %240 = vector.extract_strided_slice %223 {offsets = [0, 192], sizes = [64, 64], strides = [1, 1]} : vector<64x576xbf16> to vector<64x64xbf16>
    %cst_191 = arith.constant dense<0.000000e+00> : vector<64x64xf32>
    %241 = tpu.matmul %239, %240, %cst_191 {dimension_numbers = #tpu.dot_dimension_numbers<[1], [0], [0], [1], [0, 0, 1, 1], [], []>} : vector<64x64xbf16>, vector<64x64xbf16>, vector<64x64xf32> -> vector<64x64xf32>
    %242 = arith.addf %237, %241 : vector<64x64xf32>
    %c4_192 = arith.constant 4 : index
    %c0_193 = arith.constant 0 : index
    %c0_194 = arith.constant 0 : index
    %243 = vector.load %arg3[%c4_192, %c0_193, %c0_194] : memref<9x64x64xbf16, #tpu.memory_space<vmem>>, vector<1x64x64xbf16>
    %244 = vector.shape_cast %243 : vector<1x64x64xbf16> to vector<64x64xbf16>
    %245 = vector.extract_strided_slice %223 {offsets = [0, 256], sizes = [64, 64], strides = [1, 1]} : vector<64x576xbf16> to vector<64x64xbf16>
    %cst_195 = arith.constant dense<0.000000e+00> : vector<64x64xf32>
    %246 = tpu.matmul %244, %245, %cst_195 {dimension_numbers = #tpu.dot_dimension_numbers<[1], [0], [0], [1], [0, 0, 1, 1], [], []>} : vector<64x64xbf16>, vector<64x64xbf16>, vector<64x64xf32> -> vector<64x64xf32>
    %247 = arith.addf %242, %246 : vector<64x64xf32>
    %c5_196 = arith.constant 5 : index
    %c0_197 = arith.constant 0 : index
    %c0_198 = arith.constant 0 : index
    %248 = vector.load %arg3[%c5_196, %c0_197, %c0_198] : memref<9x64x64xbf16, #tpu.memory_space<vmem>>, vector<1x64x64xbf16>
    %249 = vector.shape_cast %248 : vector<1x64x64xbf16> to vector<64x64xbf16>
    %250 = vector.extract_strided_slice %223 {offsets = [0, 320], sizes = [64, 64], strides = [1, 1]} : vector<64x576xbf16> to vector<64x64xbf16>
    %cst_199 = arith.constant dense<0.000000e+00> : vector<64x64xf32>
    %251 = tpu.matmul %249, %250, %cst_199 {dimension_numbers = #tpu.dot_dimension_numbers<[1], [0], [0], [1], [0, 0, 1, 1], [], []>} : vector<64x64xbf16>, vector<64x64xbf16>, vector<64x64xf32> -> vector<64x64xf32>
    %252 = arith.addf %247, %251 : vector<64x64xf32>
    %c6_200 = arith.constant 6 : index
    %c0_201 = arith.constant 0 : index
    %c0_202 = arith.constant 0 : index
    %253 = vector.load %arg3[%c6_200, %c0_201, %c0_202] : memref<9x64x64xbf16, #tpu.memory_space<vmem>>, vector<1x64x64xbf16>
    %254 = vector.shape_cast %253 : vector<1x64x64xbf16> to vector<64x64xbf16>
    %255 = vector.extract_strided_slice %223 {offsets = [0, 384], sizes = [64, 64], strides = [1, 1]} : vector<64x576xbf16> to vector<64x64xbf16>
    %cst_203 = arith.constant dense<0.000000e+00> : vector<64x64xf32>
    %256 = tpu.matmul %254, %255, %cst_203 {dimension_numbers = #tpu.dot_dimension_numbers<[1], [0], [0], [1], [0, 0, 1, 1], [], []>} : vector<64x64xbf16>, vector<64x64xbf16>, vector<64x64xf32> -> vector<64x64xf32>
    %257 = arith.addf %252, %256 : vector<64x64xf32>
    %c7_204 = arith.constant 7 : index
    %c0_205 = arith.constant 0 : index
    %c0_206 = arith.constant 0 : index
    %258 = vector.load %arg3[%c7_204, %c0_205, %c0_206] : memref<9x64x64xbf16, #tpu.memory_space<vmem>>, vector<1x64x64xbf16>
    %259 = vector.shape_cast %258 : vector<1x64x64xbf16> to vector<64x64xbf16>
    %260 = vector.extract_strided_slice %223 {offsets = [0, 448], sizes = [64, 64], strides = [1, 1]} : vector<64x576xbf16> to vector<64x64xbf16>
    %cst_207 = arith.constant dense<0.000000e+00> : vector<64x64xf32>
    %261 = tpu.matmul %259, %260, %cst_207 {dimension_numbers = #tpu.dot_dimension_numbers<[1], [0], [0], [1], [0, 0, 1, 1], [], []>} : vector<64x64xbf16>, vector<64x64xbf16>, vector<64x64xf32> -> vector<64x64xf32>
    %262 = arith.addf %257, %261 : vector<64x64xf32>
    %c8_208 = arith.constant 8 : index
    %c0_209 = arith.constant 0 : index
    %c0_210 = arith.constant 0 : index
    %263 = vector.load %arg3[%c8_208, %c0_209, %c0_210] : memref<9x64x64xbf16, #tpu.memory_space<vmem>>, vector<1x64x64xbf16>
    %264 = vector.shape_cast %263 : vector<1x64x64xbf16> to vector<64x64xbf16>
    %265 = vector.extract_strided_slice %223 {offsets = [0, 512], sizes = [64, 64], strides = [1, 1]} : vector<64x576xbf16> to vector<64x64xbf16>
    %cst_211 = arith.constant dense<0.000000e+00> : vector<64x64xf32>
    %266 = tpu.matmul %264, %265, %cst_211 {dimension_numbers = #tpu.dot_dimension_numbers<[1], [0], [0], [1], [0, 0, 1, 1], [], []>} : vector<64x64xbf16>, vector<64x64xbf16>, vector<64x64xf32> -> vector<64x64xf32>
    %267 = arith.addf %262, %266 : vector<64x64xf32>
    %c0_212 = arith.constant 0 : index
    %c0_213 = arith.constant 0 : index
    %268 = vector.load %arg17[%c0_212, %c0_213] : memref<1x64xf32, #tpu.memory_space<vmem>>, vector<1x64xf32>
    %269 = vector.broadcast %268 : vector<1x64xf32> to vector<64x64xf32>
    %270 = arith.addf %267, %269 : vector<64x64xf32>
    %cst_214 = arith.constant 0.000000e+00 : f32
    %271 = vector.broadcast %cst_214 : f32 to vector<64x64xf32>
    %272 = arith.maximumf %270, %271 : vector<64x64xf32>
    %273 = arith.truncf %272 : vector<64x64xf32> to vector<64x64xbf16>
    %c0_215 = arith.constant 0 : index
    %c0_216 = arith.constant 0 : index
    %274 = vector.load %arg18[%c0_215, %c0_216] : memref<64x128xbf16, #tpu.memory_space<vmem>>, vector<64x128xbf16>
    %cst_217 = arith.constant dense<0.000000e+00> : vector<64x128xf32>
    %275 = tpu.matmul %273, %274, %cst_217 {dimension_numbers = #tpu.dot_dimension_numbers<[1], [0], [0], [1], [0, 0, 1, 1], [], []>} : vector<64x64xbf16>, vector<64x128xbf16>, vector<64x128xf32> -> vector<64x128xf32>
    %c0_218 = arith.constant 0 : index
    %c0_219 = arith.constant 0 : index
    %276 = vector.load %arg19[%c0_218, %c0_219] : memref<1x128xf32, #tpu.memory_space<vmem>>, vector<1x128xf32>
    %277 = vector.broadcast %276 : vector<1x128xf32> to vector<64x128xf32>
    %278 = arith.addf %275, %277 : vector<64x128xf32>
    %279 = arith.truncf %278 : vector<64x128xf32> to vector<64x128xbf16>
    %c0_220 = arith.constant 0 : index
    %c0_221 = arith.constant 0 : index
    %c0_222 = arith.constant 0 : index
    %280 = vector.load %arg20[%c0_220, %c0_221, %c0_222] : memref<1x64x128xbf16, #tpu.memory_space<vmem>>, vector<1x64x128xbf16>
    %281 = vector.shape_cast %280 : vector<1x64x128xbf16> to vector<64x128xbf16>
    %282 = vector.shape_cast %279 : vector<64x128xbf16> to vector<1x64x128xbf16>
    tpu.vector_store %arg20[%c0_220, %c0_221, %c0_222], %282 {strides = array<i32>} : memref<1x64x128xbf16, #tpu.memory_space<vmem>>, vector<1x64x128xbf16>,
    return
  }
  func.func @transform_0(%arg0: i32) -> (i32, i32, i32) {
    %c0_i32 = arith.constant 0 : i32
    %c0_i32_0 = arith.constant 0 : i32
    %c0_i32_1 = arith.constant 0 : i32
    return %arg0, %c0_i32, %c0_i32_0 : i32, i32, i32
  }
  func.func @transform_1(%arg0: i32) -> (i32, i32, i32) {
    %c0_i32 = arith.constant 0 : i32
    %c0_i32_0 = arith.constant 0 : i32
    %c0_i32_1 = arith.constant 0 : i32
    %c0_i32_2 = arith.constant 0 : i32
    return %c0_i32, %c0_i32_0, %c0_i32_1 : i32, i32, i32
  }
  func.func @transform_2(%arg0: i32) -> (i32, i32, i32) {
    %c0_i32 = arith.constant 0 : i32
    %c0_i32_0 = arith.constant 0 : i32
    %c0_i32_1 = arith.constant 0 : i32
    %c0_i32_2 = arith.constant 0 : i32
    return %c0_i32, %c0_i32_0, %c0_i32_1 : i32, i32, i32
  }
  func.func @transform_3(%arg0: i32) -> (i32, i32, i32) {
    %c0_i32 = arith.constant 0 : i32
    %c0_i32_0 = arith.constant 0 : i32
    %c0_i32_1 = arith.constant 0 : i32
    %c0_i32_2 = arith.constant 0 : i32
    return %c0_i32, %c0_i32_0, %c0_i32_1 : i32, i32, i32
  }
  func.func @transform_4(%arg0: i32) -> (i32, i32, i32) {
    %c0_i32 = arith.constant 0 : i32
    %c0_i32_0 = arith.constant 0 : i32
    %c0_i32_1 = arith.constant 0 : i32
    %c0_i32_2 = arith.constant 0 : i32
    return %c0_i32, %c0_i32_0, %c0_i32_1 : i32, i32, i32
  }
  func.func @transform_5(%arg0: i32) -> (i32, i32, i32) {
    %c0_i32 = arith.constant 0 : i32
    %c0_i32_0 = arith.constant 0 : i32
    %c0_i32_1 = arith.constant 0 : i32
    %c0_i32_2 = arith.constant 0 : i32
    return %c0_i32, %c0_i32_0, %c0_i32_1 : i32, i32, i32
  }
  func.func @transform_6(%arg0: i32) -> (i32, i32, i32) {
    %c0_i32 = arith.constant 0 : i32
    %c0_i32_0 = arith.constant 0 : i32
    %c0_i32_1 = arith.constant 0 : i32
    %c0_i32_2 = arith.constant 0 : i32
    return %c0_i32, %c0_i32_0, %c0_i32_1 : i32, i32, i32
  }
  func.func @transform_7(%arg0: i32) -> (i32, i32) {
    %c0_i32 = arith.constant 0 : i32
    %c0_i32_0 = arith.constant 0 : i32
    %c0_i32_1 = arith.constant 0 : i32
    return %c0_i32, %c0_i32_0 : i32, i32
  }
  func.func @transform_8(%arg0: i32) -> (i32, i32) {
    %c0_i32 = arith.constant 0 : i32
    %c0_i32_0 = arith.constant 0 : i32
    %c0_i32_1 = arith.constant 0 : i32
    return %c0_i32, %c0_i32_0 : i32, i32
  }
  func.func @transform_9(%arg0: i32) -> (i32, i32) {
    %c0_i32 = arith.constant 0 : i32
    %c0_i32_0 = arith.constant 0 : i32
    %c0_i32_1 = arith.constant 0 : i32
    return %c0_i32, %c0_i32_0 : i32, i32
  }
  func.func @transform_10(%arg0: i32) -> (i32, i32) {
    %c0_i32 = arith.constant 0 : i32
    %c0_i32_0 = arith.constant 0 : i32
    %c0_i32_1 = arith.constant 0 : i32
    return %c0_i32, %c0_i32_0 : i32, i32
  }
  func.func @transform_11(%arg0: i32) -> (i32, i32) {
    %c0_i32 = arith.constant 0 : i32
    %c0_i32_0 = arith.constant 0 : i32
    %c0_i32_1 = arith.constant 0 : i32
    return %c0_i32, %c0_i32_0 : i32, i32
  }
  func.func @transform_12(%arg0: i32) -> (i32, i32) {
    %c0_i32 = arith.constant 0 : i32
    %c0_i32_0 = arith.constant 0 : i32
    %c0_i32_1 = arith.constant 0 : i32
    return %c0_i32, %c0_i32_0 : i32, i32
  }
  func.func @transform_13(%arg0: i32) -> (i32, i32) {
    %c0_i32 = arith.constant 0 : i32
    %c0_i32_0 = arith.constant 0 : i32
    %c0_i32_1 = arith.constant 0 : i32
    return %c0_i32, %c0_i32_0 : i32, i32
  }
  func.func @transform_14(%arg0: i32) -> (i32, i32) {
    %c0_i32 = arith.constant 0 : i32
    %c0_i32_0 = arith.constant 0 : i32
    %c0_i32_1 = arith.constant 0 : i32
    return %c0_i32, %c0_i32_0 : i32, i32
  }
  func.func @transform_15(%arg0: i32) -> (i32, i32) {
    %c0_i32 = arith.constant 0 : i32
    %c0_i32_0 = arith.constant 0 : i32
    %c0_i32_1 = arith.constant 0 : i32
    return %c0_i32, %c0_i32_0 : i32, i32
  }
  func.func @transform_16(%arg0: i32) -> (i32, i32) {
    %c0_i32 = arith.constant 0 : i32
    %c0_i32_0 = arith.constant 0 : i32
    %c0_i32_1 = arith.constant 0 : i32
    return %c0_i32, %c0_i32_0 : i32, i32
  }
  func.func @transform_17(%arg0: i32) -> (i32, i32) {
    %c0_i32 = arith.constant 0 : i32
    %c0_i32_0 = arith.constant 0 : i32
    %c0_i32_1 = arith.constant 0 : i32
    return %c0_i32, %c0_i32_0 : i32, i32
  }
  func.func @transform_18(%arg0: i32) -> (i32, i32) {
    %c0_i32 = arith.constant 0 : i32
    %c0_i32_0 = arith.constant 0 : i32
    %c0_i32_1 = arith.constant 0 : i32
    return %c0_i32, %c0_i32_0 : i32, i32
  }
  func.func @transform_19(%arg0: i32) -> (i32, i32, i32) {
    %c0_i32 = arith.constant 0 : i32
    %c0_i32_0 = arith.constant 0 : i32
    %c0_i32_1 = arith.constant 0 : i32
    return %arg0, %c0_i32, %c0_i32_0 : i32, i32, i32
  }
}

</mosaic_0001>

<bundles_post_ra>
// kernel: unet_forward.1
= control target key start
LH: loop header
LB: loop body
LE: loop exit
PB: predicated region body
PF: predicated region fallthrough
CT: control target
= control target key end

     0   :  { %s20474_s0 = inlined_call_operand.vmem [shape: bf16[2,256,8], index: 0, kind: input, shape index: {}]   ;;  %s20475_s1 = inlined_call_operand.vmem [shape: bf16[9,256,256], index: 1, kind: input, shape index: {}]   ;;  %s20476_s2 = inlined_call_operand.vmem [shape: bf16[9,64,64], index: 2, kind: input, shape index: {}]   ;;  %s20477_s3 = inlined_call_operand.vmem [shape: bf16[9,16,16], index: 3, kind: input, shape index: {}]   ;;  %s20478_s4 = inlined_call_operand.vmem [shape: bf16[4,64,256], index: 4, kind: input, shape index: {}]   ;;  %s20479_s5 = inlined_call_operand.vmem [shape: bf16[4,16,64], index: 5, kind: input, shape index: {}]   ;;  %s20480_s6 = inlined_call_operand.vmem [shape: bf16[4,64,16], index: 6, kind: input, shape index: {}]   ;;  %s20481_s7 = inlined_call_operand.vmem [shape: bf16[8,576], index: 7, kind: input, shape index: {}]   ;;  %s20482_s8 = inlined_call_operand.vmem [shape: f32[1,64], index: 8, kind: input, shape index: {}]   ;;  %s20483_s9 = inlined_call_operand.vmem [shape: bf16[64,1152], index: 9, kind: input, shape index: {}]   ;;  %s20484_s10 = inlined_call_operand.vmem [shape: f32[1,128], index: 10, kind: input, shape index: {}]   ;;  %s20485_s11 = inlined_call_operand.vmem [shape: bf16[128,2304], index: 11, kind: input, shape index: {}]   ;;  %s20486_s12 = inlined_call_operand.vmem [shape: f32[1,256], index: 12, kind: input, shape index: {}]   ;;  %s20487_s13 = inlined_call_operand.vmem [shape: bf16[256,512], index: 13, kind: input, shape index: {}]   ;;  %s20488_s14 = inlined_call_operand.vmem [shape: f32[1,128], index: 14, kind: input, shape index: {}]   ;;  %s20489_s15 = inlined_call_operand.vmem [shape: bf16[128,576], index: 15, kind: input, shape index: {}]   ;;  %s20490_s16 = inlined_call_operand.vmem [shape: f32[1,64], index: 16, kind: input, shape index: {}]   ;;  %s20491_s17 = inlined_call_operand.vmem [shape: bf16[64,128], index: 17, kind: input, shape index: {}]   ;;  %s20492_s18 = inlined_call_operand.vmem [shape: f32[1,128], index: 18, kind: input, shape index: {}]   ;;  %s20493_s19 = inlined_call_operand.vmem [shape: bf16[2,64,128], index: 19, kind: output, shape index: {}]  }
   0x1   :  { %20524 = sst [smem:[#allocation46_spill]] %s20474_s0  ;;  %s16051_s0 = smov 0  }
   0x2   :  { %20525 = sst [smem:[#allocation47_spill]] %s20475_s1 }
   0x3   :  { %20526 = sst [smem:[#allocation48_spill]] %s20476_s2 }
   0x4   :  { %20527 = sst [smem:[#allocation49_spill]] %s20477_s3 }
   0x5 LB: > { %s11714_s30 = sadd.s32 4294967295, %s15945_s0   ;;  %p11718_p0 = scmp.ge.s32.totalorder %s15945_s0, 1  ;;  %s15945_s0 = sphi %s16051_s0, %s29_s0  }
   0x6   : > { %p537_p1 = scmp.lt.s32.totalorder %s15945_s0, 3 }
   0x8   : > { %p538_p2 = pnand %p11718_p0, %p537_p1 }
   0xa   : > { %541 = sbr.rel (%p538_p2) target bundleno = 4197 (0x1065), region = 96 }
   0xf   : > { %v636_v0 = vld [vmem:[%s20481_s7] sm:$0xff]  ;;  %vm781_vm0 = vcmask 1043456   ;;  %p593_p3 = scmp.lt.s32.totalorder %s11714_s30, 1  ;;  %v637_v1 = vld [vmem:[%s20481_s7 + $0x8] sm:$0xff]  ;;  %v20497_v4 = vmov 0   ;;  %s20528_s25 = sld [smem:[#allocation46_spill]] }
  0x10   : > { %v11740_v2 = vcombine.high %v636_v0, %v636_v0  ;;  %v11739_v3 = vcombine.low %v636_v0, %v636_v0  ;;  %829 = vmatprep.mubr.bf16.mxu0 %v20497_v4  ;;  %v11742_v5 = vcombine.high %v637_v1, %v637_v1  ;;  %v11741_v6 = vcombine.low %v637_v1, %v637_v1  ;;  %v14926_v25 = vld [vmem:[%s20481_s7 + $0x10] ss:$0 sps:$4 sm:$0xff]   ;;  %s20536_s20 = sld [smem:[#allocation47_spill]]  ;;  %s20522_s21 = smov 64  }
  0x11   : > { %s20777_s30 = smov (!%p593_p3, %s11714_s30), 1  ;;  %1022 = vmatprep.mubr.bf16.mxu1 %v20497_v4  ;;  %vm732_vm1 = vcmask 64512   ;;  %v795_v26 = vsel %vm781_vm0, %v14926_v25, 0  ;;  %vm5883_vm2 = vcmask 523264   ;;  %s20757_s29 = sld [smem:[#allocation48_spill]]  ;;  %vm15950_vm3 = vmmov 0  }
  0x12   : > { %11744 = vmatprep.subr.msk.bf16.mxu0 %vm781_vm0, %v11740_v2  ;;  %v783_v7 = vsel %vm781_vm0, %v11739_v3, 0  ;;  %11761 = vmatprep.subr.msk.bf16.mxu1 %vm781_vm0, %v11742_v5  ;;  %v789_v8 = vsel %vm781_vm0, %v11741_v6, 0  ;;  %s12997_s2 = sshll.u32 %s20777_s30, 7  ;;  %s20766_s1 = sld [smem:[#allocation49_spill]]  ;;  %vm8818_vm4 = vcmask 130048  }
  0x13   : > { %812 = vmatpush1.bf16.msra.mxu0 %v783_v7  ;;  %1005 = vmatpush1.bf16.msra.mxu1 %v789_v8  ;;  %s20767_s26 = smov 64   ;;  %s12998_s27 = sshll.u32 %s20777_s30, 5 }
  0x14   : > { %14893 = vmatprep.subr.msk.bf16.mxu0 %vm781_vm0, %v14926_v25 }
  0x15   : > { %s16077_s3 = scalar_lea.vmem %s20528_s25, %s12997_s2 }
  0x16   : > { %v16080_v9 = vld [vmem:[%s16077_s3] sm:$0xff]   ;;  %v14909_v10 = vld [vmem:[%s16077_s3 + $0x8] sm:$0xff]   ;;  %v14910_v11 = vld [vmem:[%s16077_s3 + $0x10] sm:$0xff]  }
  0x17   : > { %11745 = vmatmul.mubr.msk.bf16.vlgmr.msra.gmra.mxu0 %vm732_vm1, %v16080_v9  ;;  %11762 = vmatmul.mubr.msk.bf16.vlgmr.msra.gmra.mxu1 %vm732_vm1, %v16080_v9  ;;  %v14911_v12 = vld [vmem:[%s16077_s3 + $0x18] sm:$0xff]   ;;  %v14912_v13 = vld [vmem:[%s16077_s3 + $0x20] sm:$0xff]   ;;  %v14913_v14 = vld [vmem:[%s16077_s3 + $0x28] sm:$0xff]  }
  0x18   : > { %839 = vmatprep.mubr.bf16.mxu0 %v20497_v4  ;;  %1032 = vmatprep.mubr.bf16.mxu1 %v20497_v4  ;;  %v14914_v15 = vld [vmem:[%s16077_s3 + $0x30] sm:$0xff]   ;;  %v14915_v16 = vld [vmem:[%s16077_s3 + $0x38] sm:$0xff]   ;;  %v16124_v17 = vld [vmem:[%s16077_s3 + $0x40] sm:$0xff]  }
  0x19   : > { %v16133_v18 = vld [vmem:[%s16077_s3 + $0x48] sm:$0xff]   ;;  %v14918_v19 = vld [vmem:[%s16077_s3 + $0x50] sm:$0xff]   ;;  %v14919_v20 = vld [vmem:[%s16077_s3 + $0x58] sm:$0xff]   ;;  %14428 = vmatpush3.bf16.msra.mxu0 %v795_v26 }
  0x1a   : > { %v14920_v21 = vld [vmem:[%s16077_s3 + $0x60] sm:$0xff]   ;;  %v14921_v22 = vld [vmem:[%s16077_s3 + $0x68] sm:$0xff]   ;;  %v14922_v23 = vld [vmem:[%s16077_s3 + $0x70] sm:$0xff]  }
  0x1b   : > { %v16167_v24 = vld [vmem:[%s16077_s3 + $0x78] sm:$0xff]   ;;  %v15896_v27 = vld [vmem:[%s16077_s3 + $0x8] sm:$0xff]   ;;  %v15897_v28 = vld [vmem:[%s16077_s3 + $0x10] sm:$0xff]  }
  0x1c   : > { %v15898_v29 = vld [vmem:[%s16077_s3 + $0x18] sm:$0xff]   ;;  %v15899_v30 = vld [vmem:[%s16077_s3 + $0x20] sm:$0xff]   ;;  %v15900_v33 = vld [vmem:[%s16077_s3 + $0x28] sm:$0xff]  }
  0x1d   : > { %v15901_v34 = vld [vmem:[%s16077_s3 + $0x30] sm:$0xff]   ;;  %v15902_v40 = vld [vmem:[%s16077_s3 + $0x38] sm:$0xff]  }
  0x1f   : > { %11746 = vmatmul.mubr.msk.bf16.gmra.mxu0 %vm732_vm1, %v14909_v10  ;;  %11763 = vmatmul.mubr.msk.bf16.gmra.mxu1 %vm732_vm1, %v14909_v10 }
  0x20   : > { %849 = vmatprep.mubr.bf16.mxu0 %v20497_v4  ;;  %1042 = vmatprep.mubr.bf16.mxu1 %v20497_v4 }
  0x27   : > { %11747 = vmatmul.mubr.msk.bf16.gmra.mxu0 %vm732_vm1, %v14910_v11  ;;  %11764 = vmatmul.mubr.msk.bf16.gmra.mxu1 %vm732_vm1, %v14910_v11 }
  0x28   : > { %859 = vmatprep.mubr.bf16.mxu0 %v20497_v4  ;;  %1052 = vmatprep.mubr.bf16.mxu1 %v20497_v4 }
  0x2f   : > { %11748 = vmatmul.mubr.msk.bf16.gmra.mxu0 %vm732_vm1, %v14911_v12  ;;  %11765 = vmatmul.mubr.msk.bf16.gmra.mxu1 %vm732_vm1, %v14911_v12 }
  0x30   : > { %869 = vmatprep.mubr.bf16.mxu0 %v20497_v4  ;;  %1062 = vmatprep.mubr.bf16.mxu1 %v20497_v4 }
  0x37   : > { %11749 = vmatmul.mubr.msk.bf16.gmra.mxu0 %vm732_vm1, %v14912_v13  ;;  %11766 = vmatmul.mubr.msk.bf16.gmra.mxu1 %vm732_vm1, %v14912_v13  ;;  %v14929_v13 = vld [vmem:[%s20536_s20 + $0x4] ss:$8 sps:$4 sm:$0xff]  }
  0x38   : > { %879 = vmatprep.mubr.bf16.mxu0 %v20497_v4  ;;  %1072 = vmatprep.mubr.bf16.mxu1 %v20497_v4 }
  0x3f   : > { %11750 = vmatmul.mubr.msk.bf16.gmra.mxu0 %vm732_vm1, %v14913_v14  ;;  %11767 = vmatmul.mubr.msk.bf16.gmra.mxu1 %vm732_vm1, %v14913_v14 }
  0x40   : > { %889 = vmatprep.mubr.bf16.mxu0 %v20497_v4  ;;  %1082 = vmatprep.mubr.bf16.mxu1 %v20497_v4 }
  0x47   : > { %11751 = vmatmul.mubr.msk.bf16.gmra.mxu0 %vm732_vm1, %v14914_v15  ;;  %11768 = vmatmul.mubr.msk.bf16.gmra.mxu1 %vm732_vm1, %v14914_v15 }
  0x48   : > { %899 = vmatprep.mubr.bf16.mxu0 %v20497_v4  ;;  %1092 = vmatprep.mubr.bf16.mxu1 %v20497_v4 }
  0x4f   : > { %11752 = vmatmul.mubr.msk.bf16.gmra.mxu0 %vm732_vm1, %v14915_v16  ;;  %11769 = vmatmul.mubr.msk.bf16.gmra.mxu1 %vm732_vm1, %v14915_v16 }
  0x50   : > { %909 = vmatprep.mubr.bf16.mxu0 %v20497_v4  ;;  %1102 = vmatprep.mubr.bf16.mxu1 %v20497_v4 }
  0x57   : > { %11753 = vmatmul.mubr.msk.bf16.gmra.mxu0 %vm732_vm1, %v16124_v17  ;;  %11770 = vmatmul.mubr.msk.bf16.gmra.mxu1 %vm732_vm1, %v16124_v17 }
  0x58   : > { %919 = vmatprep.mubr.bf16.mxu0 %v20497_v4  ;;  %1112 = vmatprep.mubr.bf16.mxu1 %v20497_v4 }
  0x5f   : > { %11754 = vmatmul.mubr.msk.bf16.gmra.mxu0 %vm732_vm1, %v16133_v18  ;;  %11771 = vmatmul.mubr.msk.bf16.gmra.mxu1 %vm732_vm1, %v16133_v18 }
  0x60   : > { %929 = vmatprep.mubr.bf16.mxu0 %v20497_v4  ;;  %1122 = vmatprep.mubr.bf16.mxu1 %v20497_v4 }
  0x67   : > { %11755 = vmatmul.mubr.msk.bf16.gmra.mxu0 %vm732_vm1, %v14918_v19  ;;  %11772 = vmatmul.mubr.msk.bf16.gmra.mxu1 %vm732_vm1, %v14918_v19 }
  0x68   : > { %939 = vmatprep.mubr.bf16.mxu0 %v20497_v4  ;;  %1132 = vmatprep.mubr.bf16.mxu1 %v20497_v4 }
  0x6f   : > { %11756 = vmatmul.mubr.msk.bf16.gmra.mxu0 %vm732_vm1, %v14919_v20  ;;  %11773 = vmatmul.mubr.msk.bf16.gmra.mxu1 %vm732_vm1, %v14919_v20 }
  0x70   : > { %949 = vmatprep.mubr.bf16.mxu0 %v20497_v4  ;;  %1142 = vmatprep.mubr.bf16.mxu1 %v20497_v4 }
  0x77   : > { %11757 = vmatmul.mubr.msk.bf16.gmra.mxu0 %vm732_vm1, %v14920_v21  ;;  %11774 = vmatmul.mubr.msk.bf16.gmra.mxu1 %vm732_vm1, %v14920_v21 }
  0x78   : > { %959 = vmatprep.mubr.bf16.mxu0 %v20497_v4  ;;  %1152 = vmatprep.mubr.bf16.mxu1 %v20497_v4 }
  0x7f   : > { %11758 = vmatmul.mubr.msk.bf16.gmra.mxu0 %vm732_vm1, %v14921_v22  ;;  %11775 = vmatmul.mubr.msk.bf16.gmra.mxu1 %vm732_vm1, %v14921_v22 }
  0x80   : > { %969 = vmatprep.mubr.bf16.mxu0 %v20497_v4  ;;  %1162 = vmatprep.mubr.bf16.mxu1 %v20497_v4 }
  0x87   : > { %11759 = vmatmul.mubr.msk.bf16.gmra.mxu0 %vm732_vm1, %v14922_v23  ;;  %11776 = vmatmul.mubr.msk.bf16.gmra.mxu1 %vm732_vm1, %v14922_v23 }
  0x88   : > { %979 = vmatprep.mubr.bf16.mxu0 %v20497_v4  ;;  %1172 = vmatprep.mubr.bf16.mxu1 %v20497_v4 }
  0x8f   : > { %11760 = vmatmul.mubr.msk.bf16.gmra.mxu0 %vm732_vm1, %v16167_v24  ;;  %11777 = vmatmul.mubr.msk.bf16.gmra.mxu1 %vm732_vm1, %v16167_v24 }
  0x90   : > { %14429 = vmatprep.mubr.msk.bf16.mxu0 %vm732_vm1, %v16080_v9 }
  0x97   : > { %14430 = vmatmul.mubr.msk.bf16.vlgmr.msra.gmra.mxu0 %vm732_vm1, %v15896_v27 }
  0x98   : > { %14433 = vmatprep.mubr.msk.bf16.mxu0 %vm732_vm1, %v15897_v28 }
  0x9f   : > { %14434 = vmatmul.mubr.msk.bf16.gmra.mxu0 %vm732_vm1, %v15898_v29 }
  0xa0   : > { %14437 = vmatprep.mubr.msk.bf16.mxu0 %vm732_vm1, %v15899_v30 }
  0xa7   : > { %14438 = vmatmul.mubr.msk.bf16.gmra.mxu0 %vm732_vm1, %v15900_v33 }
  0xa8   : > { %14441 = vmatprep.mubr.msk.bf16.mxu0 %vm732_vm1, %v15901_v34 }
  0xaf   : > { %14442 = vmatmul.mubr.msk.bf16.gmra.mxu0 %vm732_vm1, %v15902_v40 }
  0xb0   : > { %14445 = vmatprep.mubr.msk.bf16.mxu0 %vm732_vm1, %v16124_v17 }
  0xb7   : > { %14446 = vmatmul.mubr.msk.bf16.gmra.mxu0 %vm732_vm1, %v16133_v18 }
  0xb8   : > { %14449 = vmatprep.mubr.msk.bf16.mxu0 %vm732_vm1, %v14918_v19 }
  0xbf   : > { %14450 = vmatmul.mubr.msk.bf16.gmra.mxu0 %vm732_vm1, %v14919_v20 }
  0xc0   : > { %14453 = vmatprep.mubr.msk.bf16.mxu0 %vm732_vm1, %v14920_v21 }
  0xc7   : > { %14454 = vmatmul.mubr.msk.bf16.gmra.mxu0 %vm732_vm1, %v14921_v22 }
  0xc8   : > { %14457 = vmatprep.mubr.msk.bf16.mxu0 %vm732_vm1, %v14922_v23 }
  0xcf   : > { %14458 = vmatmul.mubr.msk.bf16.gmra.mxu0 %vm732_vm1, %v16167_v24 }
  0xd0   : > { %2066 = vmatprep.mubr.bf16.mxu0 %v14929_v13 }
  0xd7   : > { %v831_v31 = vpop.f32.mrf.mxu0  ;;  %v1024_v53 = vpop.f32.mrf.mxu1 }
  0xd9   : > { %v16188_v32 = vpop.f32.mrf.mxu0  ;;  %v16225_v55 = vpop.f32.mrf.mxu1 }
  0xda   : > { %20529 = vst [vmem:[#allocation2_spill] sm:$0xff] %v16225_v55 }
  0xdb   : > { %v835_v35 = vpop.f32.mrf.mxu0  ;;  %v1028_v57 = vpop.f32.mrf.mxu1 }
  0xdc   : > { %v16194_v36 = vpack.c.bf16 %v835_v35, %v831_v31  ;;  %v16230_v59 = vpack.c.bf16 %v1028_v57, %v1024_v53 }
  0xdd   : > { %v16196_v37 = vpop.f32.mrf.mxu0  ;;  %v16232_v60 = vpop.f32.mrf.mxu1 }
  0xde   : > { %20530 = vst [vmem:[#allocation3_spill] sm:$0xff] %v16230_v59  ;;  %20531 = vst [vmem:[#allocation4_spill] sm:$0xff] %v16232_v60 }
  0xdf   : > { %v841_v38 = vpop.f32.mrf.mxu0  ;;  %v1034_v63 = vpop.f32.mrf.mxu1 }
  0xe1   : > { %v16198_v39 = vpop.f32.mrf.mxu0  ;;  %v16239_v1 = vpop.f32.mrf.mxu1 }
  0xe2   : > { %20532 = vst [vmem:[#allocation5_spill] sm:$0xff] %v16239_v1 }
  0xe3   : > { %v845_v41 = vpop.f32.mrf.mxu0  ;;  %v1038_v3 = vpop.f32.mrf.mxu1 }
  0xe4   : > { %v16204_v42 = vpack.c.bf16 %v845_v41, %v841_v38  ;;  %v16245_v6 = vpack.c.bf16 %v1038_v3, %v1034_v63 }
  0xe5   : > { %v16206_v43 = vpop.f32.mrf.mxu0  ;;  %v16247_v7 = vpop.f32.mrf.mxu1 }
  0xe6   : > { %20533 = vst [vmem:[#allocation6_spill] sm:$0xff] %v16245_v6  ;;  %20534 = vst [vmem:[#allocation7_spill] sm:$0xff] %v16247_v7 }
  0xe7   : > { %v851_v44 = vpop.f32.mrf.mxu0  ;;  %v1044_v10 = vpop.f32.mrf.mxu1 }
  0xe9   : > { %v16208_v45 = vpop.f32.mrf.mxu0  ;;  %v16253_v12 = vpop.f32.mrf.mxu1 }
  0xea   : > { %20535 = vst [vmem:[#allocation8_spill] sm:$0xff] %v16253_v12 }
  0xeb   : > { %v855_v46 = vpop.f32.mrf.mxu0  ;;  %v1048_v15 = vpop.f32.mrf.mxu1 }
  0xec   : > { %v16213_v47 = vpack.c.bf16 %v855_v46, %v851_v44  ;;  %v16260_v17 = vpack.c.bf16 %v1048_v15, %v1044_v10 }
  0xed   : > { %v16215_v48 = vpop.f32.mrf.mxu0  ;;  %v16262_v18 = vpop.f32.mrf.mxu1 }
  0xee   : > { %20537 = vst [vmem:[#allocation9_spill] sm:$0xff] %v16260_v17  ;;  %20538 = vst [vmem:[#allocation10_spill] sm:$0xff] %v16262_v18 }
  0xef   : > { %v861_v49 = vpop.f32.mrf.mxu0  ;;  %v1054_v21 = vpop.f32.mrf.mxu1 }
  0xf1   : > { %v16217_v50 = vpop.f32.mrf.mxu0  ;;  %v16268_v23 = vpop.f32.mrf.mxu1 }
  0xf2   : > { %20539 = vst [vmem:[#allocation11_spill] sm:$0xff] %v16268_v23 }
  0xf3   : > { %v865_v51 = vpop.f32.mrf.mxu0  ;;  %v1058_v25 = vpop.f32.mrf.mxu1 }
  0xf4   : > { %v16221_v52 = vpack.c.bf16 %v865_v51, %v861_v49  ;;  %v16272_v27 = vpack.c.bf16 %v1058_v25, %v1054_v21 }
  0xf5   : > { %v16223_v54 = vpop.f32.mrf.mxu0  ;;  %v16274_v28 = vpop.f32.mrf.mxu1 }
  0xf6   : > { %20540 = vst [vmem:[#allocation12_spill] sm:$0xff] %v16272_v27  ;;  %20541 = vst [vmem:[#allocation13_spill] sm:$0xff] %v16274_v28 }
  0xf7   : > { %v871_v56 = vpop.f32.mrf.mxu0  ;;  %v1064_v31 = vpop.f32.mrf.mxu1 }
  0xf9   : > { %v16227_v58 = vpop.f32.mrf.mxu0  ;;  %v16280_v34 = vpop.f32.mrf.mxu1 }
  0xfa   : > { %20542 = vst [vmem:[#allocation14_spill] sm:$0xff] %v16280_v34 }
  0xfb   : > { %v875_v61 = vpop.f32.mrf.mxu0  ;;  %v1068_v38 = vpop.f32.mrf.mxu1 }
  0xfc   : > { %v16235_v62 = vpack.c.bf16 %v875_v61, %v871_v56  ;;  %v16284_v41 = vpack.c.bf16 %v1068_v38, %v1064_v31 }
  0xfd   : > { %v16237_v0 = vpop.f32.mrf.mxu0  ;;  %v16286_v44 = vpop.f32.mrf.mxu1 }
  0xfe   : > { %20543 = vst [vmem:[#allocation15_spill] sm:$0xff] %v16286_v44 }
  0xff   : > { %v881_v2 = vpop.f32.mrf.mxu0  ;;  %v1074_v51 = vpop.f32.mrf.mxu1 }
 0x101   : > { %v16241_v5 = vpop.f32.mrf.mxu0  ;;  %v16292_v56 = vpop.f32.mrf.mxu1 }
 0x102   : > { %20544 = vst [vmem:[#allocation16_spill] sm:$0xff] %v16292_v56 }
 0x103   : > { %v885_v8 = vpop.f32.mrf.mxu0  ;;  %v1078_v61 = vpop.f32.mrf.mxu1 }
 0x104   : > { %v16249_v9 = vpack.c.bf16 %v885_v8, %v881_v2  ;;  %v16296_v2 = vpack.c.bf16 %v1078_v61, %v1074_v51 }
 0x105   : > { %v16251_v11 = vpop.f32.mrf.mxu0  ;;  %v16298_v3 = vpop.f32.mrf.mxu1 }
 0x106   : > { %20545 = vst [vmem:[#allocation17_spill] sm:$0xff] %v16298_v3 }
 0x107   : > { %v891_v14 = vpop.f32.mrf.mxu0  ;;  %v1084_v13 = vpop.f32.mrf.mxu1 }
 0x109   : > { %v16258_v16 = vpop.f32.mrf.mxu0  ;;  %v16304_v15 = vpop.f32.mrf.mxu1 }
 0x10a   : > { %20546 = vst [vmem:[#allocation18_spill] sm:$0xff] %v16304_v15 }
 0x10b   : > { %v895_v19 = vpop.f32.mrf.mxu0  ;;  %v1088_v21 = vpop.f32.mrf.mxu1 }
 0x10c   : > { %v16264_v20 = vpack.c.bf16 %v895_v19, %v891_v14  ;;  %v16310_v25 = vpack.c.bf16 %v1088_v21, %v1084_v13 }
 0x10d   : > { %v16266_v22 = vpop.f32.mrf.mxu0 }
 0x10f   : > { %v901_v24 = vpop.f32.mrf.mxu0 }
 0x111   : > { %v16270_v26 = vpop.f32.mrf.mxu0 }
 0x113   : > { %v905_v29 = vpop.f32.mrf.mxu0 }
 0x114   : > { %v16276_v30 = vpack.c.bf16 %v905_v29, %v901_v24  ;;  %v16312_v29 = vpop.f32.mrf.mxu1 }
 0x115   : > { %v16278_v33 = vpop.f32.mrf.mxu0  ;;  %20547 = vst [vmem:[#allocation19_spill] sm:$0xff] %v16312_v29 }
 0x117   : > { %v911_v35 = vpop.f32.mrf.mxu0 }
 0x119   : > { %v16282_v40 = vpop.f32.mrf.mxu0 }
 0x11b   : > { %v915_v46 = vpop.f32.mrf.mxu0 }
 0x11c   : > { %v16288_v49 = vpack.c.bf16 %v915_v46, %v911_v35  ;;  %v16316_v35 = vpop.f32.mrf.mxu1 }
 0x11d   : > { %v16290_v53 = vpop.f32.mrf.mxu0 }
 0x11e   : > { %v16320_v46 = vpop.f32.mrf.mxu1 }
 0x11f   : > { %v921_v57 = vpop.f32.mrf.mxu0  ;;  %20548 = vst [vmem:[#allocation20_spill] sm:$0xff] %v16320_v46 }
 0x121   : > { %v16294_v63 = vpop.f32.mrf.mxu0 }
 0x123   : > { %v925_v8 = vpop.f32.mrf.mxu0 }
 0x124   : > { %v16300_v10 = vpack.c.bf16 %v925_v8, %v921_v57  ;;  %v16324_v57 = vpop.f32.mrf.mxu1 }
 0x125   : > { %v16302_v14 = vpop.f32.mrf.mxu0 }
 0x126   : > { %v16328_v8 = vpop.f32.mrf.mxu1 }
 0x127   : > { %v16306_v19 = vpop.f32.mrf.mxu0  ;;  %20549 = vst [vmem:[#allocation21_spill] sm:$0xff] %v16328_v8 }
 0x128   : > { %v1104_v21 = vpop.f32.mrf.mxu1 }
 0x129   : > { %v16308_v24 = vpop.f32.mrf.mxu0 }
 0x12a   : > { %v16332_v60 = vpop.f32.mrf.mxu1 }
 0x12b   : > { %v16314_v31 = vpop.f32.mrf.mxu0  ;;  %20550 = vst [vmem:[#allocation22_spill] sm:$0xff] %v16332_v60 }
 0x12c   : > { %v1108_v7 = vpop.f32.mrf.mxu1 }
 0x12d   : > { %v16318_v38 = vpop.f32.mrf.mxu0  ;;  %v16336_v18 = vpack.c.bf16 %v1108_v7, %v1104_v21 }
 0x12e   : > { %v16338_v12 = vpop.f32.mrf.mxu1 }
 0x12f   : > { %v16322_v51 = vpop.f32.mrf.mxu0  ;;  %20551 = vst [vmem:[#allocation23_spill] sm:$0xff] %v16336_v18  ;;  %20552 = vst [vmem:[#allocation24_spill] sm:$0xff] %v16338_v12 }
 0x130   : > { %v1114_v23 = vpop.f32.mrf.mxu1 }
 0x131   : > { %v16326_v61 = vpop.f32.mrf.mxu0 }
 0x132   : > { %v16342_v34 = vpop.f32.mrf.mxu1 }
 0x133   : > { %v945_v13 = vpop.f32.mrf.mxu0  ;;  %20553 = vst [vmem:[#allocation25_spill] sm:$0xff] %v16342_v34 }
 0x134   : > { %v1118_v56 = vpop.f32.mrf.mxu1 }
 0x135   : > { %v16330_v4 = vpop.f32.mrf.mxu0  ;;  %v16346_v15 = vpack.c.bf16 %v1118_v56, %v1114_v23 }
 0x136   : > { %v16348_v60 = vpop.f32.mrf.mxu1 }
 0x137   : > { %v951_v55 = vpop.f32.mrf.mxu0  ;;  %20554 = vst [vmem:[#allocation26_spill] sm:$0xff] %v16346_v15  ;;  %20555 = vst [vmem:[#allocation27_spill] sm:$0xff] %v16348_v60 }
 0x138   : > { %v16350_v8 = vpop.f32.mrf.mxu1 }
 0x139   : > { %v16334_v1 = vpop.f32.mrf.mxu0  ;;  %20556 = vst [vmem:[#allocation28_spill] sm:$0xff] %v16350_v8 }
 0x13a   : > { %v16354_v21 = vpop.f32.mrf.mxu1 }
 0x13b   : > { %v955_v28 = vpop.f32.mrf.mxu0  ;;  %20557 = vst [vmem:[#allocation29_spill] sm:$0xff] %v16354_v21 }
 0x13c   : > { %v16358_v46 = vpop.f32.mrf.mxu1 }
 0x13d   : > { %v16340_v44 = vpop.f32.mrf.mxu0  ;;  %20558 = vst [vmem:[#allocation30_spill] sm:$0xff] %v16358_v46 }
 0x13e   : > { %v16360_v6 = vpop.f32.mrf.mxu1 }
 0x13f   : > { %v961_v3 = vpop.f32.mrf.mxu0  ;;  %20559 = vst [vmem:[#allocation31_spill] sm:$0xff] %v16360_v6 }
 0x140   : > { %v16364_v56 = vpop.f32.mrf.mxu1 }
 0x141   : > { %v16344_v29 = vpop.f32.mrf.mxu0 }
 0x142   : > { %v16367_v15 = vpop.f32.mrf.mxu1 }
 0x143   : > { %v965_v59 = vpop.f32.mrf.mxu0 }
 0x144   : > { %v16369_v8 = vpop.f32.mrf.mxu1  ;;  %v1409_v6 = vpack.c.bf16 %v965_v59, %v961_v3  ;;  %v1399_v59 = vpack.c.bf16 %v945_v13, %v16322_v51  ;;  %v20561_v13 = vld [vmem:[#allocation12_spill] sm:$0xff] }
 0x145   : > { %v16352_v7 = vpop.f32.mrf.mxu0 }
 0x146   : > { %v16373_v27 = vpop.f32.mrf.mxu1 }
 0x147   : > { %v971_v12 = vpop.f32.mrf.mxu0  ;;  %20560 = vst [vmem:[#allocation32_spill] sm:$0xff] %v16373_v27 }
 0x149   : > { %v16356_v18 = vpop.f32.mrf.mxu0 }
 0x14b   : > { %v975_v34 = vpop.f32.mrf.mxu0 }
 0x14c   : > { %v1414_v17 = vpack.c.bf16 %v975_v34, %v971_v12  ;;  %v16378_v34 = vpop.f32.mrf.mxu1 }
 0x14d   : > { %v16362_v23 = vpop.f32.mrf.mxu0 }
 0x14e   : > { %1693 = vrot.lane.b32.xlu1 %v1414_v17, %s20522_s21  ;;  %v16385_v27 = vpop.f32.mrf.mxu1 }
 0x14f   : > { %v981_v60 = vpop.f32.mrf.mxu0 }
 0x151   : > { %v983_v21 = vpop.f32.mrf.mxu0 }
 0x152   : > { %1677 = vrot.lane.b32.xlu1 %v16264_v20, %s20522_s21 }
 0x153   : > { %v985_v46 = vpop.f32.mrf.mxu0 }
 0x154   : > { %v1419_v12 = vpack.c.bf16 %v985_v46, %v981_v60  ;;  %v1404_v60 = vpack.c.bf16 %v955_v28, %v951_v55  ;;  %v16391_v46 = vpop.f32.mrf.mxu1  ;;  %v1394_v55 = vpack.c.bf16 %v16314_v31, %v16306_v19  ;;  %v16431_v28 = vpack.c.bf16 %v16266_v22, %v16258_v16  ;;  %v14930_v22 = vld [vmem:[%s20536_s20 + $0x14] ss:$8 sps:$4 sm:$0xff]  }
 0x155   : > { %v16446_v16 = vpack.c.bf16 %v16251_v11, %v16241_v5  ;;  %v16460_v5 = vpack.c.bf16 %v16237_v0, %v16227_v58  ;;  %v16464_v11 = vpack.c.bf16 %v16362_v23, %v16356_v18  ;;  %v16477_v58 = vpack.c.bf16 %v16223_v54, %v16217_v50  ;;  %v14933_v18 = vld [vmem:[%s20536_s20 + $0x24] ss:$8 sps:$4 sm:$0xff]   ;;  %v20563_v23 = vld [vmem:[#allocation9_spill] sm:$0xff] }
 0x156   : > { %1675 = vrot.lane.b32.xlu1 %v16249_v9, %s20522_s21  ;;  %1695 = vrot.lane.b32.xlu0 %v1419_v12, %s20522_s21  ;;  %v16481_v0 = vpack.c.bf16 %v16352_v7, %v16344_v29  ;;  %v16492_v50 = vpack.c.bf16 %v16215_v48, %v16208_v45  ;;  %v16496_v54 = vpack.c.bf16 %v16340_v44, %v16334_v1  ;;  %v14936_v1 = vld [vmem:[%s20536_s20 + $0x34] ss:$8 sps:$4 sm:$0xff]   ;;  %v14941_v29 = vld [vmem:[%s20536_s20 + $0x44] ss:$8 sps:$4 sm:$0xff]  }
 0x157   : > { %13159 = vmatprep.subr.bf16.mxu0 %v1419_v12  ;;  %v16509_v45 = vpack.c.bf16 %v16206_v43, %v16198_v39  ;;  %v16513_v48 = vpack.c.bf16 %v16330_v4, %v16326_v61  ;;  %v16524_v39 = vpack.c.bf16 %v16196_v37, %v16188_v32  ;;  %v16528_v4 = vpack.c.bf16 %v16318_v38, %v16308_v24  ;;  %v14938_v32 = vld [vmem:[%s20536_s20 + $0x30] ss:$8 sps:$4 sm:$0xff]   ;;  %v14944_v38 = vld [vmem:[%s20536_s20 + $0x54] ss:$8 sps:$4 sm:$0xff]   ;;  %v14945_v12 = vld [vmem:[%s20536_s20 + $0x60] ss:$8 sps:$4 sm:$0xff]  }
 0x158   : > { %13160 = vmatpush3.bf16.msra.mxu0 %v16276_v30  ;;  %v16536_v43 = vpack.c.bf16 %v16324_v57, %v16316_v35  ;;  %v16543_v24 = vpack.c.bf16 %v16302_v14, %v16294_v63  ;;  %v16554_v35 = vpack.c.bf16 %v16290_v53, %v16282_v40  ;;  %v14939_v14 = vld [vmem:[%s20536_s20 + $0x40] ss:$8 sps:$4 sm:$0xff]   ;;  %v14942_v53 = vld [vmem:[%s20536_s20 + $0x50] ss:$8 sps:$4 sm:$0xff]   ;;  %v14947_v57 = vld [vmem:[%s20536_s20 + $0x64] ss:$8 sps:$4 sm:$0xff]   ;;  %v16590_v61 = vpack.c.bf16 %v16391_v46, %v16378_v34 }
 0x159   : > { %13161 = vmatprep.subr.bf16.mxu0 %v1414_v17  ;;  %v16398_v17 = vpop.f32.mrf.mxu1  ;;  %v14950_v34 = vld [vmem:[%s20536_s20 + $0x74] ss:$8 sps:$4 sm:$0xff]  }
 0x15a   : > { %1673 = vrot.lane.b32.xlu1 %v16235_v62, %s20522_s21  ;;  %1679 = vrot.lane.b32.xlu0 %v16276_v30, %s20522_s21  ;;  %v20565_v46 = vld [vmem:[#allocation28_spill] sm:$0xff] }
 0x15c   : > { %13162 = vmatpush3.bf16.msra.mxu0 %v16264_v20  ;;  %v16419_v20 = vpack.c.bf16 %v16278_v33, %v16270_v26  ;;  %v987_v26 = vpop.f32.mrf.mxu0 }
 0x15d   : > { %13163 = vmatprep.subr.bf16.mxu0 %v1409_v6 }
 0x15e   : > { %1671 = vrot.lane.b32.xlu1 %v16221_v52, %s20522_s21  ;;  %1691 = vrot.lane.b32.xlu0 %v1409_v6, %s20522_s21  ;;  %v16406_v6 = vpop.f32.mrf.mxu1  ;;  %v16596_v7 = vpop.f32.mrf.mxu0 }
 0x15f   : > { %20562 = vst [vmem:[#allocation12_spill] sm:$0xff] %v16596_v7  ;;  %v20598_v7 = vld [vmem:[#allocation7_spill] sm:$0xff] }
 0x160   : > { %13164 = vmatpush3.bf16.msra.mxu0 %v16249_v9  ;;  %v16415_v9 = vpop.f32.mrf.mxu1 }
 0x161   : > { %13165 = vmatprep.subr.bf16.mxu0 %v1404_v60 }
 0x162   : > { %1669 = vrot.lane.b32.xlu1 %v16213_v47, %s20522_s21  ;;  %1689 = vrot.lane.b32.xlu0 %v1404_v60, %s20522_s21  ;;  %v16612_v60 = vpop.f32.mrf.mxu0 }
 0x163   : > { %20564 = vst [vmem:[#allocation9_spill] sm:$0xff] %v16612_v60 }
 0x164   : > { %13166 = vmatpush3.bf16.msra.mxu0 %v16235_v62  ;;  %v14968_v62 = vld [vmem:[%s20536_s20 + $0x104] ss:$8 sps:$4 sm:$0xff]  }
 0x165   : > { %13167 = vmatprep.subr.bf16.mxu0 %v1399_v59  ;;  %1745 = vmatprep.mubr.bf16.mxu1 %v14968_v62 }
 0x166   : > { %1667 = vrot.lane.b32.xlu1 %v16204_v42, %s20522_s21  ;;  %1687 = vrot.lane.b32.xlu0 %v1399_v59, %s20522_s21  ;;  %v20566_v59 = vld [vmem:[#allocation30_spill] sm:$0xff] }
 0x168   : > { %13168 = vmatpush3.bf16.msra.mxu0 %v16221_v52  ;;  %v16427_v52 = vpop.f32.mrf.mxu1 }
 0x169   : > { %13169 = vmatprep.subr.bf16.mxu0 %v1394_v55  ;;  %v16576_v40 = vpack.c.bf16 %v16427_v52, %v16406_v6  ;;  %v20570_v52 = vld [vmem:[#allocation20_spill] sm:$0xff] }
 0x16a   : > { %1665 = vrot.lane.b32.xlu1 %v16194_v36, %s20522_s21  ;;  %1685 = vrot.lane.b32.xlu0 %v1394_v55, %s20522_s21  ;;  %v16442_v30 = vpop.f32.mrf.mxu1  ;;  %v16622_v55 = vpop.f32.mrf.mxu0 }
 0x16b   : > { %20568 = vst [vmem:[#allocation28_spill] sm:$0xff] %v16622_v55 }
 0x16c   : > { %13170 = vmatpush3.bf16.msra.mxu0 %v16213_v47  ;;  %v14927_v47 = vld [vmem:[%s20536_s20] ss:$8 sps:$4 sm:$0xff]   ;;  %v1164_v33 = vpop.f32.mrf.mxu1  ;;  %v16626_v62 = vpop.f32.mrf.mxu0 }
 0x16d   : > { %13171 = vmatprep.subr.bf16.mxu0 %v16300_v10  ;;  %20569 = vst [vmem:[#allocation30_spill] sm:$0xff] %v16626_v62 }
 0x16e   : > { %2804 = vrot.lane.b32.xlu1 %v16419_v20, %s20522_s21  ;;  %1683 = vrot.lane.b32.xlu0 %v16300_v10, %s20522_s21  ;;  %v14935_v10 = vld [vmem:[%s20536_s20 + $0x20] ss:$8 sps:$4 sm:$0xff]  }
 0x170   : > { %13172 = vmatpush3.bf16.msra.mxu0 %v16204_v42  ;;  %v16448_v42 = vpack.c.bf16 %v987_v26, %v983_v21  ;;  %v16600_v21 = vpack.c.bf16 %v16369_v8, %v16364_v56  ;;  %v16616_v8 = vpack.c.bf16 %v20566_v59, %v20565_v46  ;;  %v20567_v56 = vld [vmem:[#allocation6_spill] sm:$0xff]  ;;  %v20571_v26 = vld [vmem:[#allocation21_spill] sm:$0xff] }
 0x171   : > { %13173 = vmatprep.subr.bf16.mxu0 %v16288_v49 }
 0x172   : > { %2802 = vrot.lane.b32.xlu1 %v16431_v28, %s20522_s21  ;;  %1681 = vrot.lane.b32.xlu0 %v16288_v49, %s20522_s21  ;;  %v16473_v49 = vpop.f32.mrf.mxu1 }
 0x174   : > { %13174 = vmatpush3.bf16.msra.mxu0 %v16194_v36  ;;  %v14932_v36 = vld [vmem:[%s20536_s20 + $0x10] ss:$8 sps:$4 sm:$0xff]   ;;  %v1168_v3 = vpop.f32.mrf.mxu1 }
 0x175   : > { %v16568_v51 = vpack.c.bf16 %v1168_v3, %v1164_v33  ;;  %v16636_v33 = vpop.f32.mrf.mxu0 }
 0x176   : > { %2800 = vrot.lane.b32.xlu1 %v16446_v16, %s20522_s21  ;;  %2820 = vrot.lane.b32.xlu0 %v16448_v42, %s20522_s21  ;;  %v16505_v19 = vpop.f32.mrf.mxu1  ;;  %20573 = vst [vmem:[#allocation6_spill] sm:$0xff] %v16636_v33  ;;  %v20605_v33 = vld [vmem:[#allocation31_spill] sm:$0xff] }
 0x177   : > { %2067 = vmatmul.mubr.bf16.vlgmr.msra.gmra.mxu0 %v14927_v47  ;;  %v16630_v47 = vpack.c.bf16 %v20571_v26, %v20570_v52  ;;  %v16644_v3 = vpop.f32.mrf.mxu0  ;;  %v14951_v52 = vld [vmem:[%s20536_s20 + $0x80] ss:$8 sps:$4 sm:$0xff]   ;;  %v14956_v26 = vld [vmem:[%s20536_s20 + $0x94] ss:$8 sps:$4 sm:$0xff]  }
 0x178   : > { %2074 = vmatprep.mubr.bf16.mxu0 %v14930_v22  ;;  %v1174_v44 = vpop.f32.mrf.mxu1  ;;  %v20572_v22 = vld [vmem:[#allocation3_spill] sm:$0xff]  ;;  %20574 = vst [vmem:[#allocation20_spill] sm:$0xff] %v16644_v3  ;;  %v20604_v3 = vld [vmem:[#allocation29_spill] sm:$0xff] }
 0x17a   : > { %2798 = vrot.lane.b32.xlu1 %v16460_v5, %s20522_s21  ;;  %2818 = vrot.lane.b32.xlu0 %v16464_v11, %s20522_s21  ;;  %v1176_v37 = vpop.f32.mrf.mxu1 }
 0x17c   : > { %v1178_v31 = vpop.f32.mrf.mxu1 }
 0x17d   : > { %v16558_v63 = vpack.c.bf16 %v1178_v31, %v1174_v44 }
 0x17e   : > { %2796 = vrot.lane.b32.xlu1 %v16477_v58, %s20522_s21  ;;  %2816 = vrot.lane.b32.xlu0 %v16481_v0, %s20522_s21  ;;  %v1180_v31 = vpop.f32.mrf.mxu1 }
 0x17f   : > { %2075 = vmatmul.mubr.bf16.gmra.mxu0 %v14932_v36  ;;  %v14948_v36 = vld [vmem:[%s20536_s20 + $0x70] ss:$8 sps:$4 sm:$0xff]   ;;  %v16666_v46 = vpack.c.bf16 %v1180_v31, %v1176_v37  ;;  %v16686_v37 = vpack.c.bf16 %v16505_v19, %v16473_v49  ;;  %v16704_v49 = vpack.c.bf16 %v16442_v30, %v16415_v9  ;;  %v20594_v30 = vld [vmem:[#allocation10_spill] sm:$0xff] }
 0x180   : > { %2082 = vmatprep.mubr.bf16.mxu0 %v14933_v18  ;;  %v14953_v18 = vld [vmem:[%s20536_s20 + $0x84] ss:$8 sps:$4 sm:$0xff]   ;;  %v20593_v9 = vld [vmem:[#allocation8_spill] sm:$0xff] }
 0x182   : > { %2794 = vrot.lane.b32.xlu1 %v16492_v50, %s20522_s21  ;;  %2814 = vrot.lane.b32.xlu0 %v16496_v54, %s20522_s21 }
 0x186   : > { %2792 = vrot.lane.b32.xlu1 %v16509_v45, %s20522_s21  ;;  %2812 = vrot.lane.b32.xlu0 %v16513_v48, %s20522_s21 }
 0x187   : > { %2083 = vmatmul.mubr.bf16.gmra.mxu0 %v14935_v10  ;;  %v20575_v10 = vld [vmem:[#allocation18_spill] sm:$0xff] }
 0x188   : > { %2090 = vmatprep.mubr.bf16.mxu0 %v14936_v1  ;;  %v20576_v1 = vld [vmem:[#allocation19_spill] sm:$0xff] }
 0x189   : > { %v16648_v44 = vpack.c.bf16 %v20576_v1, %v20575_v10  ;;  %v20586_v10 = vld [vmem:[#allocation15_spill] sm:$0xff] }
 0x18a   : > { %2790 = vrot.lane.b32.xlu1 %v16524_v39, %s20522_s21  ;;  %2810 = vrot.lane.b32.xlu0 %v16528_v4, %s20522_s21 }
 0x18e   : > { %2808 = vrot.lane.b32.xlu0 %v16543_v24, %s20522_s21  ;;  %3640 = vrot.lane.b32.xlu1 %v16536_v43, %s20522_s21 }
 0x18f   : > { %2091 = vmatmul.mubr.bf16.gmra.mxu0 %v14938_v32  ;;  %v20577_v32 = vld [vmem:[#allocation26_spill] sm:$0xff] }
 0x190   : > { %2098 = vmatprep.mubr.bf16.mxu0 %v14941_v29  ;;  %v16654_v29 = vpop.f32.mrf.mxu0 }
 0x191   : > { %20578 = vst [vmem:[#allocation21_spill] sm:$0xff] %v16654_v29  ;;  %v16766_v29 = vpack.c.bf16 %v20605_v33, %v20604_v3  ;;  %v20608_v33 = vld [vmem:[#allocation25_spill] sm:$0xff]  ;;  %v20609_v3 = vld [vmem:[#allocation27_spill] sm:$0xff] }
 0x192   : > { %2806 = vrot.lane.b32.xlu0 %v16554_v35, %s20522_s21  ;;  %3638 = vrot.lane.b32.xlu1 %v16310_v25, %s20522_s21 }
 0x196   : > { %3656 = vrot.lane.b32.xlu0 %v16558_v63, %s20522_s21  ;;  %3636 = vrot.lane.b32.xlu1 %v16296_v2, %s20522_s21 }
 0x197   : > { %2099 = vmatmul.mubr.bf16.gmra.mxu0 %v14939_v14  ;;  %v16726_v14 = vpack.c.bf16 %v16398_v17, %v16385_v27  ;;  %v20599_v17 = vld [vmem:[#allocation32_spill] sm:$0xff] }
 0x198   : > { %2106 = vmatprep.mubr.bf16.mxu0 %v14944_v38  ;;  %v16658_v38 = vpop.f32.mrf.mxu0  ;;  %v16744_v55 = vpack.c.bf16 %v20599_v17, %v16367_v15  ;;  %v20602_v15 = vld [vmem:[#allocation2_spill] sm:$0xff]  ;;  %v20603_v17 = vld [vmem:[#allocation4_spill] sm:$0xff] }
 0x199   : > { %20579 = vst [vmem:[#allocation3_spill] sm:$0xff] %v16658_v38  ;;  %v16762_v38 = vpack.c.bf16 %v20603_v17, %v20602_v15  ;;  %v16780_v17 = vpack.c.bf16 %v20609_v3, %v20608_v33  ;;  %v20612_v3 = vld [vmem:[#allocation22_spill] sm:$0xff] }
 0x19a   : > { %3654 = vrot.lane.b32.xlu0 %v16568_v51, %s20522_s21  ;;  %3634 = vrot.lane.b32.xlu1 %v16284_v41, %s20522_s21  ;;  %v16670_v59 = vpop.f32.mrf.mxu0 }
 0x19b   : > { %20583 = vst [vmem:[#allocation18_spill] sm:$0xff] %v16670_v59 }
 0x19e   : > { %3652 = vrot.lane.b32.xlu0 %v16576_v40, %s20522_s21  ;;  %3632 = vrot.lane.b32.xlu1 %v20561_v13, %s20522_s21 }
 0x19f   : > { %2107 = vmatmul.mubr.bf16.gmra.mxu0 %v14942_v53  ;;  %v20580_v53 = vld [vmem:[#allocation16_spill] sm:$0xff] }
 0x1a0   : > { %2114 = vmatprep.mubr.bf16.mxu0 %v14947_v57  ;;  %v20581_v57 = vld [vmem:[#allocation17_spill] sm:$0xff] }
 0x1a2   : > { %3650 = vrot.lane.b32.xlu0 %v16590_v61, %s20522_s21  ;;  %3630 = vrot.lane.b32.xlu1 %v20563_v23, %s20522_s21 }
 0x1a6   : > { %3648 = vrot.lane.b32.xlu0 %v16600_v21, %s20522_s21  ;;  %3628 = vrot.lane.b32.xlu1 %v20567_v56, %s20522_s21 }
 0x1a7   : > { %2115 = vmatmul.mubr.bf16.gmra.mxu0 %v14945_v12  ;;  %v16662_v12 = vpack.c.bf16 %v20581_v57, %v20580_v53 }
 0x1a8   : > { %2122 = vmatprep.mubr.bf16.mxu0 %v14950_v34  ;;  %v20582_v34 = vld [vmem:[#allocation23_spill] sm:$0xff] }
 0x1aa   : > { %3646 = vrot.lane.b32.xlu0 %v16616_v8, %s20522_s21  ;;  %3626 = vrot.lane.b32.xlu1 %v20572_v22, %s20522_s21 }
 0x1ae   : > { %3644 = vrot.lane.b32.xlu0 %v20577_v32, %s20522_s21  ;;  %4476 = vrot.lane.b32.xlu1 %v16630_v47, %s20522_s21 }
 0x1af   : > { %2123 = vmatmul.mubr.bf16.gmra.mxu0 %v14948_v36  ;;  %v16678_v36 = vpop.f32.mrf.mxu0 }
 0x1b0   : > { %2130 = vmatprep.mubr.bf16.mxu0 %v14953_v18  ;;  %20584 = vst [vmem:[#allocation19_spill] sm:$0xff] %v16678_v36  ;;  %v20585_v18 = vld [vmem:[#allocation14_spill] sm:$0xff] }
 0x1b1   : > { %v16682_v1 = vpack.c.bf16 %v20586_v10, %v20585_v18  ;;  %v16692_v31 = vpop.f32.mrf.mxu0  ;;  %v20589_v18 = vld [vmem:[#allocation11_spill] sm:$0xff]  ;;  %v20590_v10 = vld [vmem:[#allocation13_spill] sm:$0xff] }
 0x1b2   : > { %3642 = vrot.lane.b32.xlu0 %v20582_v34, %s20522_s21  ;;  %4474 = vrot.lane.b32.xlu1 %v16648_v44, %s20522_s21  ;;  %20587 = vst [vmem:[#allocation26_spill] sm:$0xff] %v16692_v31  ;;  %v16700_v6 = vpack.c.bf16 %v20590_v10, %v20589_v18  ;;  %v16722_v10 = vpack.c.bf16 %v20594_v30, %v20593_v9  ;;  %v20597_v30 = vld [vmem:[#allocation5_spill] sm:$0xff] }
 0x1b3   : > { %v16696_v57 = vpop.f32.mrf.mxu0  ;;  %v16740_v27 = vpack.c.bf16 %v20598_v7, %v20597_v30  ;;  %v14962_v7 = vld [vmem:[%s20536_s20 + $0xb4] ss:$8 sps:$4 sm:$0xff]  }
 0x1b4   : > { %20588 = vst [vmem:[#allocation16_spill] sm:$0xff] %v16696_v57 }
 0x1b5   : > { %v16710_v19 = vpop.f32.mrf.mxu0 }
 0x1b6   : > { %4492 = vrot.lane.b32.xlu0 %v16666_v46, %s20522_s21  ;;  %4472 = vrot.lane.b32.xlu1 %v16662_v12, %s20522_s21  ;;  %20591 = vst [vmem:[#allocation17_spill] sm:$0xff] %v16710_v19 }
 0x1b7   : > { %2131 = vmatmul.mubr.bf16.gmra.mxu0 %v14951_v52  ;;  %v14954_v52 = vld [vmem:[%s20536_s20 + $0x90] ss:$8 sps:$4 sm:$0xff]   ;;  %v16718_v18 = vpop.f32.mrf.mxu0 }
 0x1b8   : > { %2138 = vmatprep.mubr.bf16.mxu0 %v14956_v26  ;;  %v14959_v26 = vld [vmem:[%s20536_s20 + $0xa4] ss:$8 sps:$4 sm:$0xff]   ;;  %20592 = vst [vmem:[#allocation23_spill] sm:$0xff] %v16718_v18 }
 0x1b9   : > { %v16732_v53 = vpop.f32.mrf.mxu0 }
 0x1ba   : > { %4490 = vrot.lane.b32.xlu0 %v16686_v37, %s20522_s21  ;;  %4470 = vrot.lane.b32.xlu1 %v16682_v1, %s20522_s21  ;;  %20595 = vst [vmem:[#allocation14_spill] sm:$0xff] %v16732_v53 }
 0x1bb   : > { %v16736_v9 = vpop.f32.mrf.mxu0 }
 0x1bc   : > { %20596 = vst [vmem:[#allocation15_spill] sm:$0xff] %v16736_v9 }
 0x1be   : > { %4488 = vrot.lane.b32.xlu0 %v16704_v49, %s20522_s21  ;;  %4468 = vrot.lane.b32.xlu1 %v16700_v6, %s20522_s21 }
 0x1bf   : > { %2139 = vmatmul.mubr.bf16.gmra.mxu0 %v14954_v52  ;;  %v16750_v52 = vpop.f32.mrf.mxu0 }
 0x1c0   : > { %v1694_v60 = vpop.permute.xlu1 %1693  ;;  %2146 = vmatprep.mubr.bf16.mxu0 %v14959_v26  ;;  %20600 = vst [vmem:[#allocation11_spill] sm:$0xff] %v16750_v52  ;;  %v14957_v26 = vld [vmem:[%s20536_s20 + $0xa0] ss:$8 sps:$4 sm:$0xff]   ;;  %v20613_v52 = vld [vmem:[#allocation24_spill] sm:$0xff] }
 0x1c1   : > { %v16758_v30 = vpop.f32.mrf.mxu0 }
 0x1c2   : > { %4486 = vrot.lane.b32.xlu0 %v16726_v14, %s20522_s21  ;;  %4466 = vrot.lane.b32.xlu1 %v16722_v10, %s20522_s21  ;;  %20601 = vst [vmem:[#allocation13_spill] sm:$0xff] %v16758_v30 }
 0x1c3   : > { %v16772_v57 = vpop.f32.mrf.mxu0 }
 0x1c4   : > { %v1678_v62 = vpop.permute.xlu1 %1677  ;;  %20606 = vst [vmem:[#allocation8_spill] sm:$0xff] %v16772_v57  ;;  %v16798_v57 = vpack.c.bf16 %v20613_v52, %v20612_v3 }
 0x1c5   : > { %v16776_v15 = vpop.f32.mrf.mxu0 }
 0x1c6   : > { %4484 = vrot.lane.b32.xlu0 %v16744_v55, %s20522_s21  ;;  %4464 = vrot.lane.b32.xlu1 %v16740_v27, %s20522_s21  ;;  %20607 = vst [vmem:[#allocation10_spill] sm:$0xff] %v16776_v15  ;;  %v14965_v15 = vld [vmem:[%s20536_s20 + $0xc4] ss:$8 sps:$4 sm:$0xff]  }
 0x1c7   : > { %2147 = vmatmul.mubr.bf16.gmra.mxu0 %v14957_v26  ;;  %v14960_v26 = vld [vmem:[%s20536_s20 + $0xb0] ss:$8 sps:$4 sm:$0xff]   ;;  %v16789_v30 = vpop.f32.mrf.mxu0 }
 0x1c8   : > { %v1676_v36 = vpop.permute.xlu1 %1675  ;;  %v1696_v59 = vpop.permute.xlu0 %1695  ;;  %2154 = vmatprep.mubr.bf16.mxu0 %v14962_v7  ;;  %20610 = vst [vmem:[#allocation5_spill] sm:$0xff] %v16789_v30 }
 0x1c9   : > { %13047 = vmatprep.subr.bf16.mxu1 %v1696_v59  ;;  %v16794_v33 = vpop.f32.mrf.mxu0 }
 0x1ca   : > { %4482 = vrot.lane.b32.xlu0 %v16766_v29, %s20522_s21  ;;  %4462 = vrot.lane.b32.xlu1 %v16762_v38, %s20522_s21  ;;  %20611 = vst [vmem:[#allocation7_spill] sm:$0xff] %v16794_v33 }
 0x1cb   : > { %v16802_v31 = vpop.f32.mrf.mxu0 }
 0x1cc   : > { %v1674_v7 = vpop.permute.xlu1 %1673  ;;  %v1680_v59 = vpop.permute.xlu0 %1679  ;;  %20614 = vst [vmem:[#allocation32_spill] sm:$0xff] %v16802_v31 }
 0x1cd   : > { %13048 = vmatpush3.bf16.msra.mxu1 %v1680_v59  ;;  %v16806_v59 = vpop.f32.mrf.mxu0 }
 0x1ce   : > { %13049 = vmatprep.subr.bf16.mxu1 %v1694_v60  ;;  %4480 = vrot.lane.b32.xlu0 %v16780_v17, %s20522_s21  ;;  %20615 = vst [vmem:[#allocation2_spill] sm:$0xff] %v16806_v59  ;;  %v14963_v60 = vld [vmem:[%s20536_s20 + $0xc0] ss:$8 sps:$4 sm:$0xff]  }
 0x1cf   : > { %2155 = vmatmul.mubr.bf16.gmra.mxu0 %v14960_v26  ;;  %v16813_v52 = vpop.f32.mrf.mxu0 }
 0x1d0   : > { %v1672_v9 = vpop.permute.xlu1 %1671  ;;  %v1692_v18 = vpop.permute.xlu0 %1691  ;;  %2162 = vmatprep.mubr.bf16.mxu0 %v14965_v15  ;;  %20616 = vst [vmem:[#allocation4_spill] sm:$0xff] %v16813_v52  ;;  %v14971_v15 = vld [vmem:[%s20536_s20 + $0xd4] ss:$8 sps:$4 sm:$0xff]   ;;  %v14975_v52 = vld [vmem:[%s20536_s20 + $0xe0] ss:$8 sps:$4 sm:$0xff]  }
 0x1d1   : > { %13050 = vmatpush3.bf16.msra.mxu1 %v1678_v62  ;;  %v16818_v62 = vpop.f32.mrf.mxu0 }
 0x1d2   : > { %13051 = vmatprep.subr.bf16.mxu1 %v1692_v18  ;;  %4478 = vrot.lane.b32.xlu0 %v16798_v57, %s20522_s21  ;;  %20617 = vst [vmem:[#allocation29_spill] sm:$0xff] %v16818_v62  ;;  %v14977_v62 = vld [vmem:[%s20536_s20 + $0xe4] ss:$8 sps:$4 sm:$0xff]   ;;  %s602_s21 = scalar_lea.vmem %s20493_s19, %s12998_s27 }
 0x1d3   : > { %v16820_v18 = vpop.f32.mrf.mxu0 }
 0x1d4   : > { %v1670_v26 = vpop.permute.xlu1 %1669  ;;  %v1690_v3 = vpop.permute.xlu0 %1689  ;;  %20618 = vst [vmem:[#allocation31_spill] sm:$0xff] %v16820_v18 }
 0x1d5   : > { %13052 = vmatpush3.bf16.msra.mxu1 %v1676_v36  ;;  %v16824_v30 = vpop.f32.mrf.mxu0  ;;  %v14969_v36 = vld [vmem:[%s20536_s20 + $0xd0] ss:$8 sps:$4 sm:$0xff]  }
 0x1d6   : > { %13053 = vmatprep.subr.bf16.mxu1 %v1690_v3  ;;  %20619 = vst [vmem:[#allocation25_spill] sm:$0xff] %v16824_v30 }
 0x1d7   : > { %2163 = vmatmul.mubr.bf16.gmra.mxu0 %v14963_v60  ;;  %v16829_v31 = vpop.f32.mrf.mxu0 }
 0x1d8   : > { %v1668_v19 = vpop.permute.xlu1 %1667  ;;  %v1688_v59 = vpop.permute.xlu0 %1687  ;;  %2170 = vmatprep.mubr.bf16.mxu0 %v14971_v15 }
 0x1d9   : > { %13054 = vmatpush3.bf16.msra.mxu1 %v1674_v7  ;;  %v16834_v15 = vpop.f32.mrf.mxu0 }
 0x1da   : > { %13055 = vmatprep.subr.bf16.mxu1 %v1688_v59  ;;  %20620 = vst [vmem:[#allocation27_spill] sm:$0xff] %v16834_v15 }
 0x1db   : > { %v16836_v7 = vpop.f32.mrf.mxu0 }
 0x1dc   : > { %v1666_v3 = vpop.permute.xlu1 %1665  ;;  %v1686_v60 = vpop.permute.xlu0 %1685 }
 0x1dd   : > { %13056 = vmatpush3.bf16.msra.mxu1 %v1672_v9 }
 0x1de   : > { %13057 = vmatprep.subr.bf16.mxu1 %v1686_v60 }
 0x1df   : > { %2171 = vmatmul.mubr.bf16.gmra.mxu0 %v14969_v36  ;;  %v14983_v36 = vld [vmem:[%s20536_s20 + $0xf4] ss:$8 sps:$4 sm:$0xff]  }
 0x1e0   : > { %v2805_v59 = vpop.permute.xlu1 %2804  ;;  %v1684_v33 = vpop.permute.xlu0 %1683  ;;  %2178 = vmatprep.mubr.bf16.mxu0 %v14977_v62 }
 0x1e1   : > { %13058 = vmatpush3.bf16.msra.mxu1 %v1670_v26  ;;  %v14966_v26 = vld [vmem:[%s20536_s20 + $0x100] ss:$8 sps:$4 sm:$0xff]  }
 0x1e2   : > { %13059 = vmatprep.subr.bf16.mxu1 %v1684_v33  ;;  %v14972_v33 = vld [vmem:[%s20536_s20 + $0x114] ss:$8 sps:$4 sm:$0xff]  }
 0x1e4   : > { %v2803_v18 = vpop.permute.xlu1 %2802  ;;  %v1682_v9 = vpop.permute.xlu0 %1681 }
 0x1e5   : > { %13060 = vmatpush3.bf16.msra.mxu1 %v1668_v19  ;;  %v14981_v19 = vld [vmem:[%s20536_s20 + $0xf0] ss:$8 sps:$4 sm:$0xff]  }
 0x1e6   : > { %13061 = vmatprep.subr.bf16.mxu1 %v1682_v9 }
 0x1e7   : > { %2179 = vmatmul.mubr.bf16.gmra.mxu0 %v14975_v52 }
 0x1e8   : > { %v2801_v60 = vpop.permute.xlu1 %2800  ;;  %v2821_v62 = vpop.permute.xlu0 %2820  ;;  %2186 = vmatprep.mubr.bf16.mxu0 %v14983_v36  ;;  %v14989_v36 = vld [vmem:[%s20536_s20 + $0x304] ss:$8 sps:$4 sm:$0xff]  }
 0x1e9   : > { %13062 = vmatpush3.bf16.msra.mxu1 %v1666_v3  ;;  %13383 = vmatprep.subr.bf16.mxu0 %v2821_v62 }
 0x1ea   : > { %13271 = vmatprep.subr.bf16.mxu1 %v16448_v42  ;;  %13384 = vmatpush3.bf16.msra.mxu0 %v2805_v59  ;;  %v14974_v59 = vld [vmem:[%s20536_s20 + $0x110] ss:$8 sps:$4 sm:$0xff]  }
 0x1ec   : > { %v2799_v52 = vpop.permute.xlu1 %2798  ;;  %1746 = vmatmul.mubr.bf16.vlgmr.msra.gmra.mxu1 %v14966_v26  ;;  %v2819_v9 = vpop.permute.xlu0 %2818 }
 0x1ed   : > { %13272 = vmatpush3.bf16.msra.mxu1 %v16419_v20  ;;  %13385 = vmatprep.subr.bf16.mxu0 %v2819_v9  ;;  %v14978_v20 = vld [vmem:[%s20536_s20 + $0x124] ss:$8 sps:$4 sm:$0xff]  }
 0x1ee   : > { %13273 = vmatprep.subr.bf16.mxu1 %v16464_v11  ;;  %13386 = vmatpush3.bf16.msra.mxu0 %v2803_v18 }
 0x1ef   : > { %1753 = vmatprep.mubr.bf16.mxu1 %v14972_v33  ;;  %2187 = vmatmul.mubr.bf16.gmra.mxu0 %v14981_v19  ;;  %v14987_v19 = vld [vmem:[%s20536_s20 + $0x300] ss:$8 sps:$4 sm:$0xff]  }
 0x1f0   : > { %v2797_v42 = vpop.permute.xlu1 %2796  ;;  %v2817_v3 = vpop.permute.xlu0 %2816  ;;  %2870 = vmatprep.mubr.bf16.mxu0 %v14989_v36  ;;  %v14993_v36 = vld [vmem:[%s20536_s20 + $0x310] ss:$8 sps:$4 sm:$0xff]  }
 0x1f1   : > { %13274 = vmatpush3.bf16.msra.mxu1 %v16431_v28  ;;  %13387 = vmatprep.subr.bf16.mxu0 %v2817_v3  ;;  %v14998_v3 = vld [vmem:[%s20536_s20 + $0x150] ss:$8 sps:$4 sm:$0xff]  }
 0x1f2   : > { %13275 = vmatprep.subr.bf16.mxu1 %v16481_v0  ;;  %13388 = vmatpush3.bf16.msra.mxu0 %v2801_v60  ;;  %v14980_v0 = vld [vmem:[%s20536_s20 + $0x120] ss:$8 sps:$4 sm:$0xff]  }
 0x1f4   : > { %v2795_v11 = vpop.permute.xlu1 %2794  ;;  %1754 = vmatmul.mubr.bf16.gmra.mxu1 %v14974_v59  ;;  %v2815_v18 = vpop.permute.xlu0 %2814 }
 0x1f5   : > { %13276 = vmatpush3.bf16.msra.mxu1 %v16446_v16  ;;  %13389 = vmatprep.subr.bf16.mxu0 %v2815_v18  ;;  %v14984_v16 = vld [vmem:[%s20536_s20 + $0x134] ss:$8 sps:$4 sm:$0xff]   ;;  %v14999_v18 = vld [vmem:[%s20536_s20 + $0x320] ss:$8 sps:$4 sm:$0xff]  }
 0x1f6   : > { %13277 = vmatprep.subr.bf16.mxu1 %v16496_v54  ;;  %13390 = vmatpush3.bf16.msra.mxu0 %v2799_v52 }
 0x1f7   : > { %1761 = vmatprep.mubr.bf16.mxu1 %v14978_v20 }
 0x1f8   : > { %v2793_v62 = vpop.permute.xlu1 %2792  ;;  %v2813_v28 = vpop.permute.xlu0 %2812 }
 0x1f9   : > { %13278 = vmatpush3.bf16.msra.mxu1 %v16460_v5  ;;  %13391 = vmatprep.subr.bf16.mxu0 %v2813_v28  ;;  %v14986_v5 = vld [vmem:[%s20536_s20 + $0x130] ss:$8 sps:$4 sm:$0xff]   ;;  %v15004_v28 = vld [vmem:[%s20536_s20 + $0x160] ss:$8 sps:$4 sm:$0xff]  }
 0x1fa   : > { %13279 = vmatprep.subr.bf16.mxu1 %v16513_v48  ;;  %13392 = vmatpush3.bf16.msra.mxu0 %v2797_v42 }
 0x1fc   : > { %v2791_v60 = vpop.permute.xlu1 %2790  ;;  %1762 = vmatmul.mubr.bf16.gmra.mxu1 %v14980_v0  ;;  %v2811_v54 = vpop.permute.xlu0 %2810 }
 0x1fd   : > { %13280 = vmatpush3.bf16.msra.mxu1 %v16477_v58  ;;  %13393 = vmatprep.subr.bf16.mxu0 %v2811_v54  ;;  %v14990_v58 = vld [vmem:[%s20536_s20 + $0x144] ss:$8 sps:$4 sm:$0xff]  }
 0x1fe   : > { %13281 = vmatprep.subr.bf16.mxu1 %v16528_v4  ;;  %13394 = vmatpush3.bf16.msra.mxu0 %v2795_v11 }
 0x1ff   : > { %1769 = vmatprep.mubr.bf16.mxu1 %v14984_v16  ;;  %v15008_v16 = vld [vmem:[%s20536_s20 + $0x174] ss:$8 sps:$4 sm:$0xff]  }
 0x200   : > { %v2809_v26 = vpop.permute.xlu0 %2808  ;;  %v3641_v48 = vpop.permute.xlu1 %3640 }
 0x201   : > { %13282 = vmatpush3.bf16.msra.mxu1 %v16492_v50  ;;  %13395 = vmatprep.subr.bf16.mxu0 %v2809_v26  ;;  %v14995_v50 = vld [vmem:[%s20536_s20 + $0x314] ss:$8 sps:$4 sm:$0xff]   ;;  %v15005_v26 = vld [vmem:[%s20536_s20 + $0x330] ss:$8 sps:$4 sm:$0xff]  }
 0x202   : > { %13283 = vmatprep.subr.bf16.mxu1 %v16543_v24  ;;  %13396 = vmatpush3.bf16.msra.mxu0 %v2793_v62  ;;  %v14992_v24 = vld [vmem:[%s20536_s20 + $0x140] ss:$8 sps:$4 sm:$0xff]   ;;  %v15007_v62 = vld [vmem:[%s20536_s20 + $0x334] ss:$8 sps:$4 sm:$0xff]  }
 0x204   : > { %1770 = vmatmul.mubr.bf16.gmra.mxu1 %v14986_v5  ;;  %v2807_v4 = vpop.permute.xlu0 %2806  ;;  %v3639_v33 = vpop.permute.xlu1 %3638  ;;  %v15013_v5 = vld [vmem:[%s20536_s20 + $0x344] ss:$8 sps:$4 sm:$0xff]  }
 0x205   : > { %13284 = vmatpush3.bf16.msra.mxu1 %v16509_v45  ;;  %13397 = vmatprep.subr.bf16.mxu0 %v2807_v4  ;;  %v14996_v45 = vld [vmem:[%s20536_s20 + $0x154] ss:$8 sps:$4 sm:$0xff]  }
 0x206   : > { %13285 = vmatprep.subr.bf16.mxu1 %v16554_v35  ;;  %13398 = vmatpush3.bf16.msra.mxu0 %v2791_v60 }
 0x207   : > { %1777 = vmatprep.mubr.bf16.mxu1 %v14990_v58 }
 0x208   : > { %v3657_v52 = vpop.permute.xlu0 %3656  ;;  %v3637_v9 = vpop.permute.xlu1 %3636 }
 0x209   : > { %13286 = vmatpush3.bf16.msra.mxu1 %v16524_v39  ;;  %2871 = vmatmul.mubr.bf16.vlgmr.msra.gmra.mxu0 %v14987_v19  ;;  %v15001_v39 = vld [vmem:[%s20536_s20 + $0x324] ss:$8 sps:$4 sm:$0xff]  }
 0x20a   : > { %2878 = vmatprep.mubr.bf16.mxu0 %v14995_v50  ;;  %13607 = vmatprep.subr.bf16.mxu0 %v3657_v52  ;;  %v15011_v50 = vld [vmem:[%s20536_s20 + $0x340] ss:$8 sps:$4 sm:$0xff]  }
 0x20b   : > { %13608 = vmatpush3.bf16.msra.mxu0 %v3641_v48  ;;  %13495 = vmatprep.subr.bf16.mxu1 %v16558_v63  ;;  %v15002_v63 = vld [vmem:[%s20536_s20 + $0x164] ss:$8 sps:$4 sm:$0xff]   ;;  %v15010_v48 = vld [vmem:[%s20536_s20 + $0x170] ss:$8 sps:$4 sm:$0xff]  }
 0x20c   : > { %1778 = vmatmul.mubr.bf16.gmra.mxu1 %v14992_v24  ;;  %v3655_v35 = vpop.permute.xlu0 %3654  ;;  %v3635_v42 = vpop.permute.xlu1 %3634  ;;  %v15019_v24 = vld [vmem:[%s20536_s20 + $0x354] ss:$8 sps:$4 sm:$0xff]  }
 0x20d   : > { %1785 = vmatprep.mubr.bf16.mxu1 %v14996_v45  ;;  %13609 = vmatprep.subr.bf16.mxu0 %v3655_v35  ;;  %v15020_v35 = vld [vmem:[%s20536_s20 + $0x194] ss:$8 sps:$4 sm:$0xff]  }
 0x20f   : > { %13610 = vmatpush3.bf16.msra.mxu0 %v3639_v33  ;;  %v15014_v33 = vld [vmem:[%s20536_s20 + $0x184] ss:$8 sps:$4 sm:$0xff]  }
 0x210   : > { %v3653_v59 = vpop.permute.xlu0 %3652  ;;  %v3633_v11 = vpop.permute.xlu1 %3632 }
 0x211   : > { %2879 = vmatmul.mubr.bf16.gmra.mxu0 %v14993_v36  ;;  %13611 = vmatprep.subr.bf16.mxu0 %v3653_v59  ;;  %v15017_v36 = vld [vmem:[%s20536_s20 + $0x350] ss:$8 sps:$4 sm:$0xff]   ;;  %v16965_v59 = vpop.f32.mrf.mxu0 }
 0x212   : > { %2886 = vmatprep.mubr.bf16.mxu0 %v15001_v39  ;;  %v15025_v39 = vld [vmem:[%s20536_s20 + $0x364] ss:$8 sps:$4 sm:$0xff]   ;;  %20621 = vst [vmem:[#allocation22_spill] sm:$0xff] %v16965_v59 }
 0x213   : > { %13612 = vmatpush3.bf16.msra.mxu0 %v3637_v9  ;;  %v15016_v9 = vld [vmem:[%s20536_s20 + $0x180] ss:$8 sps:$4 sm:$0xff]  }
 0x214   : > { %1786 = vmatmul.mubr.bf16.gmra.mxu1 %v14998_v3  ;;  %v3651_v20 = vpop.permute.xlu0 %3650  ;;  %v3631_v60 = vpop.permute.xlu1 %3630  ;;  %v15026_v3 = vld [vmem:[%s20536_s20 + $0x1a4] ss:$8 sps:$4 sm:$0xff]  }
 0x215   : > { %1793 = vmatprep.mubr.bf16.mxu1 %v15002_v63  ;;  %13613 = vmatprep.subr.bf16.mxu0 %v3651_v20  ;;  %v15023_v63 = vld [vmem:[%s20536_s20 + $0x360] ss:$8 sps:$4 sm:$0xff]   ;;  %v15031_v20 = vld [vmem:[%s20536_s20 + $0x374] ss:$8 sps:$4 sm:$0xff]  }
 0x217   : > { %13614 = vmatpush3.bf16.msra.mxu0 %v3635_v42  ;;  %v15022_v42 = vld [vmem:[%s20536_s20 + $0x190] ss:$8 sps:$4 sm:$0xff]  }
 0x218   : > { %v3649_v0 = vpop.permute.xlu0 %3648  ;;  %v3629_v58 = vpop.permute.xlu1 %3628 }
 0x219   : > { %2887 = vmatmul.mubr.bf16.gmra.mxu0 %v14999_v18  ;;  %13615 = vmatprep.subr.bf16.mxu0 %v3649_v0  ;;  %v15028_v18 = vld [vmem:[%s20536_s20 + $0x1a0] ss:$8 sps:$4 sm:$0xff]  }
 0x21a   : > { %2894 = vmatprep.mubr.bf16.mxu0 %v15007_v62  ;;  %v15032_v62 = vld [vmem:[%s20536_s20 + $0x1b4] ss:$8 sps:$4 sm:$0xff]  }
 0x21b   : > { %13616 = vmatpush3.bf16.msra.mxu0 %v3633_v11 }
 0x21c   : > { %1794 = vmatmul.mubr.bf16.gmra.mxu1 %v15004_v28  ;;  %v3647_v54 = vpop.permute.xlu0 %3646  ;;  %v3627_v52 = vpop.permute.xlu1 %3626 }
 0x21d   : > { %1801 = vmatprep.mubr.bf16.mxu1 %v15008_v16  ;;  %13617 = vmatprep.subr.bf16.mxu0 %v3647_v54 }
 0x21f   : > { %13618 = vmatpush3.bf16.msra.mxu0 %v3631_v60  ;;  %v15029_v60 = vld [vmem:[%s20536_s20 + $0x370] ss:$8 sps:$4 sm:$0xff]  }
 0x220   : > { %v3645_v4 = vpop.permute.xlu0 %3644 }
 0x221   : > { %2895 = vmatmul.mubr.bf16.gmra.mxu0 %v15005_v26  ;;  %13619 = vmatprep.subr.bf16.mxu0 %v3645_v4  ;;  %v15037_v26 = vld [vmem:[%s20536_s20 + $0x384] ss:$8 sps:$4 sm:$0xff]  }
 0x222   : > { %2902 = vmatprep.mubr.bf16.mxu0 %v15013_v5  ;;  %v15040_v4 = vld [vmem:[%s20536_s20 + $0x1c4] ss:$8 sps:$4 sm:$0xff]  }
 0x223   : > { %13620 = vmatpush3.bf16.msra.mxu0 %v3629_v58  ;;  %v15034_v58 = vld [vmem:[%s20536_s20 + $0x1b0] ss:$8 sps:$4 sm:$0xff]  }
 0x224   : > { %1802 = vmatmul.mubr.bf16.gmra.mxu1 %v15010_v48  ;;  %v3643_v19 = vpop.permute.xlu0 %3642 }
 0x225   : > { %1809 = vmatprep.mubr.bf16.mxu1 %v15014_v33  ;;  %13621 = vmatprep.subr.bf16.mxu0 %v3643_v19 }
 0x227   : > { %13622 = vmatpush3.bf16.msra.mxu0 %v3627_v52 }
 0x228   : > { %v4493_v45 = vpop.permute.xlu0 %4492 }
 0x229   : > { %2903 = vmatmul.mubr.bf16.gmra.mxu0 %v15011_v50  ;;  %13831 = vmatprep.subr.bf16.mxu0 %v4493_v45 }
 0x22a   : > { %2910 = vmatprep.mubr.bf16.mxu0 %v15019_v24  ;;  %v15035_v24 = vld [vmem:[%s20536_s20 + $0x380] ss:$8 sps:$4 sm:$0xff]  }
 0x22c   : > { %1810 = vmatmul.mubr.bf16.gmra.mxu1 %v15016_v9  ;;  %v15043_v9 = vld [vmem:[%s20536_s20 + $0x394] ss:$8 sps:$4 sm:$0xff]  }
 0x22d   : > { %1817 = vmatprep.mubr.bf16.mxu1 %v15020_v35 }
 0x231   : > { %2911 = vmatmul.mubr.bf16.gmra.mxu0 %v15017_v36  ;;  %v15038_v36 = vld [vmem:[%s20536_s20 + $0x1c0] ss:$8 sps:$4 sm:$0xff]  }
 0x232   : > { %2918 = vmatprep.mubr.bf16.mxu0 %v15025_v39  ;;  %v15046_v39 = vld [vmem:[%s20536_s20 + $0x1d4] ss:$8 sps:$4 sm:$0xff]  }
 0x234   : > { %1818 = vmatmul.mubr.bf16.gmra.mxu1 %v15022_v42 }
 0x235   : > { %1825 = vmatprep.mubr.bf16.mxu1 %v15026_v3 }
 0x237   : > { %v13175_v11 = vpop.f32.mrf.mxu0 }
 0x239   : > { %2919 = vmatmul.mubr.bf16.gmra.mxu0 %v15023_v63  ;;  %v13176_v28 = vpop.f32.mrf.mxu0 }
 0x23a   : > { %2926 = vmatprep.mubr.bf16.mxu0 %v15031_v20  ;;  %v16979_v0 = vadd.f32 %v13176_v28, %v13175_v11  ;;  %v15041_v20 = vld [vmem:[%s20536_s20 + $0x390] ss:$8 sps:$4 sm:$0xff]  }
 0x23b   : > { %v13178_v16 = vpop.f32.mrf.mxu0 }
 0x23c   : > { %1826 = vmatmul.mubr.bf16.gmra.mxu1 %v15028_v18  ;;  %v15049_v18 = vld [vmem:[%s20536_s20 + $0x3a4] ss:$8 sps:$4 sm:$0xff]  }
 0x23d   : > { %1833 = vmatprep.mubr.bf16.mxu1 %v15032_v62  ;;  %v13179_v54 = vpop.f32.mrf.mxu0 }
 0x23e   : > { %v16987_v5 = vadd.f32 %v13179_v54, %v13178_v16  ;;  %v15044_v16 = vld [vmem:[%s20536_s20 + $0x1d0] ss:$8 sps:$4 sm:$0xff]  }
 0x23f   : > { %v13181_v48 = vpop.f32.mrf.mxu0 }
 0x241   : > { %2927 = vmatmul.mubr.bf16.gmra.mxu0 %v15029_v60  ;;  %v13182_v33 = vpop.f32.mrf.mxu0  ;;  %v15052_v60 = vld [vmem:[%s20536_s20 + $0x1e4] ss:$8 sps:$4 sm:$0xff]  }
 0x242   : > { %2934 = vmatprep.mubr.bf16.mxu0 %v15037_v26  ;;  %v16995_v19 = vadd.f32 %v13182_v33, %v13181_v48  ;;  %v15055_v33 = vld [vmem:[%s20536_s20 + $0x3b4] ss:$8 sps:$4 sm:$0xff]  }
 0x243   : > { %v13184_v50 = vpop.f32.mrf.mxu0 }
 0x244   : > { %1834 = vmatmul.mubr.bf16.gmra.mxu1 %v15034_v58  ;;  %v15047_v58 = vld [vmem:[%s20536_s20 + $0x3a0] ss:$8 sps:$4 sm:$0xff]  }
 0x245   : > { %1841 = vmatprep.mubr.bf16.mxu1 %v15040_v4  ;;  %v13185_v52 = vpop.f32.mrf.mxu0 }
 0x246   : > { %v17003_v45 = vadd.f32 %v13185_v52, %v13184_v50  ;;  %v15050_v52 = vld [vmem:[%s20536_s20 + $0x1e0] ss:$8 sps:$4 sm:$0xff]  }
 0x247   : > { %v13187_v35 = vpop.f32.mrf.mxu0 }
 0x249   : > { %2935 = vmatmul.mubr.bf16.gmra.mxu0 %v15035_v24  ;;  %v13188_v42 = vpop.f32.mrf.mxu0 }
 0x24a   : > { %2942 = vmatprep.mubr.bf16.mxu0 %v15043_v9  ;;  %v17011_v3 = vadd.f32 %v13188_v42, %v13187_v35  ;;  %v15058_v9 = vld [vmem:[%s20536_s20 + $0x1f4] ss:$8 sps:$4 sm:$0xff]   ;;  %v15053_v42 = vld [vmem:[%s20536_s20 + $0x3b0] ss:$8 sps:$4 sm:$0xff]  }
 0x24b   : > { %v13190_v63 = vpop.f32.mrf.mxu0 }
 0x24c   : > { %1842 = vmatmul.mubr.bf16.gmra.mxu1 %v15038_v36 }
 0x24d   : > { %1849 = vmatprep.mubr.bf16.mxu1 %v15046_v39  ;;  %v13191_v11 = vpop.f32.mrf.mxu0 }
 0x24e   : > { %v17019_v62 = vadd.f32 %v13191_v11, %v13190_v63 }
 0x24f   : > { %v13193_v28 = vpop.f32.mrf.mxu0 }
 0x251   : > { %2943 = vmatmul.mubr.bf16.gmra.mxu0 %v15041_v20  ;;  %v13194_v54 = vpop.f32.mrf.mxu0  ;;  %v15061_v20 = vld [vmem:[%s20536_s20 + $0x3c4] ss:$8 sps:$4 sm:$0xff]  }
 0x252   : > { %2950 = vmatprep.mubr.bf16.mxu0 %v15049_v18  ;;  %v17027_v26 = vadd.f32 %v13194_v54, %v13193_v28  ;;  %v15056_v28 = vld [vmem:[%s20536_s20 + $0x1f0] ss:$8 sps:$4 sm:$0xff]  }
 0x253   : > { %v13196_v48 = vpop.f32.mrf.mxu0 }
 0x254   : > { %1850 = vmatmul.mubr.bf16.gmra.mxu1 %v15044_v16  ;;  %v15064_v16 = vld [vmem:[%s20536_s20 + $0x204] ss:$8 sps:$4 sm:$0xff]  }
 0x255   : > { %1857 = vmatprep.mubr.bf16.mxu1 %v15052_v60  ;;  %v13197_v4 = vpop.f32.mrf.mxu0 }
 0x256   : > { %v17035_v50 = vadd.f32 %v13197_v4, %v13196_v48 }
 0x257   : > { %v13199_v24 = vpop.f32.mrf.mxu0 }
 0x259   : > { %2951 = vmatmul.mubr.bf16.gmra.mxu0 %v15047_v58  ;;  %v13200_v35 = vpop.f32.mrf.mxu0  ;;  %v15059_v58 = vld [vmem:[%s20536_s20 + $0x3c0] ss:$8 sps:$4 sm:$0xff]  }
 0x25a   : > { %2958 = vmatprep.mubr.bf16.mxu0 %v15055_v33  ;;  %v17043_v36 = vadd.f32 %v13200_v35, %v13199_v24  ;;  %v15067_v33 = vld [vmem:[%s20536_s20 + $0x3d4] ss:$8 sps:$4 sm:$0xff]  }
 0x25b   : > { %v13202_v39 = vpop.f32.mrf.mxu0  ;;  %v15070_v35 = vld [vmem:[%s20536_s20 + $0x214] ss:$8 sps:$4 sm:$0xff]  }
 0x25c   : > { %1858 = vmatmul.mubr.bf16.gmra.mxu1 %v15050_v52 }
 0x25d   : > { %1865 = vmatprep.mubr.bf16.mxu1 %v15058_v9  ;;  %v13203_v63 = vpop.f32.mrf.mxu0  ;;  %v15062_v9 = vld [vmem:[%s20536_s20 + $0x200] ss:$8 sps:$4 sm:$0xff]  }
 0x25e   : > { %v17051_v11 = vadd.f32 %v13203_v63, %v13202_v39 }
 0x25f   : > { %v13205_v18 = vpop.f32.mrf.mxu0 }
 0x261   : > { %2959 = vmatmul.mubr.bf16.gmra.mxu0 %v15053_v42  ;;  %v13206_v60 = vpop.f32.mrf.mxu0 }
 0x262   : > { %2966 = vmatprep.mubr.bf16.mxu0 %v15061_v20  ;;  %v17059_v54 = vadd.f32 %v13206_v60, %v13205_v18  ;;  %v15065_v20 = vld [vmem:[%s20536_s20 + $0x3d0] ss:$8 sps:$4 sm:$0xff]  }
 0x263   : > { %v13208_v48 = vpop.f32.mrf.mxu0 }
 0x264   : > { %1866 = vmatmul.mubr.bf16.gmra.mxu1 %v15056_v28  ;;  %v15073_v28 = vld [vmem:[%s20536_s20 + $0x3e4] ss:$8 sps:$4 sm:$0xff]  }
 0x265   : > { %2420 = vmatprep.mubr.bf16.mxu1 %v15064_v16  ;;  %v13209_v4 = vpop.f32.mrf.mxu0 }
 0x266   : > { %v17067_v24 = vadd.f32 %v13209_v4, %v13208_v48  ;;  %v15068_v48 = vld [vmem:[%s20536_s20 + $0x210] ss:$8 sps:$4 sm:$0xff]  }
 0x267   : > { %v13211_v52 = vpop.f32.mrf.mxu0 }
 0x269   : > { %2967 = vmatmul.mubr.bf16.gmra.mxu0 %v15059_v58  ;;  %v13212_v39 = vpop.f32.mrf.mxu0 }
 0x26a   : > { %2974 = vmatprep.mubr.bf16.mxu0 %v15067_v33  ;;  %v17075_v42 = vadd.f32 %v13212_v39, %v13211_v52  ;;  %v15071_v33 = vld [vmem:[%s20536_s20 + $0x3e0] ss:$8 sps:$4 sm:$0xff]   ;;  %v15079_v52 = vld [vmem:[%s20536_s20 + $0x3f4] ss:$8 sps:$4 sm:$0xff]  }
 0x26b   : > { %v13214_v63 = vpop.f32.mrf.mxu0 }
 0x26c   : > { %2421 = vmatmul.mubr.bf16.vlgmr.msra.gmra.mxu1 %v15062_v9 }
 0x26d   : > { %13496 = vmatpush3.bf16.msra.mxu1 %v16536_v43  ;;  %2428 = vmatprep.mubr.bf16.mxu1 %v15070_v35  ;;  %v13215_v18 = vpop.f32.mrf.mxu0  ;;  %v15076_v43 = vld [vmem:[%s20536_s20 + $0x224] ss:$8 sps:$4 sm:$0xff]   ;;  %v15074_v35 = vld [vmem:[%s20536_s20 + $0x220] ss:$8 sps:$4 sm:$0xff]  }
 0x26e   : > { %13497 = vmatprep.subr.bf16.mxu1 %v16568_v51  ;;  %v17085_v16 = vadd.f32 %v13215_v18, %v13214_v63  ;;  %v4477_v63 = vpop.permute.xlu1 %4476  ;;  %v4491_v18 = vpop.permute.xlu0 %4490 }
 0x26f   : > { %v13217_v60 = vpop.f32.mrf.mxu0 }
 0x271   : > { %13498 = vmatpush3.bf16.msra.mxu1 %v16310_v25  ;;  %2975 = vmatmul.mubr.bf16.gmra.mxu0 %v15065_v20  ;;  %v13218_v58 = vpop.f32.mrf.mxu0 }
 0x272   : > { %13499 = vmatprep.subr.bf16.mxu1 %v16576_v40  ;;  %2982 = vmatprep.mubr.bf16.mxu0 %v15073_v28  ;;  %v17095_v51 = vadd.f32 %v13218_v58, %v13217_v60  ;;  %v15088_v58 = vld [vmem:[%s20536_s20 + $0x244] ss:$8 sps:$4 sm:$0xff]  }
 0x273   : > { %v13220_v4 = vpop.f32.mrf.mxu0 }
 0x274   : > { %2429 = vmatmul.mubr.bf16.gmra.mxu1 %v15068_v48 }
 0x275   : > { %13500 = vmatpush3.bf16.msra.mxu1 %v16296_v2  ;;  %2436 = vmatprep.mubr.bf16.mxu1 %v15076_v43  ;;  %v13221_v25 = vpop.f32.mrf.mxu0  ;;  %v15082_v2 = vld [vmem:[%s20536_s20 + $0x234] ss:$8 sps:$4 sm:$0xff]   ;;  %v15080_v43 = vld [vmem:[%s20536_s20 + $0x230] ss:$8 sps:$4 sm:$0xff]  }
 0x276   : > { %13501 = vmatprep.subr.bf16.mxu1 %v16590_v61  ;;  %v17105_v40 = vadd.f32 %v13221_v25, %v13220_v4  ;;  %v4489_v4 = vpop.permute.xlu0 %4488 }
 0x277   : > { %v13223_v9 = vpop.f32.mrf.mxu0 }
 0x279   : > { %13502 = vmatpush3.bf16.msra.mxu1 %v16284_v41  ;;  %2983 = vmatmul.mubr.bf16.gmra.mxu0 %v15071_v33  ;;  %v13224_v39 = vpop.f32.mrf.mxu0  ;;  %v15077_v41 = vld [vmem:[%s20536_s20 + $0x3f0] ss:$8 sps:$4 sm:$0xff]  }
 0x27a   : > { %13503 = vmatprep.subr.bf16.mxu1 %v16600_v21  ;;  %2990 = vmatprep.mubr.bf16.mxu0 %v15079_v52  ;;  %v17115_v61 = vadd.f32 %v13224_v39, %v13223_v9  ;;  %v15085_v21 = vld [vmem:[%s20536_s20 + $0x504] ss:$8 sps:$4 sm:$0xff]   ;;  %v4487_v39 = vpop.permute.xlu0 %4486 }
 0x27b   : > { %v13226_v20 = vpop.f32.mrf.mxu0 }
 0x27c   : > { %2437 = vmatmul.mubr.bf16.gmra.mxu1 %v15074_v35 }
 0x27d   : > { %13504 = vmatpush3.bf16.msra.mxu1 %v20561_v13  ;;  %2444 = vmatprep.mubr.bf16.mxu1 %v15082_v2  ;;  %v13227_v28 = vpop.f32.mrf.mxu0  ;;  %v4475_v13 = vpop.permute.xlu1 %4474 }
 0x27e   : > { %13505 = vmatprep.subr.bf16.mxu1 %v16616_v8  ;;  %v17125_v60 = vadd.f32 %v13227_v28, %v13226_v20 }
 0x27f   : > { %v13229_v48 = vpop.f32.mrf.mxu0 }
 0x281   : > { %13506 = vmatpush3.bf16.msra.mxu1 %v20563_v23  ;;  %2991 = vmatmul.mubr.bf16.gmra.mxu0 %v15077_v41  ;;  %v13230_v8 = vpop.f32.mrf.mxu0  ;;  %v15083_v23 = vld [vmem:[%s20536_s20 + $0x500] ss:$8 sps:$4 sm:$0xff]   ;;  %v4473_v35 = vpop.permute.xlu1 %4472 }
 0x282   : > { %13507 = vmatprep.subr.bf16.mxu1 %v20577_v32  ;;  %3706 = vmatprep.mubr.bf16.mxu0 %v15085_v21  ;;  %v17135_v33 = vadd.f32 %v13230_v8, %v13229_v48  ;;  %v15130_v32 = vld [vmem:[%s20536_s20 + $0x514] ss:$8 sps:$4 sm:$0xff]   ;;  %v15094_v8 = vld [vmem:[%s20536_s20 + $0x264] ss:$8 sps:$4 sm:$0xff]  }
 0x283   : > { %v13232_v25 = vpop.f32.mrf.mxu0 }
 0x284   : > { %2445 = vmatmul.mubr.bf16.gmra.mxu1 %v15080_v43  ;;  %v4485_v43 = vpop.permute.xlu0 %4484 }
 0x285   : > { %13508 = vmatpush3.bf16.msra.mxu1 %v20567_v56  ;;  %2452 = vmatprep.mubr.bf16.mxu1 %v15088_v58  ;;  %v13233_v52 = vpop.f32.mrf.mxu0  ;;  %v15086_v56 = vld [vmem:[%s20536_s20 + $0x240] ss:$8 sps:$4 sm:$0xff]   ;;  %v4471_v21 = vpop.permute.xlu1 %4470  ;;  %v15089_v58 = vld [vmem:[%s20536_s20 + $0x250] ss:$8 sps:$4 sm:$0xff]  }
 0x286   : > { %13509 = vmatprep.subr.bf16.mxu1 %v20582_v34  ;;  %v17142_v9 = vadd.f32 %v13233_v52, %v13232_v25  ;;  %v15091_v34 = vld [vmem:[%s20536_s20 + $0x254] ss:$8 sps:$4 sm:$0xff]  }
 0x287   : > { %v13235_v2 = vpop.f32.mrf.mxu0 }
 0x289   : > { %13510 = vmatpush3.bf16.msra.mxu1 %v20572_v22  ;;  %3707 = vmatmul.mubr.bf16.vlgmr.msra.gmra.mxu0 %v15083_v23  ;;  %v13236_v20 = vpop.f32.mrf.mxu0  ;;  %v15128_v22 = vld [vmem:[%s20536_s20 + $0x510] ss:$8 sps:$4 sm:$0xff]   ;;  %v4469_v23 = vpop.permute.xlu1 %4468 }
 0x28a   : > { %13832 = vmatpush3.bf16.msra.mxu0 %v4477_v63  ;;  %13719 = vmatprep.subr.bf16.mxu1 %v16666_v46  ;;  %v17155_v41 = vadd.f32 %v13236_v20, %v13235_v2  ;;  %v15136_v63 = vld [vmem:[%s20536_s20 + $0x524] ss:$8 sps:$4 sm:$0xff]  }
 0x28b   : > { %13833 = vmatprep.subr.bf16.mxu0 %v4491_v18  ;;  %3714 = vmatprep.mubr.bf16.mxu0 %v15130_v32  ;;  %v13238_v28 = vpop.f32.mrf.mxu0  ;;  %v15134_v32 = vld [vmem:[%s20536_s20 + $0x520] ss:$8 sps:$4 sm:$0xff]  }
 0x28c   : > { %2453 = vmatmul.mubr.bf16.gmra.mxu1 %v15086_v56  ;;  %v15142_v56 = vld [vmem:[%s20536_s20 + $0x534] ss:$8 sps:$4 sm:$0xff]  }
 0x28d   : > { %2460 = vmatprep.mubr.bf16.mxu1 %v15091_v34  ;;  %v13239_v48 = vpop.f32.mrf.mxu0  ;;  %v4467_v20 = vpop.permute.xlu1 %4466 }
 0x28e   : > { %13834 = vmatpush3.bf16.msra.mxu0 %v4475_v13  ;;  %v17163_v46 = vadd.f32 %v13239_v48, %v13238_v28  ;;  %v15097_v28 = vld [vmem:[%s20536_s20 + $0x274] ss:$8 sps:$4 sm:$0xff]  }
 0x28f   : > { %13835 = vmatprep.subr.bf16.mxu0 %v4489_v4  ;;  %v13241_v18 = vpop.f32.mrf.mxu0  ;;  %v4483_v4 = vpop.permute.xlu0 %4482 }
 0x291   : > { %3715 = vmatmul.mubr.bf16.gmra.mxu0 %v15128_v22  ;;  %v13242_v25 = vpop.f32.mrf.mxu0 }
 0x292   : > { %13836 = vmatpush3.bf16.msra.mxu0 %v4473_v35  ;;  %3722 = vmatprep.mubr.bf16.mxu0 %v15136_v63  ;;  %v17171_v13 = vadd.f32 %v13242_v25, %v13241_v18  ;;  %v4465_v25 = vpop.permute.xlu1 %4464 }
 0x293   : > { %13837 = vmatprep.subr.bf16.mxu0 %v4487_v39  ;;  %v13244_v52 = vpop.f32.mrf.mxu0  ;;  %v15092_v39 = vld [vmem:[%s20536_s20 + $0x260] ss:$8 sps:$4 sm:$0xff]  }
 0x294   : > { %2461 = vmatmul.mubr.bf16.gmra.mxu1 %v15089_v58  ;;  %v15148_v58 = vld [vmem:[%s20536_s20 + $0x544] ss:$8 sps:$4 sm:$0xff]  }
 0x295   : > { %2468 = vmatprep.mubr.bf16.mxu1 %v15094_v8  ;;  %v13245_v2 = vpop.f32.mrf.mxu0 }
 0x296   : > { %13838 = vmatpush3.bf16.msra.mxu0 %v4471_v21  ;;  %v17179_v35 = vadd.f32 %v13245_v2, %v13244_v52  ;;  %v4481_v21 = vpop.permute.xlu0 %4480 }
 0x297   : > { %13839 = vmatprep.subr.bf16.mxu0 %v4485_v43  ;;  %v13247_v34 = vpop.f32.mrf.mxu0  ;;  %v15140_v43 = vld [vmem:[%s20536_s20 + $0x530] ss:$8 sps:$4 sm:$0xff]  }
 0x299   : > { %3723 = vmatmul.mubr.bf16.gmra.mxu0 %v15134_v32  ;;  %v13248_v22 = vpop.f32.mrf.mxu0  ;;  %v15100_v32 = vld [vmem:[%s20536_s20 + $0x284] ss:$8 sps:$4 sm:$0xff]  }
 0x29a   : > { %13840 = vmatpush3.bf16.msra.mxu0 %v4469_v23  ;;  %3730 = vmatprep.mubr.bf16.mxu0 %v15142_v56  ;;  %v17187_v48 = vadd.f32 %v13248_v22, %v13247_v34  ;;  %v4479_v52 = vpop.permute.xlu0 %4478  ;;  %v15154_v22 = vld [vmem:[%s20536_s20 + $0x554] ss:$8 sps:$4 sm:$0xff]  }
 0x29b   : > { %13841 = vmatprep.subr.bf16.mxu0 %v4483_v4  ;;  %v13250_v63 = vpop.f32.mrf.mxu0  ;;  %v15095_v4 = vld [vmem:[%s20536_s20 + $0x270] ss:$8 sps:$4 sm:$0xff]  }
 0x29c   : > { %2469 = vmatmul.mubr.bf16.gmra.mxu1 %v15092_v39  ;;  %v4463_v39 = vpop.permute.xlu1 %4462 }
 0x29d   : > { %2476 = vmatprep.mubr.bf16.mxu1 %v15097_v28  ;;  %v13251_v18 = vpop.f32.mrf.mxu0 }
 0x29e   : > { %13842 = vmatpush3.bf16.msra.mxu0 %v4467_v20  ;;  %v17195_v8 = vadd.f32 %v13251_v18, %v13250_v63  ;;  %v15146_v20 = vld [vmem:[%s20536_s20 + $0x540] ss:$8 sps:$4 sm:$0xff]   ;;  %v15103_v18 = vld [vmem:[%s20536_s20 + $0x294] ss:$8 sps:$4 sm:$0xff]  }
 0x29f   : > { %13843 = vmatprep.subr.bf16.mxu0 %v4481_v21  ;;  %v13253_v23 = vpop.f32.mrf.mxu0 }
 0x2a1   : > { %3731 = vmatmul.mubr.bf16.gmra.mxu0 %v15140_v43  ;;  %v13254_v2 = vpop.f32.mrf.mxu0  ;;  %v15098_v43 = vld [vmem:[%s20536_s20 + $0x280] ss:$8 sps:$4 sm:$0xff]  }
 0x2a2   : > { %13844 = vmatpush3.bf16.msra.mxu0 %v4465_v25  ;;  %3738 = vmatprep.mubr.bf16.mxu0 %v15148_v58  ;;  %v17203_v56 = vadd.f32 %v13254_v2, %v13253_v23 }
 0x2a3   : > { %13845 = vmatprep.subr.bf16.mxu0 %v4479_v52  ;;  %v13256_v34 = vpop.f32.mrf.mxu0 }
 0x2a4   : > { %2477 = vmatmul.mubr.bf16.gmra.mxu1 %v15095_v4  ;;  %v15152_v4 = vld [vmem:[%s20536_s20 + $0x550] ss:$8 sps:$4 sm:$0xff]  }
 0x2a5   : > { %2484 = vmatprep.mubr.bf16.mxu1 %v15100_v32  ;;  %v13257_v28 = vpop.f32.mrf.mxu0 }
 0x2a6   : > { %13846 = vmatpush3.bf16.msra.mxu0 %v4463_v39  ;;  %v17211_v21 = vadd.f32 %v13257_v28, %v13256_v34  ;;  %v15160_v34 = vld [vmem:[%s20536_s20 + $0x564] ss:$8 sps:$4 sm:$0xff]  }
 0x2a7   : > { %v13259_v63 = vpop.f32.mrf.mxu0 }
 0x2a9   : > { %3739 = vmatmul.mubr.bf16.gmra.mxu0 %v15146_v20  ;;  %v13260_v58 = vpop.f32.mrf.mxu0 }
 0x2aa   : > { %3746 = vmatprep.mubr.bf16.mxu0 %v15154_v22  ;;  %v17219_v25 = vadd.f32 %v13260_v58, %v13259_v63  ;;  %v15101_v63 = vld [vmem:[%s20536_s20 + $0x290] ss:$8 sps:$4 sm:$0xff]  }
 0x2ab   : > { %v13262_v23 = vpop.f32.mrf.mxu0 }
 0x2ac   : > { %v13063_v52 = vpop.f32.mrf.mxu1  ;;  %2485 = vmatmul.mubr.bf16.gmra.mxu1 %v15098_v43 }
 0x2ad   : > { %2492 = vmatprep.mubr.bf16.mxu1 %v15103_v18  ;;  %v13263_v32 = vpop.f32.mrf.mxu0  ;;  %v15106_v18 = vld [vmem:[%s20536_s20 + $0x2a4] ss:$8 sps:$4 sm:$0xff]  }
 0x2ae   : > { %v13064_v2 = vpop.f32.mrf.mxu1  ;;  %v17227_v39 = vadd.f32 %v13263_v32, %v13262_v23 }
 0x2af   : > { %v13065_v20 = vadd.f32 %v13064_v2, %v13063_v52  ;;  %v13265_v28 = vpop.f32.mrf.mxu0 }
 0x2b0   : > { %v13066_v22 = vpop.f32.mrf.mxu1 }
 0x2b1   : > { %v17233_v43 = vadd.f32 %v16979_v0, %v13065_v20  ;;  %3747 = vmatmul.mubr.bf16.gmra.mxu0 %v15152_v4  ;;  %v13266_v58 = vpop.f32.mrf.mxu0  ;;  %v15158_v0 = vld [vmem:[%s20536_s20 + $0x560] ss:$8 sps:$4 sm:$0xff]   ;;  %v15166_v4 = vld [vmem:[%s20536_s20 + $0x574] ss:$8 sps:$4 sm:$0xff]  }
 0x2b2   : > { %v13067_v30 = vpop.f32.mrf.mxu1  ;;  %3754 = vmatprep.mubr.bf16.mxu0 %v15160_v34  ;;  %v17238_v23 = vadd.f32 %v13266_v58, %v13265_v28 }
 0x2b3   : > { %v13068_v52 = vadd.f32 %v13067_v30, %v13066_v22  ;;  %v13268_v32 = vpop.f32.mrf.mxu0 }
 0x2b4   : > { %v13069_v2 = vpop.f32.mrf.mxu1  ;;  %2493 = vmatmul.mubr.bf16.gmra.mxu1 %v15101_v63  ;;  %v15109_v63 = vld [vmem:[%s20536_s20 + $0x2b4] ss:$8 sps:$4 sm:$0xff]  }
 0x2b5   : > { %v17241_v53 = vadd.f32 %v16987_v5, %v13068_v52  ;;  %2500 = vmatprep.mubr.bf16.mxu1 %v15106_v18  ;;  %v13269_v20 = vpop.f32.mrf.mxu0  ;;  %v15104_v5 = vld [vmem:[%s20536_s20 + $0x2a0] ss:$8 sps:$4 sm:$0xff]  }
 0x2b6   : > { %v13070_v59 = vpop.f32.mrf.mxu1  ;;  %v17249_v34 = vadd.f32 %v13269_v20, %v13268_v32  ;;  %v15164_v32 = vld [vmem:[%s20536_s20 + $0x570] ss:$8 sps:$4 sm:$0xff]  }
 0x2b7   : > { %v13071_v30 = vadd.f32 %v13070_v59, %v13069_v2  ;;  %v15172_v2 = vld [vmem:[%s20536_s20 + $0x584] ss:$8 sps:$4 sm:$0xff]  }
 0x2b8   : > { %v13072_v28 = vpop.f32.mrf.mxu1 }
 0x2b9   : > { %v17255_v22 = vadd.f32 %v16995_v19, %v13071_v30  ;;  %3755 = vmatmul.mubr.bf16.gmra.mxu0 %v15158_v0 }
 0x2ba   : > { %v13073_v18 = vpop.f32.mrf.mxu1  ;;  %3762 = vmatprep.mubr.bf16.mxu0 %v15166_v4  ;;  %v15107_v4 = vld [vmem:[%s20536_s20 + $0x2b0] ss:$8 sps:$4 sm:$0xff]  }
 0x2bb   : > { %v13074_v58 = vadd.f32 %v13073_v18, %v13072_v28 }
 0x2bc   : > { %v13075_v52 = vpop.f32.mrf.mxu1  ;;  %2501 = vmatmul.mubr.bf16.gmra.mxu1 %v15104_v5 }
 0x2bd   : > { %v17261_v59 = vadd.f32 %v17003_v45, %v13074_v58  ;;  %2508 = vmatprep.mubr.bf16.mxu1 %v15109_v63  ;;  %v15112_v45 = vld [vmem:[%s20536_s20 + $0x2c4] ss:$8 sps:$4 sm:$0xff]   ;;  %v15170_v58 = vld [vmem:[%s20536_s20 + $0x580] ss:$8 sps:$4 sm:$0xff]  }
 0x2be   : > { %v13076_v19 = vpop.f32.mrf.mxu1 }
 0x2bf   : > { %v13077_v20 = vadd.f32 %v13076_v19, %v13075_v52  ;;  %v15178_v52 = vld [vmem:[%s20536_s20 + $0x594] ss:$8 sps:$4 sm:$0xff]  }
 0x2c0   : > { %v13078_v0 = vpop.f32.mrf.mxu1 }
 0x2c1   : > { %v17273_v30 = vadd.f32 %v17011_v3, %v13077_v20  ;;  %3763 = vmatmul.mubr.bf16.gmra.mxu0 %v15164_v32 }
 0x2c2   : > { %v13079_v28 = vpop.f32.mrf.mxu1  ;;  %3770 = vmatprep.mubr.bf16.mxu0 %v15172_v2  ;;  %v15110_v2 = vld [vmem:[%s20536_s20 + $0x2c0] ss:$8 sps:$4 sm:$0xff]  }
 0x2c3   : > { %v13080_v5 = vadd.f32 %v13079_v28, %v13078_v0 }
 0x2c4   : > { %v13081_v63 = vpop.f32.mrf.mxu1  ;;  %2509 = vmatmul.mubr.bf16.gmra.mxu1 %v15107_v4 }
 0x2c5   : > { %v17279_v18 = vadd.f32 %v17019_v62, %v13080_v5  ;;  %2516 = vmatprep.mubr.bf16.mxu1 %v15112_v45  ;;  %v15115_v62 = vld [vmem:[%s20536_s20 + $0x2d4] ss:$8 sps:$4 sm:$0xff]  }
 0x2c6   : > { %v13082_v3 = vpop.f32.mrf.mxu1 }
 0x2c7   : > { %v13083_v19 = vadd.f32 %v13082_v3, %v13081_v63 }
 0x2c8   : > { %v13084_v32 = vpop.f32.mrf.mxu1 }
 0x2c9   : > { %v17291_v20 = vadd.f32 %v17027_v26, %v13083_v19  ;;  %v13399_v0 = vpop.f32.mrf.mxu0  ;;  %3771 = vmatmul.mubr.bf16.gmra.mxu0 %v15170_v58  ;;  %v15176_v19 = vld [vmem:[%s20536_s20 + $0x590] ss:$8 sps:$4 sm:$0xff]   ;;  %v15184_v58 = vld [vmem:[%s20536_s20 + $0x5a4] ss:$8 sps:$4 sm:$0xff]  }
 0x2ca   : > { %v13085_v4 = vpop.f32.mrf.mxu1  ;;  %3778 = vmatprep.mubr.bf16.mxu0 %v15178_v52 }
 0x2cb   : > { %20622 = vst [vmem:[#allocation24_spill] sm:$0xff] %v17291_v20  ;;  %v13086_v45 = vadd.f32 %v13085_v4, %v13084_v32  ;;  %v13400_v28 = vpop.f32.mrf.mxu0 }
 0x2cc   : > { %v13087_v5 = vpop.f32.mrf.mxu1  ;;  %2517 = vmatmul.mubr.bf16.gmra.mxu1 %v15110_v2  ;;  %v17296_v63 = vadd.f32 %v13400_v28, %v13399_v0  ;;  %v15113_v2 = vld [vmem:[%s20536_s20 + $0x2d0] ss:$8 sps:$4 sm:$0xff]   ;;  %v15118_v0 = vld [vmem:[%s20536_s20 + $0x2e4] ss:$8 sps:$4 sm:$0xff]  }
 0x2cd   : > { %v17299_v3 = vadd.f32 %v17035_v50, %v13086_v45  ;;  %2524 = vmatprep.mubr.bf16.mxu1 %v15115_v62  ;;  %v13402_v26 = vpop.f32.mrf.mxu0 }
 0x2ce   : > { %v13088_v15 = vpop.f32.mrf.mxu1 }
 0x2cf   : > { %20623 = vst [vmem:[#allocation33_spill] sm:$0xff] %v17299_v3  ;;  %v13089_v52 = vadd.f32 %v13088_v15, %v13087_v5  ;;  %v13403_v32 = vpop.f32.mrf.mxu0 }
 0x2d0   : > { %v13090_v4 = vpop.f32.mrf.mxu1  ;;  %v17310_v50 = vadd.f32 %v13403_v32, %v13402_v26 }
 0x2d1   : > { %v17313_v62 = vadd.f32 %v17043_v36, %v13089_v52  ;;  %v13405_v45 = vpop.f32.mrf.mxu0  ;;  %3779 = vmatmul.mubr.bf16.gmra.mxu0 %v15176_v19  ;;  %v15182_v52 = vld [vmem:[%s20536_s20 + $0x5a0] ss:$8 sps:$4 sm:$0xff]   ;;  %v15190_v19 = vld [vmem:[%s20536_s20 + $0x5b4] ss:$8 sps:$4 sm:$0xff]  }
 0x2d2   : > { %v13091_v28 = vpop.f32.mrf.mxu1  ;;  %3786 = vmatprep.mubr.bf16.mxu0 %v15184_v58 }
 0x2d3   : > { %20624 = vst [vmem:[#allocation34_spill] sm:$0xff] %v17313_v62  ;;  %v13092_v15 = vadd.f32 %v13091_v28, %v13090_v4  ;;  %v13406_v5 = vpop.f32.mrf.mxu0 }
 0x2d4   : > { %v13093_v3 = vpop.f32.mrf.mxu1  ;;  %2525 = vmatmul.mubr.bf16.gmra.mxu1 %v15113_v2  ;;  %v17318_v20 = vadd.f32 %v13406_v5, %v13405_v45  ;;  %v15116_v2 = vld [vmem:[%s20536_s20 + $0x2e0] ss:$8 sps:$4 sm:$0xff]   ;;  %v15121_v45 = vld [vmem:[%s20536_s20 + $0x2f4] ss:$8 sps:$4 sm:$0xff]  }
 0x2d5   : > { %v17321_v26 = vadd.f32 %v17051_v11, %v13092_v15  ;;  %2532 = vmatprep.mubr.bf16.mxu1 %v15118_v0  ;;  %v13408_v36 = vpop.f32.mrf.mxu0 }
 0x2d6   : > { %v13094_v32 = vpop.f32.mrf.mxu1 }
 0x2d7   : > { %20625 = vst [vmem:[#allocation35_spill] sm:$0xff] %v17321_v26  ;;  %v13095_v58 = vadd.f32 %v13094_v32, %v13093_v3  ;;  %v13409_v4 = vpop.f32.mrf.mxu0 }
 0x2d8   : > { %v13096_v28 = vpop.f32.mrf.mxu1  ;;  %v17332_v11 = vadd.f32 %v13409_v4, %v13408_v36 }
 0x2d9   : > { %v17335_v0 = vadd.f32 %v17059_v54, %v13095_v58  ;;  %v13411_v15 = vpop.f32.mrf.mxu0  ;;  %3787 = vmatmul.mubr.bf16.gmra.mxu0 %v15182_v52  ;;  %v15188_v58 = vld [vmem:[%s20536_s20 + $0x5b0] ss:$8 sps:$4 sm:$0xff]   ;;  %v15196_v52 = vld [vmem:[%s20536_s20 + $0x5c4] ss:$8 sps:$4 sm:$0xff]  }
 0x2da   : > { %v13097_v5 = vpop.f32.mrf.mxu1  ;;  %3794 = vmatprep.mubr.bf16.mxu0 %v15190_v19 }
 0x2db   : > { %20626 = vst [vmem:[#allocation36_spill] sm:$0xff] %v17335_v0  ;;  %v13098_v3 = vadd.f32 %v13097_v5, %v13096_v28  ;;  %v13412_v32 = vpop.f32.mrf.mxu0 }
 0x2dc   : > { %v13099_v26 = vpop.f32.mrf.mxu1  ;;  %2533 = vmatmul.mubr.bf16.gmra.mxu1 %v15116_v2  ;;  %v17340_v62 = vadd.f32 %v13412_v32, %v13411_v15  ;;  %v15119_v2 = vld [vmem:[%s20536_s20 + $0x2f0] ss:$8 sps:$4 sm:$0xff]   ;;  %v15124_v15 = vld [vmem:[%s20536_s20 + $0x404] ss:$8 sps:$4 sm:$0xff]  }
 0x2dd   : > { %v17343_v36 = vadd.f32 %v17067_v24, %v13098_v3  ;;  %2540 = vmatprep.mubr.bf16.mxu1 %v15121_v45  ;;  %v13414_v54 = vpop.f32.mrf.mxu0 }
 0x2de   : > { %v13100_v4 = vpop.f32.mrf.mxu1 }
 0x2df   : > { %20627 = vst [vmem:[#allocation37_spill] sm:$0xff] %v17343_v36  ;;  %v13101_v19 = vadd.f32 %v13100_v4, %v13099_v26  ;;  %v13415_v28 = vpop.f32.mrf.mxu0 }
 0x2e0   : > { %v13102_v5 = vpop.f32.mrf.mxu1  ;;  %v17354_v24 = vadd.f32 %v13415_v28, %v13414_v54 }
 0x2e1   : > { %v17357_v45 = vadd.f32 %v17075_v42, %v13101_v19  ;;  %v13417_v3 = vpop.f32.mrf.mxu0  ;;  %3795 = vmatmul.mubr.bf16.gmra.mxu0 %v15188_v58  ;;  %v15194_v19 = vld [vmem:[%s20536_s20 + $0x5c0] ss:$8 sps:$4 sm:$0xff]   ;;  %v15202_v58 = vld [vmem:[%s20536_s20 + $0x5d4] ss:$8 sps:$4 sm:$0xff]  }
 0x2e2   : > { %v13103_v32 = vpop.f32.mrf.mxu1  ;;  %3802 = vmatprep.mubr.bf16.mxu0 %v15196_v52 }
 0x2e3   : > { %20628 = vst [vmem:[#allocation38_spill] sm:$0xff] %v17357_v45  ;;  %v13104_v26 = vadd.f32 %v13103_v32, %v13102_v5  ;;  %v13418_v4 = vpop.f32.mrf.mxu0 }
 0x2e4   : > { %v13105_v36 = vpop.f32.mrf.mxu1  ;;  %2541 = vmatmul.mubr.bf16.gmra.mxu1 %v15119_v2  ;;  %v17362_v0 = vadd.f32 %v13418_v4, %v13417_v3  ;;  %v15122_v2 = vld [vmem:[%s20536_s20 + $0x400] ss:$8 sps:$4 sm:$0xff]   ;;  %v15127_v3 = vld [vmem:[%s20536_s20 + $0x414] ss:$8 sps:$4 sm:$0xff]  }
 0x2e5   : > { %v17365_v54 = vadd.f32 %v17085_v16, %v13104_v26  ;;  %3256 = vmatprep.mubr.bf16.mxu1 %v15124_v15  ;;  %v13420_v42 = vpop.f32.mrf.mxu0 }
 0x2e6   : > { %v13106_v28 = vpop.f32.mrf.mxu1 }
 0x2e7   : > { %20629 = vst [vmem:[#allocation39_spill] sm:$0xff] %v17365_v54  ;;  %v13107_v52 = vadd.f32 %v13106_v28, %v13105_v36  ;;  %v13421_v5 = vpop.f32.mrf.mxu0 }
 0x2e8   : > { %v13108_v32 = vpop.f32.mrf.mxu1  ;;  %v17376_v16 = vadd.f32 %v13421_v5, %v13420_v42 }
 0x2e9   : > { %v17379_v15 = vadd.f32 %v17095_v51, %v13107_v52  ;;  %v13423_v26 = vpop.f32.mrf.mxu0  ;;  %3803 = vmatmul.mubr.bf16.gmra.mxu0 %v15194_v19  ;;  %v15200_v52 = vld [vmem:[%s20536_s20 + $0x5d0] ss:$8 sps:$4 sm:$0xff]  }
 0x2ea   : > { %v13109_v4 = vpop.f32.mrf.mxu1  ;;  %3810 = vmatprep.mubr.bf16.mxu0 %v15202_v58  ;;  %v15208_v58 = vld [vmem:[%s20536_s20 + $0x5e4] ss:$8 sps:$4 sm:$0xff]  }
 0x2eb   : > { %v13110_v36 = vadd.f32 %v13109_v4, %v13108_v32  ;;  %v13424_v28 = vpop.f32.mrf.mxu0 }
 0x2ec   : > { %v13111_v54 = vpop.f32.mrf.mxu1  ;;  %3257 = vmatmul.mubr.bf16.vlgmr.msra.gmra.mxu1 %v15122_v2  ;;  %v17384_v45 = vadd.f32 %v13424_v28, %v13423_v26 }
 0x2ed   : > { %v17387_v42 = vadd.f32 %v17105_v40, %v13110_v36  ;;  %13720 = vmatpush3.bf16.msra.mxu1 %v16630_v47  ;;  %3264 = vmatprep.mubr.bf16.mxu1 %v15127_v3  ;;  %v13426_v51 = vpop.f32.mrf.mxu0  ;;  %v15125_v47 = vld [vmem:[%s20536_s20 + $0x410] ss:$8 sps:$4 sm:$0xff]  }
 0x2ee   : > { %13721 = vmatprep.subr.bf16.mxu1 %v16686_v37  ;;  %v13112_v19 = vpop.f32.mrf.mxu1  ;;  %v15133_v37 = vld [vmem:[%s20536_s20 + $0x424] ss:$8 sps:$4 sm:$0xff]  }
 0x2ef   : > { %v13113_v5 = vadd.f32 %v13112_v19, %v13111_v54  ;;  %v13427_v32 = vpop.f32.mrf.mxu0  ;;  %v15214_v19 = vld [vmem:[%s20536_s20 + $0x5f4] ss:$8 sps:$4 sm:$0xff]  }
 0x2f0   : > { %v13114_v2 = vpop.f32.mrf.mxu1  ;;  %v17400_v40 = vadd.f32 %v13427_v32, %v13426_v51 }
 0x2f1   : > { %v17403_v3 = vadd.f32 %v17115_v61, %v13113_v5  ;;  %13722 = vmatpush3.bf16.msra.mxu1 %v16648_v44  ;;  %v13429_v26 = vpop.f32.mrf.mxu0  ;;  %3811 = vmatmul.mubr.bf16.gmra.mxu0 %v15200_v52  ;;  %v15206_v52 = vld [vmem:[%s20536_s20 + $0x5e0] ss:$8 sps:$4 sm:$0xff]  }
 0x2f2   : > { %13723 = vmatprep.subr.bf16.mxu1 %v16704_v49  ;;  %v13115_v54 = vpop.f32.mrf.mxu1  ;;  %3818 = vmatprep.mubr.bf16.mxu0 %v15208_v58 }
 0x2f3   : > { %v13116_v4 = vadd.f32 %v13115_v54, %v13114_v2  ;;  %v13430_v36 = vpop.f32.mrf.mxu0 }
 0x2f4   : > { %v13117_v28 = vpop.f32.mrf.mxu1  ;;  %3265 = vmatmul.mubr.bf16.gmra.mxu1 %v15125_v47  ;;  %v17410_v51 = vadd.f32 %v13430_v36, %v13429_v26 }
 0x2f5   : > { %v17413_v61 = vadd.f32 %v17125_v60, %v13116_v4  ;;  %13724 = vmatpush3.bf16.msra.mxu1 %v16662_v12  ;;  %3272 = vmatprep.mubr.bf16.mxu1 %v15133_v37  ;;  %v13432_v44 = vpop.f32.mrf.mxu0  ;;  %v15131_v12 = vld [vmem:[%s20536_s20 + $0x420] ss:$8 sps:$4 sm:$0xff]  }
 0x2f6   : > { %13725 = vmatprep.subr.bf16.mxu1 %v16726_v14  ;;  %v13118_v49 = vpop.f32.mrf.mxu1  ;;  %v15139_v14 = vld [vmem:[%s20536_s20 + $0x434] ss:$8 sps:$4 sm:$0xff]  }
 0x2f7   : > { %v13119_v58 = vadd.f32 %v13118_v49, %v13117_v28  ;;  %v13433_v5 = vpop.f32.mrf.mxu0  ;;  %v15212_v28 = vld [vmem:[%s20536_s20 + $0x5f0] ss:$8 sps:$4 sm:$0xff]  }
 0x2f8   : > { %v13120_v32 = vpop.f32.mrf.mxu1  ;;  %v17426_v60 = vadd.f32 %v13433_v5, %v13432_v44  ;;  %v15220_v44 = vld [vmem:[%s20536_s20 + $0x704] ss:$8 sps:$4 sm:$0xff]  }
 0x2f9   : > { %v17429_v2 = vadd.f32 %v17135_v33, %v13119_v58  ;;  %13726 = vmatpush3.bf16.msra.mxu1 %v16682_v1  ;;  %v13435_v47 = vpop.f32.mrf.mxu0  ;;  %3819 = vmatmul.mubr.bf16.gmra.mxu0 %v15206_v52 }
 0x2fa   : > { %13727 = vmatprep.subr.bf16.mxu1 %v16744_v55  ;;  %v13121_v37 = vpop.f32.mrf.mxu1  ;;  %3826 = vmatprep.mubr.bf16.mxu0 %v15214_v19 }
 0x2fb   : > { %v13122_v26 = vadd.f32 %v13121_v37, %v13120_v32  ;;  %v13436_v54 = vpop.f32.mrf.mxu0 }
 0x2fc   : > { %v13123_v4 = vpop.f32.mrf.mxu1  ;;  %3273 = vmatmul.mubr.bf16.gmra.mxu1 %v15131_v12  ;;  %v17436_v36 = vadd.f32 %v13436_v54, %v13435_v47  ;;  %v15226_v54 = vld [vmem:[%s20536_s20 + $0x714] ss:$8 sps:$4 sm:$0xff]  }
 0x2fd   : > { %v17439_v33 = vadd.f32 %v17142_v9, %v13122_v26  ;;  %13728 = vmatpush3.bf16.msra.mxu1 %v16700_v6  ;;  %3280 = vmatprep.mubr.bf16.mxu1 %v15139_v14  ;;  %v13438_v1 = vpop.f32.mrf.mxu0  ;;  %v15137_v6 = vld [vmem:[%s20536_s20 + $0x430] ss:$8 sps:$4 sm:$0xff]   ;;  %v15218_v26 = vld [vmem:[%s20536_s20 + $0x700] ss:$8 sps:$4 sm:$0xff]  }
 0x2fe   : > { %13729 = vmatprep.subr.bf16.mxu1 %v16766_v29  ;;  %v13124_v55 = vpop.f32.mrf.mxu1  ;;  %v15145_v29 = vld [vmem:[%s20536_s20 + $0x444] ss:$8 sps:$4 sm:$0xff]  }
 0x2ff   : > { %v13125_v52 = vadd.f32 %v13124_v55, %v13123_v4  ;;  %v13439_v49 = vpop.f32.mrf.mxu0 }
 0x300   : > { %v13126_v19 = vpop.f32.mrf.mxu1  ;;  %v17452_v9 = vadd.f32 %v13439_v49, %v13438_v1  ;;  %v20630_v49 = vpack.c.bf16 %v16836_v7, %v16829_v31  ;;  %v15232_v31 = vld [vmem:[%s20536_s20 + $0x724] ss:$8 sps:$4 sm:$0xff]  }
 0x301   : > { %v17455_v58 = vadd.f32 %v17155_v41, %v13125_v52  ;;  %13730 = vmatpush3.bf16.msra.mxu1 %v16722_v10  ;;  %v13441_v5 = vpop.f32.mrf.mxu0  ;;  %3827 = vmatmul.mubr.bf16.gmra.mxu0 %v15212_v28 }
 0x302   : > { %13731 = vmatprep.subr.bf16.mxu1 %v16780_v17  ;;  %v13127_v32 = vpop.f32.mrf.mxu1  ;;  %4542 = vmatprep.mubr.bf16.mxu0 %v15220_v44 }
 0x303   : > { %v13128_v12 = vadd.f32 %v13127_v32, %v13126_v19  ;;  %v13442_v14 = vpop.f32.mrf.mxu0  ;;  %v15224_v32 = vld [vmem:[%s20536_s20 + $0x710] ss:$8 sps:$4 sm:$0xff]  }
 0x304   : > { %v13129_v47 = vpop.f32.mrf.mxu1  ;;  %3281 = vmatmul.mubr.bf16.gmra.mxu1 %v15137_v6  ;;  %v17462_v37 = vadd.f32 %v13442_v14, %v13441_v5 }
 0x305   : > { %v17465_v41 = vadd.f32 %v17163_v46, %v13128_v12  ;;  %13732 = vmatpush3.bf16.msra.mxu1 %v16740_v27  ;;  %3288 = vmatprep.mubr.bf16.mxu1 %v15145_v29  ;;  %v13444_v10 = vpop.f32.mrf.mxu0  ;;  %v15143_v27 = vld [vmem:[%s20536_s20 + $0x440] ss:$8 sps:$4 sm:$0xff]  }
 0x306   : > { %13733 = vmatprep.subr.bf16.mxu1 %v16798_v57  ;;  %v13130_v17 = vpop.f32.mrf.mxu1  ;;  %v15151_v57 = vld [vmem:[%s20536_s20 + $0x454] ss:$8 sps:$4 sm:$0xff]  }
 0x307   : > { %v13131_v4 = vadd.f32 %v13130_v17, %v13129_v47  ;;  %v13445_v1 = vpop.f32.mrf.mxu0  ;;  %v15157_v17 = vld [vmem:[%s20536_s20 + $0x464] ss:$8 sps:$4 sm:$0xff]  }
 0x308   : > { %v13132_v28 = vpop.f32.mrf.mxu1  ;;  %v17478_v46 = vadd.f32 %v13445_v1, %v13444_v10  ;;  %v15149_v10 = vld [vmem:[%s20536_s20 + $0x450] ss:$8 sps:$4 sm:$0xff]  }
 0x309   : > { %v17481_v55 = vadd.f32 %v17171_v13, %v13131_v4  ;;  %13734 = vmatpush3.bf16.msra.mxu1 %v16762_v38  ;;  %v13447_v44 = vpop.f32.mrf.mxu0  ;;  %4543 = vmatmul.mubr.bf16.vlgmr.msra.gmra.mxu0 %v15218_v26 }
 0x30a   : > { %v13133_v52 = vpop.f32.mrf.mxu1  ;;  %13943 = vmatprep.subr.bf16.mxu1 %v20630_v49  ;;  %4550 = vmatprep.mubr.bf16.mxu0 %v15226_v54 }
 0x30b   : > { %v13134_v19 = vadd.f32 %v13133_v52, %v13132_v28  ;;  %v13448_v6 = vpop.f32.mrf.mxu0  ;;  %v15230_v52 = vld [vmem:[%s20536_s20 + $0x720] ss:$8 sps:$4 sm:$0xff]  }
 0x30c   : > { %v13135_v29 = vpop.f32.mrf.mxu1  ;;  %3289 = vmatmul.mubr.bf16.gmra.mxu1 %v15143_v27  ;;  %v17490_v13 = vadd.f32 %v13448_v6, %v13447_v44 }
 0x30d   : > { %v17493_v38 = vadd.f32 %v17179_v35, %v13134_v19  ;;  %3296 = vmatprep.mubr.bf16.mxu1 %v15151_v57  ;;  %v13450_v5 = vpop.f32.mrf.mxu0  ;;  %v15238_v19 = vld [vmem:[%s20536_s20 + $0x734] ss:$8 sps:$4 sm:$0xff]  }
 0x30e   : > { %v13136_v12 = vpop.f32.mrf.mxu1 }
 0x30f   : > { %v13137_v7 = vadd.f32 %v13136_v12, %v13135_v29  ;;  %v13451_v14 = vpop.f32.mrf.mxu0 }
 0x310   : > { %v13138_v47 = vpop.f32.mrf.mxu1  ;;  %v17504_v35 = vadd.f32 %v13451_v14, %v13450_v5 }
 0x311   : > { %v17507_v26 = vadd.f32 %v17187_v48, %v13137_v7  ;;  %v13453_v54 = vpop.f32.mrf.mxu0  ;;  %4551 = vmatmul.mubr.bf16.gmra.mxu0 %v15224_v32  ;;  %v15155_v32 = vld [vmem:[%s20536_s20 + $0x460] ss:$8 sps:$4 sm:$0xff]  }
 0x312   : > { %v13139_v4 = vpop.f32.mrf.mxu1  ;;  %4558 = vmatprep.mubr.bf16.mxu0 %v15232_v31  ;;  %v15163_v31 = vld [vmem:[%s20536_s20 + $0x474] ss:$8 sps:$4 sm:$0xff]  }
 0x313   : > { %v13140_v1 = vadd.f32 %v13139_v4, %v13138_v47  ;;  %v13454_v28 = vpop.f32.mrf.mxu0 }
 0x314   : > { %v13141_v27 = vpop.f32.mrf.mxu1  ;;  %3297 = vmatmul.mubr.bf16.gmra.mxu1 %v15149_v10  ;;  %v17512_v57 = vadd.f32 %v13454_v28, %v13453_v54 }
 0x315   : > { %v17515_v44 = vadd.f32 %v17195_v8, %v13140_v1  ;;  %3304 = vmatprep.mubr.bf16.mxu1 %v15157_v17  ;;  %v13456_v48 = vpop.f32.mrf.mxu0  ;;  %v15236_v1 = vld [vmem:[%s20536_s20 + $0x730] ss:$8 sps:$4 sm:$0xff]  }
 0x316   : > { %v13142_v49 = vpop.f32.mrf.mxu1 }
 0x317   : > { %v13143_v6 = vadd.f32 %v13142_v49, %v13141_v27  ;;  %v13457_v29 = vpop.f32.mrf.mxu0  ;;  %v15244_v27 = vld [vmem:[%s20536_s20 + $0x744] ss:$8 sps:$4 sm:$0xff]  }
 0x318   : > { %v13144_v5 = vpop.f32.mrf.mxu1  ;;  %v17526_v8 = vadd.f32 %v13457_v29, %v13456_v48  ;;  %v15169_v29 = vld [vmem:[%s20536_s20 + $0x484] ss:$8 sps:$4 sm:$0xff]  }
 0x319   : > { %v17529_v12 = vadd.f32 %v17203_v56, %v13143_v6  ;;  %v13459_v7 = vpop.f32.mrf.mxu0  ;;  %4559 = vmatmul.mubr.bf16.gmra.mxu0 %v15230_v52 }
 0x31a   : > { %v13145_v14 = vpop.f32.mrf.mxu1  ;;  %4566 = vmatprep.mubr.bf16.mxu0 %v15238_v19  ;;  %v15161_v19 = vld [vmem:[%s20536_s20 + $0x470] ss:$8 sps:$4 sm:$0xff]  }
 0x31b   : > { %v13146_v47 = vadd.f32 %v13145_v14, %v13144_v5  ;;  %v13460_v10 = vpop.f32.mrf.mxu0 }
 0x31c   : > { %v13147_v17 = vpop.f32.mrf.mxu1  ;;  %3305 = vmatmul.mubr.bf16.gmra.mxu1 %v15155_v32  ;;  %v17534_v54 = vadd.f32 %v13460_v10, %v13459_v7 }
 0x31d   : > { %v17537_v4 = vadd.f32 %v17211_v21, %v13146_v47  ;;  %3312 = vmatprep.mubr.bf16.mxu1 %v15163_v31  ;;  %v13462_v56 = vpop.f32.mrf.mxu0 }
 0x31e   : > { %v13148_v28 = vpop.f32.mrf.mxu1 }
 0x31f   : > { %v13149_v48 = vadd.f32 %v13148_v28, %v13147_v17  ;;  %v13463_v52 = vpop.f32.mrf.mxu0  ;;  %v15242_v17 = vld [vmem:[%s20536_s20 + $0x740] ss:$8 sps:$4 sm:$0xff]  }
 0x320   : > { %v13150_v49 = vpop.f32.mrf.mxu1  ;;  %v17548_v21 = vadd.f32 %v13463_v52, %v13462_v56  ;;  %v15167_v52 = vld [vmem:[%s20536_s20 + $0x480] ss:$8 sps:$4 sm:$0xff]  }
 0x321   : > { %v17551_v6 = vadd.f32 %v17219_v25, %v13149_v48  ;;  %v13465_v5 = vpop.f32.mrf.mxu0  ;;  %4567 = vmatmul.mubr.bf16.gmra.mxu0 %v15236_v1  ;;  %v15250_v1 = vld [vmem:[%s20536_s20 + $0x754] ss:$8 sps:$4 sm:$0xff]  }
 0x322   : > { %v13151_v32 = vpop.f32.mrf.mxu1  ;;  %4574 = vmatprep.mubr.bf16.mxu0 %v15244_v27 }
 0x323   : > { %v13152_v31 = vadd.f32 %v13151_v32, %v13150_v49  ;;  %v13466_v7 = vpop.f32.mrf.mxu0 }
 0x324   : > { %v13153_v14 = vpop.f32.mrf.mxu1  ;;  %3313 = vmatmul.mubr.bf16.gmra.mxu1 %v15161_v19  ;;  %v17556_v47 = vadd.f32 %v13466_v7, %v13465_v5  ;;  %v15175_v19 = vld [vmem:[%s20536_s20 + $0x494] ss:$8 sps:$4 sm:$0xff]  }
 0x325   : > { %v17559_v10 = vadd.f32 %v17227_v39, %v13152_v31  ;;  %3320 = vmatprep.mubr.bf16.mxu1 %v15169_v29  ;;  %v13468_v25 = vpop.f32.mrf.mxu0 }
 0x326   : > { %v13154_v56 = vpop.f32.mrf.mxu1 }
 0x327   : > { %v13155_v28 = vadd.f32 %v13154_v56, %v13153_v14  ;;  %v13469_v27 = vpop.f32.mrf.mxu0  ;;  %v15248_v56 = vld [vmem:[%s20536_s20 + $0x750] ss:$8 sps:$4 sm:$0xff]  }
 0x328   : > { %v13156_v48 = vpop.f32.mrf.mxu1  ;;  %v17570_v39 = vadd.f32 %v13469_v27, %v13468_v25 }
 0x329   : > { %v17573_v49 = vadd.f32 %v17238_v23, %v13155_v28  ;;  %v13471_v29 = vpop.f32.mrf.mxu0  ;;  %4575 = vmatmul.mubr.bf16.gmra.mxu0 %v15242_v17  ;;  %v15256_v17 = vld [vmem:[%s20536_s20 + $0x764] ss:$8 sps:$4 sm:$0xff]  }
 0x32a   : > { %v13157_v5 = vpop.f32.mrf.mxu1  ;;  %4582 = vmatprep.mubr.bf16.mxu0 %v15250_v1 }
 0x32b   : > { %20631 = vst [vmem:[#allocation40_spill] sm:$0xff] %v17573_v49  ;;  %v13158_v32 = vadd.f32 %v13157_v5, %v13156_v48  ;;  %v13472_v31 = vpop.f32.mrf.mxu0 }
 0x32c   : > { %v13287_v7 = vpop.f32.mrf.mxu1  ;;  %3321 = vmatmul.mubr.bf16.gmra.mxu1 %v15167_v52  ;;  %v17578_v14 = vadd.f32 %v13472_v31, %v13471_v29  ;;  %v15173_v52 = vld [vmem:[%s20536_s20 + $0x490] ss:$8 sps:$4 sm:$0xff]   ;;  %v15181_v29 = vld [vmem:[%s20536_s20 + $0x4a4] ss:$8 sps:$4 sm:$0xff]  }
 0x32d   : > { %v17581_v25 = vadd.f32 %v17249_v34, %v13158_v32  ;;  %3328 = vmatprep.mubr.bf16.mxu1 %v15175_v19  ;;  %v13474_v23 = vpop.f32.mrf.mxu0 }
 0x32e   : > { %v13288_v28 = vpop.f32.mrf.mxu1 }
 0x32f   : > { %20632 = vst [vmem:[#allocation41_spill] sm:$0xff] %v17581_v25  ;;  %v13289_v1 = vadd.f32 %v13288_v28, %v13287_v7  ;;  %v13475_v27 = vpop.f32.mrf.mxu0 }
 0x330   : > { %v13290_v48 = vpop.f32.mrf.mxu1  ;;  %v17592_v34 = vadd.f32 %v13475_v27, %v13474_v23 }
 0x331   : > { %v2549_v19 = vadd.f32 %v13289_v1, %v17233_v43  ;;  %v13477_v5 = vpop.f32.mrf.mxu0  ;;  %4583 = vmatmul.mubr.bf16.gmra.mxu0 %v15248_v56  ;;  %v15254_v1 = vld [vmem:[%s20536_s20 + $0x760] ss:$8 sps:$4 sm:$0xff]  }
 0x332   : > { %v13291_v32 = vpop.f32.mrf.mxu1  ;;  %4590 = vmatprep.mubr.bf16.mxu0 %v15256_v17 }
 0x333   : > { %v17599_v31 = vadd.f32 %v17296_v63, %v2549_v19  ;;  %v13292_v7 = vadd.f32 %v13291_v32, %v13290_v48  ;;  %v13478_v28 = vpop.f32.mrf.mxu0  ;;  %v15262_v63 = vld [vmem:[%s20536_s20 + $0x774] ss:$8 sps:$4 sm:$0xff]  }
 0x334   : > { %v13293_v25 = vpop.f32.mrf.mxu1  ;;  %3329 = vmatmul.mubr.bf16.gmra.mxu1 %v15173_v52  ;;  %v17601_v49 = vadd.f32 %v13478_v28, %v13477_v5  ;;  %v15187_v5 = vld [vmem:[%s20536_s20 + $0x4b4] ss:$8 sps:$4 sm:$0xff]  }
 0x335   : > { %v2550_v23 = vadd.f32 %v13292_v7, %v17241_v53  ;;  %3336 = vmatprep.mubr.bf16.mxu1 %v15181_v29  ;;  %v13480_v43 = vpop.f32.mrf.mxu0  ;;  %v15179_v53 = vld [vmem:[%s20536_s20 + $0x4a0] ss:$8 sps:$4 sm:$0xff]  }
 0x336   : > { %v13294_v56 = vpop.f32.mrf.mxu1 }
 0x337   : > { %v17611_v17 = vadd.f32 %v17310_v50, %v2550_v23  ;;  %v13295_v27 = vadd.f32 %v13294_v56, %v13293_v25  ;;  %v13481_v48 = vpop.f32.mrf.mxu0 }
 0x338   : > { %v13296_v52 = vpop.f32.mrf.mxu1  ;;  %v17616_v19 = vadd.f32 %v13481_v48, %v13480_v43 }
 0x339   : > { %v2551_v29 = vadd.f32 %v13295_v27, %v17255_v22  ;;  %v13483_v32 = vpop.f32.mrf.mxu0  ;;  %4591 = vmatmul.mubr.bf16.gmra.mxu0 %v15254_v1  ;;  %v15260_v27 = vld [vmem:[%s20536_s20 + $0x770] ss:$8 sps:$4 sm:$0xff]  }
 0x33a   : > { %v13297_v7 = vpop.f32.mrf.mxu1  ;;  %4598 = vmatprep.mubr.bf16.mxu0 %v15262_v63 }
 0x33b   : > { %v17623_v50 = vadd.f32 %v17318_v20, %v2551_v29  ;;  %v13298_v25 = vadd.f32 %v13297_v7, %v13296_v52  ;;  %v13484_v28 = vpop.f32.mrf.mxu0  ;;  %v15268_v20 = vld [vmem:[%s20536_s20 + $0x784] ss:$8 sps:$4 sm:$0xff]  }
 0x33c   : > { %v13299_v23 = vpop.f32.mrf.mxu1  ;;  %3337 = vmatmul.mubr.bf16.gmra.mxu1 %v15179_v53  ;;  %v17625_v56 = vadd.f32 %v13484_v28, %v13483_v32  ;;  %v15193_v32 = vld [vmem:[%s20536_s20 + $0x4c4] ss:$8 sps:$4 sm:$0xff]  }
 0x33d   : > { %v2552_v43 = vadd.f32 %v13298_v25, %v17261_v59  ;;  %3344 = vmatprep.mubr.bf16.mxu1 %v15187_v5  ;;  %v13486_v22 = vpop.f32.mrf.mxu0  ;;  %v15185_v59 = vld [vmem:[%s20536_s20 + $0x4b0] ss:$8 sps:$4 sm:$0xff]  }
 0x33e   : > { %v13300_v1 = vpop.f32.mrf.mxu1 }
 0x33f   : > { %v17635_v63 = vadd.f32 %v17332_v11, %v2552_v43  ;;  %v13301_v48 = vadd.f32 %v13300_v1, %v13299_v23  ;;  %v13487_v52 = vpop.f32.mrf.mxu0 }
 0x340   : > { %v13302_v53 = vpop.f32.mrf.mxu1  ;;  %v17640_v29 = vadd.f32 %v13487_v52, %v13486_v22 }
 0x341   : > { %v2553_v5 = vadd.f32 %v13301_v48, %v17273_v30  ;;  %v13489_v7 = vpop.f32.mrf.mxu0  ;;  %4599 = vmatmul.mubr.bf16.gmra.mxu0 %v15260_v27  ;;  %v15266_v48 = vld [vmem:[%s20536_s20 + $0x780] ss:$8 sps:$4 sm:$0xff]  }
 0x342   : > { %v13303_v25 = vpop.f32.mrf.mxu1  ;;  %4606 = vmatprep.mubr.bf16.mxu0 %v15268_v20 }
 0x343   : > { %v17647_v11 = vadd.f32 %v17340_v62, %v2553_v5  ;;  %v13304_v28 = vadd.f32 %v13303_v25, %v13302_v53  ;;  %v13490_v23 = vpop.f32.mrf.mxu0  ;;  %v15274_v62 = vld [vmem:[%s20536_s20 + $0x794] ss:$8 sps:$4 sm:$0xff]  }
 0x344   : > { %v13305_v43 = vpop.f32.mrf.mxu1  ;;  %3345 = vmatmul.mubr.bf16.gmra.mxu1 %v15185_v59  ;;  %v17649_v1 = vadd.f32 %v13490_v23, %v13489_v7  ;;  %v15199_v25 = vld [vmem:[%s20536_s20 + $0x4d4] ss:$8 sps:$4 sm:$0xff]  }
 0x345   : > { %v2554_v22 = vadd.f32 %v13304_v28, %v17279_v18  ;;  %3352 = vmatprep.mubr.bf16.mxu1 %v15193_v32  ;;  %v13492_v30 = vpop.f32.mrf.mxu0  ;;  %v15191_v18 = vld [vmem:[%s20536_s20 + $0x4c0] ss:$8 sps:$4 sm:$0xff]   ;;  %v20634_v32 = vld [vmem:[#allocation24_spill] sm:$0xff] }
 0x346   : > { %v13306_v27 = vpop.f32.mrf.mxu1 }
 0x347   : > { %v17659_v20 = vadd.f32 %v17354_v24, %v2554_v22  ;;  %v13307_v52 = vadd.f32 %v13306_v27, %v13305_v43  ;;  %v13493_v53 = vpop.f32.mrf.mxu0 }
 0x348   : > { %v13308_v59 = vpop.f32.mrf.mxu1  ;;  %v17664_v5 = vadd.f32 %v13493_v53, %v13492_v30  ;;  %v20636_v30 = vld [vmem:[#allocation33_spill] sm:$0xff] }
 0x349   : > { %20633 = vst [vmem:[#allocation42_spill] sm:$0xff] %v17659_v20  ;;  %v2555_v7 = vadd.f32 %v13307_v52, %v20634_v32  ;;  %v13623_v28 = vpop.f32.mrf.mxu0  ;;  %4607 = vmatmul.mubr.bf16.gmra.mxu0 %v15266_v48  ;;  %v15272_v32 = vld [vmem:[%s20536_s20 + $0x790] ss:$8 sps:$4 sm:$0xff]  }
 0x34a   : > { %v13309_v23 = vpop.f32.mrf.mxu1  ;;  %4614 = vmatprep.mubr.bf16.mxu0 %v15274_v62 }
 0x34b   : > { %v17671_v24 = vadd.f32 %v17362_v0, %v2555_v7  ;;  %v13310_v43 = vadd.f32 %v13309_v23, %v13308_v59  ;;  %v13624_v22 = vpop.f32.mrf.mxu0  ;;  %v15280_v0 = vld [vmem:[%s20536_s20 + $0x7a4] ss:$8 sps:$4 sm:$0xff]  }
 0x34c   : > { %v13311_v27 = vpop.f32.mrf.mxu1  ;;  %3353 = vmatmul.mubr.bf16.gmra.mxu1 %v15191_v18  ;;  %v17673_v20 = vadd.f32 %v13624_v22, %v13623_v28  ;;  %v20638_v23 = vld [vmem:[#allocation34_spill] sm:$0xff] }
 0x34d   : > { %20635 = vst [vmem:[#allocation24_spill] sm:$0xff] %v17671_v24  ;;  %v2556_v53 = vadd.f32 %v13310_v43, %v20636_v30  ;;  %3360 = vmatprep.mubr.bf16.mxu1 %v15199_v25  ;;  %v13626_v52 = vpop.f32.mrf.mxu0  ;;  %v15197_v25 = vld [vmem:[%s20536_s20 + $0x4d0] ss:$8 sps:$4 sm:$0xff]   ;;  %v15205_v22 = vld [vmem:[%s20536_s20 + $0x4e4] ss:$8 sps:$4 sm:$0xff]  }
 0x34e   : > { %v13312_v48 = vpop.f32.mrf.mxu1 }
 0x34f   : > { %v17683_v62 = vadd.f32 %v17376_v16, %v2556_v53  ;;  %v13313_v59 = vadd.f32 %v13312_v48, %v13311_v27  ;;  %v13627_v18 = vpop.f32.mrf.mxu0 }
 0x350   : > { %v13314_v7 = vpop.f32.mrf.mxu1  ;;  %v17688_v28 = vadd.f32 %v13627_v18, %v13626_v52  ;;  %v20640_v52 = vld [vmem:[#allocation35_spill] sm:$0xff] }
 0x351   : > { %20637 = vst [vmem:[#allocation33_spill] sm:$0xff] %v17683_v62  ;;  %v2557_v43 = vadd.f32 %v13313_v59, %v20638_v23  ;;  %v13629_v30 = vpop.f32.mrf.mxu0  ;;  %4615 = vmatmul.mubr.bf16.gmra.mxu0 %v15272_v32  ;;  %v15278_v23 = vld [vmem:[%s20536_s20 + $0x7a0] ss:$8 sps:$4 sm:$0xff]  }
 0x352   : > { %v13315_v24 = vpop.f32.mrf.mxu1  ;;  %4622 = vmatprep.mubr.bf16.mxu0 %v15280_v0 }
 0x353   : > { %v17695_v16 = vadd.f32 %v17384_v45, %v2557_v43  ;;  %v13316_v27 = vadd.f32 %v13315_v24, %v13314_v7  ;;  %v13630_v53 = vpop.f32.mrf.mxu0  ;;  %v15286_v45 = vld [vmem:[%s20536_s20 + $0x7b4] ss:$8 sps:$4 sm:$0xff]   ;;  %v15203_v43 = vld [vmem:[%s20536_s20 + $0x4e0] ss:$8 sps:$4 sm:$0xff]  }
 0x354   : > { %v13317_v48 = vpop.f32.mrf.mxu1  ;;  %3361 = vmatmul.mubr.bf16.gmra.mxu1 %v15197_v25  ;;  %v17697_v62 = vadd.f32 %v13630_v53, %v13629_v30  ;;  %v20642_v30 = vld [vmem:[#allocation36_spill] sm:$0xff] }
 0x355   : > { %20639 = vst [vmem:[#allocation34_spill] sm:$0xff] %v17695_v16  ;;  %v2558_v18 = vadd.f32 %v13316_v27, %v20640_v52  ;;  %3368 = vmatprep.mubr.bf16.mxu1 %v15205_v22  ;;  %v13632_v59 = vpop.f32.mrf.mxu0  ;;  %v15211_v53 = vld [vmem:[%s20536_s20 + $0x4f4] ss:$8 sps:$4 sm:$0xff]  }
 0x356   : > { %v13318_v32 = vpop.f32.mrf.mxu1 }
 0x357   : > { %v17707_v24 = vadd.f32 %v17400_v40, %v2558_v18  ;;  %v13319_v0 = vadd.f32 %v13318_v32, %v13317_v48  ;;  %v13633_v7 = vpop.f32.mrf.mxu0 }
 0x358   : > { %v13320_v25 = vpop.f32.mrf.mxu1  ;;  %v17712_v22 = vadd.f32 %v13633_v7, %v13632_v59  ;;  %v20644_v59 = vld [vmem:[#allocation37_spill] sm:$0xff] }
 0x359   : > { %20641 = vst [vmem:[#allocation35_spill] sm:$0xff] %v17707_v24  ;;  %v2559_v27 = vadd.f32 %v13319_v0, %v20642_v30  ;;  %v13635_v52 = vpop.f32.mrf.mxu0  ;;  %4623 = vmatmul.mubr.bf16.gmra.mxu0 %v15278_v23  ;;  %v15284_v30 = vld [vmem:[%s20536_s20 + $0x7b0] ss:$8 sps:$4 sm:$0xff]  }
 0x35a   : > { %v13321_v16 = vpop.f32.mrf.mxu1  ;;  %4630 = vmatprep.mubr.bf16.mxu0 %v15286_v45 }
 0x35b   : > { %v17719_v40 = vadd.f32 %v17410_v51, %v2559_v27  ;;  %v13322_v48 = vadd.f32 %v13321_v16, %v13320_v25  ;;  %v13636_v18 = vpop.f32.mrf.mxu0  ;;  %v15292_v51 = vld [vmem:[%s20536_s20 + $0x7c4] ss:$8 sps:$4 sm:$0xff]   ;;  %v15209_v27 = vld [vmem:[%s20536_s20 + $0x4f0] ss:$8 sps:$4 sm:$0xff]  }
 0x35c   : > { %v13323_v32 = vpop.f32.mrf.mxu1  ;;  %3369 = vmatmul.mubr.bf16.gmra.mxu1 %v15203_v43  ;;  %v17721_v24 = vadd.f32 %v13636_v18, %v13635_v52  ;;  %v20646_v52 = vld [vmem:[#allocation38_spill] sm:$0xff] }
 0x35d   : > { %20643 = vst [vmem:[#allocation36_spill] sm:$0xff] %v17719_v40  ;;  %v2560_v7 = vadd.f32 %v13322_v48, %v20644_v59  ;;  %3376 = vmatprep.mubr.bf16.mxu1 %v15211_v53  ;;  %v13638_v0 = vpop.f32.mrf.mxu0  ;;  %v15217_v18 = vld [vmem:[%s20536_s20 + $0x604] ss:$8 sps:$4 sm:$0xff]  }
 0x35e   : > { %v13324_v23 = vpop.f32.mrf.mxu1 }
 0x35f   : > { %v17731_v16 = vadd.f32 %v17426_v60, %v2560_v7  ;;  %v13325_v45 = vadd.f32 %v13324_v23, %v13323_v32  ;;  %v13639_v25 = vpop.f32.mrf.mxu0 }
 0x360   : > { %v13326_v43 = vpop.f32.mrf.mxu1  ;;  %v17736_v53 = vadd.f32 %v13639_v25, %v13638_v0  ;;  %v20649_v0 = vld [vmem:[#allocation39_spill] sm:$0xff] }
 0x361   : > { %20645 = vst [vmem:[#allocation37_spill] sm:$0xff] %v17731_v16  ;;  %v2561_v48 = vadd.f32 %v13325_v45, %v20646_v52  ;;  %v13641_v59 = vpop.f32.mrf.mxu0  ;;  %4631 = vmatmul.mubr.bf16.gmra.mxu0 %v15284_v30  ;;  %v15290_v52 = vld [vmem:[%s20536_s20 + $0x7c0] ss:$8 sps:$4 sm:$0xff]  }
 0x362   : > { %v13327_v40 = vpop.f32.mrf.mxu1  ;;  %4638 = vmatprep.mubr.bf16.mxu0 %v15292_v51 }
 0x363   : > { %v17743_v60 = vadd.f32 %v17436_v36, %v2561_v48  ;;  %v13328_v32 = vadd.f32 %v13327_v40, %v13326_v43  ;;  %v13642_v7 = vpop.f32.mrf.mxu0  ;;  %v15298_v36 = vld [vmem:[%s20536_s20 + $0x7d4] ss:$8 sps:$4 sm:$0xff]   ;;  %v15215_v48 = vld [vmem:[%s20536_s20 + $0x600] ss:$8 sps:$4 sm:$0xff]  }
 0x364   : > { %v13329_v23 = vpop.f32.mrf.mxu1  ;;  %3377 = vmatmul.mubr.bf16.gmra.mxu1 %v15209_v27  ;;  %v17745_v16 = vadd.f32 %v13642_v7, %v13641_v59 }
 0x365   : > { %20647 = vst [vmem:[#allocation38_spill] sm:$0xff] %v17743_v60  ;;  %v2562_v25 = vadd.f32 %v13328_v32, %v20649_v0  ;;  %4092 = vmatprep.mubr.bf16.mxu1 %v15217_v18  ;;  %v13644_v45 = vpop.f32.mrf.mxu0  ;;  %v15223_v32 = vld [vmem:[%s20536_s20 + $0x614] ss:$8 sps:$4 sm:$0xff]  }
 0x366   : > { %20648 = vst [vmem:[#allocation43_spill] sm:$0xff] %v17745_v16  ;;  %v13330_v30 = vpop.f32.mrf.mxu1 }
 0x367   : > { %v17755_v40 = vadd.f32 %v17452_v9, %v2562_v25  ;;  %v13331_v51 = vadd.f32 %v13330_v30, %v13329_v23  ;;  %v13645_v43 = vpop.f32.mrf.mxu0  ;;  %v20653_v30 = vld [vmem:[#allocation27_spill] sm:$0xff] }
 0x368   : > { %v13332_v27 = vpop.f32.mrf.mxu1  ;;  %v17760_v18 = vadd.f32 %v13645_v43, %v13644_v45 }
 0x369   : > { %20650 = vst [vmem:[#allocation39_spill] sm:$0xff] %v17755_v40  ;;  %v2563_v59 = vadd.f32 %v13331_v51, %v17379_v15  ;;  %v13647_v7 = vpop.f32.mrf.mxu0  ;;  %4639 = vmatmul.mubr.bf16.gmra.mxu0 %v15290_v52  ;;  %v20654_v40 = vld [vmem:[#allocation22_spill] sm:$0xff] }
 0x36a   : > { %20651 = vst [vmem:[#allocation44_spill] sm:$0xff] %v17760_v18  ;;  %v13333_v0 = vpop.f32.mrf.mxu1  ;;  %4646 = vmatprep.mubr.bf16.mxu0 %v15298_v36  ;;  %v1418_v60 = vpack.c.bf16 %v20654_v40, %v20653_v30  ;;  %v20655_v51 = vld [vmem:[#allocation14_spill] sm:$0xff]  ;;  %v20656_v18 = vld [vmem:[#allocation17_spill] sm:$0xff] }
 0x36b   : > { %v17767_v9 = vadd.f32 %v17462_v37, %v2563_v59  ;;  %v13334_v23 = vadd.f32 %v13333_v0, %v13332_v27  ;;  %v13648_v25 = vpop.f32.mrf.mxu0  ;;  %v20657_v16 = vpack.c.bf16 %v20655_v51, %v20656_v18  ;;  %v15296_v37 = vld [vmem:[%s20536_s20 + $0x7d0] ss:$8 sps:$4 sm:$0xff]   ;;  %v15304_v40 = vld [vmem:[%s20536_s20 + $0x7e4] ss:$8 sps:$4 sm:$0xff]  }
 0x36c   : > { %v13335_v45 = vpop.f32.mrf.mxu1  ;;  %4093 = vmatmul.mubr.bf16.vlgmr.msra.gmra.mxu1 %v15215_v48  ;;  %v17771_v43 = vadd.f32 %v13648_v25, %v13647_v7  ;;  %v20658_v27 = vld [vmem:[#allocation23_spill] sm:$0xff]  ;;  %v15221_v7 = vld [vmem:[%s20536_s20 + $0x610] ss:$8 sps:$4 sm:$0xff]  }
 0x36d   : > { %20652 = vst [vmem:[#allocation45_spill] sm:$0xff] %v17767_v9  ;;  %v2564_v15 = vadd.f32 %v13334_v23, %v17387_v42  ;;  %13944 = vmatpush3.bf16.msra.mxu1 %v20657_v16  ;;  %4100 = vmatprep.mubr.bf16.mxu1 %v15223_v32  ;;  %v17777_v52 = vpop.f32.mrf.mxu0  ;;  %v20659_v48 = vld [vmem:[#allocation15_spill] sm:$0xff]  ;;  %v20667_v9 = vld [vmem:[#allocation18_spill] sm:$0xff] }
 0x36e   : > { %13945 = vmatprep.subr.bf16.mxu1 %v1418_v60  ;;  %v13336_v36 = vpop.f32.mrf.mxu1  ;;  %v1378_v42 = vpack.c.bf16 %v20659_v48, %v20658_v27  ;;  %v15229_v0 = vld [vmem:[%s20536_s20 + $0x624] ss:$8 sps:$4 sm:$0xff]   ;;  %v20664_v27 = vld [vmem:[#allocation29_spill] sm:$0xff] }
 0x36f   : > { %v17788_v59 = vadd.f32 %v17478_v46, %v2564_v15  ;;  %v13337_v16 = vadd.f32 %v13336_v36, %v13335_v45  ;;  %v17790_v18 = vpop.f32.mrf.mxu0  ;;  %v20661_v25 = vld [vmem:[#allocation31_spill] sm:$0xff]  ;;  %v20662_v46 = vld [vmem:[#allocation4_spill] sm:$0xff] }
 0x370   : > { %v13338_v32 = vpop.f32.mrf.mxu1  ;;  %v20663_v30 = vpack.c.bf16 %v20661_v25, %v20662_v46 }
 0x371   : > { %20660 = vst [vmem:[#allocation27_spill] sm:$0xff] %v17788_v59  ;;  %v2565_v60 = vadd.f32 %v13337_v16, %v17403_v3  ;;  %13946 = vmatpush3.bf16.msra.mxu1 %v1378_v42  ;;  %v13653_v23 = vpop.f32.mrf.mxu0  ;;  %4647 = vmatmul.mubr.bf16.gmra.mxu0 %v15296_v37  ;;  %v20665_v3 = vld [vmem:[#allocation25_spill] sm:$0xff]  ;;  %v20666_v59 = vld [vmem:[#allocation26_spill] sm:$0xff] }
 0x372   : > { %13947 = vmatprep.subr.bf16.mxu1 %v20663_v30  ;;  %v13339_v45 = vpop.f32.mrf.mxu1  ;;  %4654 = vmatprep.mubr.bf16.mxu0 %v15304_v40  ;;  %v1408_v48 = vpack.c.bf16 %v20665_v3, %v20664_v27  ;;  %v20668_v25 = vpack.c.bf16 %v20666_v59, %v20667_v9  ;;  %v15227_v30 = vld [vmem:[%s20536_s20 + $0x620] ss:$8 sps:$4 sm:$0xff]   ;;  %v20672_v27 = vld [vmem:[#allocation32_spill] sm:$0xff] }
 0x373   : > { %v17803_v15 = vadd.f32 %v17490_v13, %v2565_v60  ;;  %v13340_v51 = vadd.f32 %v13339_v45, %v13338_v32  ;;  %v13654_v36 = vpop.f32.mrf.mxu0  ;;  %v15302_v13 = vld [vmem:[%s20536_s20 + $0x7e0] ss:$8 sps:$4 sm:$0xff]  }
 0x374   : > { %v13341_v42 = vpop.f32.mrf.mxu1  ;;  %4101 = vmatmul.mubr.bf16.gmra.mxu1 %v15221_v7  ;;  %v17807_v16 = vadd.f32 %v13654_v36, %v13653_v23  ;;  %v15310_v7 = vld [vmem:[%s20536_s20 + $0x7f4] ss:$8 sps:$4 sm:$0xff]   ;;  %v20669_v60 = vld [vmem:[#allocation19_spill] sm:$0xff] }
 0x375   : > { %v2566_v37 = vadd.f32 %v13340_v51, %v17413_v61  ;;  %13948 = vmatpush3.bf16.msra.mxu1 %v20668_v25  ;;  %4108 = vmatprep.mubr.bf16.mxu1 %v15229_v0  ;;  %v17813_v40 = vpop.f32.mrf.mxu0  ;;  %v20670_v23 = vld [vmem:[#allocation16_spill] sm:$0xff] }
 0x376   : > { %13949 = vmatprep.subr.bf16.mxu1 %v1408_v48  ;;  %v13342_v32 = vpop.f32.mrf.mxu1  ;;  %v1368_v61 = vpack.c.bf16 %v20670_v23, %v20669_v60  ;;  %v15235_v51 = vld [vmem:[%s20536_s20 + $0x634] ss:$8 sps:$4 sm:$0xff]  }
 0x377   : > { %v17824_v46 = vadd.f32 %v17504_v35, %v2566_v37  ;;  %v13343_v9 = vadd.f32 %v13342_v32, %v13341_v42  ;;  %v17826_v59 = vpop.f32.mrf.mxu0  ;;  %v20673_v35 = vld [vmem:[#allocation5_spill] sm:$0xff]  ;;  %v20675_v32 = vld [vmem:[#allocation7_spill] sm:$0xff] }
 0x378   : > { %v13344_v0 = vpop.f32.mrf.mxu1  ;;  %v20674_v3 = vpack.c.bf16 %v20672_v27, %v20673_v35  ;;  %v20681_v35 = vld [vmem:[#allocation3_spill] sm:$0xff] }
 0x379   : > { %20671 = vst [vmem:[#allocation22_spill] sm:$0xff] %v17824_v46  ;;  %v2567_v45 = vadd.f32 %v13343_v9, %v17429_v2  ;;  %13950 = vmatpush3.bf16.msra.mxu1 %v1368_v61  ;;  %v13659_v36 = vpop.f32.mrf.mxu0  ;;  %4655 = vmatmul.mubr.bf16.gmra.mxu0 %v15302_v13  ;;  %v20676_v2 = vld [vmem:[#allocation2_spill] sm:$0xff]  ;;  %v20677_v9 = vld [vmem:[#allocation21_spill] sm:$0xff] }
 0x37a   : > { %13951 = vmatprep.subr.bf16.mxu1 %v20674_v3  ;;  %v13345_v48 = vpop.f32.mrf.mxu1  ;;  %4662 = vmatprep.mubr.bf16.mxu0 %v15310_v7  ;;  %v1398_v60 = vpack.c.bf16 %v20676_v2, %v20675_v32  ;;  %v20678_v46 = vld [vmem:[#allocation6_spill] sm:$0xff]  ;;  %v20683_v32 = vld [vmem:[#allocation8_spill] sm:$0xff] }
 0x37b   : > { %v17839_v42 = vadd.f32 %v17512_v57, %v2567_v45  ;;  %v13346_v37 = vadd.f32 %v13345_v48, %v13344_v0  ;;  %v13660_v25 = vpop.f32.mrf.mxu0  ;;  %v20679_v27 = vpack.c.bf16 %v20677_v9, %v20678_v46  ;;  %v15308_v57 = vld [vmem:[%s20536_s20 + $0x7f0] ss:$8 sps:$4 sm:$0xff]  }
 0x37c   : > { %v13347_v23 = vpop.f32.mrf.mxu1  ;;  %4109 = vmatmul.mubr.bf16.gmra.mxu1 %v15227_v30  ;;  %v17843_v61 = vadd.f32 %v13660_v25, %v13659_v36  ;;  %v20680_v45 = vld [vmem:[#allocation20_spill] sm:$0xff] }
 0x37d   : > { %v2568_v13 = vadd.f32 %v13346_v37, %v17439_v33  ;;  %13952 = vmatpush3.bf16.msra.mxu1 %v20679_v27  ;;  %4116 = vmatprep.mubr.bf16.mxu1 %v15235_v51  ;;  %v17849_v7 = vpop.f32.mrf.mxu0  ;;  %v1358_v30 = vpack.c.bf16 %v20681_v35, %v20680_v45  ;;  %v15233_v51 = vld [vmem:[%s20536_s20 + $0x630] ss:$8 sps:$4 sm:$0xff]   ;;  %v15241_v37 = vld [vmem:[%s20536_s20 + $0x644] ss:$8 sps:$4 sm:$0xff]  }
 0x37e   : > { %13953 = vmatprep.subr.bf16.mxu1 %v1398_v60  ;;  %v13348_v0 = vpop.f32.mrf.mxu1  ;;  %v20686_v27 = vld [vmem:[#allocation13_spill] sm:$0xff] }
 0x37f   : > { %v17857_v36 = vadd.f32 %v17526_v8, %v2568_v13  ;;  %v13349_v33 = vadd.f32 %v13348_v0, %v13347_v23  ;;  %v17859_v3 = vpop.f32.mrf.mxu0  ;;  %v20684_v8 = vld [vmem:[#allocation11_spill] sm:$0xff]  ;;  %v20687_v0 = vld [vmem:[#allocation10_spill] sm:$0xff] }
 0x380   : > { %v13350_v46 = vpop.f32.mrf.mxu1  ;;  %v20685_v2 = vpack.c.bf16 %v20683_v32, %v20684_v8 }
 0x381   : > { %20682 = vst [vmem:[#allocation14_spill] sm:$0xff] %v17857_v36  ;;  %v2569_v48 = vadd.f32 %v13349_v33, %v17455_v58  ;;  %13954 = vmatpush3.bf16.msra.mxu1 %v1358_v30  ;;  %v13665_v25 = vpop.f32.mrf.mxu0  ;;  %4663 = vmatmul.mubr.bf16.gmra.mxu0 %v15308_v57  ;;  %v1388_v58 = vpack.c.bf16 %v20687_v0, %v20686_v27  ;;  %v20688_v57 = vld [vmem:[#allocation28_spill] sm:$0xff] }
 0x382   : > { %13955 = vmatprep.subr.bf16.mxu1 %v20685_v2  ;;  %v13351_v60 = vpop.f32.mrf.mxu1  ;;  %v20689_v33 = vld [vmem:[#allocation12_spill] sm:$0xff] }
 0x383   : > { %v17872_v23 = vadd.f32 %v17534_v54, %v2569_v48  ;;  %v13352_v13 = vadd.f32 %v13351_v60, %v13350_v46  ;;  %v13666_v9 = vpop.f32.mrf.mxu0  ;;  %v20690_v36 = vpack.c.bf16 %v20688_v57, %v20689_v33  ;;  %v20691_v46 = vld [vmem:[#allocation9_spill] sm:$0xff]  ;;  %v20692_v48 = vld [vmem:[#allocation30_spill] sm:$0xff] }
 0x384   : > { %v13353_v45 = vpop.f32.mrf.mxu1  ;;  %4117 = vmatmul.mubr.bf16.gmra.mxu1 %v15233_v51  ;;  %v17876_v35 = vadd.f32 %v13666_v9, %v13665_v25  ;;  %v1348_v8 = vpack.c.bf16 %v20692_v48, %v20691_v46  ;;  %v15245_v48 = vld [vmem:[%s20536_s20 + $0x650] ss:$8 sps:$4 sm:$0xff]  }
 0x385   : > { %v2570_v30 = vadd.f32 %v13352_v13, %v17465_v41  ;;  %13956 = vmatpush3.bf16.msra.mxu1 %v20690_v36  ;;  %4124 = vmatprep.mubr.bf16.mxu1 %v15241_v37  ;;  %v17882_v32 = vpop.f32.mrf.mxu0  ;;  %v15239_v41 = vld [vmem:[%s20536_s20 + $0x640] ss:$8 sps:$4 sm:$0xff]   ;;  %v15247_v37 = vld [vmem:[%s20536_s20 + $0x654] ss:$8 sps:$4 sm:$0xff]  }
 0x386   : > { %13957 = vmatprep.subr.bf16.mxu1 %v1388_v58  ;;  %v13354_v54 = vpop.f32.mrf.mxu1 }
 0x387   : > { %v17887_v2 = vadd.f32 %v17548_v21, %v2570_v30  ;;  %v13355_v51 = vadd.f32 %v13354_v54, %v13353_v45  ;;  %v17889_v25 = vpop.f32.mrf.mxu0 }
 0x388   : > { %v13356_v60 = vpop.f32.mrf.mxu1 }
 0x389   : > { %v2571_v36 = vadd.f32 %v13355_v51, %v17481_v55  ;;  %13958 = vmatpush3.bf16.msra.mxu1 %v1348_v8  ;;  %v13671_v13 = vpop.f32.mrf.mxu0 }
 0x38a   : > { %v13357_v9 = vpop.f32.mrf.mxu1 }
 0x38b   : > { %v17899_v21 = vadd.f32 %v17556_v47, %v2571_v36  ;;  %v13358_v27 = vadd.f32 %v13357_v9, %v13356_v60  ;;  %v13672_v0 = vpop.f32.mrf.mxu0 }
 0x38c   : > { %v13359_v58 = vpop.f32.mrf.mxu1  ;;  %4125 = vmatmul.mubr.bf16.gmra.mxu1 %v15239_v41  ;;  %v17901_v45 = vadd.f32 %v13672_v0, %v13671_v13 }
 0x38d   : > { %v2572_v30 = vadd.f32 %v13358_v27, %v17493_v38  ;;  %4132 = vmatprep.mubr.bf16.mxu1 %v15247_v37  ;;  %v17904_v55 = vpop.f32.mrf.mxu0  ;;  %v15253_v38 = vld [vmem:[%s20536_s20 + $0x664] ss:$8 sps:$4 sm:$0xff]  }
 0x38e   : > { %v13360_v57 = vpop.f32.mrf.mxu1 }
 0x38f   : > { %v17907_v33 = vadd.f32 %v17570_v39, %v2572_v30  ;;  %v13361_v54 = vadd.f32 %v13360_v57, %v13359_v58  ;;  %v17909_v46 = vpop.f32.mrf.mxu0  ;;  %v15251_v57 = vld [vmem:[%s20536_s20 + $0x660] ss:$8 sps:$4 sm:$0xff]  }
 0x390   : > { %v13362_v47 = vpop.f32.mrf.mxu1 }
 0x391   : > { %v2573_v8 = vadd.f32 %v13361_v54, %v17507_v26  ;;  %v13677_v51 = vpop.f32.mrf.mxu0 }
 0x392   : > { %v13363_v60 = vpop.f32.mrf.mxu1 }
 0x393   : > { %v17919_v41 = vadd.f32 %v17578_v14, %v2573_v8  ;;  %v13364_v39 = vadd.f32 %v13363_v60, %v13362_v47  ;;  %v13678_v36 = vpop.f32.mrf.mxu0 }
 0x394   : > { %v13365_v37 = vpop.f32.mrf.mxu1  ;;  %4133 = vmatmul.mubr.bf16.gmra.mxu1 %v15245_v48  ;;  %v17921_v13 = vadd.f32 %v13678_v36, %v13677_v51 }
 0x395   : > { %v2574_v9 = vadd.f32 %v13364_v39, %v17515_v44  ;;  %4140 = vmatprep.mubr.bf16.mxu1 %v15253_v38  ;;  %v17924_v27 = vpop.f32.mrf.mxu0  ;;  %v15259_v44 = vld [vmem:[%s20536_s20 + $0x674] ss:$8 sps:$4 sm:$0xff]  }
 0x396   : > { %v13366_v26 = vpop.f32.mrf.mxu1 }
 0x397   : > { %v17927_v0 = vadd.f32 %v17592_v34, %v2574_v9  ;;  %v13367_v58 = vadd.f32 %v13366_v26, %v13365_v37  ;;  %v17929_v30 = vpop.f32.mrf.mxu0 }
 0x398   : > { %v13368_v14 = vpop.f32.mrf.mxu1 }
 0x399   : > { %v2575_v54 = vadd.f32 %v13367_v58, %v17529_v12  ;;  %v13683_v47 = vpop.f32.mrf.mxu0  ;;  %v15257_v58 = vld [vmem:[%s20536_s20 + $0x670] ss:$8 sps:$4 sm:$0xff]  }
 0x39a   : > { %v13369_v48 = vpop.f32.mrf.mxu1 }
 0x39b   : > { %v17939_v8 = vadd.f32 %v17601_v49, %v2575_v54  ;;  %v13370_v34 = vadd.f32 %v13369_v48, %v13368_v14  ;;  %v13684_v38 = vpop.f32.mrf.mxu0 }
 0x39c   : > { %v13371_v51 = vpop.f32.mrf.mxu1  ;;  %4141 = vmatmul.mubr.bf16.gmra.mxu1 %v15251_v57  ;;  %v17941_v60 = vadd.f32 %v13684_v38, %v13683_v47 }
 0x39d   : > { %v2576_v39 = vadd.f32 %v13370_v34, %v17537_v4  ;;  %4148 = vmatprep.mubr.bf16.mxu1 %v15259_v44  ;;  %v17944_v36 = vpop.f32.mrf.mxu0  ;;  %v15265_v4 = vld [vmem:[%s20536_s20 + $0x684] ss:$8 sps:$4 sm:$0xff]  }
 0x39e   : > { %v13372_v12 = vpop.f32.mrf.mxu1 }
 0x39f   : > { %v17947_v37 = vadd.f32 %v17616_v19, %v2576_v39  ;;  %v13373_v9 = vadd.f32 %v13372_v12, %v13371_v51  ;;  %v17949_v26 = vpop.f32.mrf.mxu0 }
 0x3a0   : > { %v13374_v49 = vpop.f32.mrf.mxu1 }
 0x3a1   : > { %20693 = vst [vmem:[#allocation17_spill] sm:$0xff] %v17947_v37  ;;  %v2577_v14 = vadd.f32 %v13373_v9, %v17551_v6  ;;  %v13689_v57 = vpop.f32.mrf.mxu0 }
 0x3a2   : > { %v13375_v54 = vpop.f32.mrf.mxu1 }
 0x3a3   : > { %v17959_v44 = vadd.f32 %v17625_v56, %v2577_v14  ;;  %v13376_v19 = vadd.f32 %v13375_v54, %v13374_v49  ;;  %v13690_v47 = vpop.f32.mrf.mxu0  ;;  %v15263_v49 = vld [vmem:[%s20536_s20 + $0x680] ss:$8 sps:$4 sm:$0xff]  }
 0x3a4   : > { %v13377_v48 = vpop.f32.mrf.mxu1  ;;  %4149 = vmatmul.mubr.bf16.gmra.mxu1 %v15257_v58  ;;  %v17961_v34 = vadd.f32 %v13690_v47, %v13689_v57  ;;  %v20696_v58 = vld [vmem:[#allocation40_spill] sm:$0xff] }
 0x3a5   : > { %20694 = vst [vmem:[#allocation23_spill] sm:$0xff] %v17959_v44  ;;  %v2578_v38 = vadd.f32 %v13376_v19, %v17559_v10  ;;  %4156 = vmatprep.mubr.bf16.mxu1 %v15265_v4  ;;  %v17964_v51 = vpop.f32.mrf.mxu0  ;;  %v15271_v10 = vld [vmem:[%s20536_s20 + $0x694] ss:$8 sps:$4 sm:$0xff]  }
 0x3a6   : > { %v13378_v6 = vpop.f32.mrf.mxu1 }
 0x3a7   : > { %v17967_v39 = vadd.f32 %v17640_v29, %v2578_v38  ;;  %v13379_v12 = vadd.f32 %v13378_v6, %v13377_v48  ;;  %v17969_v9 = vpop.f32.mrf.mxu0  ;;  %v20697_v38 = vld [vmem:[#allocation41_spill] sm:$0xff] }
 0x3a8   : > { %v13380_v56 = vpop.f32.mrf.mxu1 }
 0x3a9   : > { %20695 = vst [vmem:[#allocation15_spill] sm:$0xff] %v17967_v39  ;;  %v2579_v14 = vadd.f32 %v13379_v12, %v20696_v58  ;;  %v13695_v4 = vpop.f32.mrf.mxu0 }
 0x3aa   : > { %v13381_v57 = vpop.f32.mrf.mxu1 }
 0x3ab   : > { %v17979_v54 = vadd.f32 %v17649_v1, %v2579_v14  ;;  %v13382_v29 = vadd.f32 %v13381_v57, %v13380_v56  ;;  %v13696_v19 = vpop.f32.mrf.mxu0  ;;  %v15269_v56 = vld [vmem:[%s20536_s20 + $0x690] ss:$8 sps:$4 sm:$0xff]   ;;  %v15277_v14 = vld [vmem:[%s20536_s20 + $0x6a4] ss:$8 sps:$4 sm:$0xff]  }
 0x3ac   : > { %v13511_v47 = vpop.f32.mrf.mxu1  ;;  %4157 = vmatmul.mubr.bf16.gmra.mxu1 %v15263_v49  ;;  %v17981_v48 = vadd.f32 %v13696_v19, %v13695_v4 }
 0x3ad   : > { %v2580_v6 = vadd.f32 %v13382_v29, %v20697_v38  ;;  %4164 = vmatprep.mubr.bf16.mxu1 %v15271_v10  ;;  %v17984_v39 = vpop.f32.mrf.mxu0 }
 0x3ae   : > { %v13512_v12 = vpop.f32.mrf.mxu1 }
 0x3af   : > { %v17987_v58 = vadd.f32 %v17664_v5, %v2580_v6  ;;  %v13513_v44 = vadd.f32 %v13512_v12, %v13511_v47  ;;  %v17989_v37 = vpop.f32.mrf.mxu0 }
 0x3b0   : > { %v13514_v1 = vpop.f32.mrf.mxu1 }
 0x3b1   : > { %20698 = vst [vmem:[#allocation31_spill] sm:$0xff] %v17987_v58  ;;  %v3385_v49 = vadd.f32 %v13513_v44, %v17599_v31  ;;  %v13701_v10 = vpop.f32.mrf.mxu0 }
 0x3b2   : > { %v13515_v4 = vpop.f32.mrf.mxu1 }
 0x3b3   : > { %v17999_v57 = vadd.f32 %v17673_v20, %v3385_v49  ;;  %v13516_v5 = vadd.f32 %v13515_v4, %v13514_v1  ;;  %v13702_v29 = vpop.f32.mrf.mxu0  ;;  %v15275_v1 = vld [vmem:[%s20536_s20 + $0x6a0] ss:$8 sps:$4 sm:$0xff]  }
 0x3b4   : > { %v13517_v19 = vpop.f32.mrf.mxu1  ;;  %4165 = vmatmul.mubr.bf16.gmra.mxu1 %v15269_v56  ;;  %v18001_v47 = vadd.f32 %v13702_v29, %v13701_v10 }
 0x3b5   : > { %20699 = vst [vmem:[#allocation4_spill] sm:$0xff] %v17999_v57  ;;  %v3386_v38 = vadd.f32 %v13516_v5, %v17611_v17  ;;  %4172 = vmatprep.mubr.bf16.mxu1 %v15277_v14  ;;  %v18004_v6 = vpop.f32.mrf.mxu0  ;;  %v15283_v17 = vld [vmem:[%s20536_s20 + $0x6b4] ss:$8 sps:$4 sm:$0xff]  }
 0x3b6   : > { %v13518_v31 = vpop.f32.mrf.mxu1 }
 0x3b7   : > { %v18007_v44 = vadd.f32 %v17688_v28, %v3386_v38  ;;  %v13519_v12 = vadd.f32 %v13518_v31, %v13517_v19  ;;  %v18009_v58 = vpop.f32.mrf.mxu0 }
 0x3b8   : > { %v13520_v20 = vpop.f32.mrf.mxu1 }
 0x3b9   : > { %20700 = vst [vmem:[#allocation29_spill] sm:$0xff] %v18007_v44  ;;  %v3387_v56 = vadd.f32 %v13519_v12, %v17623_v50  ;;  %v13707_v49 = vpop.f32.mrf.mxu0 }
 0x3ba   : > { %v13521_v14 = vpop.f32.mrf.mxu1 }
 0x3bb   : > { %v18019_v10 = vadd.f32 %v17697_v62, %v3387_v56  ;;  %v13522_v28 = vadd.f32 %v13521_v14, %v13520_v20  ;;  %v13708_v4 = vpop.f32.mrf.mxu0  ;;  %v15281_v20 = vld [vmem:[%s20536_s20 + $0x6b0] ss:$8 sps:$4 sm:$0xff]  }
 0x3bc   : > { %v13523_v5 = vpop.f32.mrf.mxu1  ;;  %4173 = vmatmul.mubr.bf16.gmra.mxu1 %v15275_v1  ;;  %v18021_v29 = vadd.f32 %v13708_v4, %v13707_v49 }
 0x3bd   : > { %20701 = vst [vmem:[#allocation25_spill] sm:$0xff] %v18019_v10  ;;  %v3388_v19 = vadd.f32 %v13522_v28, %v17635_v63  ;;  %4180 = vmatprep.mubr.bf16.mxu1 %v15283_v17  ;;  %v18024_v38 = vpop.f32.mrf.mxu0  ;;  %v15289_v63 = vld [vmem:[%s20536_s20 + $0x6c4] ss:$8 sps:$4 sm:$0xff]  }
 0x3be   : > { %v13524_v50 = vpop.f32.mrf.mxu1 }
 0x3bf   : > { %v18027_v31 = vadd.f32 %v17712_v22, %v3388_v19  ;;  %v13525_v12 = vadd.f32 %v13524_v50, %v13523_v5  ;;  %v18029_v44 = vpop.f32.mrf.mxu0  ;;  %v20704_v5 = vld [vmem:[#allocation42_spill] sm:$0xff] }
 0x3c0   : > { %v13526_v62 = vpop.f32.mrf.mxu1 }
 0x3c1   : > { %20702 = vst [vmem:[#allocation26_spill] sm:$0xff] %v18027_v31  ;;  %v3389_v1 = vadd.f32 %v13525_v12, %v17647_v11  ;;  %v13713_v56 = vpop.f32.mrf.mxu0 }
 0x3c2   : > { %v13527_v17 = vpop.f32.mrf.mxu1 }
 0x3c3   : > { %v18039_v49 = vadd.f32 %v17721_v24, %v3389_v1  ;;  %v13528_v22 = vadd.f32 %v13527_v17, %v13526_v62  ;;  %v13714_v14 = vpop.f32.mrf.mxu0  ;;  %v15287_v62 = vld [vmem:[%s20536_s20 + $0x6c0] ss:$8 sps:$4 sm:$0xff]  }
 0x3c4   : > { %v13529_v28 = vpop.f32.mrf.mxu1  ;;  %4181 = vmatmul.mubr.bf16.gmra.mxu1 %v15281_v20  ;;  %v18041_v4 = vadd.f32 %v13714_v14, %v13713_v56  ;;  %v20708_v20 = vld [vmem:[#allocation24_spill] sm:$0xff] }
 0x3c5   : > { %20703 = vst [vmem:[#allocation18_spill] sm:$0xff] %v18039_v49  ;;  %v3390_v19 = vadd.f32 %v13528_v22, %v20704_v5  ;;  %4188 = vmatprep.mubr.bf16.mxu1 %v15289_v63  ;;  %v18044_v50 = vpop.f32.mrf.mxu0  ;;  %v15295_v63 = vld [vmem:[%s20536_s20 + $0x6d4] ss:$8 sps:$4 sm:$0xff]   ;;  %v20709_v22 = vld [vmem:[#allocation43_spill] sm:$0xff] }
 0x3c6   : > { %20705 = vst [vmem:[#allocation19_spill] sm:$0xff] %v18044_v50  ;;  %v13530_v11 = vpop.f32.mrf.mxu1 }
 0x3c7   : > { %v18047_v12 = vadd.f32 %v17736_v53, %v3390_v19  ;;  %v13531_v31 = vadd.f32 %v13530_v11, %v13529_v28  ;;  %v18049_v10 = vpop.f32.mrf.mxu0  ;;  %v20711_v11 = vld [vmem:[#allocation33_spill] sm:$0xff] }
 0x3c8   : > { %20707 = vst [vmem:[#allocation32_spill] sm:$0xff] %v18049_v10  ;;  %v13532_v24 = vpop.f32.mrf.mxu1 }
 0x3c9   : > { %20706 = vst [vmem:[#allocation16_spill] sm:$0xff] %v18047_v12  ;;  %v3391_v1 = vadd.f32 %v13531_v31, %v20708_v20  ;;  %v13847_v56 = vpop.f32.mrf.mxu0  ;;  %v20712_v20 = vld [vmem:[#allocation44_spill] sm:$0xff] }
 0x3ca   : > { %v13533_v17 = vpop.f32.mrf.mxu1 }
 0x3cb   : > { %v18059_v14 = vadd.f32 %v20709_v22, %v3391_v1  ;;  %v13534_v53 = vadd.f32 %v13533_v17, %v13532_v24  ;;  %v13848_v28 = vpop.f32.mrf.mxu0  ;;  %v15293_v24 = vld [vmem:[%s20536_s20 + $0x6d0] ss:$8 sps:$4 sm:$0xff]  }
 0x3cc   : > { %v13535_v5 = vpop.f32.mrf.mxu1  ;;  %4189 = vmatmul.mubr.bf16.gmra.mxu1 %v15287_v62  ;;  %v18061_v19 = vadd.f32 %v13848_v28, %v13847_v56  ;;  %v20715_v62 = vld [vmem:[#allocation34_spill] sm:$0xff]  ;;  %v13652_v28 = vadd.f32 %v17790_v18, %v17777_v52  ;;  %v20719_v18 = vld [vmem:[#allocation36_spill] sm:$0xff] }
 0x3cd   : > { %20710 = vst [vmem:[#allocation5_spill] sm:$0xff] %v18059_v14  ;;  %v3392_v12 = vadd.f32 %v13534_v53, %v20711_v11  ;;  %4196 = vmatprep.mubr.bf16.mxu1 %v15295_v63  ;;  %v18064_v49 = vpop.f32.mrf.mxu0  ;;  %v15301_v63 = vld [vmem:[%s20536_s20 + $0x6e4] ss:$8 sps:$4 sm:$0xff]   ;;  %v15299_v52 = vld [vmem:[%s20536_s20 + $0x6e0] ss:$8 sps:$4 sm:$0xff]  }
 0x3ce   : > { %v13536_v31 = vpop.f32.mrf.mxu1 }
 0x3cf   : > { %v18067_v57 = vadd.f32 %v20712_v20, %v3392_v12  ;;  %v13537_v10 = vadd.f32 %v13536_v31, %v13535_v5  ;;  %v18069_v50 = vpop.f32.mrf.mxu0  ;;  %v20717_v20 = vld [vmem:[#allocation35_spill] sm:$0xff] }
 0x3d0   : > { %20714 = vst [vmem:[#allocation2_spill] sm:$0xff] %v18069_v50  ;;  %v13538_v1 = vpop.f32.mrf.mxu1 }
 0x3d1   : > { %20713 = vst [vmem:[#allocation7_spill] sm:$0xff] %v18067_v57  ;;  %v3393_v56 = vadd.f32 %v13537_v10, %v20715_v62  ;;  %v13853_v17 = vpop.f32.mrf.mxu0 }
 0x3d2   : > { %v13539_v22 = vpop.f32.mrf.mxu1 }
 0x3d3   : > { %v18079_v53 = vadd.f32 %v17771_v43, %v3393_v56  ;;  %v13540_v12 = vadd.f32 %v13539_v22, %v13538_v1  ;;  %v13854_v5 = vpop.f32.mrf.mxu0  ;;  %v15307_v56 = vld [vmem:[%s20536_s20 + $0x6f4] ss:$8 sps:$4 sm:$0xff]  }
 0x3d4   : > { %v13541_v11 = vpop.f32.mrf.mxu1  ;;  %4197 = vmatmul.mubr.bf16.gmra.mxu1 %v15293_v24  ;;  %v18083_v31 = vadd.f32 %v13854_v5, %v13853_v17 }
 0x3d5   : > { %20716 = vst [vmem:[#allocation21_spill] sm:$0xff] %v18079_v53  ;;  %v3394_v10 = vadd.f32 %v13540_v12, %v20717_v20  ;;  %4204 = vmatprep.mubr.bf16.mxu1 %v15301_v63  ;;  %v18086_v62 = vpop.f32.mrf.mxu0  ;;  %v20721_v20 = vld [vmem:[#allocation37_spill] sm:$0xff] }
 0x3d6   : > { %v13542_v57 = vpop.f32.mrf.mxu1 }
 0x3d7   : > { %v18088_v14 = vadd.f32 %v13652_v28, %v3394_v10  ;;  %v13543_v50 = vadd.f32 %v13542_v57, %v13541_v11  ;;  %v18090_v43 = vpop.f32.mrf.mxu0  ;;  %v13658_v57 = vadd.f32 %v17826_v59, %v17813_v40  ;;  %v15305_v40 = vld [vmem:[%s20536_s20 + $0x6f0] ss:$8 sps:$4 sm:$0xff]   ;;  %v20723_v59 = vld [vmem:[#allocation38_spill] sm:$0xff] }
 0x3d8   : > { %v13544_v1 = vpop.f32.mrf.mxu1 }
 0x3d9   : > { %20718 = vst [vmem:[#allocation6_spill] sm:$0xff] %v18088_v14  ;;  %v3395_v24 = vadd.f32 %v13543_v50, %v20719_v18  ;;  %v13859_v63 = vpop.f32.mrf.mxu0 }
 0x3da   : > { %v13545_v17 = vpop.f32.mrf.mxu1 }
 0x3db   : > { %v18100_v22 = vadd.f32 %v17807_v16, %v3395_v24  ;;  %v13546_v12 = vadd.f32 %v13545_v17, %v13544_v1  ;;  %v13860_v28 = vpop.f32.mrf.mxu0  ;;  %v15313_v24 = vld [vmem:[%s20536_s20 + $0x804] ss:$8 sps:$4 sm:$0xff]  }
 0x3dc   : > { %v13547_v5 = vpop.f32.mrf.mxu1  ;;  %4205 = vmatmul.mubr.bf16.gmra.mxu1 %v15299_v52  ;;  %v18104_v11 = vadd.f32 %v13860_v28, %v13859_v63 }
 0x3dd   : > { %20720 = vst [vmem:[#allocation20_spill] sm:$0xff] %v18100_v22  ;;  %v3396_v50 = vadd.f32 %v13546_v12, %v20721_v20  ;;  %4212 = vmatprep.mubr.bf16.mxu1 %v15307_v56  ;;  %v18107_v10 = vpop.f32.mrf.mxu0 }
 0x3de   : > { %v13548_v18 = vpop.f32.mrf.mxu1 }
 0x3df   : > { %v18109_v14 = vadd.f32 %v13658_v57, %v3396_v50  ;;  %v13549_v53 = vadd.f32 %v13548_v18, %v13547_v5  ;;  %v18111_v16 = vpop.f32.mrf.mxu0  ;;  %v13664_v57 = vadd.f32 %v17859_v3, %v17849_v7  ;;  %v20725_v50 = vld [vmem:[#allocation39_spill] sm:$0xff]  ;;  %v20727_v3 = vld [vmem:[#allocation45_spill] sm:$0xff] }
 0x3e0   : > { %v13550_v1 = vpop.f32.mrf.mxu1  ;;  %v15311_v7 = vld [vmem:[%s20536_s20 + $0x800] ss:$8 sps:$4 sm:$0xff]  }
 0x3e1   : > { %20722 = vst [vmem:[#allocation3_spill] sm:$0xff] %v18109_v14  ;;  %v3397_v52 = vadd.f32 %v13549_v53, %v20723_v59  ;;  %v13865_v56 = vpop.f32.mrf.mxu0 }
 0x3e2   : > { %v13551_v63 = vpop.f32.mrf.mxu1 }
 0x3e3   : > { %v18121_v17 = vadd.f32 %v17843_v61, %v3397_v52  ;;  %v13552_v12 = vadd.f32 %v13551_v63, %v13550_v1  ;;  %v13866_v28 = vpop.f32.mrf.mxu0  ;;  %v15316_v52 = vld [vmem:[%s20536_s20 + $0x814] ss:$8 sps:$4 sm:$0xff]  }
 0x3e4   : > { %v13553_v5 = vpop.f32.mrf.mxu1  ;;  %4213 = vmatmul.mubr.bf16.gmra.mxu1 %v15305_v40  ;;  %v18125_v20 = vadd.f32 %v13866_v28, %v13865_v56 }
 0x3e5   : > { %20724 = vst [vmem:[#allocation8_spill] sm:$0xff] %v18121_v17  ;;  %v3398_v53 = vadd.f32 %v13552_v12, %v20725_v50  ;;  %4928 = vmatprep.mubr.bf16.mxu1 %v15313_v24  ;;  %v18128_v18 = vpop.f32.mrf.mxu0 }
 0x3e6   : > { %v13554_v59 = vpop.f32.mrf.mxu1 }
 0x3e7   : > { %v18130_v14 = vadd.f32 %v13664_v57, %v3398_v53  ;;  %v13555_v22 = vadd.f32 %v13554_v59, %v13553_v5  ;;  %v18132_v61 = vpop.f32.mrf.mxu0  ;;  %v13670_v57 = vadd.f32 %v17889_v25, %v17882_v32  ;;  %v20728_v53 = vld [vmem:[#allocation27_spill] sm:$0xff]  ;;  %v15314_v32 = vld [vmem:[%s20536_s20 + $0x810] ss:$8 sps:$4 sm:$0xff]  }
 0x3e8   : > { %v13556_v1 = vpop.f32.mrf.mxu1 }
 0x3e9   : > { %20726 = vst [vmem:[#allocation11_spill] sm:$0xff] %v18130_v14  ;;  %v3399_v40 = vadd.f32 %v13555_v22, %v20727_v3  ;;  %v13871_v24 = vpop.f32.mrf.mxu0 }
 0x3ea   : > { %v13557_v56 = vpop.f32.mrf.mxu1 }
 0x3eb   : > { %v18142_v63 = vadd.f32 %v17876_v35, %v3399_v40  ;;  %v13558_v12 = vadd.f32 %v13557_v56, %v13556_v1  ;;  %v13872_v28 = vpop.f32.mrf.mxu0 }
 0x3ec   : > { %v13559_v5 = vpop.f32.mrf.mxu1  ;;  %4929 = vmatmul.mubr.bf16.vlgmr.msra.gmra.mxu1 %v15311_v7  ;;  %v18146_v50 = vadd.f32 %v13872_v28, %v13871_v24  ;;  %v15319_v7 = vld [vmem:[%s20536_s20 + $0x824] ss:$8 sps:$4 sm:$0xff]  }
 0x3ed   : > { %v3400_v22 = vadd.f32 %v13558_v12, %v20728_v53  ;;  %4936 = vmatprep.mubr.bf16.mxu1 %v15316_v52  ;;  %v18149_v59 = vpop.f32.mrf.mxu0  ;;  %v13676_v12 = vadd.f32 %v17909_v46, %v17904_v55  ;;  %v20730_v53 = vld [vmem:[#allocation22_spill] sm:$0xff] }
 0x3ee   : > { %v13560_v3 = vpop.f32.mrf.mxu1  ;;  %v15317_v55 = vld [vmem:[%s20536_s20 + $0x820] ss:$8 sps:$4 sm:$0xff]  }
 0x3ef   : > { %v18151_v14 = vadd.f32 %v13670_v57, %v3400_v22  ;;  %v13561_v17 = vadd.f32 %v13560_v3, %v13559_v5  ;;  %v18153_v35 = vpop.f32.mrf.mxu0 }
 0x3f0   : > { %v13562_v1 = vpop.f32.mrf.mxu1 }
 0x3f1   : > { %20729 = vst [vmem:[#allocation13_spill] sm:$0xff] %v18151_v14  ;;  %v3401_v25 = vadd.f32 %v13561_v17, %v17803_v15  ;;  %v13877_v40 = vpop.f32.mrf.mxu0 }
 0x3f2   : > { %v13563_v52 = vpop.f32.mrf.mxu1 }
 0x3f3   : > { %v18163_v24 = vadd.f32 %v17901_v45, %v3401_v25  ;;  %v13564_v56 = vadd.f32 %v13563_v52, %v13562_v1  ;;  %v13878_v57 = vpop.f32.mrf.mxu0 }
 0x3f4   : > { %v13565_v28 = vpop.f32.mrf.mxu1  ;;  %4937 = vmatmul.mubr.bf16.gmra.mxu1 %v15314_v32  ;;  %v18167_v5 = vadd.f32 %v13878_v57, %v13877_v40  ;;  %v15322_v32 = vld [vmem:[%s20536_s20 + $0x834] ss:$8 sps:$4 sm:$0xff]  }
 0x3f5   : > { %v3402_v15 = vadd.f32 %v13564_v56, %v20730_v53  ;;  %4944 = vmatprep.mubr.bf16.mxu1 %v15319_v7  ;;  %v18170_v17 = vpop.f32.mrf.mxu0  ;;  %v13682_v56 = vadd.f32 %v17929_v30, %v17924_v27  ;;  %v20732_v53 = vld [vmem:[#allocation14_spill] sm:$0xff]  ;;  %v15320_v27 = vld [vmem:[%s20536_s20 + $0x830] ss:$8 sps:$4 sm:$0xff]  }
 0x3f6   : > { %v13566_v22 = vpop.f32.mrf.mxu1 }
 0x3f7   : > { %v18172_v3 = vadd.f32 %v13676_v12, %v3402_v15  ;;  %v13567_v14 = vadd.f32 %v13566_v22, %v13565_v28  ;;  %v18174_v45 = vpop.f32.mrf.mxu0 }
 0x3f8   : > { %v13568_v1 = vpop.f32.mrf.mxu1 }
 0x3f9   : > { %20731 = vst [vmem:[#allocation10_spill] sm:$0xff] %v18172_v3  ;;  %v3403_v46 = vadd.f32 %v13567_v14, %v17839_v42  ;;  %v13883_v25 = vpop.f32.mrf.mxu0 }
 0x3fa   : > { %v13569_v7 = vpop.f32.mrf.mxu1 }
 0x3fb   : > { %v18184_v40 = vadd.f32 %v17921_v13, %v3403_v46  ;;  %v13570_v52 = vadd.f32 %v13569_v7, %v13568_v1  ;;  %v13884_v12 = vpop.f32.mrf.mxu0 }
 0x3fc   : > { %v13571_v57 = vpop.f32.mrf.mxu1  ;;  %4945 = vmatmul.mubr.bf16.gmra.mxu1 %v15317_v55  ;;  %v18188_v28 = vadd.f32 %v13884_v12, %v13883_v25  ;;  %v15325_v55 = vld [vmem:[%s20536_s20 + $0x844] ss:$8 sps:$4 sm:$0xff]  }
 0x3fd   : > { %v3404_v42 = vadd.f32 %v13570_v52, %v20732_v53  ;;  %4952 = vmatprep.mubr.bf16.mxu1 %v15322_v32  ;;  %v18191_v14 = vpop.f32.mrf.mxu0  ;;  %v13688_v52 = vadd.f32 %v17949_v26, %v17944_v36  ;;  %v15323_v36 = vld [vmem:[%s20536_s20 + $0x840] ss:$8 sps:$4 sm:$0xff]  }
 0x3fe   : > { %v13572_v15 = vpop.f32.mrf.mxu1 }
 0x3ff   : > { %v18193_v22 = vadd.f32 %v13682_v56, %v3404_v42  ;;  %v13573_v3 = vadd.f32 %v13572_v15, %v13571_v57  ;;  %v18195_v13 = vpop.f32.mrf.mxu0 }
 0x400   : > { %v13574_v1 = vpop.f32.mrf.mxu1 }
 0x401   : > { %v3405_v30 = vadd.f32 %v13573_v3, %v17872_v23  ;;  %v13889_v46 = vpop.f32.mrf.mxu0 }
 0x402   : > { %v13575_v32 = vpop.f32.mrf.mxu1 }
 0x403   : > { %v18205_v25 = vadd.f32 %v17941_v60, %v3405_v30  ;;  %v13576_v7 = vadd.f32 %v13575_v32, %v13574_v1  ;;  %v13890_v56 = vpop.f32.mrf.mxu0  ;;  %v13694_v32 = vadd.f32 %v17969_v9, %v17964_v51  ;;  %v15326_v51 = vld [vmem:[%s20536_s20 + $0x850] ss:$8 sps:$4 sm:$0xff]  }
 0x404   : > { %v13577_v12 = vpop.f32.mrf.mxu1  ;;  %4953 = vmatmul.mubr.bf16.gmra.mxu1 %v15320_v27  ;;  %v18209_v57 = vadd.f32 %v13890_v56, %v13889_v46 }
 0x405   : > { %v3406_v23 = vadd.f32 %v13576_v7, %v17887_v2  ;;  %4960 = vmatprep.mubr.bf16.mxu1 %v15325_v55  ;;  %v18212_v3 = vpop.f32.mrf.mxu0  ;;  %v15328_v2 = vld [vmem:[%s20536_s20 + $0x854] ss:$8 sps:$4 sm:$0xff]  }
 0x406   : > { %v13578_v53 = vpop.f32.mrf.mxu1 }
 0x407   : > { %v18214_v42 = vadd.f32 %v13688_v52, %v3406_v23  ;;  %v13579_v15 = vadd.f32 %v13578_v53, %v13577_v12  ;;  %v18216_v60 = vpop.f32.mrf.mxu0 }
 0x408   : > { %v13580_v1 = vpop.f32.mrf.mxu1 }
 0x409   : > { %v3407_v26 = vadd.f32 %v13579_v15, %v17899_v21  ;;  %v13895_v27 = vpop.f32.mrf.mxu0 }
 0x40a   : > { %v13581_v30 = vpop.f32.mrf.mxu1 }
 0x40b   : > { %v18226_v55 = vadd.f32 %v17961_v34, %v3407_v26  ;;  %v13582_v46 = vadd.f32 %v13581_v30, %v13580_v1  ;;  %v13896_v7 = vpop.f32.mrf.mxu0  ;;  %v13700_v30 = vadd.f32 %v17989_v37, %v17984_v39  ;;  %v15334_v37 = vld [vmem:[%s20536_s20 + $0x874] ss:$8 sps:$4 sm:$0xff]  }
 0x40c   : > { %v13583_v52 = vpop.f32.mrf.mxu1  ;;  %4961 = vmatmul.mubr.bf16.gmra.mxu1 %v15323_v36  ;;  %v18230_v56 = vadd.f32 %v13896_v7, %v13895_v27 }
 0x40d   : > { %v3408_v21 = vadd.f32 %v13582_v46, %v17907_v33  ;;  %4968 = vmatprep.mubr.bf16.mxu1 %v15328_v2  ;;  %v18233_v12 = vpop.f32.mrf.mxu0  ;;  %v15331_v33 = vld [vmem:[%s20536_s20 + $0x864] ss:$8 sps:$4 sm:$0xff]  }
 0x40e   : > { %v13584_v23 = vpop.f32.mrf.mxu1 }
 0x40f   : > { %v18235_v53 = vadd.f32 %v13694_v32, %v3408_v21  ;;  %v13585_v15 = vadd.f32 %v13584_v23, %v13583_v52  ;;  %v18237_v34 = vpop.f32.mrf.mxu0 }
 0x410   : > { %v13586_v1 = vpop.f32.mrf.mxu1 }
 0x411   : > { %v3409_v9 = vadd.f32 %v13585_v15, %v17919_v41  ;;  %v13901_v36 = vpop.f32.mrf.mxu0 }
 0x412   : > { %v13587_v26 = vpop.f32.mrf.mxu1 }
 0x413   : > { %v18247_v2 = vadd.f32 %v17981_v48, %v3409_v9  ;;  %v13588_v27 = vadd.f32 %v13587_v26, %v13586_v1  ;;  %v13902_v46 = vpop.f32.mrf.mxu0  ;;  %v15329_v48 = vld [vmem:[%s20536_s20 + $0x860] ss:$8 sps:$4 sm:$0xff]   ;;  %v13706_v9 = vadd.f32 %v18009_v58, %v18004_v6  ;;  %v15337_v58 = vld [vmem:[%s20536_s20 + $0x884] ss:$8 sps:$4 sm:$0xff]  }
 0x414   : > { %v13589_v32 = vpop.f32.mrf.mxu1  ;;  %4969 = vmatmul.mubr.bf16.gmra.mxu1 %v15326_v51  ;;  %v18251_v7 = vadd.f32 %v13902_v46, %v13901_v36  ;;  %v20733_v36 = vld [vmem:[#allocation17_spill] sm:$0xff] }
 0x415   : > { %v3410_v41 = vadd.f32 %v13588_v27, %v17927_v0  ;;  %4976 = vmatprep.mubr.bf16.mxu1 %v15331_v33 }
 0x416   : > { %v13590_v52 = vpop.f32.mrf.mxu1 }
 0x417   : > { %v18254_v21 = vadd.f32 %v13700_v30, %v3410_v41  ;;  %v13591_v23 = vadd.f32 %v13590_v52, %v13589_v32  ;;  %v15332_v32 = vld [vmem:[%s20536_s20 + $0x870] ss:$8 sps:$4 sm:$0xff]  }
 0x418   : > { %v13592_v15 = vpop.f32.mrf.mxu1 }
 0x419   : > { %v3411_v1 = vadd.f32 %v13591_v23, %v17939_v8 }
 0x41a   : > { %v13593_v39 = vpop.f32.mrf.mxu1 }
 0x41b   : > { %v18264_v51 = vadd.f32 %v18001_v47, %v3411_v1  ;;  %v13594_v0 = vadd.f32 %v13593_v39, %v13592_v15  ;;  %v20734_v47 = vld [vmem:[#allocation23_spill] sm:$0xff]  ;;  %v13712_v15 = vadd.f32 %v18029_v44, %v18024_v38  ;;  %v15340_v44 = vld [vmem:[%s20536_s20 + $0x894] ss:$8 sps:$4 sm:$0xff]  }
 0x41c   : > { %v13595_v33 = vpop.f32.mrf.mxu1  ;;  %4977 = vmatmul.mubr.bf16.gmra.mxu1 %v15329_v48  ;;  %v20735_v1 = vld [vmem:[#allocation15_spill] sm:$0xff] }
 0x41d   : > { %v3412_v26 = vadd.f32 %v13594_v0, %v20733_v36  ;;  %4984 = vmatprep.mubr.bf16.mxu1 %v15334_v37  ;;  %v15335_v36 = vld [vmem:[%s20536_s20 + $0x880] ss:$8 sps:$4 sm:$0xff]  }
 0x41e   : > { %v13596_v27 = vpop.f32.mrf.mxu1 }
 0x41f   : > { %v18269_v30 = vadd.f32 %v13706_v9, %v3412_v26  ;;  %v13597_v8 = vadd.f32 %v13596_v27, %v13595_v33 }
 0x420   : > { %v13598_v46 = vpop.f32.mrf.mxu1 }
 0x421   : > { %v3413_v41 = vadd.f32 %v13597_v8, %v20734_v47  ;;  %v20736_v8 = vld [vmem:[#allocation19_spill] sm:$0xff] }
 0x422   : > { %v13599_v6 = vpop.f32.mrf.mxu1 }
 0x423   : > { %v18279_v52 = vadd.f32 %v18021_v29, %v3413_v41  ;;  %v13600_v23 = vadd.f32 %v13599_v6, %v13598_v46  ;;  %v20737_v46 = vld [vmem:[#allocation32_spill] sm:$0xff]  ;;  %v20738_v41 = vld [vmem:[#allocation31_spill] sm:$0xff] }
 0x424   : > { %v13601_v48 = vpop.f32.mrf.mxu1  ;;  %4985 = vmatmul.mubr.bf16.gmra.mxu1 %v15332_v32  ;;  %v13718_v32 = vadd.f32 %v20737_v46, %v20736_v8 }
 0x425   : > { %v3414_v37 = vadd.f32 %v13600_v23, %v20735_v1  ;;  %4992 = vmatprep.mubr.bf16.mxu1 %v15337_v58 }
 0x426   : > { %v13602_v39 = vpop.f32.mrf.mxu1 }
 0x427   : > { %v18284_v0 = vadd.f32 %v13712_v15, %v3414_v37  ;;  %v13603_v9 = vadd.f32 %v13602_v39, %v13601_v48  ;;  %v15338_v48 = vld [vmem:[%s20536_s20 + $0x890] ss:$8 sps:$4 sm:$0xff]   ;;  %v15343_v37 = vld [vmem:[%s20536_s20 + $0x8a4] ss:$8 sps:$4 sm:$0xff]  }
 0x428   : > { %v13604_v33 = vpop.f32.mrf.mxu1 }
 0x429   : > { %v3415_v29 = vadd.f32 %v13603_v9, %v17979_v54 }
 0x42a   : > { %v13605_v38 = vpop.f32.mrf.mxu1 }
 0x42b   : > { %v18294_v26 = vadd.f32 %v18041_v4, %v3415_v29  ;;  %v13606_v27 = vadd.f32 %v13605_v38, %v13604_v33  ;;  %v20739_v4 = vld [vmem:[#allocation4_spill] sm:$0xff]  ;;  %v20741_v38 = vld [vmem:[#allocation29_spill] sm:$0xff] }
 0x42c   : > { %v13735_v47 = vpop.f32.mrf.mxu1  ;;  %4993 = vmatmul.mubr.bf16.gmra.mxu1 %v15335_v36  ;;  %v20740_v36 = vld [vmem:[#allocation2_spill] sm:$0xff] }
 0x42d   : > { %v3416_v58 = vadd.f32 %v13606_v27, %v20738_v41  ;;  %5000 = vmatprep.mubr.bf16.mxu1 %v15340_v44  ;;  %v13852_v29 = vadd.f32 %v20740_v36, %v18064_v49  ;;  %v15341_v41 = vld [vmem:[%s20536_s20 + $0x8a0] ss:$8 sps:$4 sm:$0xff]   ;;  %v15346_v49 = vld [vmem:[%s20536_s20 + $0x8b4] ss:$8 sps:$4 sm:$0xff]  }
 0x42e   : > { %v13736_v6 = vpop.f32.mrf.mxu1 }
 0x42f   : > { %v18299_v23 = vadd.f32 %v13718_v32, %v3416_v58  ;;  %v13737_v54 = vadd.f32 %v13736_v6, %v13735_v47 }
 0x430   : > { %v13738_v15 = vpop.f32.mrf.mxu1 }
 0x431   : > { %v4221_v1 = vadd.f32 %v13737_v54, %v20739_v4 }
 0x432   : > { %v13739_v39 = vpop.f32.mrf.mxu1 }
 0x433   : > { %v18309_v9 = vadd.f32 %v18061_v19, %v4221_v1  ;;  %v13740_v33 = vadd.f32 %v13739_v39, %v13738_v15  ;;  %v20742_v19 = vld [vmem:[#allocation25_spill] sm:$0xff]  ;;  %v20743_v1 = vld [vmem:[#allocation26_spill] sm:$0xff] }
 0x434   : > { %v13741_v44 = vpop.f32.mrf.mxu1  ;;  %5001 = vmatmul.mubr.bf16.gmra.mxu1 %v15338_v48  ;;  %v13858_v48 = vadd.f32 %v18090_v43, %v18086_v62  ;;  %v15349_v62 = vld [vmem:[%s20536_s20 + $0x8c4] ss:$8 sps:$4 sm:$0xff]  }
 0x435   : > { %v4222_v27 = vadd.f32 %v13740_v33, %v20741_v38  ;;  %5008 = vmatprep.mubr.bf16.mxu1 %v15343_v37 }
 0x436   : > { %v13742_v8 = vpop.f32.mrf.mxu1 }
 0x437   : > { %v18314_v46 = vadd.f32 %v13852_v29, %v4222_v27  ;;  %v13743_v32 = vadd.f32 %v13742_v8, %v13741_v44  ;;  %v15344_v44 = vld [vmem:[%s20536_s20 + $0x8b0] ss:$8 sps:$4 sm:$0xff]  }
 0x438   : > { %v13744_v47 = vpop.f32.mrf.mxu1 }
 0x439   : > { %v4223_v58 = vadd.f32 %v13743_v32, %v20742_v19  ;;  %v13864_v32 = vadd.f32 %v18111_v16, %v18107_v10  ;;  %v15352_v10 = vld [vmem:[%s20536_s20 + $0x8d4] ss:$8 sps:$4 sm:$0xff]  }
 0x43a   : > { %v13745_v6 = vpop.f32.mrf.mxu1 }
 0x43b   : > { %v18324_v54 = vadd.f32 %v18083_v31, %v4223_v58  ;;  %v13746_v15 = vadd.f32 %v13745_v6, %v13744_v47  ;;  %v20744_v31 = vld [vmem:[#allocation18_spill] sm:$0xff] }
 0x43c   : > { %v13747_v4 = vpop.f32.mrf.mxu1  ;;  %5009 = vmatmul.mubr.bf16.gmra.mxu1 %v15341_v41  ;;  %v20745_v41 = vld [vmem:[#allocation16_spill] sm:$0xff] }
 0x43d   : > { %v4224_v37 = vadd.f32 %v13746_v15, %v20743_v1  ;;  %5016 = vmatprep.mubr.bf16.mxu1 %v15346_v49 }
 0x43e   : > { %v13748_v39 = vpop.f32.mrf.mxu1 }
 0x43f   : > { %v18329_v33 = vadd.f32 %v13858_v48, %v4224_v37  ;;  %v13749_v36 = vadd.f32 %v13748_v39, %v13747_v4  ;;  %v15347_v48 = vld [vmem:[%s20536_s20 + $0x8c0] ss:$8 sps:$4 sm:$0xff]   ;;  %v13870_v39 = vadd.f32 %v18132_v61, %v18128_v18  ;;  %v15355_v18 = vld [vmem:[%s20536_s20 + $0x8e4] ss:$8 sps:$4 sm:$0xff]  }
 0x440   : > { %v13750_v29 = vpop.f32.mrf.mxu1 }
 0x441   : > { %v4225_v38 = vadd.f32 %v13749_v36, %v20744_v31 }
 0x442   : > { %v13751_v43 = vpop.f32.mrf.mxu1 }
 0x443   : > { %v18339_v27 = vadd.f32 %v18104_v11, %v4225_v38  ;;  %v13752_v8 = vadd.f32 %v13751_v43, %v13750_v29  ;;  %v20746_v11 = vld [vmem:[#allocation5_spill] sm:$0xff]  ;;  %v20747_v29 = vld [vmem:[#allocation7_spill] sm:$0xff] }
 0x444   : > { %v13753_v47 = vpop.f32.mrf.mxu1  ;;  %5017 = vmatmul.mubr.bf16.gmra.mxu1 %v15344_v44 }
 0x445   : > { %v4226_v19 = vadd.f32 %v13752_v8, %v20745_v41  ;;  %5024 = vmatprep.mubr.bf16.mxu1 %v15349_v62  ;;  %v15350_v8 = vld [vmem:[%s20536_s20 + $0x8d0] ss:$8 sps:$4 sm:$0xff]  }
 0x446   : > { %v13754_v58 = vpop.f32.mrf.mxu1 }
 0x447   : > { %v18344_v49 = vadd.f32 %v13864_v32, %v4226_v19  ;;  %v13755_v6 = vadd.f32 %v13754_v58, %v13753_v47  ;;  %v13876_v19 = vadd.f32 %v18153_v35, %v18149_v59  ;;  %v15358_v59 = vld [vmem:[%s20536_s20 + $0x8f4] ss:$8 sps:$4 sm:$0xff]  }
 0x448   : > { %v13756_v15 = vpop.f32.mrf.mxu1 }
 0x449   : > { %v4227_v4 = vadd.f32 %v13755_v6, %v20746_v11  ;;  %v20749_v6 = vld [vmem:[#allocation6_spill] sm:$0xff] }
 0x44a   : > { %v13757_v16 = vpop.f32.mrf.mxu1 }
 0x44b   : > { %v18354_v1 = vadd.f32 %v18125_v20, %v4227_v4  ;;  %v13758_v37 = vadd.f32 %v13757_v16, %v13756_v15  ;;  %v20748_v20 = vld [vmem:[#allocation21_spill] sm:$0xff]  ;;  %v15353_v16 = vld [vmem:[%s20536_s20 + $0x8e0] ss:$8 sps:$4 sm:$0xff]  }
 0x44c   : > { %v13759_v36 = vpop.f32.mrf.mxu1  ;;  %5025 = vmatmul.mubr.bf16.gmra.mxu1 %v15347_v48 }
 0x44d   : > { %v4228_v44 = vadd.f32 %v13758_v37, %v20747_v29  ;;  %5032 = vmatprep.mubr.bf16.mxu1 %v15352_v10  ;;  %v13882_v29 = vadd.f32 %v18174_v45, %v18170_v17  ;;  %v13888_v45 = vadd.f32 %v18195_v13, %v18191_v14  ;;  %v20754_v13 = vld [vmem:[#allocation13_spill] sm:$0xff] }
 0x44e   : > { %v13760_v31 = vpop.f32.mrf.mxu1 }
 0x44f   : > { %v18359_v38 = vadd.f32 %v13870_v39, %v4228_v44  ;;  %v13761_v62 = vadd.f32 %v13760_v31, %v13759_v36  ;;  %v20751_v31 = vld [vmem:[#allocation3_spill] sm:$0xff] }
 0x450   : > { %v13762_v43 = vpop.f32.mrf.mxu1 }
 0x451   : > { %v4229_v32 = vadd.f32 %v13761_v62, %v20748_v20 }
 0x452   : > { %v13763_v61 = vpop.f32.mrf.mxu1 }
 0x453   : > { %v18369_v47 = vadd.f32 %v18146_v50, %v4229_v32  ;;  %v13764_v41 = vadd.f32 %v13763_v61, %v13762_v43  ;;  %v20750_v50 = vld [vmem:[#allocation20_spill] sm:$0xff] }
 0x454   : > { %v13765_v58 = vpop.f32.mrf.mxu1  ;;  %5033 = vmatmul.mubr.bf16.gmra.mxu1 %v15350_v8 }
 0x455   : > { %v4230_v15 = vadd.f32 %v13764_v41, %v20749_v6  ;;  %5040 = vmatprep.mubr.bf16.mxu1 %v15355_v18  ;;  %v15356_v18 = vld [vmem:[%s20536_s20 + $0x8f0] ss:$8 sps:$4 sm:$0xff]   ;;  %v20753_v6 = vld [vmem:[#allocation11_spill] sm:$0xff] }
 0x456   : > { %v13766_v48 = vpop.f32.mrf.mxu1 }
 0x457   : > { %v18374_v11 = vadd.f32 %v13876_v19, %v4230_v15  ;;  %v13767_v4 = vadd.f32 %v13766_v48, %v13765_v58 }
 0x458   : > { %v13768_v10 = vpop.f32.mrf.mxu1 }
 0x459   : > { %v4231_v37 = vadd.f32 %v13767_v4, %v20750_v50 }
 0x45a   : > { %v13769_v35 = vpop.f32.mrf.mxu1 }
 0x45b   : > { %v18384_v39 = vadd.f32 %v18167_v5, %v4231_v37  ;;  %v13770_v36 = vadd.f32 %v13769_v35, %v13768_v10  ;;  %v20752_v5 = vld [vmem:[#allocation8_spill] sm:$0xff]  ;;  %v13894_v35 = vadd.f32 %v18216_v60, %v18212_v3 }
 0x45c   : > { %v13771_v44 = vpop.f32.mrf.mxu1  ;;  %5041 = vmatmul.mubr.bf16.gmra.mxu1 %v15353_v16 }
 0x45d   : > { %v4232_v62 = vadd.f32 %v13770_v36, %v20751_v31  ;;  %5048 = vmatprep.mubr.bf16.mxu1 %v15358_v59 }
 0x45e   : > { %v13772_v43 = vpop.f32.mrf.mxu1 }
 0x45f   : > { %v18389_v8 = vadd.f32 %v13882_v29, %v4232_v62  ;;  %v13773_v20 = vadd.f32 %v13772_v43, %v13771_v44  ;;  %v13904_v43 = vpop.f32.mrf.mxu0 }
 0x460   : > { %v13774_v32 = vpop.f32.mrf.mxu1 }
 0x461   : > { %v4233_v61 = vadd.f32 %v13773_v20, %v20752_v5  ;;  %v13905_v60 = vpop.f32.mrf.mxu0  ;;  %v20755_v5 = vld [vmem:[#allocation10_spill] sm:$0xff] }
 0x462   : > { %v13775_v41 = vpop.f32.mrf.mxu1 }
 0x463   : > { %v18396_v19 = vadd.f32 %v18188_v28, %v4233_v61  ;;  %v13776_v17 = vadd.f32 %v13775_v41, %v13774_v32 }
 0x464   : > { %v13777_v58 = vpop.f32.mrf.mxu1  ;;  %5049 = vmatmul.mubr.bf16.gmra.mxu1 %v15356_v18  ;;  %v13900_v18 = vadd.f32 %v18237_v34, %v18233_v12 }
 0x465   : > { %v4234_v15 = vadd.f32 %v13776_v17, %v20753_v6  ;;  %v13907_v6 = vpop.f32.mrf.mxu0 }
 0x466   : > { %v13778_v48 = vpop.f32.mrf.mxu1 }
 0x467   : > { %v18401_v4 = vadd.f32 %v13888_v45, %v4234_v15  ;;  %v13779_v10 = vadd.f32 %v13778_v48, %v13777_v58  ;;  %v13908_v12 = vpop.f32.mrf.mxu0 }
 0x468   : > { %v13780_v16 = vpop.f32.mrf.mxu1 }
 0x469   : > { %v4235_v50 = vadd.f32 %v13779_v10, %v18142_v63  ;;  %v13906_v10 = vadd.f32 %v13905_v60, %v13904_v43 }
 0x46a   : > { %v13781_v37 = vpop.f32.mrf.mxu1 }
 0x46b   : > { %v18405_v59 = vadd.f32 %v18209_v57, %v4235_v50  ;;  %v13782_v28 = vadd.f32 %v13781_v37, %v13780_v16 }
 0x46c   : > { %v13783_v14 = vpop.f32.mrf.mxu1 }
 0x46d   : > { %v4236_v36 = vadd.f32 %v13782_v28, %v20754_v13 }
 0x46e   : > { %v13784_v29 = vpop.f32.mrf.mxu1 }
 0x46f   : > { %v18410_v44 = vadd.f32 %v13894_v35, %v4236_v36  ;;  %v13785_v31 = vadd.f32 %v13784_v29, %v13783_v14  ;;  %v13909_v35 = vadd.f32 %v13908_v12, %v13907_v6 }
 0x470   : > { %v13786_v62 = vpop.f32.mrf.mxu1 }
 0x471   : > { %v4237_v20 = vadd.f32 %v13785_v31, %v18163_v24 }
 0x472   : > { %v13787_v63 = vpop.f32.mrf.mxu1 }
 0x473   : > { %v18414_v32 = vadd.f32 %v18230_v56, %v4237_v20  ;;  %v13788_v57 = vadd.f32 %v13787_v63, %v13786_v62 }
 0x474   : > { %v13789_v3 = vpop.f32.mrf.mxu1 }
 0x475   : > { %v4238_v61 = vadd.f32 %v13788_v57, %v20755_v5 }
 0x476   : > { %v13790_v41 = vpop.f32.mrf.mxu1 }
 0x477   : > { %v18419_v17 = vadd.f32 %v13900_v18, %v4238_v61  ;;  %v13791_v45 = vadd.f32 %v13790_v41, %v13789_v3 }
 0x478   : > { %v13792_v58 = vpop.f32.mrf.mxu1 }
 0x479   : > { %v4239_v24 = vadd.f32 %v13791_v45, %v18184_v40 }
 0x47a   : > { %v13793_v15 = vpop.f32.mrf.mxu1 }
 0x47b   : > { %v18423_v56 = vadd.f32 %v18251_v7, %v4239_v24  ;;  %v13794_v48 = vadd.f32 %v13793_v15, %v13792_v58 }
 0x47c   : > { %v13795_v16 = vpop.f32.mrf.mxu1 }
 0x47d   : > { %v4240_v34 = vadd.f32 %v13794_v48, %v18193_v22 }
 0x47e   : > { %v13796_v50 = vpop.f32.mrf.mxu1 }
 0x47f   : > { %v18426_v37 = vadd.f32 %v13906_v10, %v4240_v34  ;;  %v13797_v28 = vadd.f32 %v13796_v50, %v13795_v16 }
 0x480   : > { %v13798_v14 = vpop.f32.mrf.mxu1 }
 0x481   : > { %v4241_v13 = vadd.f32 %v13797_v28, %v18205_v25 }
 0x482   : > { %v13799_v36 = vpop.f32.mrf.mxu1 }
 0x483   : > { %v18429_v40 = vadd.f32 %v13909_v35, %v4241_v13  ;;  %v13800_v29 = vadd.f32 %v13799_v36, %v13798_v14 }
 0x484   : > { %v13801_v7 = vpop.f32.mrf.mxu1 }
 0x485   : > { %v18432_v31 = vadd.f32 %v13800_v29, %v18214_v42 }
 0x486   : > { %v13802_v62 = vpop.f32.mrf.mxu1 }
 0x487   : > { %v13803_v43 = vadd.f32 %v13802_v62, %v13801_v7 }
 0x488   : > { %v13804_v20 = vpop.f32.mrf.mxu1 }
 0x489   : > { %v18435_v22 = vadd.f32 %v13803_v43, %v18226_v55 }
 0x48a   : > { %v13805_v63 = vpop.f32.mrf.mxu1 }
 0x48b   : > { %v13806_v57 = vadd.f32 %v13805_v63, %v13804_v20 }
 0x48c   : > { %v13807_v18 = vpop.f32.mrf.mxu1 }
 0x48d   : > { %v18438_v3 = vadd.f32 %v13806_v57, %v18235_v53 }
 0x48e   : > { %v13808_v25 = vpop.f32.mrf.mxu1 }
 0x48f   : > { %v13809_v60 = vadd.f32 %v13808_v25, %v13807_v18 }
 0x490   : > { %v13810_v5 = vpop.f32.mrf.mxu1 }
 0x491   : > { %v18441_v61 = vadd.f32 %v13809_v60, %v18247_v2 }
 0x492   : > { %v13811_v42 = vpop.f32.mrf.mxu1 }
 0x493   : > { %v13812_v41 = vadd.f32 %v13811_v42, %v13810_v5 }
 0x494   : > { %v13813_v45 = vpop.f32.mrf.mxu1 }
 0x495   : > { %v18444_v58 = vadd.f32 %v13812_v41, %v18254_v21 }
 0x496   : > { %v13814_v55 = vpop.f32.mrf.mxu1 }
 0x497   : > { %v13815_v6 = vadd.f32 %v13814_v55, %v13813_v45 }
 0x498   : > { %v13816_v24 = vpop.f32.mrf.mxu1 }
 0x499   : > { %v18447_v15 = vadd.f32 %v13815_v6, %v18264_v51 }
 0x49a   : > { %v13817_v53 = vpop.f32.mrf.mxu1 }
 0x49b   : > { %v13818_v48 = vadd.f32 %v13817_v53, %v13816_v24 }
 0x49c   : > { %v13819_v10 = vpop.f32.mrf.mxu1 }
 0x49d   : > { %v18450_v16 = vadd.f32 %v13818_v48, %v18269_v30 }
 0x49e   : > { %v13820_v2 = vpop.f32.mrf.mxu1 }
 0x49f   : > { %v13821_v12 = vadd.f32 %v13820_v2, %v13819_v10 }
 0x4a0   : > { %v13822_v34 = vpop.f32.mrf.mxu1 }
 0x4a1   : > { %v18453_v50 = vadd.f32 %v13821_v12, %v18279_v52 }
 0x4a2   : > { %v13823_v21 = vpop.f32.mrf.mxu1 }
 0x4a3   : > { %v13824_v28 = vadd.f32 %v13823_v21, %v13822_v34 }
 0x4a4   : > { %v13825_v35 = vpop.f32.mrf.mxu1 }
 0x4a5   : > { %v18456_v14 = vadd.f32 %v13824_v28, %v18284_v0  ;;  %v18468_v0 = vld [vmem:[%s20482_s8] ss:$0 sm:$0xff] }
 0x4a6   : > { %v13826_v51 = vpop.f32.mrf.mxu1 }
 0x4a7   : > { %v13827_v13 = vadd.f32 %v13826_v51, %v13825_v35 }
 0x4a8   : > { %v13828_v36 = vpop.f32.mrf.mxu1 }
 0x4a9   : > { %v18459_v29 = vadd.f32 %v13827_v13, %v18294_v26 }
 0x4aa   : > { %v13829_v30 = vpop.f32.mrf.mxu1 }
 0x4ab   : > { %v13830_v7 = vadd.f32 %v13829_v30, %v13828_v36 }
 0x4ac   : > { %v13959_v62 = vpop.f32.mrf.mxu1 }
 0x4ad   : > { %v18462_v43 = vadd.f32 %v13830_v7, %v18299_v23 }
 0x4ae   : > { %v13960_v52 = vpop.f32.mrf.mxu1 }
 0x4af   : > { %v13961_v20 = vadd.f32 %v13960_v52, %v13959_v62 }
 0x4b0   : > { %v13962_v63 = vpop.f32.mrf.mxu1 }
 0x4b1   : > { %v5057_v57 = vadd.f32 %v13961_v20, %v18309_v9 }
 0x4b2   : > { %v13963_v18 = vpop.f32.mrf.mxu1 }
 0x4b3   : > { %v13964_v25 = vadd.f32 %v13963_v18, %v13962_v63  ;;  %v5096_v60 = vadd.f32 %v18468_v0, %v5057_v57 }
 0x4b4   : > { %v13965_v26 = vpop.f32.mrf.mxu1 }
 0x4b5   : > { %v5058_v5 = vadd.f32 %v13964_v25, %v18314_v46  ;;  %v5128_v55 = vmax.f32 %v5096_v60, 0.0 }
 0x4b6   : > { %v13966_v42 = vpop.f32.mrf.mxu1 }
 0x4b7   : > { %v5097_v23 = vadd.f32 %v18468_v0, %v5058_v5  ;;  %v13967_v41 = vadd.f32 %v13966_v42, %v13965_v26 }
 0x4b8   : > { %v13968_v45 = vpop.f32.mrf.mxu1 }
 0x4b9   : > { %v5129_v6 = vmax.f32 %v5097_v23, 0.0  ;;  %v5059_v9 = vadd.f32 %v13967_v41, %v18324_v54 }
 0x4ba   : > { %v13969_v24 = vpop.f32.mrf.mxu1 }
 0x4bb   : > { %v13970_v53 = vadd.f32 %v13969_v24, %v13968_v45  ;;  %v18474_v48 = vpack.c.bf16 %v5129_v6, %v5128_v55  ;;  %v5098_v2 = vadd.f32 %v18468_v0, %v5059_v9  ;;  %v18491_v6 = vpop.f32.mrf.mxu0 }
 0x4bc   : > { %v13971_v10 = vpop.f32.mrf.mxu1 }
 0x4bd   : > { %v5060_v12 = vadd.f32 %v13970_v53, %v18329_v33  ;;  %v5130_v35 = vmax.f32 %v5098_v2, 0.0 }
 0x4be   : > { %v13972_v34 = vpop.f32.mrf.mxu1 }
 0x4bf   : > { %v5099_v46 = vadd.f32 %v18468_v0, %v5060_v12  ;;  %v13973_v21 = vadd.f32 %v13972_v34, %v13971_v10  ;;  %v15361_v34 = vld [vmem:[%s20478_s4 + $0x4] ss:$8 sps:$4 sm:$0xff]  }
 0x4c0   : > { %v13974_v28 = vpop.f32.mrf.mxu1  ;;  %5256 = vmatprep.mubr.bf16.mxu0 %v15361_v34 }
 0x4c1   : > { %v5131_v51 = vmax.f32 %v5099_v46, 0.0  ;;  %v5061_v13 = vadd.f32 %v13973_v21, %v18339_v27 }
 0x4c2   : > { %v13975_v36 = vpop.f32.mrf.mxu1 }
 0x4c3   : > { %v13976_v54 = vadd.f32 %v13975_v36, %v13974_v28  ;;  %v18480_v30 = vpack.c.bf16 %v5131_v51, %v5130_v35  ;;  %v5100_v62 = vadd.f32 %v18468_v0, %v5061_v13 }
 0x4c4   : > { %v13977_v7 = vpop.f32.mrf.mxu1 }
 0x4c5   : > { %v5062_v52 = vadd.f32 %v13976_v54, %v18344_v49  ;;  %v5132_v18 = vmax.f32 %v5100_v62, 0.0 }
 0x4c6   : > { %v13978_v20 = vpop.f32.mrf.mxu1 }
 0x4c7   : > { %v5101_v33 = vadd.f32 %v18468_v0, %v5062_v52  ;;  %v13979_v63 = vadd.f32 %v13978_v20, %v13977_v7 }
 0x4c8   : > { %v13980_v57 = vpop.f32.mrf.mxu1 }
 0x4c9   : > { %v5133_v25 = vmax.f32 %v5101_v33, 0.0  ;;  %v5063_v26 = vadd.f32 %v13979_v63, %v18354_v1 }
 0x4ca   : > { %v13981_v60 = vpop.f32.mrf.mxu1 }
 0x4cb   : > { %v13982_v27 = vadd.f32 %v13981_v60, %v13980_v57  ;;  %v18486_v5 = vpack.c.bf16 %v5133_v25, %v5132_v18  ;;  %v5102_v23 = vadd.f32 %v18468_v0, %v5063_v26 }
 0x4cc   : > { %v13983_v42 = vpop.f32.mrf.mxu1 }
 0x4cd   : > { %v5064_v41 = vadd.f32 %v13982_v27, %v18359_v38  ;;  %v5134_v24 = vmax.f32 %v5102_v23, 0.0  ;;  %v18499_v38 = vpop.f32.mrf.mxu0 }
 0x4ce   : > { %v13984_v45 = vpop.f32.mrf.mxu1 }
 0x4cf   : > { %v5103_v49 = vadd.f32 %v18468_v0, %v5064_v41  ;;  %v13985_v55 = vadd.f32 %v13984_v45, %v13983_v42  ;;  %v18504_v13 = vpop.f32.mrf.mxu0 }
 0x4d0   : > { %v13986_v9 = vpop.f32.mrf.mxu1 }
 0x4d1   : > { %v5135_v53 = vmax.f32 %v5103_v49, 0.0  ;;  %v5065_v1 = vadd.f32 %v13985_v55, %v18369_v47  ;;  %v18509_v63 = vpop.f32.mrf.mxu0 }
 0x4d2   : > { %v13987_v10 = vpop.f32.mrf.mxu1 }
 0x4d3   : > { %v13988_v2 = vadd.f32 %v13987_v10, %v13986_v9  ;;  %v18494_v12 = vpack.c.bf16 %v5135_v53, %v5134_v24  ;;  %v5104_v21 = vadd.f32 %v18468_v0, %v5065_v1  ;;  %v18514_v27 = vpop.f32.mrf.mxu0 }
 0x4d4   : > { %v13989_v46 = vpop.f32.mrf.mxu1 }
 0x4d5   : > { %v5066_v28 = vadd.f32 %v13988_v2, %v18374_v11  ;;  %v5136_v54 = vmax.f32 %v5104_v21, 0.0  ;;  %v18519_v9 = vpop.f32.mrf.mxu0 }
 0x4d6   : > { %v13990_v35 = vpop.f32.mrf.mxu1 }
 0x4d7   : > { %v5105_v51 = vadd.f32 %v18468_v0, %v5066_v28  ;;  %v13991_v47 = vadd.f32 %v13990_v35, %v13989_v46  ;;  %v18524_v34 = vpop.f32.mrf.mxu0 }
 0x4d8   : > { %v13992_v36 = vpop.f32.mrf.mxu1 }
 0x4d9   : > { %v5137_v7 = vmax.f32 %v5105_v51, 0.0  ;;  %v5067_v62 = vadd.f32 %v13991_v47, %v18384_v39 }
 0x4da   : > { %v13993_v52 = vpop.f32.mrf.mxu1 }
 0x4db   : > { %v13994_v20 = vadd.f32 %v13993_v52, %v13992_v36  ;;  %v18507_v33 = vpack.c.bf16 %v5137_v7, %v5136_v54  ;;  %v5106_v11 = vadd.f32 %v18468_v0, %v5067_v62  ;;  %v18529_v36 = vpop.f32.mrf.mxu0 }
 0x4dc   : > { %v13995_v57 = vpop.f32.mrf.mxu1 }
 0x4dd   : > { %v5068_v18 = vadd.f32 %v13994_v20, %v18389_v8  ;;  %v5138_v23 = vmax.f32 %v5106_v11, 0.0 }
 0x4de   : > { %v13996_v25 = vpop.f32.mrf.mxu1 }
 0x4df   : > { %v5107_v26 = vadd.f32 %v18468_v0, %v5068_v18  ;;  %v13997_v60 = vadd.f32 %v13996_v25, %v13995_v57  ;;  %v18534_v57 = vpop.f32.mrf.mxu0 }
 0x4e0   : > { %v13998_v42 = vpop.f32.mrf.mxu1 }
 0x4e1   : > { %v5139_v39 = vmax.f32 %v5107_v26, 0.0  ;;  %v5069_v41 = vadd.f32 %v13997_v60, %v18396_v19 }
 0x4e2   : > { %v13999_v45 = vpop.f32.mrf.mxu1 }
 0x4e3   : > { %v14000_v49 = vadd.f32 %v13999_v45, %v13998_v42  ;;  %v18517_v55 = vpack.c.bf16 %v5139_v39, %v5138_v23  ;;  %v5108_v8 = vadd.f32 %v18468_v0, %v5069_v41  ;;  %v13923_v23 = vpop.f32.mrf.mxu0 }
 0x4e4   : > { %v14001_v24 = vpop.f32.mrf.mxu1 }
 0x4e5   : > { %v5070_v53 = vadd.f32 %v14000_v49, %v18401_v4  ;;  %v5140_v21 = vmax.f32 %v5108_v8, 0.0  ;;  %v18542_v8 = vpop.f32.mrf.mxu0 }
 0x4e6   : > { %v14002_v1 = vpop.f32.mrf.mxu1 }
 0x4e7   : > { %v5109_v10 = vadd.f32 %v18468_v0, %v5070_v53  ;;  %v14003_v2 = vadd.f32 %v14002_v1, %v14001_v24 }
 0x4e8   : > { %v14004_v46 = vpop.f32.mrf.mxu1 }
 0x4e9   : > { %v5141_v19 = vmax.f32 %v5109_v10, 0.0  ;;  %v5071_v28 = vadd.f32 %v14003_v2, %v18405_v59 }
 0x4ea   : > { %v14005_v35 = vpop.f32.mrf.mxu1 }
 0x4eb   : > { %v14006_v51 = vadd.f32 %v14005_v35, %v14004_v46  ;;  %v18527_v47 = vpack.c.bf16 %v5141_v19, %v5140_v21  ;;  %v5110_v4 = vadd.f32 %v18468_v0, %v5071_v28  ;;  %v13926_v19 = vpop.f32.mrf.mxu0 }
 0x4ec   : > { %v14007_v54 = vpop.f32.mrf.mxu1 }
 0x4ed   : > { %v5072_v7 = vadd.f32 %v14006_v51, %v18410_v44  ;;  %v5142_v18 = vmax.f32 %v5110_v4, 0.0 }
 0x4ee   : > { %v14008_v62 = vpop.f32.mrf.mxu1 }
 0x4ef   : > { %v5111_v52 = vadd.f32 %v18468_v0, %v5072_v7  ;;  %v14009_v20 = vadd.f32 %v14008_v62, %v14007_v54  ;;  %v13912_v54 = vadd.f32 %v18499_v38, %v18491_v6  ;;  %v13928_v62 = vpop.f32.mrf.mxu0 }
 0x4f0   : > { %v14010_v11 = vpop.f32.mrf.mxu1 }
 0x4f1   : > { %v5143_v59 = vmax.f32 %v5111_v52, 0.0  ;;  %v5073_v25 = vadd.f32 %v14009_v20, %v18414_v32 }
 0x4f2   : > { %v14011_v26 = vpop.f32.mrf.mxu1 }
 0x4f3   : > { %v14012_v60 = vadd.f32 %v14011_v26, %v14010_v11  ;;  %v18537_v42 = vpack.c.bf16 %v5143_v59, %v5142_v18  ;;  %v5112_v41 = vadd.f32 %v18468_v0, %v5073_v25  ;;  %v4692_v59 = vadd.f32 %v13912_v54, %v18432_v31 }
 0x4f4   : > { %v14013_v39 = vpop.f32.mrf.mxu1  ;;  %v13915_v25 = vadd.f32 %v18509_v63, %v18504_v13 }
 0x4f5   : > { %v5074_v44 = vadd.f32 %v14012_v60, %v18419_v17  ;;  %v5144_v1 = vmax.f32 %v5112_v41, 0.0  ;;  %v13929_v60 = vpop.f32.mrf.mxu0 }
 0x4f6   : > { %v14014_v45 = vpop.f32.mrf.mxu1 }
 0x4f7   : > { %v5113_v49 = vadd.f32 %v18468_v0, %v5074_v44  ;;  %v14015_v24 = vadd.f32 %v14014_v45, %v14013_v39  ;;  %v4693_v44 = vadd.f32 %v13915_v25, %v18435_v22 }
 0x4f8   : > { %v14016_v53 = vpop.f32.mrf.mxu1 }
 0x4f9   : > { %v5145_v10 = vmax.f32 %v5113_v49, 0.0  ;;  %v5075_v32 = vadd.f32 %v14015_v24, %v18423_v56  ;;  %v13931_v49 = vpop.f32.mrf.mxu0 }
 0x4fa   : > { %v14017_v2 = vpop.f32.mrf.mxu1 }
 0x4fb   : > { %v14018_v46 = vadd.f32 %v14017_v2, %v14016_v53  ;;  %v18545_v21 = vpack.c.bf16 %v5145_v10, %v5144_v1  ;;  %v5114_v35 = vadd.f32 %v18468_v0, %v5075_v32  ;;  %v13921_v32 = vadd.f32 %v18529_v36, %v18524_v34  ;;  %v13932_v22 = vpop.f32.mrf.mxu0 }
 0x4fc   : > { %v14019_v28 = vpop.f32.mrf.mxu1 }
 0x4fd   : > { %v5076_v17 = vadd.f32 %v14018_v46, %v18426_v37  ;;  %v5146_v56 = vmax.f32 %v5114_v35, 0.0  ;;  %v15388_v35 = vld [vmem:[%s20478_s4 + $0xc4] ss:$8 sps:$4 sm:$0xff]   ;;  %v13934_v36 = vpop.f32.mrf.mxu0 }
 0x4fe   : > { %v14020_v51 = vpop.f32.mrf.mxu1  ;;  %5598 = vmatprep.mubr.bf16.mxu1 %v15388_v35 }
 0x4ff   : > { %v5115_v4 = vadd.f32 %v18468_v0, %v5076_v17  ;;  %v14021_v7 = vadd.f32 %v14020_v51, %v14019_v28  ;;  %v4695_v51 = vadd.f32 %v13921_v32, %v18441_v61  ;;  %v13935_v61 = vpop.f32.mrf.mxu0 }
 0x500   : > { %v14022_v52 = vpop.f32.mrf.mxu1 }
 0x501   : > { %v5147_v20 = vmax.f32 %v5115_v4, 0.0  ;;  %v5077_v11 = vadd.f32 %v14021_v7, %v18429_v40  ;;  %v13918_v40 = vadd.f32 %v18519_v9, %v18514_v27 }
 0x502   : > { %v14023_v18 = vpop.f32.mrf.mxu1 }
 0x503   : > { %v14024_v37 = vadd.f32 %v14023_v18, %v14022_v52  ;;  %v18556_v26 = vpack.c.bf16 %v5147_v20, %v5146_v56  ;;  %v5116_v38 = vadd.f32 %v18468_v0, %v5077_v11  ;;  %v4694_v10 = vadd.f32 %v13918_v40, %v18438_v3  ;;  %v13937_v40 = vpop.f32.mrf.mxu0 }
 0x504   : > { %v14025_v6 = vpop.f32.mrf.mxu1  ;;  %v13924_v3 = vadd.f32 %v13923_v23, %v18534_v57  ;;  %v13927_v18 = vadd.f32 %v13926_v19, %v18542_v8 }
 0x505   : > { %v5078_v39 = vadd.f32 %v14024_v37, %v4692_v59  ;;  %v5148_v13 = vmax.f32 %v5116_v38, 0.0 }
 0x506   : > { %v14026_v41 = vpop.f32.mrf.mxu1  ;;  %v4696_v11 = vadd.f32 %v13924_v3, %v18444_v58  ;;  %v4697_v38 = vadd.f32 %v13927_v18, %v18447_v15 }
 0x507   : > { %v5117_v45 = vadd.f32 %v18468_v0, %v5078_v39  ;;  %v14027_v31 = vadd.f32 %v14026_v41, %v14025_v6  ;;  %v13930_v39 = vadd.f32 %v13929_v60, %v13928_v62 }
 0x508   : > { %v14028_v24 = vpop.f32.mrf.mxu1 }
 0x509   : > { %v5149_v63 = vmax.f32 %v5117_v45, 0.0  ;;  %v5079_v53 = vadd.f32 %v14027_v31, %v4693_v44 }
 0x50a   : > { %v14029_v1 = vpop.f32.mrf.mxu1 }
 0x50b   : > { %v14030_v2 = vadd.f32 %v14029_v1, %v14028_v24  ;;  %v18566_v46 = vpack.c.bf16 %v5149_v63, %v5148_v13  ;;  %v5118_v27 = vadd.f32 %v18468_v0, %v5079_v53  ;;  %v4698_v24 = vadd.f32 %v13930_v39, %v18450_v16  ;;  %v13938_v1 = vpop.f32.mrf.mxu0 }
 0x50c   : > { %v14031_v28 = vpop.f32.mrf.mxu1  ;;  %v13933_v13 = vadd.f32 %v13932_v22, %v13931_v49  ;;  %v13939_v3 = vadd.f32 %v13938_v1, %v13937_v40  ;;  %v15398_v1 = vld [vmem:[%s20478_s4 + $0xe0] ss:$8 sps:$4 sm:$0xff]  }
 0x50d   : > { %v5080_v9 = vadd.f32 %v14030_v2, %v4694_v10  ;;  %v5150_v7 = vmax.f32 %v5118_v27, 0.0  ;;  %v13936_v2 = vadd.f32 %v13935_v61, %v13934_v36 }
 0x50e   : > { %v14032_v17 = vpop.f32.mrf.mxu1  ;;  %v4699_v32 = vadd.f32 %v13933_v13, %v18453_v50  ;;  %v15400_v13 = vld [vmem:[%s20478_s4 + $0xe4] ss:$8 sps:$4 sm:$0xff]  }
 0x50f   : > { %v5119_v54 = vadd.f32 %v18468_v0, %v5080_v9  ;;  %v14033_v34 = vadd.f32 %v14032_v17, %v14031_v28  ;;  %v13940_v9 = vpop.f32.mrf.mxu0 }
 0x510   : > { %v14034_v4 = vpop.f32.mrf.mxu1 }
 0x511   : > { %v5151_v52 = vmax.f32 %v5119_v54, 0.0  ;;  %v5081_v56 = vadd.f32 %v14033_v34, %v4695_v51  ;;  %v4700_v51 = vadd.f32 %v13936_v2, %v18456_v14  ;;  %v20756_v2 = vmov 0  }
 0x512   : > { %v14035_v20 = vpop.f32.mrf.mxu1 }
 0x513   : > { %v14036_v59 = vadd.f32 %v14035_v20, %v14034_v4  ;;  %v18577_v25 = vpack.c.bf16 %v5151_v52, %v5150_v7  ;;  %v5120_v57 = vadd.f32 %v18468_v0, %v5081_v56  ;;  %v13941_v4 = vpop.f32.mrf.mxu0  ;;  %v4701_v56 = vadd.f32 %v13939_v3, %v18459_v29  ;;  %v15416_v3 = vld [vmem:[%s20483_s9 + $0x98] ss:$36 sps:$4 sm:$0xff]  }
 0x514   : > { %v14037_v37 = vpop.f32.mrf.mxu1  ;;  %v13942_v20 = vadd.f32 %v13941_v4, %v13940_v9  ;;  %v15374_v9 = vld [vmem:[%s20478_s4 + $0x50] ss:$8 sps:$4 sm:$0xff]   ;;  %v15419_v4 = vld [vmem:[%s20483_s9 + $0x48] ss:$36 sps:$4 sm:$0xff]  }
 0x515   : > { %v5082_v23 = vadd.f32 %v14036_v59, %v4696_v11  ;;  %v5152_v58 = vmax.f32 %v5120_v57, 0.0 }
 0x516   : > { %v14038_v6 = vpop.f32.mrf.mxu1 }
 0x517   : > { %v5121_v41 = vadd.f32 %v18468_v0, %v5082_v23  ;;  %v14039_v44 = vadd.f32 %v14038_v6, %v14037_v37  ;;  %v4702_v23 = vadd.f32 %v13942_v20, %v18462_v43  ;;  %v15359_v43 = vld [vmem:[%s20478_s4] ss:$8 sps:$4 sm:$0xff]   ;;  %v15433_v20 = vld [vmem:[%s20483_s9 + $0xec] ss:$36 sps:$4 sm:$0xff]  }
 0x518   : > { %v14040_v45 = vpop.f32.mrf.mxu1 }
 0x519   : > { %v5153_v31 = vmax.f32 %v5121_v41, 0.0  ;;  %v5083_v8 = vadd.f32 %v14039_v44, %v4697_v38 }
 0x51a   : > { %v14041_v19 = vpop.f32.mrf.mxu1 }
 0x51b   : > { %v14042_v63 = vadd.f32 %v14041_v19, %v14040_v45  ;;  %v18583_v53 = vpack.c.bf16 %v5153_v31, %v5152_v58  ;;  %v5122_v15 = vadd.f32 %v18468_v0, %v5083_v8  ;;  %v15364_v58 = vld [vmem:[%s20478_s4 + $0x14] ss:$8 sps:$4 sm:$0xff]   ;;  %v15362_v8 = vld [vmem:[%s20478_s4 + $0x10] ss:$8 sps:$4 sm:$0xff]  }
 0x51c   : > { %v14043_v10 = vpop.f32.mrf.mxu1  ;;  %v15394_v31 = vld [vmem:[%s20478_s4 + $0xd4] ss:$8 sps:$4 sm:$0xff]   ;;  %v15392_v19 = vld [vmem:[%s20478_s4 + $0xd0] ss:$8 sps:$4 sm:$0xff]  }
 0x51d   : > { %v5084_v62 = vadd.f32 %v14042_v63, %v4698_v24  ;;  %v5154_v17 = vmax.f32 %v5122_v15, 0.0  ;;  %v15367_v24 = vld [vmem:[%s20478_s4 + $0x24] ss:$8 sps:$4 sm:$0xff]   ;;  %v15365_v63 = vld [vmem:[%s20478_s4 + $0x20] ss:$8 sps:$4 sm:$0xff]  }
 0x51e   : > { %v14044_v60 = vpop.f32.mrf.mxu1  ;;  %v15406_v15 = vld [vmem:[%s20478_s4 + $0xf4] ss:$8 sps:$4 sm:$0xff]  }
 0x51f   : > { %v5123_v28 = vadd.f32 %v18468_v0, %v5084_v62  ;;  %v14045_v27 = vadd.f32 %v14044_v60, %v14043_v10  ;;  %v15370_v10 = vld [vmem:[%s20478_s4 + $0x34] ss:$8 sps:$4 sm:$0xff]   ;;  %v15368_v62 = vld [vmem:[%s20478_s4 + $0x30] ss:$8 sps:$4 sm:$0xff]  }
 0x520   : > { %v14046_v35 = vpop.f32.mrf.mxu1  ;;  %v15404_v60 = vld [vmem:[%s20478_s4 + $0xf0] ss:$8 sps:$4 sm:$0xff]  }
 0x521   : > { %v5155_v16 = vmax.f32 %v5123_v28, 0.0  ;;  %v5085_v49 = vadd.f32 %v14045_v27, %v4699_v32  ;;  %v15373_v32 = vld [vmem:[%s20478_s4 + $0x44] ss:$8 sps:$4 sm:$0xff]   ;;  %v15371_v28 = vld [vmem:[%s20478_s4 + $0x40] ss:$8 sps:$4 sm:$0xff]  }
 0x522   : > { %v14047_v22 = vpop.f32.mrf.mxu1  ;;  %v15376_v27 = vld [vmem:[%s20478_s4 + $0x54] ss:$8 sps:$4 sm:$0xff]  }
 0x523   : > { %v14048_v54 = vadd.f32 %v14047_v22, %v14046_v35  ;;  %v18589_v34 = vpack.c.bf16 %v5155_v16, %v5154_v17  ;;  %v5124_v50 = vadd.f32 %v18468_v0, %v5085_v49  ;;  %v15379_v35 = vld [vmem:[%s20478_s4 + $0x64] ss:$8 sps:$4 sm:$0xff]   ;;  %v15407_v17 = vld [vmem:[%s20483_s9 + $0xd8] ss:$36 sps:$4 sm:$0xff]  }
 0x524   : > { %v14049_v7 = vpop.f32.mrf.mxu1  ;;  %v15410_v16 = vld [vmem:[%s20483_s9 + $0xe0] ss:$36 sps:$4 sm:$0xff]   ;;  %v15415_v49 = vld [vmem:[%s20483_s9 + $0x94] ss:$36 sps:$4 sm:$0xff]  }
 0x525   : > { %v5086_v36 = vadd.f32 %v14048_v54, %v4700_v51  ;;  %v5156_v61 = vmax.f32 %v5124_v50, 0.0  ;;  %v15418_v22 = vld [vmem:[%s20483_s9 + $0x9c] ss:$36 sps:$4 sm:$0xff]   ;;  %v15413_v51 = vld [vmem:[%s20483_s9 + $0x90] ss:$36 sps:$4 sm:$0xff]  }
 0x526   : > { %v14050_v52 = vpop.f32.mrf.mxu1  ;;  %v15421_v54 = vld [vmem:[%s20483_s9 + $0x4c] ss:$36 sps:$4 sm:$0xff]   ;;  %v15427_v50 = vld [vmem:[%s20483_s9 + $0x4] ss:$36 sps:$4 sm:$0xff]  }
 0x527   : > { %v5125_v11 = vadd.f32 %v18468_v0, %v5086_v36  ;;  %v14051_v18 = vadd.f32 %v14050_v52, %v14049_v7  ;;  %v15422_v7 = vld [vmem:[%s20483_s9 + $0x50] ss:$36 sps:$4 sm:$0xff]   ;;  %v15425_v52 = vld [vmem:[%s20483_s9] ss:$36 sps:$4 sm:$0xff]  }
 0x528   : > { %v14052_v59 = vpop.f32.mrf.mxu1  ;;  %v15430_v36 = vld [vmem:[%s20483_s9 + $0xc] ss:$36 sps:$4 sm:$0xff]  }
 0x529   : > { %v5157_v37 = vmax.f32 %v5125_v11, 0.0  ;;  %v5087_v14 = vadd.f32 %v14051_v18, %v4701_v56  ;;  %v15428_v56 = vld [vmem:[%s20483_s9 + $0x8] ss:$36 sps:$4 sm:$0xff]   ;;  %v15436_v11 = vld [vmem:[%s20483_s9 + $0xf4] ss:$36 sps:$4 sm:$0xff]  }
 0x52a   : > { %v14053_v57 = vpop.f32.mrf.mxu1 }
 0x52b   : > { %v14054_v6 = vadd.f32 %v14053_v57, %v14052_v59  ;;  %v18595_v38 = vpack.c.bf16 %v5157_v37, %v5156_v61  ;;  %v5126_v39 = vadd.f32 %v18468_v0, %v5087_v14 }
 0x52d   : > { %v5088_v41 = vadd.f32 %v14054_v6, %v4702_v23  ;;  %v5158_v29 = vmax.f32 %v5126_v39, 0.0 }
 0x52f   : > { %v5127_v44 = vadd.f32 %v18468_v0, %v5088_v41  ;;  %v15386_v0 = vld [vmem:[%s20478_s4 + $0xc0] ss:$8 sps:$4 sm:$0xff]  }
 0x531   : > { %v5159_v40 = vmax.f32 %v5127_v44, 0.0 }
 0x533   : > { %v18599_v45 = vpack.c.bf16 %v5159_v40, %v5158_v29 }
 0x535   : > { %14055 = vmatprep.subr.bf16.mxu0 %v18599_v45  ;;  %14175 = vmatprep.subr.bf16.mxu1 %v18599_v45 }
 0x536   : > { %14056 = vmatpush3.bf16.msra.mxu0 %v18537_v42  ;;  %14176 = vmatpush3.bf16.msra.mxu1 %v18537_v42 }
 0x537   : > { %14057 = vmatprep.subr.bf16.mxu0 %v18595_v38  ;;  %14177 = vmatprep.subr.bf16.mxu1 %v18595_v38 }
 0x53a   : > { %14058 = vmatpush3.bf16.msra.mxu0 %v18527_v47  ;;  %14178 = vmatpush3.bf16.msra.mxu1 %v18527_v47 }
 0x53b   : > { %14059 = vmatprep.subr.bf16.mxu0 %v18589_v34  ;;  %14179 = vmatprep.subr.bf16.mxu1 %v18589_v34 }
 0x53e   : > { %14060 = vmatpush3.bf16.msra.mxu0 %v18517_v55  ;;  %14180 = vmatpush3.bf16.msra.mxu1 %v18517_v55 }
 0x53f   : > { %14061 = vmatprep.subr.bf16.mxu0 %v18583_v53  ;;  %14181 = vmatprep.subr.bf16.mxu1 %v18583_v53 }
 0x542   : > { %14062 = vmatpush3.bf16.msra.mxu0 %v18507_v33  ;;  %14182 = vmatpush3.bf16.msra.mxu1 %v18507_v33 }
 0x543   : > { %14063 = vmatprep.subr.bf16.mxu0 %v18577_v25  ;;  %14183 = vmatprep.subr.bf16.mxu1 %v18577_v25 }
 0x546   : > { %14064 = vmatpush3.bf16.msra.mxu0 %v18494_v12  ;;  %14184 = vmatpush3.bf16.msra.mxu1 %v18494_v12 }
 0x547   : > { %14065 = vmatprep.subr.bf16.mxu0 %v18566_v46  ;;  %14185 = vmatprep.subr.bf16.mxu1 %v18566_v46 }
 0x54a   : > { %14066 = vmatpush3.bf16.msra.mxu0 %v18486_v5  ;;  %14186 = vmatpush3.bf16.msra.mxu1 %v18486_v5 }
 0x54b   : > { %14067 = vmatprep.subr.bf16.mxu0 %v18556_v26  ;;  %14187 = vmatprep.subr.bf16.mxu1 %v18556_v26 }
 0x54e   : > { %14068 = vmatpush3.bf16.msra.mxu0 %v18480_v30  ;;  %14188 = vmatpush3.bf16.msra.mxu1 %v18480_v30 }
 0x54f   : > { %14069 = vmatprep.subr.bf16.mxu0 %v18545_v21  ;;  %14189 = vmatprep.subr.bf16.mxu1 %v18545_v21 }
 0x552   : > { %14070 = vmatpush3.bf16.msra.mxu0 %v18474_v48  ;;  %14190 = vmatpush3.bf16.msra.mxu1 %v18474_v48 }
 0x553   : > { %14095 = vmatprep.subr.bf16.mxu0 %v18599_v45 }
 0x555   : > { %5257 = vmatmul.mubr.bf16.vlgmr.msra.gmra.mxu0 %v15359_v43  ;;  %5599 = vmatmul.mubr.bf16.vlgmr.msra.gmra.mxu1 %v15386_v0 }
 0x556   : > { %14096 = vmatpush3.bf16.msra.mxu0 %v18537_v42  ;;  %5264 = vmatprep.mubr.bf16.mxu0 %v15364_v58 }
 0x557   : > { %14097 = vmatprep.subr.bf16.mxu0 %v18595_v38  ;;  %5606 = vmatprep.mubr.bf16.mxu1 %v15394_v31 }
 0x55a   : > { %14098 = vmatpush3.bf16.msra.mxu0 %v18527_v47 }
 0x55b   : > { %14099 = vmatprep.subr.bf16.mxu0 %v18589_v34 }
 0x55d   : > { %5265 = vmatmul.mubr.bf16.gmra.mxu0 %v15362_v8  ;;  %5607 = vmatmul.mubr.bf16.gmra.mxu1 %v15392_v19 }
 0x55e   : > { %14100 = vmatpush3.bf16.msra.mxu0 %v18517_v55  ;;  %5272 = vmatprep.mubr.bf16.mxu0 %v15367_v24 }
 0x55f   : > { %14101 = vmatprep.subr.bf16.mxu0 %v18583_v53  ;;  %5614 = vmatprep.mubr.bf16.mxu1 %v15400_v13 }
 0x562   : > { %14102 = vmatpush3.bf16.msra.mxu0 %v18507_v33 }
 0x563   : > { %14103 = vmatprep.subr.bf16.mxu0 %v18577_v25 }
 0x565   : > { %5273 = vmatmul.mubr.bf16.gmra.mxu0 %v15365_v63  ;;  %5615 = vmatmul.mubr.bf16.gmra.mxu1 %v15398_v1 }
 0x566   : > { %14104 = vmatpush3.bf16.msra.mxu0 %v18494_v12  ;;  %5280 = vmatprep.mubr.bf16.mxu0 %v15370_v10 }
 0x567   : > { %14105 = vmatprep.subr.bf16.mxu0 %v18566_v46  ;;  %5622 = vmatprep.mubr.bf16.mxu1 %v15406_v15 }
 0x56a   : > { %14106 = vmatpush3.bf16.msra.mxu0 %v18486_v5 }
 0x56b   : > { %14107 = vmatprep.subr.bf16.mxu0 %v18556_v26 }
 0x56d   : > { %5281 = vmatmul.mubr.bf16.gmra.mxu0 %v15368_v62  ;;  %5623 = vmatmul.mubr.bf16.gmra.mxu1 %v15404_v60 }
 0x56e   : > { %14108 = vmatpush3.bf16.msra.mxu0 %v18480_v30  ;;  %5370 = vmatprep.mubr.bf16.mxu0 %v15373_v32 }
 0x56f   : > { %14109 = vmatprep.subr.bf16.mxu0 %v18545_v21  ;;  %6001 = vmatprep.mubr.bf16.mxu1 %v20756_v2 }
 0x572   : > { %14110 = vmatpush3.bf16.msra.mxu0 %v18474_v48 }
 0x573   : > { %14135 = vmatprep.subr.bf16.mxu0 %v18599_v45 }
 0x575   : > { %5371 = vmatmul.mubr.bf16.vlgmr.msra.gmra.mxu0 %v15371_v28 }
 0x576   : > { %14136 = vmatpush3.bf16.msra.mxu0 %v18537_v42  ;;  %5378 = vmatprep.mubr.bf16.mxu0 %v15376_v27  ;;  %v15377_v42 = vld [vmem:[%s20478_s4 + $0x60] ss:$8 sps:$4 sm:$0xff]  }
 0x577   : > { %14137 = vmatprep.subr.bf16.mxu0 %v18595_v38 }
 0x57a   : > { %14138 = vmatpush3.bf16.msra.mxu0 %v18527_v47  ;;  %v15382_v47 = vld [vmem:[%s20478_s4 + $0x74] ss:$8 sps:$4 sm:$0xff]  }
 0x57b   : > { %14139 = vmatprep.subr.bf16.mxu0 %v18589_v34  ;;  %v15424_v34 = vld [vmem:[%s20483_s9 + $0x54] ss:$36 sps:$4 sm:$0xff]  }
 0x57d   : > { %5379 = vmatmul.mubr.bf16.gmra.mxu0 %v15374_v9 }
 0x57e   : > { %14140 = vmatpush3.bf16.msra.mxu0 %v18517_v55  ;;  %5386 = vmatprep.mubr.bf16.mxu0 %v15379_v35  ;;  %v15380_v55 = vld [vmem:[%s20478_s4 + $0x70] ss:$8 sps:$4 sm:$0xff]  }
 0x57f   : > { %14141 = vmatprep.subr.bf16.mxu0 %v18583_v53  ;;  %v15412_v53 = vld [vmem:[%s20483_s9 + $0xe4] ss:$36 sps:$4 sm:$0xff]  }
 0x580   : > { %5977 = vmatprep.subr.bf16.mxu1 %v15412_v53 }
 0x581   : > { %5978 = vmatpush1.bf16.msra.mxu1 %v15410_v16 }
 0x582   : > { %14142 = vmatpush3.bf16.msra.mxu0 %v18507_v33  ;;  %v15385_v33 = vld [vmem:[%s20478_s4 + $0x84] ss:$8 sps:$4 sm:$0xff]   ;;  %5979 = vmatprep.subr.bf16.mxu1 %v15418_v22 }
 0x583   : > { %14143 = vmatprep.subr.bf16.mxu0 %v18577_v25  ;;  %v15409_v25 = vld [vmem:[%s20483_s9 + $0xdc] ss:$36 sps:$4 sm:$0xff]  }
 0x585   : > { %5387 = vmatmul.mubr.bf16.gmra.mxu0 %v15377_v42  ;;  %5980 = vmatpush1.bf16.msra.mxu1 %v15416_v3 }
 0x586   : > { %14144 = vmatpush3.bf16.msra.mxu0 %v18494_v12  ;;  %5394 = vmatprep.mubr.bf16.mxu0 %v15382_v47  ;;  %v15383_v12 = vld [vmem:[%s20478_s4 + $0x80] ss:$8 sps:$4 sm:$0xff]  }
 0x587   : > { %14145 = vmatprep.subr.bf16.mxu0 %v18566_v46  ;;  %v15401_v46 = vld [vmem:[%s20478_s4 + $0xb0] ss:$8 sps:$4 sm:$0xff]   ;;  %5981 = vmatprep.subr.bf16.mxu1 %v15424_v34 }
 0x589   : > { %5982 = vmatpush1.bf16.msra.mxu1 %v15422_v7 }
 0x58a   : > { %14146 = vmatpush3.bf16.msra.mxu0 %v18486_v5  ;;  %v15391_v5 = vld [vmem:[%s20478_s4 + $0x94] ss:$8 sps:$4 sm:$0xff]   ;;  %5983 = vmatprep.subr.bf16.mxu1 %v15430_v36 }
 0x58b   : > { %14147 = vmatprep.subr.bf16.mxu0 %v18556_v26  ;;  %v15389_v26 = vld [vmem:[%s20478_s4 + $0x90] ss:$8 sps:$4 sm:$0xff]  }
 0x58d   : > { %5395 = vmatmul.mubr.bf16.gmra.mxu0 %v15380_v55  ;;  %5984 = vmatpush1.bf16.msra.mxu1 %v15428_v56 }
 0x58e   : > { %14148 = vmatpush3.bf16.msra.mxu0 %v18480_v30  ;;  %5484 = vmatprep.mubr.bf16.mxu0 %v15385_v33  ;;  %v15397_v30 = vld [vmem:[%s20478_s4 + $0xa4] ss:$8 sps:$4 sm:$0xff]  }
 0x58f   : > { %14149 = vmatprep.subr.bf16.mxu0 %v18545_v21  ;;  %v15403_v21 = vld [vmem:[%s20478_s4 + $0xb4] ss:$8 sps:$4 sm:$0xff]   ;;  %6123 = vmatprep.subr.bf16.mxu1 %v15436_v11 }
 0x592   : > { %14150 = vmatpush3.bf16.msra.mxu0 %v18474_v48  ;;  %v15395_v48 = vld [vmem:[%s20478_s4 + $0xa0] ss:$8 sps:$4 sm:$0xff]  }
 0x593   : > { %5904 = vmatprep.subr.bf16.mxu0 %v15409_v25 }
 0x595   : > { %5485 = vmatmul.mubr.bf16.vlgmr.msra.gmra.mxu0 %v15383_v12 }
 0x596   : > { %5492 = vmatprep.mubr.bf16.mxu0 %v15391_v5  ;;  %5905 = vmatpush1.bf16.msra.mxu0 %v15407_v17 }
 0x597   : > { %5906 = vmatprep.subr.bf16.mxu0 %v15415_v49 }
 0x59a   : > { %5907 = vmatpush1.bf16.msra.mxu0 %v15413_v51 }
 0x59b   : > { %5908 = vmatprep.subr.bf16.mxu0 %v15421_v54 }
 0x59d   : > { %5493 = vmatmul.mubr.bf16.gmra.mxu0 %v15389_v26 }
 0x59e   : > { %5500 = vmatprep.mubr.bf16.mxu0 %v15397_v30  ;;  %5909 = vmatpush1.bf16.msra.mxu0 %v15419_v4 }
 0x59f   : > { %5910 = vmatprep.subr.bf16.mxu0 %v15427_v50 }
 0x5a2   : > { %5911 = vmatpush1.bf16.msra.mxu0 %v15425_v52 }
 0x5a3   : > { %6050 = vmatprep.subr.bf16.mxu0 %v15433_v20 }
 0x5a5   : > { %5501 = vmatmul.mubr.bf16.gmra.mxu0 %v15395_v48 }
 0x5a6   : > { %5508 = vmatprep.mubr.bf16.mxu0 %v15403_v21 }
 0x5ad   : > { %5509 = vmatmul.mubr.bf16.gmra.mxu0 %v15401_v46 }
 0x5ae   : > { %5928 = vmatprep.mubr.bf16.mxu0 %v20756_v2 }
 0x615   : > { %v14071_v18 = vpop.f32.mrf.mxu0  ;;  %v14191_v24 = vpop.f32.mrf.mxu1 }
 0x617   : > { %v14072_v59 = vpop.f32.mrf.mxu0  ;;  %v14192_v1 = vpop.f32.mrf.mxu1 }
 0x618   : > { %v18811_v61 = vadd.f32 %v14072_v59, %v14071_v18  ;;  %v14193_v3 = vadd.f32 %v14192_v1, %v14191_v24  ;;  %v15442_v1 = vld [vmem:[%s20483_s9 + $0xac] ss:$36 sps:$4 sm:$0xff]  }
 0x619   : > { %v14074_v37 = vpop.f32.mrf.mxu0  ;;  %v14194_v62 = vpop.f32.mrf.mxu1 }
 0x61b   : > { %v14075_v14 = vpop.f32.mrf.mxu0  ;;  %v14195_v28 = vpop.f32.mrf.mxu1 }
 0x61c   : > { %v14076_v34 = vadd.f32 %v14075_v14, %v14074_v37  ;;  %v14196_v50 = vadd.f32 %v14195_v28, %v14194_v62 }
 0x61d   : > { %v14077_v57 = vpop.f32.mrf.mxu0  ;;  %v14197_v35 = vpop.f32.mrf.mxu1 }
 0x61f   : > { %v14078_v23 = vpop.f32.mrf.mxu0  ;;  %v14198_v55 = vpop.f32.mrf.mxu1 }
 0x620   : > { %v18813_v6 = vadd.f32 %v14078_v23, %v14077_v57  ;;  %v14199_v14 = vadd.f32 %v14198_v55, %v14197_v35  ;;  %v15440_v35 = vld [vmem:[%s20483_s9 + $0xa8] ss:$36 sps:$4 sm:$0xff]  }
 0x621   : > { %v18815_v38 = vpop.f32.mrf.mxu0  ;;  %v14200_v5 = vpop.f32.mrf.mxu1 }
 0x623   : > { %v18817_v39 = vpop.f32.mrf.mxu0  ;;  %v14201_v48 = vpop.f32.mrf.mxu1 }
 0x624   : > { %v14082_v24 = vadd.f32 %v18817_v39, %v18815_v38  ;;  %v14202_v62 = vadd.f32 %v14201_v48, %v14200_v5  ;;  %v15445_v5 = vld [vmem:[%s20483_s9 + $0x5c] ss:$36 sps:$4 sm:$0xff]  }
 0x625   : > { %v14083_v41 = vpop.f32.mrf.mxu0  ;;  %v14203_v25 = vpop.f32.mrf.mxu1 }
 0x627   : > { %v14084_v44 = vpop.f32.mrf.mxu0  ;;  %v14204_v49 = vpop.f32.mrf.mxu1 }
 0x628   : > { %v18819_v29 = vadd.f32 %v14084_v44, %v14083_v41 }
 0x629   : > { %v18821_v40 = vpop.f32.mrf.mxu0  ;;  %v18847_v52 = vpop.f32.mrf.mxu1 }
 0x62b   : > { %v18823_v45 = vpop.f32.mrf.mxu0  ;;  %v14207_v44 = vpop.f32.mrf.mxu1 }
 0x62d   : > { %v14089_v43 = vpop.f32.mrf.mxu0  ;;  %v14209_v38 = vpop.f32.mrf.mxu1 }
 0x62f   : > { %v14090_v0 = vpop.f32.mrf.mxu0 }
 0x630   : > { %v18825_v58 = vadd.f32 %v14090_v0, %v14089_v43 }
 0x631   : > { %v18827_v31 = vpop.f32.mrf.mxu0 }
 0x633   : > { %v18829_v8 = vpop.f32.mrf.mxu0 }
 0x635   : > { %v14111_v19 = vpop.f32.mrf.mxu0 }
 0x637   : > { %v14112_v13 = vpop.f32.mrf.mxu0 }
 0x638   : > { %v14113_v22 = vadd.f32 %v14112_v13, %v14111_v19  ;;  %v15431_v19 = vld [vmem:[%s20483_s9 + $0xe8] ss:$36 sps:$4 sm:$0xff]  }
 0x639   : > { %v14114_v63 = vpop.f32.mrf.mxu0 }
 0x63a   : > { %v5631_v56 = vmax.f32 %v18811_v61, %v14113_v22  ;;  %v15434_v61 = vld [vmem:[%s20483_s9 + $0xf0] ss:$36 sps:$4 sm:$0xff]   ;;  %v14210_v22 = vpop.f32.mrf.mxu1 }
 0x63b   : > { %v14115_v10 = vpop.f32.mrf.mxu0 }
 0x63c   : > { %v14116_v51 = vadd.f32 %v14115_v10, %v14114_v63  ;;  %v15439_v63 = vld [vmem:[%s20483_s9 + $0xa4] ss:$36 sps:$4 sm:$0xff]  }
 0x63d   : > { %v14117_v15 = vpop.f32.mrf.mxu0 }
 0x63e   : > { %v5632_v20 = vmax.f32 %v14076_v34, %v14116_v51  ;;  %v15443_v34 = vld [vmem:[%s20483_s9 + $0x58] ss:$36 sps:$4 sm:$0xff]  }
 0x63f   : > { %v14118_v60 = vpop.f32.mrf.mxu0 }
 0x640   : > { %v14119_v43 = vadd.f32 %v14118_v60, %v14117_v15 }
 0x641   : > { %v14120_v32 = vpop.f32.mrf.mxu0 }
 0x642   : > { %v5633_v39 = vmax.f32 %v18813_v6, %v14119_v43  ;;  %v15448_v6 = vld [vmem:[%s20483_s9 + $0x64] ss:$36 sps:$4 sm:$0xff]  }
 0x643   : > { %v14121_v27 = vpop.f32.mrf.mxu0 }
 0x644   : > { %v14122_v0 = vadd.f32 %v14121_v27, %v14120_v32  ;;  %v15437_v27 = vld [vmem:[%s20483_s9 + $0xa0] ss:$36 sps:$4 sm:$0xff]  }
 0x645   : > { %v18831_v9 = vpop.f32.mrf.mxu0 }
 0x646   : > { %v5634_v32 = vmax.f32 %v14082_v24, %v14122_v0 }
 0x647   : > { %v18833_v42 = vpop.f32.mrf.mxu0 }
 0x648   : > { %v14125_v51 = vadd.f32 %v18833_v42, %v18831_v9  ;;  %v15451_v9 = vld [vmem:[%s20483_s9 + $0x14] ss:$36 sps:$4 sm:$0xff]   ;;  %v15454_v42 = vld [vmem:[%s20483_s9 + $0x1c] ss:$36 sps:$4 sm:$0xff]  }
 0x649   : > { %v18835_v47 = vpop.f32.mrf.mxu0 }
 0x64b   : > { %v18837_v33 = vpop.f32.mrf.mxu0 }
 0x64d   : > { %v18839_v12 = vpop.f32.mrf.mxu0 }
 0x64f   : > { %v18841_v26 = vpop.f32.mrf.mxu0 }
 0x650   : > { %v14131_v43 = vadd.f32 %v18841_v26, %v18839_v12 }
 0x651   : > { %v18843_v30 = vpop.f32.mrf.mxu0 }
 0x652   : > { %v5637_v12 = vmax.f32 %v18825_v58, %v14131_v43  ;;  %v15457_v58 = vld [vmem:[%s20483_s9 + $0x68] ss:$36 sps:$4 sm:$0xff]  }
 0x653   : > { %v18845_v21 = vpop.f32.mrf.mxu0 }
 0x654   : > { %v14134_v0 = vadd.f32 %v18845_v21, %v18843_v30 }
 0x655   : > { %v14151_v46 = vpop.f32.mrf.mxu0 }
 0x657   : > { %v14152_v53 = vpop.f32.mrf.mxu0 }
 0x658   : > { %v14153_v17 = vadd.f32 %v14152_v53, %v14151_v46 }
 0x659   : > { %v14154_v16 = vpop.f32.mrf.mxu0 }
 0x65a   : > { %v5639_v4 = vmax.f32 %v14153_v17, %v14193_v3  ;;  %v14205_v17 = vadd.f32 %v14204_v49, %v14203_v25  ;;  %v14128_v3 = vadd.f32 %v18837_v33, %v18835_v47  ;;  %v15446_v25 = vld [vmem:[%s20483_s9 + $0x60] ss:$36 sps:$4 sm:$0xff]   ;;  %v14088_v49 = vadd.f32 %v18823_v45, %v18821_v40  ;;  %v14212_v45 = vpop.f32.mrf.mxu1 }
 0x65b   : > { %v14155_v54 = vpop.f32.mrf.mxu0 }
 0x65c   : > { %v14156_v7 = vadd.f32 %v14155_v54, %v14154_v16  ;;  %v5647_v59 = vmax.f32 %v5631_v56, %v5639_v4 }
 0x65d   : > { %v14157_v36 = vpop.f32.mrf.mxu0 }
 0x65e   : > { %v5640_v11 = vmax.f32 %v14156_v7, %v14196_v50  ;;  %v14208_v7 = vadd.f32 %v14207_v44, %v18847_v52  ;;  %v5635_v50 = vmax.f32 %v18819_v29, %v14125_v51  ;;  %v15449_v52 = vld [vmem:[%s20483_s9 + $0x10] ss:$36 sps:$4 sm:$0xff]   ;;  %v14213_v44 = vpop.f32.mrf.mxu1 }
 0x65f   : > { %v14158_v18 = vpop.f32.mrf.mxu0 }
 0x660   : > { %v5648_v57 = vmax.f32 %v5632_v20, %v5640_v11  ;;  %v14159_v23 = vadd.f32 %v14158_v18, %v14157_v36  ;;  %v5636_v36 = vmax.f32 %v14088_v49, %v14128_v3  ;;  %v15452_v20 = vld [vmem:[%s20483_s9 + $0x18] ss:$36 sps:$4 sm:$0xff]  }
 0x661   : > { %v14160_v41 = vpop.f32.mrf.mxu0  ;;  %v15455_v18 = vld [vmem:[%s20483_s9 + $0xf8] ss:$36 sps:$4 sm:$0xff]  }
 0x662   : > { %v18850_v37 = vpack.c.bf16 %v5648_v57, %v5647_v59  ;;  %v5641_v10 = vmax.f32 %v14159_v23, %v14199_v14  ;;  %v14211_v23 = vadd.f32 %v14210_v22, %v14209_v38 }
 0x663   : > { %v14161_v13 = vpop.f32.mrf.mxu0 }
 0x664   : > { %v14162_v15 = vadd.f32 %v14161_v13, %v14160_v41  ;;  %12431 = vmatmul.mubr.msk.bf16.vlgmr.msra.gmra.mxu0 %vm5883_vm2, %v18850_v37  ;;  %12435 = vmatmul.mubr.msk.bf16.vlgmr.msra.gmra.mxu1 %vm5883_vm2, %v18850_v37  ;;  %v5649_v48 = vmax.f32 %v5633_v39, %v5641_v10  ;;  %v15458_v10 = vld [vmem:[%s20483_s9 + $0x20] ss:$36 sps:$4 sm:$0xff]  }
 0x665   : > { %v14163_v60 = vpop.f32.mrf.mxu0  ;;  %5938 = vmatprep.mubr.bf16.mxu0 %v20756_v2  ;;  %6011 = vmatprep.mubr.bf16.mxu1 %v20756_v2 }
 0x666   : > { %v5642_v28 = vmax.f32 %v14162_v15, %v14202_v62  ;;  %6051 = vmatpush1.bf16.msra.mxu0 %v15431_v19  ;;  %6124 = vmatpush1.bf16.msra.mxu1 %v15434_v61  ;;  %v14094_v19 = vadd.f32 %v18829_v8, %v18827_v31  ;;  %v15456_v8 = vld [vmem:[%s20483_s9 + $0xb0] ss:$36 sps:$4 sm:$0xff]   ;;  %v15459_v15 = vld [vmem:[%s20757_s29] sm:$0xff]  }
 0x667   : > { %v14164_v55 = vpop.f32.mrf.mxu0  ;;  %6052 = vmatprep.subr.bf16.mxu0 %v15439_v63  ;;  %6125 = vmatprep.subr.bf16.mxu1 %v15442_v1  ;;  %v14214_v63 = vadd.f32 %v14213_v44, %v14212_v45  ;;  %v15460_v62 = vld [vmem:[%s20757_s29 + $0x20] sm:$0xff]  }
 0x668   : > { %v5650_v46 = vmax.f32 %v5634_v32, %v5642_v28  ;;  %v14165_v53 = vadd.f32 %v14164_v55, %v14163_v60  ;;  %v5638_v26 = vmax.f32 %v14094_v19, %v14134_v0 }
 0x669   : > { %v14166_v16 = vpop.f32.mrf.mxu0 }
 0x66a   : > { %v18889_v54 = vpack.c.bf16 %v5650_v46, %v5649_v48  ;;  %6053 = vmatpush1.bf16.msra.mxu0 %v15437_v27  ;;  %6126 = vmatpush1.bf16.msra.mxu1 %v15440_v35  ;;  %v5643_v47 = vmax.f32 %v14165_v53, %v14205_v17 }
 0x66b   : > { %v14167_v4 = vpop.f32.mrf.mxu0  ;;  %6054 = vmatprep.subr.bf16.mxu0 %v15445_v5  ;;  %6127 = vmatprep.subr.bf16.mxu1 %v15448_v6 }
 0x66c   : > { %v14168_v33 = vadd.f32 %v14167_v4, %v14166_v16  ;;  %12432 = vmatmul.mubr.msk.bf16.gmra.mxu0 %vm5883_vm2, %v18889_v54  ;;  %12436 = vmatmul.mubr.msk.bf16.gmra.mxu1 %vm5883_vm2, %v18889_v54  ;;  %v5651_v29 = vmax.f32 %v5635_v50, %v5643_v47 }
 0x66d   : > { %v14169_v40 = vpop.f32.mrf.mxu0  ;;  %5948 = vmatprep.mubr.bf16.mxu0 %v20756_v2  ;;  %6021 = vmatprep.mubr.bf16.mxu1 %v20756_v2 }
 0x66e   : > { %v5644_v56 = vmax.f32 %v14168_v33, %v14208_v7  ;;  %6055 = vmatpush1.bf16.msra.mxu0 %v15443_v34  ;;  %6128 = vmatpush1.bf16.msra.mxu1 %v15446_v25 }
 0x66f   : > { %v14170_v11 = vpop.f32.mrf.mxu0  ;;  %6056 = vmatprep.subr.bf16.mxu0 %v15451_v9  ;;  %6129 = vmatprep.subr.bf16.mxu1 %v15454_v42 }
 0x670   : > { %v5652_v59 = vmax.f32 %v5636_v36, %v5644_v56  ;;  %v14171_v57 = vadd.f32 %v14170_v11, %v14169_v40 }
 0x671   : > { %v14172_v41 = vpop.f32.mrf.mxu0 }
 0x672   : > { %v5657_v14 = vpack.c.bf16 %v5652_v59, %v5651_v29  ;;  %6057 = vmatpush1.bf16.msra.mxu0 %v15449_v52  ;;  %6130 = vmatpush1.bf16.msra.mxu1 %v15452_v20  ;;  %v5645_v24 = vmax.f32 %v14171_v57, %v14211_v23 }
 0x673   : > { %v14173_v61 = vpop.f32.mrf.mxu0  ;;  %14461 = vmatprep.subr.bf16.mxu0 %v15455_v18 }
 0x674   : > { %v14174_v13 = vadd.f32 %v14173_v61, %v14172_v41  ;;  %12433 = vmatmul.mubr.msk.bf16.gmra.mxu0 %vm5883_vm2, %v5657_v14  ;;  %12437 = vmatmul.mubr.msk.bf16.gmra.mxu1 %vm5883_vm2, %v5657_v14  ;;  %v5653_v21 = vmax.f32 %v5637_v12, %v5645_v24 }
 0x675   : > { %5958 = vmatprep.mubr.bf16.mxu0 %v20756_v2  ;;  %6031 = vmatprep.mubr.bf16.mxu1 %v20756_v2 }
 0x676   : > { %v5646_v30 = vmax.f32 %v14174_v13, %v14214_v63 }
 0x678   : > { %v5654_v1 = vmax.f32 %v5638_v26, %v5646_v30  ;;  %v15461_v26 = vld [vmem:[%s20757_s29 + $0x8] sm:$0xff]  }
 0x67a   : > { %v5658_v31 = vpack.c.bf16 %v5654_v1, %v5653_v21  ;;  %v15465_v1 = vld [vmem:[%s20757_s29 + $0x10] sm:$0xff]  }
 0x67c   : > { %12434 = vmatmul.mubr.msk.bf16.gmra.mxu0 %vm5883_vm2, %v5658_v31  ;;  %12438 = vmatmul.mubr.msk.bf16.gmra.mxu1 %vm5883_vm2, %v5658_v31 }
 0x67d   : > { %6074 = vmatprep.mubr.bf16.mxu0 %v20756_v2  ;;  %6147 = vmatprep.mubr.bf16.mxu1 %v20756_v2 }
 0x684   : > { %12439 = vmatmul.mubr.msk.bf16.vlgmr.msra.gmra.mxu0 %vm5883_vm2, %v18850_v37  ;;  %12443 = vmatmul.mubr.msk.bf16.vlgmr.msra.gmra.mxu1 %vm5883_vm2, %v18850_v37 }
 0x685   : > { %6084 = vmatprep.mubr.bf16.mxu0 %v20756_v2  ;;  %6157 = vmatprep.mubr.bf16.mxu1 %v20756_v2 }
 0x686   : > { %14462 = vmatpush3.bf16.msra.mxu0 %v15455_v18 }
 0x687   : > { %14463 = vmatprep.subr.bf16.mxu0 %v15456_v8 }
 0x68a   : > { %14464 = vmatpush3.bf16.msra.mxu0 %v15456_v8  ;;  %v15462_v8 = vld [vmem:[%s20757_s29 + $0x28] sm:$0xff]  }
 0x68b   : > { %14465 = vmatprep.subr.bf16.mxu0 %v15457_v58 }
 0x68c   : > { %12440 = vmatmul.mubr.msk.bf16.gmra.mxu0 %vm5883_vm2, %v18889_v54  ;;  %12444 = vmatmul.mubr.msk.bf16.gmra.mxu1 %vm5883_vm2, %v18889_v54 }
 0x68d   : > { %6094 = vmatprep.mubr.bf16.mxu0 %v20756_v2  ;;  %6167 = vmatprep.mubr.bf16.mxu1 %v20756_v2 }
 0x68e   : > { %14466 = vmatpush3.bf16.msra.mxu0 %v15457_v58 }
 0x68f   : > { %14467 = vmatprep.subr.bf16.mxu0 %v15458_v10 }
 0x692   : > { %14468 = vmatpush3.bf16.msra.mxu0 %v15458_v10 }
 0x694   : > { %12441 = vmatmul.mubr.msk.bf16.gmra.mxu0 %vm5883_vm2, %v5657_v14  ;;  %12445 = vmatmul.mubr.msk.bf16.gmra.mxu1 %vm5883_vm2, %v5657_v14 }
 0x695   : > { %6104 = vmatprep.mubr.bf16.mxu0 %v20756_v2  ;;  %6177 = vmatprep.mubr.bf16.mxu1 %v20756_v2 }
 0x69c   : > { %12442 = vmatmul.mubr.msk.bf16.gmra.mxu0 %vm5883_vm2, %v5658_v31  ;;  %12446 = vmatmul.mubr.msk.bf16.gmra.mxu1 %vm5883_vm2, %v5658_v31 }
 0x69d   : > { %14469 = vmatprep.mubr.msk.bf16.mxu0 %vm5883_vm2, %v18850_v37  ;;  %14485 = vmatprep.mubr.msk.bf16.mxu1 %vm5883_vm2, %v15460_v62 }
 0x6a4   : > { %14470 = vmatmul.mubr.msk.bf16.vlgmr.msra.gmra.mxu0 %vm5883_vm2, %v18889_v54 }
 0x6a5   : > { %14473 = vmatprep.mubr.msk.bf16.mxu0 %vm5883_vm2, %v5657_v14 }
 0x6ac   : > { %14474 = vmatmul.mubr.msk.bf16.gmra.mxu0 %vm5883_vm2, %v5658_v31 }
 0x6ad   : > { %14501 = vmatprep.mubr.msk.bf16.mxu0 %vm5883_vm2, %v15459_v15  ;;  %v15463_v15 = vld [vmem:[%s20757_s29 + $0x30] sm:$0xff]  }
 0x724   : > { %v5930_v37 = vpop.f32.mrf.mxu0  ;;  %v18978_v60 = vpop.f32.mrf.mxu1 }
 0x726   : > { %v5932_v38 = vpop.f32.mrf.mxu0  ;;  %v18980_v39 = vpop.f32.mrf.mxu1 }
 0x728   : > { %v5934_v32 = vpop.f32.mrf.mxu0  ;;  %v18982_v28 = vpop.f32.mrf.mxu1 }
 0x729   : > { %v6253_v14 = vpack.c.bf16 %v5934_v32, %v5930_v37 }
 0x72a   : > { %v5936_v27 = vpop.f32.mrf.mxu0  ;;  %v18984_v35 = vpop.f32.mrf.mxu1 }
 0x72b   : > { %v6254_v24 = vpack.c.bf16 %v5936_v27, %v5932_v38 }
 0x72c   : > { %v5940_v55 = vpop.f32.mrf.mxu0  ;;  %v18986_v5 = vpop.f32.mrf.mxu1 }
 0x72e   : > { %v5942_v6 = vpop.f32.mrf.mxu0  ;;  %v18988_v48 = vpop.f32.mrf.mxu1 }
 0x730   : > { %v5944_v46 = vpop.f32.mrf.mxu0  ;;  %v18990_v53 = vpop.f32.mrf.mxu1 }
 0x731   : > { %v6262_v57 = vpack.c.bf16 %v5944_v46, %v5940_v55  ;;  %v15466_v46 = vld [vmem:[%s20757_s29 + $0x18] sm:$0xff]  }
 0x732   : > { %v5946_v17 = vpop.f32.mrf.mxu0  ;;  %v18992_v16 = vpop.f32.mrf.mxu1 }
 0x733   : > { %v6263_v44 = vpack.c.bf16 %v5946_v17, %v5942_v6  ;;  %v6265_v6 = vpack.c.bf16 %v18992_v16, %v18988_v48 }
 0x734   : > { %v5950_v22 = vpop.f32.mrf.mxu0  ;;  %v18994_v51 = vpop.f32.mrf.mxu1 }
 0x736   : > { %v5952_v3 = vpop.f32.mrf.mxu0  ;;  %v6025_v54 = vpop.f32.mrf.mxu1 }
 0x738   : > { %v5954_v34 = vpop.f32.mrf.mxu0  ;;  %v18996_v25 = vpop.f32.mrf.mxu1 }
 0x739   : > { %v6271_v56 = vpack.c.bf16 %v5954_v34, %v5950_v22  ;;  %v6273_v32 = vpack.c.bf16 %v18996_v25, %v18994_v51  ;;  %v15469_v22 = vld [vmem:[%s20757_s29 + $0x60] sm:$0xff]   ;;  %v6264_v51 = vpack.c.bf16 %v18990_v53, %v18986_v5  ;;  %v6256_v34 = vpack.c.bf16 %v18984_v35, %v18980_v39  ;;  %v15470_v39 = vld [vmem:[%s20757_s29 + $0x68] sm:$0xff]  }
 0x73a   : > { %v5956_v49 = vpop.f32.mrf.mxu0  ;;  %v6029_v4 = vpop.f32.mrf.mxu1  ;;  %v6255_v53 = vpack.c.bf16 %v18982_v28, %v18978_v60  ;;  %v15473_v60 = vld [vmem:[%s20757_s29 + $0x70] sm:$0xff]  }
 0x73b   : > { %v6272_v18 = vpack.c.bf16 %v5956_v49, %v5952_v3  ;;  %v6274_v62 = vpack.c.bf16 %v6029_v4, %v6025_v54  ;;  %v15464_v3 = vld [vmem:[%s20757_s29 + $0x38] sm:$0xff]   ;;  %v15467_v54 = vld [vmem:[%s20757_s29 + $0x40] sm:$0xff]   ;;  %v15468_v4 = vld [vmem:[%s20757_s29 + $0x48] sm:$0xff]  }
 0x73c   : > { %v5960_v9 = vpop.f32.mrf.mxu0  ;;  %v6033_v42 = vpop.f32.mrf.mxu1 }
 0x73e   : > { %v5962_v47 = vpop.f32.mrf.mxu0  ;;  %v6035_v33 = vpop.f32.mrf.mxu1 }
 0x740   : > { %v5964_v7 = vpop.f32.mrf.mxu0  ;;  %v6037_v40 = vpop.f32.mrf.mxu1 }
 0x741   : > { %v6280_v45 = vpack.c.bf16 %v5964_v7, %v5960_v9  ;;  %v6282_v31 = vpack.c.bf16 %v6037_v40, %v6033_v42 }
 0x742   : > { %v5966_v50 = vpop.f32.mrf.mxu0  ;;  %v6039_v36 = vpop.f32.mrf.mxu1 }
 0x743   : > { %v6281_v52 = vpack.c.bf16 %v5966_v50, %v5962_v47  ;;  %14493 = vmatprep.subr.bf16.mxu0 %v6280_v45  ;;  %v6283_v12 = vpack.c.bf16 %v6039_v36, %v6035_v33  ;;  %v15471_v33 = vld [vmem:[%s20757_s29 + $0x50] sm:$0xff]   ;;  %v15474_v36 = vld [vmem:[%s20757_s29 + $0x78] sm:$0xff]  }
 0x744   : > { %v18998_v20 = vpop.f32.mrf.mxu0  ;;  %v19000_v11 = vpop.f32.mrf.mxu1  ;;  %14494 = vmatpush3.bf16.msra.mxu0 %v6280_v45 }
 0x745   : > { %14477 = vmatprep.subr.bf16.mxu1 %v6281_v52  ;;  %14495 = vmatprep.subr.bf16.mxu0 %v6271_v56 }
 0x746   : > { %v19002_v29 = vpop.f32.mrf.mxu0  ;;  %v19004_v59 = vpop.f32.mrf.mxu1  ;;  %14478 = vmatpush3.bf16.msra.mxu1 %v6281_v52 }
 0x747   : > { %14479 = vmatprep.subr.bf16.mxu1 %v6272_v18 }
 0x748   : > { %v19006_v23 = vpop.f32.mrf.mxu0  ;;  %v19008_v41 = vpop.f32.mrf.mxu1  ;;  %14496 = vmatpush3.bf16.msra.mxu0 %v6271_v56 }
 0x749   : > { %14497 = vmatprep.subr.bf16.mxu0 %v6262_v57 }
 0x74a   : > { %v19010_v43 = vpop.f32.mrf.mxu0  ;;  %v19012_v0 = vpop.f32.mrf.mxu1  ;;  %14480 = vmatpush3.bf16.msra.mxu1 %v6272_v18  ;;  %v15472_v18 = vld [vmem:[%s20757_s29 + $0x58] sm:$0xff]  }
 0x74b   : > { %14481 = vmatprep.subr.bf16.mxu1 %v6263_v44 }
 0x74c   : > { %v19014_v19 = vpop.f32.mrf.mxu0  ;;  %v19016_v61 = vpop.f32.mrf.mxu1  ;;  %14498 = vmatpush3.bf16.msra.mxu0 %v6262_v57  ;;  %v15477_v57 = vld [vmem:[%s20757_s29 + $0xa0] sm:$0xff]  }
 0x74d   : > { %14499 = vmatprep.subr.bf16.mxu0 %v6253_v14 }
 0x74e   : > { %v19018_v13 = vpop.f32.mrf.mxu0  ;;  %v19020_v63 = vpop.f32.mrf.mxu1  ;;  %14482 = vmatpush3.bf16.msra.mxu1 %v6263_v44 }
 0x74f   : > { %14483 = vmatprep.subr.bf16.mxu1 %v6254_v24 }
 0x750   : > { %v19025_v30 = vpop.f32.mrf.mxu0  ;;  %v19027_v21 = vpop.f32.mrf.mxu1  ;;  %14500 = vmatpush3.bf16.msra.mxu0 %v6253_v14 }
 0x751   : > { %14525 = vmatprep.subr.bf16.mxu0 %v6283_v12  ;;  %v6266_v56 = vpack.c.bf16 %v19025_v30, %v19014_v19  ;;  %v15475_v19 = vld [vmem:[%s20757_s29 + $0x80] sm:$0xff]  }
 0x752   : > { %v19035_v58 = vpop.f32.mrf.mxu0  ;;  %v19037_v10 = vpop.f32.mrf.mxu1  ;;  %14484 = vmatpush3.bf16.msra.mxu1 %v6254_v24  ;;  %v6257_v24 = vpack.c.bf16 %v19006_v23, %v18998_v20  ;;  %v15476_v20 = vld [vmem:[%s20757_s29 + $0x88] sm:$0xff]  }
 0x753   : > { %14509 = vmatprep.subr.bf16.mxu1 %v6282_v31  ;;  %14502 = vmatmul.mubr.msk.bf16.vlgmr.msra.gmra.mxu0 %vm5883_vm2, %v15461_v26  ;;  %v6267_v52 = vpack.c.bf16 %v19035_v58, %v19018_v13  ;;  %v6258_v13 = vpack.c.bf16 %v19010_v43, %v19002_v29  ;;  %v15478_v29 = vld [vmem:[%s20757_s29 + $0xa8] sm:$0xff]   ;;  %v15479_v43 = vld [vmem:[%s20757_s29 + $0x90] sm:$0xff]  }
 0x754   : > { %v6096_v37 = vpop.f32.mrf.mxu0  ;;  %v19043_v38 = vpop.f32.mrf.mxu1  ;;  %14526 = vmatpush3.bf16.msra.mxu0 %v6283_v12  ;;  %14505 = vmatprep.mubr.msk.bf16.mxu0 %vm5883_vm2, %v15465_v1 }
 0x755   : > { %14486 = vmatmul.mubr.msk.bf16.vlgmr.msra.gmra.mxu1 %vm5883_vm2, %v15462_v8  ;;  %14527 = vmatprep.subr.bf16.mxu0 %v6274_v62 }
 0x756   : > { %v6098_v27 = vpop.f32.mrf.mxu0  ;;  %v19049_v55 = vpop.f32.mrf.mxu1  ;;  %14510 = vmatpush3.bf16.msra.mxu1 %v6282_v31  ;;  %14489 = vmatprep.mubr.msk.bf16.mxu1 %vm5883_vm2, %v15463_v15  ;;  %v15483_v31 = vld [vmem:[%s20757_s29 + $0xb0] sm:$0xff]  }
 0x757   : > { %14511 = vmatprep.subr.bf16.mxu1 %v6273_v32 }
 0x758   : > { %v6100_v17 = vpop.f32.mrf.mxu0  ;;  %14528 = vmatpush3.bf16.msra.mxu0 %v6274_v62  ;;  %v19065_v48 = vpop.f32.mrf.mxu1  ;;  %v6268_v62 = vpack.c.bf16 %v19027_v21, %v19016_v61  ;;  %v15481_v61 = vld [vmem:[%s20757_s29 + $0xc0] sm:$0xff]   ;;  %v6259_v21 = vpack.c.bf16 %v19008_v41, %v19000_v11  ;;  %v15482_v11 = vld [vmem:[%s20757_s29 + $0xc8] sm:$0xff]  }
 0x759   : > { %14529 = vmatprep.subr.bf16.mxu0 %v6265_v6  ;;  %v6275_v7 = vpack.c.bf16 %v6100_v17, %v6096_v37  ;;  %v6277_v8 = vpack.c.bf16 %v19065_v48, %v19043_v38  ;;  %v6269_v37 = vpack.c.bf16 %v19037_v10, %v19020_v63  ;;  %v15480_v38 = vld [vmem:[%s20757_s29 + $0x98] sm:$0xff]   ;;  %v15487_v63 = vld [vmem:[%s20757_s29 + $0xe0] sm:$0xff]   ;;  %v6260_v10 = vpack.c.bf16 %v19012_v0, %v19004_v59  ;;  %v15488_v59 = vld [vmem:[%s20757_s29 + $0xe8] sm:$0xff]  }
 0x75a   : > { %v6102_v16 = vpop.f32.mrf.mxu0  ;;  %14512 = vmatpush3.bf16.msra.mxu1 %v6273_v32  ;;  %v19077_v25 = vpop.f32.mrf.mxu1  ;;  %v15484_v32 = vld [vmem:[%s20757_s29 + $0xb8] sm:$0xff]   ;;  %v15485_v0 = vld [vmem:[%s20757_s29 + $0xd0] sm:$0xff]   ;;  %v15489_v48 = vld [vmem:[%s20757_s29 + $0x100] sm:$0xff]  }
 0x75b   : > { %14513 = vmatprep.subr.bf16.mxu1 %v6264_v51  ;;  %14506 = vmatmul.mubr.msk.bf16.gmra.mxu0 %vm5883_vm2, %v15466_v46  ;;  %v6276_v40 = vpack.c.bf16 %v6102_v16, %v6098_v27  ;;  %v6278_v58 = vpack.c.bf16 %v19077_v25, %v19049_v55  ;;  %v15491_v46 = vld [vmem:[%s20757_s29 + $0xf0] sm:$0xff]  }
 0x75c   : > { %v6106_v5 = vpop.f32.mrf.mxu0  ;;  %14530 = vmatpush3.bf16.msra.mxu0 %v6265_v6  ;;  %14533 = vmatprep.mubr.msk.bf16.mxu0 %vm5883_vm2, %v15469_v22  ;;  %v6179_v9 = vpop.f32.mrf.mxu1 }
 0x75d   : > { %14490 = vmatmul.mubr.msk.bf16.gmra.mxu1 %vm5883_vm2, %v15464_v3  ;;  %14531 = vmatprep.subr.bf16.mxu0 %v6256_v34  ;;  %v15492_v3 = vld [vmem:[%s20757_s29 + $0xf8] sm:$0xff]  }
 0x75e   : > { %v6108_v49 = vpop.f32.mrf.mxu0  ;;  %14514 = vmatpush3.bf16.msra.mxu1 %v6264_v51  ;;  %14517 = vmatprep.mubr.msk.bf16.mxu1 %vm5883_vm2, %v15467_v54  ;;  %v6181_v45 = vpop.f32.mrf.mxu1  ;;  %v15486_v51 = vld [vmem:[%s20757_s29 + $0xd8] sm:$0xff]   ;;  %v15490_v54 = vld [vmem:[%s20757_s29 + $0x108] sm:$0xff]  }
 0x75f   : > { %14515 = vmatprep.subr.bf16.mxu1 %v6255_v53 }
 0x760   : > { %v6110_v35 = vpop.f32.mrf.mxu0  ;;  %14532 = vmatpush3.bf16.msra.mxu0 %v6256_v34  ;;  %v6183_v44 = vpop.f32.mrf.mxu1  ;;  %v15493_v34 = vld [vmem:[%s20757_s29 + $0x110] sm:$0xff]  }
 0x761   : > { %v6284_v28 = vpack.c.bf16 %v6110_v35, %v6106_v5  ;;  %v6286_v30 = vpack.c.bf16 %v6183_v44, %v6179_v9  ;;  %v15494_v5 = vld [vmem:[%s20757_s29 + $0x118] sm:$0xff]  }
 0x762   : > { %v6112_v42 = vpop.f32.mrf.mxu0  ;;  %14516 = vmatpush3.bf16.msra.mxu1 %v6255_v53  ;;  %v6185_v12 = vpop.f32.mrf.mxu1  ;;  %v20519_v53 = vmov 0.0  }
 0x763   : > { %v6285_v47 = vpack.c.bf16 %v6112_v42, %v6108_v49  ;;  %14541 = vmatprep.subr.bf16.mxu1 %v6284_v28  ;;  %14534 = vmatmul.mubr.msk.bf16.vlgmr.msra.gmra.mxu0 %vm5883_vm2, %v15470_v39  ;;  %v6287_v1 = vpack.c.bf16 %v6185_v12, %v6181_v45 }
 0x764   : > { %14537 = vmatprep.mubr.msk.bf16.mxu0 %vm5883_vm2, %v15473_v60  ;;  %v19095_v50 = vpop.f32.mrf.mxu0 }
 0x765   : > { %14518 = vmatmul.mubr.msk.bf16.vlgmr.msra.gmra.mxu1 %vm5883_vm2, %v15468_v4  ;;  %14557 = vmatprep.subr.bf16.mxu0 %v6285_v47 }
 0x766   : > { %14542 = vmatpush3.bf16.msra.mxu1 %v6284_v28  ;;  %14558 = vmatpush3.bf16.msra.mxu0 %v6285_v47  ;;  %v19111_v14 = vpop.f32.mrf.mxu0 }
 0x767   : > { %14543 = vmatprep.subr.bf16.mxu1 %v6275_v7  ;;  %14559 = vmatprep.subr.bf16.mxu0 %v6276_v40 }
 0x768   : > { %14521 = vmatprep.mubr.msk.bf16.mxu1 %vm5883_vm2, %v15471_v33  ;;  %v19123_v26 = vpop.f32.mrf.mxu0 }
 0x769   : > { %v6270_v22 = vpack.c.bf16 %v19123_v26, %v19095_v50 }
 0x76a   : > { %14544 = vmatpush3.bf16.msra.mxu1 %v6275_v7  ;;  %14560 = vmatpush3.bf16.msra.mxu0 %v6276_v40  ;;  %v6225_v23 = vpop.f32.mrf.mxu0 }
 0x76b   : > { %14545 = vmatprep.subr.bf16.mxu1 %v6266_v56  ;;  %14561 = vmatprep.subr.bf16.mxu0 %v6267_v52  ;;  %v6261_v16 = vpack.c.bf16 %v6225_v23, %v19111_v14 }
 0x76c   : > { %14538 = vmatmul.mubr.msk.bf16.gmra.mxu0 %vm5883_vm2, %v15474_v36  ;;  %v14475_v15 = vpop.f32.mrf.mxu0 }
 0x76d   : > { %14522 = vmatmul.mubr.msk.bf16.gmra.mxu1 %vm5883_vm2, %v15472_v18  ;;  %14565 = vmatprep.mubr.msk.bf16.mxu0 %vm5883_vm2, %v15477_v57 }
 0x76e   : > { %14546 = vmatpush3.bf16.msra.mxu1 %v6266_v56  ;;  %14562 = vmatpush3.bf16.msra.mxu0 %v6267_v52  ;;  %v6238_v27 = vpop.f32.mrf.mxu0 }
 0x76f   : > { %14547 = vmatprep.subr.bf16.mxu1 %v6257_v24  ;;  %14563 = vmatprep.subr.bf16.mxu0 %v6258_v13 }
 0x770   : > { %14549 = vmatprep.mubr.msk.bf16.mxu1 %vm5883_vm2, %v15475_v19  ;;  %v14476_v55 = vpop.f32.mrf.mxu0 }
 0x771   : > { %v6288_v6 = vpack.c.bf16 %v14476_v55, %v14475_v15 }
 0x772   : > { %14548 = vmatpush3.bf16.msra.mxu1 %v6257_v24  ;;  %14564 = vmatpush3.bf16.msra.mxu0 %v6258_v13  ;;  %v6241_v41 = vpop.f32.mrf.mxu0 }
 0x773   : > { %14573 = vmatprep.subr.bf16.mxu1 %v6286_v30  ;;  %14589 = vmatprep.subr.bf16.mxu0 %v6287_v1  ;;  %v6279_v17 = vpack.c.bf16 %v6241_v41, %v6238_v27 }
 0x775   : > { %14550 = vmatmul.mubr.msk.bf16.vlgmr.msra.gmra.mxu1 %vm5883_vm2, %v15476_v20  ;;  %14566 = vmatmul.mubr.msk.bf16.vlgmr.msra.gmra.mxu0 %vm5883_vm2, %v15478_v29 }
 0x776   : > { %14574 = vmatpush3.bf16.msra.mxu1 %v6286_v30  ;;  %14590 = vmatpush3.bf16.msra.mxu0 %v6287_v1 }
 0x777   : > { %14575 = vmatprep.subr.bf16.mxu1 %v6277_v8  ;;  %14591 = vmatprep.subr.bf16.mxu0 %v6278_v58 }
 0x778   : > { %14553 = vmatprep.mubr.msk.bf16.mxu1 %vm5883_vm2, %v15479_v43  ;;  %14569 = vmatprep.mubr.msk.bf16.mxu0 %vm5883_vm2, %v15483_v31 }
 0x77a   : > { %14576 = vmatpush3.bf16.msra.mxu1 %v6277_v8  ;;  %14592 = vmatpush3.bf16.msra.mxu0 %v6278_v58 }
 0x77b   : > { %14577 = vmatprep.subr.bf16.mxu1 %v6268_v62  ;;  %14593 = vmatprep.subr.bf16.mxu0 %v6269_v37 }
 0x77d   : > { %14554 = vmatmul.mubr.msk.bf16.gmra.mxu1 %vm5883_vm2, %v15480_v38  ;;  %14570 = vmatmul.mubr.msk.bf16.gmra.mxu0 %vm5883_vm2, %v15484_v32 }
 0x77e   : > { %14578 = vmatpush3.bf16.msra.mxu1 %v6268_v62  ;;  %14594 = vmatpush3.bf16.msra.mxu0 %v6269_v37 }
 0x77f   : > { %14579 = vmatprep.subr.bf16.mxu1 %v6259_v21  ;;  %14595 = vmatprep.subr.bf16.mxu0 %v6260_v10 }
 0x780   : > { %14581 = vmatprep.mubr.msk.bf16.mxu1 %vm5883_vm2, %v15481_v61  ;;  %14597 = vmatprep.mubr.msk.bf16.mxu0 %vm5883_vm2, %v15487_v63 }
 0x782   : > { %14580 = vmatpush3.bf16.msra.mxu1 %v6259_v21  ;;  %14596 = vmatpush3.bf16.msra.mxu0 %v6260_v10 }
 0x783   : > { %14605 = vmatprep.subr.bf16.mxu1 %v6288_v6  ;;  %14621 = vmatprep.subr.bf16.mxu0 %v20519_v53 }
 0x785   : > { %14582 = vmatmul.mubr.msk.bf16.vlgmr.msra.gmra.mxu1 %vm5883_vm2, %v15482_v11  ;;  %14598 = vmatmul.mubr.msk.bf16.vlgmr.msra.gmra.mxu0 %vm5883_vm2, %v15488_v59 }
 0x786   : > { %14606 = vmatpush3.bf16.msra.mxu1 %v6288_v6  ;;  %14585 = vmatprep.mubr.msk.bf16.mxu1 %vm5883_vm2, %v15485_v0 }
 0x787   : > { %14607 = vmatprep.subr.bf16.mxu1 %v6279_v17  ;;  %14601 = vmatprep.mubr.msk.bf16.mxu0 %vm5883_vm2, %v15491_v46 }
 0x78a   : > { %14608 = vmatpush3.bf16.msra.mxu1 %v6279_v17 }
 0x78b   : > { %14609 = vmatprep.subr.bf16.mxu1 %v6270_v22 }
 0x78d   : > { %14586 = vmatmul.mubr.msk.bf16.gmra.mxu1 %vm5883_vm2, %v15486_v51  ;;  %14602 = vmatmul.mubr.msk.bf16.gmra.mxu0 %vm5883_vm2, %v15492_v3 }
 0x78e   : > { %14610 = vmatpush3.bf16.msra.mxu1 %v6270_v22  ;;  %14613 = vmatprep.mubr.msk.bf16.mxu1 %vm5883_vm2, %v15489_v48 }
 0x78f   : > { %14611 = vmatprep.subr.bf16.mxu1 %v6261_v16  ;;  %14629 = vmatprep.mubr.msk.bf16.mxu0 %vm15950_vm3, %v20519_v53 }
 0x792   : > { %14612 = vmatpush3.bf16.msra.mxu1 %v6261_v16 }
 0x793   : > { %14633 = vmatprep.subr.bf16.mxu1 %v20519_v53 }
 0x795   : > { %14614 = vmatmul.mubr.msk.bf16.vlgmr.msra.gmra.mxu1 %vm5883_vm2, %v15490_v54 }
 0x796   : > { %14617 = vmatprep.mubr.msk.bf16.mxu1 %vm5883_vm2, %v15493_v34 }
 0x79d   : > { %14618 = vmatmul.mubr.msk.bf16.gmra.mxu1 %vm5883_vm2, %v15494_v5 }
 0x79e   : > { %14641 = vmatprep.mubr.msk.bf16.mxu1 %vm15950_vm3, %v20519_v53 }
 0x813   : > { %v14503_v25 = vpop.f32.mrf.mxu0 }
 0x815   : > { %v14487_v49 = vpop.f32.mrf.mxu1  ;;  %v19219_v39 = vpop.f32.mrf.mxu0 }
 0x816   : > { %v6478_v55 = vadd.f32 %v14503_v25, %v14487_v49 }
 0x817   : > { %v19221_v35 = vpop.f32.mrf.mxu1  ;;  %v14504_v60 = vpop.f32.mrf.mxu0 }
 0x819   : > { %v14488_v28 = vpop.f32.mrf.mxu1  ;;  %v19223_v4 = vpop.f32.mrf.mxu0 }
 0x81a   : > { %v6481_v46 = vadd.f32 %v14504_v60, %v14488_v28 }
 0x81b   : > { %v19225_v9 = vpop.f32.mrf.mxu1  ;;  %v14507_v42 = vpop.f32.mrf.mxu0 }
 0x81d   : > { %v14491_v47 = vpop.f32.mrf.mxu1  ;;  %v6485_v33 = vpop.f32.mrf.mxu0 }
 0x81e   : > { %v6494_v16 = vadd.f32 %v14507_v42, %v14491_v47 }
 0x81f   : > { %v6388_v7 = vpop.f32.mrf.mxu1  ;;  %v14508_v40 = vpop.f32.mrf.mxu0 }
 0x820   : > { %v6486_v2 = vadd.f32 %v6485_v33, %v6388_v7 }
 0x821   : > { %v14492_v45 = vpop.f32.mrf.mxu1  ;;  %v6488_v50 = vpop.f32.mrf.mxu0 }
 0x823   : > { %v6391_v36 = vpop.f32.mrf.mxu1  ;;  %v14535_v56 = vpop.f32.mrf.mxu0 }
 0x824   : > { %v6489_v60 = vadd.f32 %v6488_v50, %v6391_v36  ;;  %v6470_v36 = vadd.f32 %v19219_v39, %v19221_v35 }
 0x825   : > { %v14519_v52 = vpop.f32.mrf.mxu1  ;;  %v19227_v18 = vpop.f32.mrf.mxu0 }
 0x826   : > { %v6608_v59 = vadd.f32 %v14519_v52, %v6478_v55  ;;  %v6497_v52 = vadd.f32 %v14508_v40, %v14492_v45 }
 0x827   : > { %v19229_v57 = vpop.f32.mrf.mxu1  ;;  %v14536_v44 = vpop.f32.mrf.mxu0 }
 0x828   : > { %v6722_v3 = vadd.f32 %v14535_v56, %v6608_v59 }
 0x829   : > { %v14520_v14 = vpop.f32.mrf.mxu1  ;;  %v19231_v19 = vpop.f32.mrf.mxu0 }
 0x82a   : > { %v6609_v51 = vadd.f32 %v14520_v14, %v6481_v46 }
 0x82b   : > { %v19233_v24 = vpop.f32.mrf.mxu1 }
 0x82c   : > { %v14539_v13 = vpop.f32.mrf.mxu0  ;;  %v6723_v25 = vadd.f32 %v14536_v44, %v6609_v51  ;;  %v6473_v44 = vadd.f32 %v19223_v4, %v19225_v9  ;;  %v12587_v9 = vld [vmem:[%s20484_s10] ss:$0 sm:$0xff] }
 0x82d   : > { %v14523_v12 = vpop.f32.mrf.mxu1 }
 0x82e   : > { %v6705_v26 = vpop.f32.mrf.mxu0  ;;  %v6612_v53 = vadd.f32 %v14523_v12, %v6494_v16 }
 0x82f   : > { %v6591_v30 = vpop.f32.mrf.mxu1 }
 0x830   : > { %v14540_v1 = vpop.f32.mrf.mxu0  ;;  %v6726_v56 = vadd.f32 %v14539_v13, %v6612_v53 }
 0x831   : > { %v14524_v20 = vpop.f32.mrf.mxu1 }
 0x832   : > { %v6708_v29 = vpop.f32.mrf.mxu0  ;;  %v6613_v14 = vadd.f32 %v14524_v20, %v6497_v52 }
 0x833   : > { %v6594_v23 = vpop.f32.mrf.mxu1 }
 0x834   : > { %v6611_v42 = vadd.f32 %v6594_v23, %v6489_v60  ;;  %v6727_v40 = vadd.f32 %v14540_v1, %v6613_v14 }
 0x835   : > { %v14551_v43 = vpop.f32.mrf.mxu1  ;;  %v14567_v31 = vpop.f32.mrf.mxu0 }
 0x836   : > { %v6836_v54 = vadd.f32 %v14551_v43, %v6722_v3  ;;  %v6725_v53 = vadd.f32 %v6708_v29, %v6611_v42 }
 0x837   : > { %v19235_v8 = vpop.f32.mrf.mxu1  ;;  %v19237_v58 = vpop.f32.mrf.mxu0 }
 0x838   : > { %20758 = vst [vmem:[#allocation28_spill] sm:$0xff] %v19237_v58  ;;  %v6950_v58 = vadd.f32 %v14567_v31, %v6836_v54 }
 0x839   : > { %v14552_v15 = vpop.f32.mrf.mxu1  ;;  %v14568_v62 = vpop.f32.mrf.mxu0 }
 0x83a   : > { %v6837_v55 = vadd.f32 %v14552_v15, %v6723_v25 }
 0x83b   : > { %v19239_v37 = vpop.f32.mrf.mxu1  ;;  %v19241_v38 = vpop.f32.mrf.mxu0 }
 0x83c   : > { %v6951_v46 = vadd.f32 %v14568_v62, %v6837_v55 }
 0x83d   : > { %v14555_v32 = vpop.f32.mrf.mxu1  ;;  %v14571_v27 = vpop.f32.mrf.mxu0 }
 0x83e   : > { %v6840_v43 = vadd.f32 %v14555_v32, %v6726_v56 }
 0x83f   : > { %v6819_v61 = vpop.f32.mrf.mxu1  ;;  %v6933_v63 = vpop.f32.mrf.mxu0  ;;  %v20761_v52 = vld [vmem:[#allocation28_spill] sm:$0xff] }
 0x840   : > { %v6954_v23 = vadd.f32 %v14571_v27, %v6840_v43 }
 0x841   : > { %v14556_v21 = vpop.f32.mrf.mxu1  ;;  %v14572_v10 = vpop.f32.mrf.mxu0 }
 0x842   : > { %v6841_v20 = vadd.f32 %v14556_v21, %v6727_v40 }
 0x843   : > { %v6822_v6 = vpop.f32.mrf.mxu1  ;;  %v6936_v11 = vpop.f32.mrf.mxu0 }
 0x844   : > { %v6839_v4 = vadd.f32 %v6822_v6, %v6725_v53  ;;  %v6955_v29 = vadd.f32 %v14572_v10, %v6841_v20 }
 0x845   : > { %v14583_v41 = vpop.f32.mrf.mxu1  ;;  %v14599_v0 = vpop.f32.mrf.mxu0 }
 0x846   : > { %v7064_v59 = vadd.f32 %v14583_v41, %v6950_v58  ;;  %v6606_v58 = vadd.f32 %v19229_v57, %v6470_v36  ;;  %v6953_v21 = vadd.f32 %v6936_v11, %v6839_v4 }
 0x847   : > { %v19243_v17 = vpop.f32.mrf.mxu1  ;;  %v19245_v22 = vpop.f32.mrf.mxu0 }
 0x848   : > { %20759 = vst [vmem:[#allocation12_spill] sm:$0xff] %v19243_v17  ;;  %20760 = vst [vmem:[#allocation9_spill] sm:$0xff] %v19245_v22  ;;  %v6610_v22 = vadd.f32 %v6591_v30, %v6486_v2  ;;  %v7178_v50 = vadd.f32 %v14599_v0, %v7064_v59  ;;  %v6607_v2 = vadd.f32 %v19233_v24, %v6473_v44 }
 0x849   : > { %v14584_v48 = vpop.f32.mrf.mxu1  ;;  %v14600_v5 = vpop.f32.mrf.mxu0  ;;  %v6720_v27 = vadd.f32 %v19227_v18, %v6606_v58 }
 0x84a   : > { %v6724_v7 = vadd.f32 %v6705_v26, %v6610_v22  ;;  %v7065_v45 = vadd.f32 %v14584_v48, %v6951_v46  ;;  %v6721_v39 = vadd.f32 %v19231_v19, %v6607_v2 }
 0x84b   : > { %v19247_v34 = vpop.f32.mrf.mxu1  ;;  %v19249_v17 = vpop.f32.mrf.mxu0  ;;  %v6834_v48 = vadd.f32 %v19235_v8, %v6720_v27  ;;  %v15508_v27 = vld [vmem:[%s20485_s11 + $0x368] ss:$72 sps:$4 sm:$0xff]  }
 0x84c   : > { %v6838_v30 = vadd.f32 %v6819_v61, %v6724_v7  ;;  %v7179_v62 = vadd.f32 %v14600_v5, %v7065_v45  ;;  %v6835_v57 = vadd.f32 %v19239_v37, %v6721_v39  ;;  %v15498_v39 = vld [vmem:[%s20479_s5 + $0x18] sm:$0xff]  }
 0x84d   : > { %v14587_v49 = vpop.f32.mrf.mxu1  ;;  %v14603_v33 = vpop.f32.mrf.mxu0  ;;  %v6948_v55 = vadd.f32 %v20761_v52, %v6834_v48  ;;  %v15520_v48 = vld [vmem:[%s20485_s11 + $0x248] ss:$72 sps:$4 sm:$0xff]   ;;  %v15538_v52 = vld [vmem:[%s20485_s11 + $0x98] ss:$72 sps:$4 sm:$0xff]  }
 0x84e   : > { %v7068_v15 = vadd.f32 %v14587_v49, %v6954_v23  ;;  %v6952_v24 = vadd.f32 %v6933_v63, %v6838_v30  ;;  %v6949_v5 = vadd.f32 %v19241_v38, %v6835_v57  ;;  %v20764_v30 = vmov 0.0   ;;  %v15513_v57 = vld [vmem:[%s20485_s11 + $0x2d4] ss:$72 sps:$4 sm:$0xff]  }
 0x84f   : > { %v7047_v28 = vpop.f32.mrf.mxu1  ;;  %v7161_v1 = vpop.f32.mrf.mxu0  ;;  %v20763_v45 = vld [vmem:[#allocation9_spill] sm:$0xff] }
 0x850   : > { %v7066_v0 = vadd.f32 %v7047_v28, %v6952_v24  ;;  %v7182_v3 = vadd.f32 %v14603_v33, %v7068_v15  ;;  %v7063_v60 = vadd.f32 %v19247_v34, %v6949_v5  ;;  %v15504_v15 = vld [vmem:[%s20485_s11 + $0x3fc] ss:$72 sps:$4 sm:$0xff]   ;;  %v15502_v24 = vld [vmem:[%s20485_s11 + $0x3f8] ss:$72 sps:$4 sm:$0xff]  }
 0x851   : > { %v14588_v47 = vpop.f32.mrf.mxu1  ;;  %v14604_v41 = vpop.f32.mrf.mxu0  ;;  %v15531_v5 = vld [vmem:[%s20485_s11 + $0x124] ss:$72 sps:$4 sm:$0xff]  }
 0x852   : > { %v7069_v22 = vadd.f32 %v14588_v47, %v6955_v29  ;;  %v7180_v37 = vadd.f32 %v7161_v1, %v7066_v0  ;;  %v20762_v47 = vld [vmem:[#allocation12_spill] sm:$0xff]  ;;  %v7177_v38 = vadd.f32 %v19249_v17, %v7063_v60  ;;  %v15507_v29 = vld [vmem:[%s20485_s11 + $0x364] ss:$72 sps:$4 sm:$0xff]   ;;  %v15514_v0 = vld [vmem:[%s20485_s11 + $0x2d8] ss:$72 sps:$4 sm:$0xff]  }
 0x853   : > { %v7050_v12 = vpop.f32.mrf.mxu1  ;;  %v7164_v18 = vpop.f32.mrf.mxu0  ;;  %v7062_v43 = vadd.f32 %v20762_v47, %v6948_v55  ;;  %v15501_v1 = vld [vmem:[%s20485_s11 + $0x3f4] ss:$72 sps:$4 sm:$0xff]   ;;  %v15543_v55 = vld [vmem:[%s20485_s11 + $0x4] ss:$72 sps:$4 sm:$0xff]  }
 0x854   : > { %v7067_v19 = vadd.f32 %v7050_v12, %v6953_v21  ;;  %v7183_v11 = vadd.f32 %v14604_v41, %v7069_v22  ;;  %v15516_v21 = vld [vmem:[%s20485_s11 + $0x2dc] ss:$72 sps:$4 sm:$0xff]   ;;  %v15511_v41 = vld [vmem:[%s20485_s11 + $0x2d0] ss:$72 sps:$4 sm:$0xff]   ;;  %v15546_v60 = vld [vmem:[%s20485_s11 + $0xc] ss:$72 sps:$4 sm:$0xff]  }
 0x855   : > { %v14615_v13 = vpop.f32.mrf.mxu1  ;;  %v15519_v22 = vld [vmem:[%s20485_s11 + $0x244] ss:$72 sps:$4 sm:$0xff]  }
 0x856   : > { %v7292_v31 = vadd.f32 %v14615_v13, %v7178_v50  ;;  %v7181_v59 = vadd.f32 %v7164_v18, %v7067_v19  ;;  %v7176_v50 = vadd.f32 %v20763_v45, %v7062_v43  ;;  %v15525_v19 = vld [vmem:[%s20485_s11 + $0x1b4] ss:$72 sps:$4 sm:$0xff]  }
 0x857   : > { %v7259_v26 = vpop.f32.mrf.mxu1  ;;  %v15534_v18 = vld [vmem:[%s20485_s11 + $0x12c] ss:$72 sps:$4 sm:$0xff]  }
 0x858   : > { %v7307_v32 = vadd.f32 %v12587_v9, %v7292_v31  ;;  %v7290_v53 = vadd.f32 %v7259_v26, %v7176_v50  ;;  %v15495_v26 = vld [vmem:[%s20479_s5] sm:$0xff]  }
 0x859   : > { %v14616_v35 = vpop.f32.mrf.mxu1 }
 0x85a   : > { %v7293_v61 = vadd.f32 %v14616_v35, %v7179_v62  ;;  %v7315_v54 = vmax.f32 %v7307_v32, 0.0  ;;  %v7305_v17 = vadd.f32 %v12587_v9, %v7290_v53  ;;  %v15497_v62 = vld [vmem:[%s20479_s5 + $0x10] sm:$0xff]  }
 0x85b   : > { %v7262_v6 = vpop.f32.mrf.mxu1  ;;  %v15499_v35 = vld [vmem:[%s20485_s11 + $0x3f0] ss:$72 sps:$4 sm:$0xff]   ;;  %v15510_v32 = vld [vmem:[%s20485_s11 + $0x36c] ss:$72 sps:$4 sm:$0xff]  }
 0x85c   : > { %v7308_v51 = vadd.f32 %v12587_v9, %v7293_v61  ;;  %v7291_v36 = vadd.f32 %v7262_v6, %v7177_v38  ;;  %v7313_v58 = vmax.f32 %v7305_v17, 0.0  ;;  %v15505_v61 = vld [vmem:[%s20485_s11 + $0x360] ss:$72 sps:$4 sm:$0xff]   ;;  %v20765_v6 = vmov 0  }
 0x85d   : > { %v14619_v16 = vpop.f32.mrf.mxu1 }
 0x85e   : > { %v7316_v63 = vmax.f32 %v7308_v51, 0.0  ;;  %v7296_v10 = vadd.f32 %v14619_v16, %v7182_v3  ;;  %v7306_v20 = vadd.f32 %v12587_v9, %v7291_v36  ;;  %v15522_v51 = vld [vmem:[%s20485_s11 + $0x24c] ss:$72 sps:$4 sm:$0xff]   ;;  %v15517_v3 = vld [vmem:[%s20485_s11 + $0x240] ss:$72 sps:$4 sm:$0xff]  }
 0x85f   : > { %v7275_v25 = vpop.f32.mrf.mxu1  ;;  %v15523_v16 = vld [vmem:[%s20485_s11 + $0x1b0] ss:$72 sps:$4 sm:$0xff]  }
 0x860   : > { %v7322_v49 = vpack.c.bf16 %v7316_v63, %v7315_v54  ;;  %v7311_v14 = vadd.f32 %v12587_v9, %v7296_v10  ;;  %v7294_v56 = vadd.f32 %v7275_v25, %v7180_v37  ;;  %v7314_v31 = vmax.f32 %v7306_v20, 0.0  ;;  %v15526_v54 = vld [vmem:[%s20485_s11 + $0x1b8] ss:$72 sps:$4 sm:$0xff]   ;;  %v15528_v63 = vld [vmem:[%s20485_s11 + $0x1bc] ss:$72 sps:$4 sm:$0xff]  }
 0x861   : > { %v14620_v28 = vpop.f32.mrf.mxu1  ;;  %v15529_v10 = vld [vmem:[%s20485_s11 + $0x120] ss:$72 sps:$4 sm:$0xff]   ;;  %v15540_v37 = vld [vmem:[%s20485_s11 + $0x9c] ss:$72 sps:$4 sm:$0xff]  }
 0x862   : > { %v7297_v8 = vadd.f32 %v14620_v28, %v7183_v11  ;;  %v7319_v12 = vmax.f32 %v7311_v14, 0.0  ;;  %v7309_v33 = vadd.f32 %v12587_v9, %v7294_v56  ;;  %v7321_v4 = vpack.c.bf16 %v7314_v31, %v7313_v58  ;;  %v15532_v25 = vld [vmem:[%s20485_s11 + $0x128] ss:$72 sps:$4 sm:$0xff]   ;;  %v15549_v56 = vld [vmem:[%s20485_s11 + $0x404] ss:$72 sps:$4 sm:$0xff]  }
 0x863   : > { %v7278_v42 = vpop.f32.mrf.mxu1  ;;  %v15535_v11 = vld [vmem:[%s20485_s11 + $0x90] ss:$72 sps:$4 sm:$0xff]   ;;  %v15541_v28 = vld [vmem:[%s20485_s11] ss:$72 sps:$4 sm:$0xff]  }
 0x864   : > { %v7312_v46 = vadd.f32 %v12587_v9, %v7297_v8  ;;  %v7295_v44 = vadd.f32 %v7278_v42, %v7181_v59  ;;  %v7317_v13 = vmax.f32 %v7309_v33, 0.0  ;;  %v15544_v14 = vld [vmem:[%s20485_s11 + $0x8] ss:$72 sps:$4 sm:$0xff]   ;;  %v15552_v8 = vld [vmem:[%s20485_s11 + $0x40c] ss:$72 sps:$4 sm:$0xff]  }
 0x865   : > { %v15547_v31 = vld [vmem:[%s20485_s11 + $0x400] ss:$72 sps:$4 sm:$0xff]  }
 0x866   : > { %v7320_v7 = vmax.f32 %v7312_v46, 0.0  ;;  %v7310_v40 = vadd.f32 %v12587_v9, %v7295_v44  ;;  %v15496_v9 = vld [vmem:[%s20479_s5 + $0x8] sm:$0xff]  }
 0x867   : > { %v15550_v58 = vld [vmem:[%s20485_s11 + $0x408] ss:$72 sps:$4 sm:$0xff]  }
 0x868   : > { %v7324_v34 = vpack.c.bf16 %v7320_v7, %v7319_v12  ;;  %v7318_v2 = vmax.f32 %v7310_v40, 0.0 }
 0x86a   : > { %14622 = vmatpush3.bf16.msra.mxu0 %v7324_v34  ;;  %14634 = vmatpush3.bf16.msra.mxu1 %v7324_v34  ;;  %v7323_v23 = vpack.c.bf16 %v7318_v2, %v7317_v13 }
 0x86b   : > { %14623 = vmatprep.subr.bf16.mxu0 %v20764_v30  ;;  %14635 = vmatprep.subr.bf16.mxu1 %v20764_v30 }
 0x86e   : > { %14624 = vmatpush3.bf16.msra.mxu0 %v7323_v23  ;;  %14636 = vmatpush3.bf16.msra.mxu1 %v7323_v23 }
 0x86f   : > { %14625 = vmatprep.subr.bf16.mxu0 %v20764_v30  ;;  %14637 = vmatprep.subr.bf16.mxu1 %v20764_v30 }
 0x872   : > { %14626 = vmatpush3.bf16.msra.mxu0 %v7322_v49  ;;  %14638 = vmatpush3.bf16.msra.mxu1 %v7322_v49 }
 0x873   : > { %14627 = vmatprep.subr.bf16.mxu0 %v20764_v30  ;;  %14639 = vmatprep.subr.bf16.mxu1 %v20764_v30 }
 0x876   : > { %14628 = vmatpush3.bf16.msra.mxu0 %v7321_v4  ;;  %14640 = vmatpush3.bf16.msra.mxu1 %v7321_v4 }
 0x877   : > { %14645 = vmatprep.subr.bf16.mxu0 %v20764_v30  ;;  %14657 = vmatprep.subr.bf16.mxu1 %v20764_v30 }
 0x879   : > { %14630 = vmatmul.mubr.msk.bf16.vlgmr.msra.gmra.mxu0 %vm5883_vm2, %v15495_v26  ;;  %14642 = vmatmul.mubr.msk.bf16.vlgmr.msra.gmra.mxu1 %vm5883_vm2, %v15496_v9  ;;  %v15555_v26 = vld [vmem:[%s20485_s11 + $0x374] ss:$72 sps:$4 sm:$0xff]  }
 0x87a   : > { %14646 = vmatpush3.bf16.msra.mxu0 %v7324_v34  ;;  %14658 = vmatpush3.bf16.msra.mxu1 %v7324_v34  ;;  %v15558_v9 = vld [vmem:[%s20485_s11 + $0x37c] ss:$72 sps:$4 sm:$0xff]  }
 0x87b   : > { %14647 = vmatprep.subr.bf16.mxu0 %v20764_v30  ;;  %14659 = vmatprep.subr.bf16.mxu1 %v20764_v30 }
 0x87c   : > { %14653 = vmatprep.mubr.msk.bf16.mxu0 %vm15950_vm3, %v20764_v30  ;;  %14665 = vmatprep.mubr.msk.bf16.mxu1 %vm15950_vm3, %v20764_v30 }
 0x87e   : > { %14648 = vmatpush3.bf16.msra.mxu0 %v7323_v23  ;;  %14660 = vmatpush3.bf16.msra.mxu1 %v7323_v23 }
 0x87f   : > { %14649 = vmatprep.subr.bf16.mxu0 %v20764_v30  ;;  %14661 = vmatprep.subr.bf16.mxu1 %v20764_v30 }
 0x882   : > { %14650 = vmatpush3.bf16.msra.mxu0 %v7322_v49  ;;  %14662 = vmatpush3.bf16.msra.mxu1 %v7322_v49  ;;  %v15537_v49 = vld [vmem:[%s20485_s11 + $0x94] ss:$72 sps:$4 sm:$0xff]  }
 0x883   : > { %14651 = vmatprep.subr.bf16.mxu0 %v20764_v30  ;;  %14663 = vmatprep.subr.bf16.mxu1 %v20764_v30 }
 0x886   : > { %14652 = vmatpush3.bf16.msra.mxu0 %v7321_v4  ;;  %14664 = vmatpush3.bf16.msra.mxu1 %v7321_v4 }
 0x887   : > { %8403 = vmatprep.subr.bf16.mxu0 %v15501_v1  ;;  %8446 = vmatprep.subr.bf16.mxu1 %v15504_v15  ;;  %v15553_v1 = vld [vmem:[%s20485_s11 + $0x370] ss:$72 sps:$4 sm:$0xff]  }
 0x888   : > { %v15556_v15 = vld [vmem:[%s20485_s11 + $0x378] ss:$72 sps:$4 sm:$0xff]  }
 0x889   : > { %14654 = vmatmul.mubr.msk.bf16.vlgmr.msra.gmra.mxu0 %vm5883_vm2, %v15497_v62  ;;  %14666 = vmatmul.mubr.msk.bf16.vlgmr.msra.gmra.mxu1 %vm5883_vm2, %v15498_v39  ;;  %v15561_v62 = vld [vmem:[%s20485_s11 + $0x2e4] ss:$72 sps:$4 sm:$0xff]  }
 0x88a   : > { %8404 = vmatpush1.bf16.msra.mxu0 %v15499_v35  ;;  %8447 = vmatpush1.bf16.msra.mxu1 %v15502_v24  ;;  %v15564_v39 = vld [vmem:[%s20485_s11 + $0x2ec] ss:$72 sps:$4 sm:$0xff]   ;;  %v15559_v35 = vld [vmem:[%s20485_s11 + $0x2e0] ss:$72 sps:$4 sm:$0xff]  }
 0x88b   : > { %8405 = vmatprep.subr.bf16.mxu0 %v15507_v29  ;;  %8448 = vmatprep.subr.bf16.mxu1 %v15510_v32  ;;  %v15562_v24 = vld [vmem:[%s20485_s11 + $0x2e8] ss:$72 sps:$4 sm:$0xff]   ;;  %v15567_v29 = vld [vmem:[%s20485_s11 + $0x254] ss:$72 sps:$4 sm:$0xff]  }
 0x88c   : > { %8435 = vmatprep.mubr.bf16.mxu0 %v20765_v6  ;;  %8478 = vmatprep.mubr.bf16.mxu1 %v20765_v6  ;;  %v15570_v32 = vld [vmem:[%s20485_s11 + $0x25c] ss:$72 sps:$4 sm:$0xff]  }
 0x88e   : > { %8406 = vmatpush1.bf16.msra.mxu0 %v15505_v61  ;;  %8449 = vmatpush1.bf16.msra.mxu1 %v15508_v27  ;;  %v15565_v61 = vld [vmem:[%s20485_s11 + $0x250] ss:$72 sps:$4 sm:$0xff]  }
 0x88f   : > { %8407 = vmatprep.subr.bf16.mxu0 %v15513_v57  ;;  %8450 = vmatprep.subr.bf16.mxu1 %v15516_v21  ;;  %v15568_v27 = vld [vmem:[%s20485_s11 + $0x258] ss:$72 sps:$4 sm:$0xff]   ;;  %v15573_v57 = vld [vmem:[%s20485_s11 + $0x1c4] ss:$72 sps:$4 sm:$0xff]  }
 0x890   : > { %v15576_v21 = vld [vmem:[%s20485_s11 + $0x1cc] ss:$72 sps:$4 sm:$0xff]  }
 0x892   : > { %8408 = vmatpush1.bf16.msra.mxu0 %v15511_v41  ;;  %8451 = vmatpush1.bf16.msra.mxu1 %v15514_v0  ;;  %v15571_v41 = vld [vmem:[%s20485_s11 + $0x1c0] ss:$72 sps:$4 sm:$0xff]  }
 0x893   : > { %8409 = vmatprep.subr.bf16.mxu0 %v15519_v22  ;;  %8452 = vmatprep.subr.bf16.mxu1 %v15522_v51  ;;  %v15574_v0 = vld [vmem:[%s20485_s11 + $0x1c8] ss:$72 sps:$4 sm:$0xff]   ;;  %v15579_v22 = vld [vmem:[%s20485_s11 + $0x134] ss:$72 sps:$4 sm:$0xff]  }
 0x894   : > { %v15582_v51 = vld [vmem:[%s20485_s11 + $0x13c] ss:$72 sps:$4 sm:$0xff]  }
 0x896   : > { %8410 = vmatpush1.bf16.msra.mxu0 %v15517_v3  ;;  %8453 = vmatpush1.bf16.msra.mxu1 %v15520_v48  ;;  %v15577_v3 = vld [vmem:[%s20485_s11 + $0x130] ss:$72 sps:$4 sm:$0xff]  }
 0x897   : > { %8411 = vmatprep.subr.bf16.mxu0 %v15525_v19  ;;  %8454 = vmatprep.subr.bf16.mxu1 %v15528_v63  ;;  %v15580_v48 = vld [vmem:[%s20485_s11 + $0x138] ss:$72 sps:$4 sm:$0xff]   ;;  %v15588_v19 = vld [vmem:[%s20485_s11 + $0xac] ss:$72 sps:$4 sm:$0xff]   ;;  %v15586_v63 = vld [vmem:[%s20485_s11 + $0xa8] ss:$72 sps:$4 sm:$0xff]  }
 0x89a   : > { %8412 = vmatpush1.bf16.msra.mxu0 %v15523_v16  ;;  %8455 = vmatpush1.bf16.msra.mxu1 %v15526_v54  ;;  %v15585_v16 = vld [vmem:[%s20485_s11 + $0xa4] ss:$72 sps:$4 sm:$0xff]   ;;  %v15583_v54 = vld [vmem:[%s20485_s11 + $0xa0] ss:$72 sps:$4 sm:$0xff]  }
 0x89b   : > { %8413 = vmatprep.subr.bf16.mxu0 %v15531_v5  ;;  %8456 = vmatprep.subr.bf16.mxu1 %v15534_v18  ;;  %v15594_v5 = vld [vmem:[%s20485_s11 + $0x1c] ss:$72 sps:$4 sm:$0xff]   ;;  %v15592_v18 = vld [vmem:[%s20485_s11 + $0x18] ss:$72 sps:$4 sm:$0xff]  }
 0x89e   : > { %8414 = vmatpush1.bf16.msra.mxu0 %v15529_v10  ;;  %8457 = vmatpush1.bf16.msra.mxu1 %v15532_v25  ;;  %v15591_v10 = vld [vmem:[%s20485_s11 + $0x14] ss:$72 sps:$4 sm:$0xff]   ;;  %v15589_v25 = vld [vmem:[%s20485_s11 + $0x10] ss:$72 sps:$4 sm:$0xff]  }
 0x89f   : > { %8415 = vmatprep.subr.bf16.mxu0 %v15537_v49  ;;  %8458 = vmatprep.subr.bf16.mxu1 %v15540_v37  ;;  %v15597_v49 = vld [vmem:[%s20485_s11 + $0x414] ss:$72 sps:$4 sm:$0xff]  }
 0x8a0   : > { %v15600_v37 = vld [vmem:[%s20485_s11 + $0x41c] ss:$72 sps:$4 sm:$0xff]  }
 0x8a2   : > { %8416 = vmatpush1.bf16.msra.mxu0 %v15535_v11  ;;  %8459 = vmatpush1.bf16.msra.mxu1 %v15538_v52  ;;  %v15595_v11 = vld [vmem:[%s20485_s11 + $0x410] ss:$72 sps:$4 sm:$0xff]  }
 0x8a3   : > { %8417 = vmatprep.subr.bf16.mxu0 %v15543_v55  ;;  %8460 = vmatprep.subr.bf16.mxu1 %v15546_v60  ;;  %v15598_v52 = vld [vmem:[%s20485_s11 + $0x418] ss:$72 sps:$4 sm:$0xff]   ;;  %v15603_v55 = vld [vmem:[%s20485_s11 + $0x384] ss:$72 sps:$4 sm:$0xff]  }
 0x8a4   : > { %v15606_v60 = vld [vmem:[%s20485_s11 + $0x38c] ss:$72 sps:$4 sm:$0xff]  }
 0x8a6   : > { %8418 = vmatpush1.bf16.msra.mxu0 %v15541_v28  ;;  %8461 = vmatpush1.bf16.msra.mxu1 %v15544_v14  ;;  %v15601_v28 = vld [vmem:[%s20485_s11 + $0x380] ss:$72 sps:$4 sm:$0xff]  }
 0x8a7   : > { %8489 = vmatprep.subr.bf16.mxu0 %v15549_v56  ;;  %8532 = vmatprep.subr.bf16.mxu1 %v15552_v8  ;;  %v15604_v14 = vld [vmem:[%s20485_s11 + $0x388] ss:$72 sps:$4 sm:$0xff]   ;;  %v15609_v56 = vld [vmem:[%s20485_s11 + $0x2f4] ss:$72 sps:$4 sm:$0xff]  }
 0x8a8   : > { %v15612_v8 = vld [vmem:[%s20485_s11 + $0x2fc] ss:$72 sps:$4 sm:$0xff]  }
 0x939   : > { %v7369_v59 = vpop.f32.mrf.mxu0  ;;  %v7421_v42 = vpop.f32.mrf.mxu1 }
 0x93a   : > { %v7532_v2 = vmax.f32 %v7369_v59, %v7421_v42  ;;  %v15607_v59 = vld [vmem:[%s20485_s11 + $0x2f0] ss:$72 sps:$4 sm:$0xff]  }
 0x93b   : > { %v14631_v47 = vpop.f32.mrf.mxu0  ;;  %v14643_v43 = vpop.f32.mrf.mxu1  ;;  %v15610_v42 = vld [vmem:[%s20485_s11 + $0x2f8] ss:$72 sps:$4 sm:$0xff]  }
 0x93c   : > { %v15615_v47 = vld [vmem:[%s20485_s11 + $0x264] ss:$72 sps:$4 sm:$0xff]  }
 0x93d   : > { %v7372_v46 = vpop.f32.mrf.mxu0  ;;  %v7424_v44 = vpop.f32.mrf.mxu1  ;;  %v15618_v43 = vld [vmem:[%s20485_s11 + $0x26c] ss:$72 sps:$4 sm:$0xff]  }
 0x93e   : > { %v7533_v53 = vmax.f32 %v7372_v46, %v7424_v44  ;;  %v15613_v46 = vld [vmem:[%s20485_s11 + $0x260] ss:$72 sps:$4 sm:$0xff]  }
 0x93f   : > { %v14632_v38 = vpop.f32.mrf.mxu0  ;;  %v14644_v12 = vpop.f32.mrf.mxu1  ;;  %v15616_v44 = vld [vmem:[%s20485_s11 + $0x268] ss:$72 sps:$4 sm:$0xff]  }
 0x940   : > { %v15621_v38 = vld [vmem:[%s20485_s11 + $0x1d4] ss:$72 sps:$4 sm:$0xff]  }
 0x941   : > { %v15624_v12 = vld [vmem:[%s20485_s11 + $0x1dc] ss:$72 sps:$4 sm:$0xff]  }
 0x949   : > { %v7473_v33 = vpop.f32.mrf.mxu0  ;;  %v7525_v7 = vpop.f32.mrf.mxu1 }
 0x94a   : > { %v7534_v50 = vmax.f32 %v7473_v33, %v7525_v7  ;;  %v15619_v33 = vld [vmem:[%s20485_s11 + $0x1d0] ss:$72 sps:$4 sm:$0xff]  }
 0x94b   : > { %v14655_v40 = vpop.f32.mrf.mxu0  ;;  %v14667_v45 = vpop.f32.mrf.mxu1  ;;  %v15622_v7 = vld [vmem:[%s20485_s11 + $0x1d8] ss:$72 sps:$4 sm:$0xff]  }
 0x94c   : > { %v7536_v23 = vmax.f32 %v7532_v2, %v7534_v50  ;;  %v15627_v40 = vld [vmem:[%s20485_s11 + $0x144] ss:$72 sps:$4 sm:$0xff]   ;;  %v15625_v50 = vld [vmem:[%s20485_s11 + $0x140] ss:$72 sps:$4 sm:$0xff]  }
 0x94d   : > { %v7476_v36 = vpop.f32.mrf.mxu0  ;;  %v7528_v34 = vpop.f32.mrf.mxu1  ;;  %v15630_v45 = vld [vmem:[%s20485_s11 + $0x14c] ss:$72 sps:$4 sm:$0xff]   ;;  %v15636_v2 = vld [vmem:[%s20485_s11 + $0xbc] ss:$72 sps:$4 sm:$0xff]  }
 0x94e   : > { %v7535_v13 = vmax.f32 %v7476_v36, %v7528_v34  ;;  %v15628_v36 = vld [vmem:[%s20485_s11 + $0x148] ss:$72 sps:$4 sm:$0xff]   ;;  %v15633_v34 = vld [vmem:[%s20485_s11 + $0xb4] ss:$72 sps:$4 sm:$0xff]  }
 0x94f   : > { %v14656_v30 = vpop.f32.mrf.mxu0  ;;  %v14668_v20 = vpop.f32.mrf.mxu1 }
 0x950   : > { %v7537_v17 = vmax.f32 %v7533_v53, %v7535_v13  ;;  %v15631_v53 = vld [vmem:[%s20485_s11 + $0xb0] ss:$72 sps:$4 sm:$0xff]   ;;  %v15639_v30 = vld [vmem:[%s20485_s11 + $0x24] ss:$72 sps:$4 sm:$0xff]  }
 0x951   : > { %v15634_v13 = vld [vmem:[%s20485_s11 + $0xb8] ss:$72 sps:$4 sm:$0xff]   ;;  %v15642_v20 = vld [vmem:[%s20485_s11 + $0x2c] ss:$72 sps:$4 sm:$0xff]  }
 0x952   : > { %v19414_v4 = vpack.c.bf16 %v7537_v17, %v7536_v23  ;;  %v15637_v23 = vld [vmem:[%s20485_s11 + $0x20] ss:$72 sps:$4 sm:$0xff]  }
 0x953   : > { %v15640_v17 = vld [vmem:[%s20485_s11 + $0x28] ss:$72 sps:$4 sm:$0xff]  }
 0x954   : > { %8436 = vmatmul.mubr.bf16.vlgmr.msra.gmra.mxu0 %v19414_v4  ;;  %8479 = vmatmul.mubr.bf16.vlgmr.msra.gmra.mxu1 %v19414_v4 }
 0x955   : > { %8490 = vmatpush1.bf16.msra.mxu0 %v15547_v31  ;;  %8533 = vmatpush1.bf16.msra.mxu1 %v15550_v58  ;;  %v15645_v31 = vld [vmem:[%s20485_s11 + $0x424] ss:$72 sps:$4 sm:$0xff]  }
 0x956   : > { %8491 = vmatprep.subr.bf16.mxu0 %v15555_v26  ;;  %8534 = vmatprep.subr.bf16.mxu1 %v15558_v9  ;;  %v15648_v58 = vld [vmem:[%s20485_s11 + $0x42c] ss:$72 sps:$4 sm:$0xff]   ;;  %v15643_v26 = vld [vmem:[%s20485_s11 + $0x420] ss:$72 sps:$4 sm:$0xff]  }
 0x957   : > { %8521 = vmatprep.mubr.bf16.mxu0 %v20765_v6  ;;  %8564 = vmatprep.mubr.bf16.mxu1 %v20765_v6  ;;  %v15646_v9 = vld [vmem:[%s20485_s11 + $0x428] ss:$72 sps:$4 sm:$0xff]  }
 0x959   : > { %8492 = vmatpush1.bf16.msra.mxu0 %v15553_v1  ;;  %8535 = vmatpush1.bf16.msra.mxu1 %v15556_v15  ;;  %v15651_v1 = vld [vmem:[%s20485_s11 + $0x394] ss:$72 sps:$4 sm:$0xff]  }
 0x95a   : > { %8493 = vmatprep.subr.bf16.mxu0 %v15561_v62  ;;  %8536 = vmatprep.subr.bf16.mxu1 %v15564_v39  ;;  %v15654_v15 = vld [vmem:[%s20485_s11 + $0x39c] ss:$72 sps:$4 sm:$0xff]   ;;  %v15649_v62 = vld [vmem:[%s20485_s11 + $0x390] ss:$72 sps:$4 sm:$0xff]  }
 0x95b   : > { %v15652_v39 = vld [vmem:[%s20485_s11 + $0x398] ss:$72 sps:$4 sm:$0xff]  }
 0x95d   : > { %8494 = vmatpush1.bf16.msra.mxu0 %v15559_v35  ;;  %8537 = vmatpush1.bf16.msra.mxu1 %v15562_v24  ;;  %v15657_v35 = vld [vmem:[%s20485_s11 + $0x304] ss:$72 sps:$4 sm:$0xff]  }
 0x95e   : > { %8495 = vmatprep.subr.bf16.mxu0 %v15567_v29  ;;  %8538 = vmatprep.subr.bf16.mxu1 %v15570_v32  ;;  %v15660_v24 = vld [vmem:[%s20485_s11 + $0x30c] ss:$72 sps:$4 sm:$0xff]   ;;  %v15655_v29 = vld [vmem:[%s20485_s11 + $0x300] ss:$72 sps:$4 sm:$0xff]  }
 0x95f   : > { %v15658_v32 = vld [vmem:[%s20485_s11 + $0x308] ss:$72 sps:$4 sm:$0xff]  }
 0x961   : > { %8496 = vmatpush1.bf16.msra.mxu0 %v15565_v61  ;;  %8539 = vmatpush1.bf16.msra.mxu1 %v15568_v27  ;;  %v15663_v61 = vld [vmem:[%s20485_s11 + $0x274] ss:$72 sps:$4 sm:$0xff]  }
 0x962   : > { %8497 = vmatprep.subr.bf16.mxu0 %v15573_v57  ;;  %8540 = vmatprep.subr.bf16.mxu1 %v15576_v21  ;;  %v15666_v27 = vld [vmem:[%s20485_s11 + $0x27c] ss:$72 sps:$4 sm:$0xff]   ;;  %v15661_v57 = vld [vmem:[%s20485_s11 + $0x270] ss:$72 sps:$4 sm:$0xff]  }
 0x963   : > { %v15664_v21 = vld [vmem:[%s20485_s11 + $0x278] ss:$72 sps:$4 sm:$0xff]  }
 0x965   : > { %8498 = vmatpush1.bf16.msra.mxu0 %v15571_v41  ;;  %8541 = vmatpush1.bf16.msra.mxu1 %v15574_v0  ;;  %v15669_v41 = vld [vmem:[%s20485_s11 + $0x1e4] ss:$72 sps:$4 sm:$0xff]  }
 0x966   : > { %8499 = vmatprep.subr.bf16.mxu0 %v15579_v22  ;;  %8542 = vmatprep.subr.bf16.mxu1 %v15582_v51  ;;  %v15672_v0 = vld [vmem:[%s20485_s11 + $0x1ec] ss:$72 sps:$4 sm:$0xff]   ;;  %v15667_v22 = vld [vmem:[%s20485_s11 + $0x1e0] ss:$72 sps:$4 sm:$0xff]  }
 0x967   : > { %v15670_v51 = vld [vmem:[%s20485_s11 + $0x1e8] ss:$72 sps:$4 sm:$0xff]  }
 0x969   : > { %8500 = vmatpush1.bf16.msra.mxu0 %v15577_v3  ;;  %8543 = vmatpush1.bf16.msra.mxu1 %v15580_v48  ;;  %v15675_v3 = vld [vmem:[%s20485_s11 + $0x154] ss:$72 sps:$4 sm:$0xff]  }
 0x96a   : > { %8501 = vmatprep.subr.bf16.mxu0 %v15585_v16  ;;  %8544 = vmatprep.subr.bf16.mxu1 %v15588_v19  ;;  %v15678_v48 = vld [vmem:[%s20485_s11 + $0x15c] ss:$72 sps:$4 sm:$0xff]   ;;  %v15673_v16 = vld [vmem:[%s20485_s11 + $0x150] ss:$72 sps:$4 sm:$0xff]  }
 0x96b   : > { %v15676_v19 = vld [vmem:[%s20485_s11 + $0x158] ss:$72 sps:$4 sm:$0xff]  }
 0x96d   : > { %8502 = vmatpush1.bf16.msra.mxu0 %v15583_v54  ;;  %8545 = vmatpush1.bf16.msra.mxu1 %v15586_v63  ;;  %v15681_v54 = vld [vmem:[%s20485_s11 + $0xc4] ss:$72 sps:$4 sm:$0xff]  }
 0x96e   : > { %8503 = vmatprep.subr.bf16.mxu0 %v15591_v10  ;;  %8546 = vmatprep.subr.bf16.mxu1 %v15594_v5  ;;  %v15684_v63 = vld [vmem:[%s20485_s11 + $0xcc] ss:$72 sps:$4 sm:$0xff]   ;;  %v15679_v10 = vld [vmem:[%s20485_s11 + $0xc0] ss:$72 sps:$4 sm:$0xff]  }
 0x96f   : > { %v15682_v5 = vld [vmem:[%s20485_s11 + $0xc8] ss:$72 sps:$4 sm:$0xff]  }
 0x971   : > { %8504 = vmatpush1.bf16.msra.mxu0 %v15589_v25  ;;  %8547 = vmatpush1.bf16.msra.mxu1 %v15592_v18  ;;  %v15687_v25 = vld [vmem:[%s20485_s11 + $0x34] ss:$72 sps:$4 sm:$0xff]  }
 0x972   : > { %8575 = vmatprep.subr.bf16.mxu0 %v15597_v49  ;;  %8618 = vmatprep.subr.bf16.mxu1 %v15600_v37  ;;  %v15690_v18 = vld [vmem:[%s20485_s11 + $0x3c] ss:$72 sps:$4 sm:$0xff]   ;;  %v15685_v49 = vld [vmem:[%s20485_s11 + $0x30] ss:$72 sps:$4 sm:$0xff]  }
 0x973   : > { %v15688_v37 = vld [vmem:[%s20485_s11 + $0x38] ss:$72 sps:$4 sm:$0xff]  }
 0x974   : > { %8522 = vmatmul.mubr.bf16.vlgmr.msra.gmra.mxu0 %v19414_v4  ;;  %8565 = vmatmul.mubr.bf16.vlgmr.msra.gmra.mxu1 %v19414_v4 }
 0x975   : > { %8576 = vmatpush1.bf16.msra.mxu0 %v15595_v11  ;;  %8619 = vmatpush1.bf16.msra.mxu1 %v15598_v52  ;;  %v15693_v11 = vld [vmem:[%s20485_s11 + $0x434] ss:$72 sps:$4 sm:$0xff]   ;;  %v15691_v52 = vld [vmem:[%s20485_s11 + $0x430] ss:$72 sps:$4 sm:$0xff]  }
 0x976   : > { %8577 = vmatprep.subr.bf16.mxu0 %v15603_v55  ;;  %8620 = vmatprep.subr.bf16.mxu1 %v15606_v60  ;;  %v15696_v55 = vld [vmem:[%s20485_s11 + $0x3a4] ss:$72 sps:$4 sm:$0xff]   ;;  %v15694_v60 = vld [vmem:[%s20485_s11 + $0x3a0] ss:$72 sps:$4 sm:$0xff]  }
 0x977   : > { %8607 = vmatprep.mubr.bf16.mxu0 %v20765_v6  ;;  %8650 = vmatprep.mubr.bf16.mxu1 %v20765_v6 }
 0x979   : > { %8578 = vmatpush1.bf16.msra.mxu0 %v15601_v28  ;;  %8621 = vmatpush1.bf16.msra.mxu1 %v15604_v14  ;;  %v15699_v28 = vld [vmem:[%s20485_s11 + $0x314] ss:$72 sps:$4 sm:$0xff]   ;;  %v15697_v14 = vld [vmem:[%s20485_s11 + $0x310] ss:$72 sps:$4 sm:$0xff]  }
 0x97a   : > { %8579 = vmatprep.subr.bf16.mxu0 %v15609_v56  ;;  %8622 = vmatprep.subr.bf16.mxu1 %v15612_v8  ;;  %v15702_v56 = vld [vmem:[%s20485_s11 + $0x284] ss:$72 sps:$4 sm:$0xff]   ;;  %v15700_v8 = vld [vmem:[%s20485_s11 + $0x280] ss:$72 sps:$4 sm:$0xff]  }
 0x97d   : > { %8580 = vmatpush1.bf16.msra.mxu0 %v15607_v59  ;;  %8623 = vmatpush1.bf16.msra.mxu1 %v15610_v42  ;;  %v15705_v59 = vld [vmem:[%s20485_s11 + $0x1f4] ss:$72 sps:$4 sm:$0xff]   ;;  %v15703_v42 = vld [vmem:[%s20485_s11 + $0x1f0] ss:$72 sps:$4 sm:$0xff]  }
 0x97e   : > { %8581 = vmatprep.subr.bf16.mxu0 %v15615_v47  ;;  %8624 = vmatprep.subr.bf16.mxu1 %v15618_v43  ;;  %v15708_v47 = vld [vmem:[%s20485_s11 + $0x164] ss:$72 sps:$4 sm:$0xff]   ;;  %v15706_v43 = vld [vmem:[%s20485_s11 + $0x160] ss:$72 sps:$4 sm:$0xff]  }
 0x981   : > { %8582 = vmatpush1.bf16.msra.mxu0 %v15613_v46  ;;  %8625 = vmatpush1.bf16.msra.mxu1 %v15616_v44  ;;  %v15711_v46 = vld [vmem:[%s20485_s11 + $0xd4] ss:$72 sps:$4 sm:$0xff]   ;;  %v15709_v44 = vld [vmem:[%s20485_s11 + $0xd0] ss:$72 sps:$4 sm:$0xff]  }
 0x982   : > { %8583 = vmatprep.subr.bf16.mxu0 %v15621_v38  ;;  %8626 = vmatprep.subr.bf16.mxu1 %v15624_v12  ;;  %v15714_v38 = vld [vmem:[%s20485_s11 + $0x44] ss:$72 sps:$4 sm:$0xff]   ;;  %v15712_v12 = vld [vmem:[%s20485_s11 + $0x40] ss:$72 sps:$4 sm:$0xff]  }
 0x985   : > { %8584 = vmatpush1.bf16.msra.mxu0 %v15619_v33  ;;  %8627 = vmatpush1.bf16.msra.mxu1 %v15622_v7 }
 0x986   : > { %8585 = vmatprep.subr.bf16.mxu0 %v15627_v40  ;;  %8628 = vmatprep.subr.bf16.mxu1 %v15630_v45 }
 0x989   : > { %8586 = vmatpush1.bf16.msra.mxu0 %v15625_v50  ;;  %8629 = vmatpush1.bf16.msra.mxu1 %v15628_v36 }
 0x98a   : > { %8587 = vmatprep.subr.bf16.mxu0 %v15633_v34  ;;  %8630 = vmatprep.subr.bf16.mxu1 %v15636_v2 }
 0x98d   : > { %8588 = vmatpush1.bf16.msra.mxu0 %v15631_v53  ;;  %8631 = vmatpush1.bf16.msra.mxu1 %v15634_v13 }
 0x98e   : > { %8589 = vmatprep.subr.bf16.mxu0 %v15639_v30  ;;  %8632 = vmatprep.subr.bf16.mxu1 %v15642_v20  ;;  %v15715_v20 = vld [vmem:[%s20766_s1 + $0x8] sm:$0xff]  }
 0x991   : > { %8590 = vmatpush1.bf16.msra.mxu0 %v15637_v23  ;;  %8633 = vmatpush1.bf16.msra.mxu1 %v15640_v17  ;;  %v15716_v23 = vld [vmem:[%s20766_s1] sm:$0xff]  }
 0x992   : > { %8661 = vmatprep.subr.bf16.mxu0 %v15645_v31  ;;  %8704 = vmatprep.subr.bf16.mxu1 %v15648_v58 }
 0x994   : > { %8608 = vmatmul.mubr.bf16.vlgmr.msra.gmra.mxu0 %v19414_v4  ;;  %8651 = vmatmul.mubr.bf16.vlgmr.msra.gmra.mxu1 %v19414_v4 }
 0x995   : > { %8662 = vmatpush1.bf16.msra.mxu0 %v15643_v26  ;;  %8705 = vmatpush1.bf16.msra.mxu1 %v15646_v9 }
 0x996   : > { %8663 = vmatprep.subr.bf16.mxu0 %v15651_v1  ;;  %8706 = vmatprep.subr.bf16.mxu1 %v15654_v15 }
 0x997   : > { %8693 = vmatprep.mubr.bf16.mxu0 %v20765_v6  ;;  %8736 = vmatprep.mubr.bf16.mxu1 %v20765_v6 }
 0x999   : > { %8664 = vmatpush1.bf16.msra.mxu0 %v15649_v62  ;;  %8707 = vmatpush1.bf16.msra.mxu1 %v15652_v39 }
 0x99a   : > { %8665 = vmatprep.subr.bf16.mxu0 %v15657_v35  ;;  %8708 = vmatprep.subr.bf16.mxu1 %v15660_v24 }
 0x99d   : > { %8666 = vmatpush1.bf16.msra.mxu0 %v15655_v29  ;;  %8709 = vmatpush1.bf16.msra.mxu1 %v15658_v32  ;;  %v15717_v29 = vld [vmem:[%s20766_s1 + $0x10] sm:$0xff]  }
 0x99e   : > { %8667 = vmatprep.subr.bf16.mxu0 %v15663_v61  ;;  %8710 = vmatprep.subr.bf16.mxu1 %v15666_v27  ;;  %v15718_v61 = vld [vmem:[%s20766_s1 + $0x18] sm:$0xff]  }
 0x9a1   : > { %8668 = vmatpush1.bf16.msra.mxu0 %v15661_v57  ;;  %8711 = vmatpush1.bf16.msra.mxu1 %v15664_v21 }
 0x9a2   : > { %8669 = vmatprep.subr.bf16.mxu0 %v15669_v41  ;;  %8712 = vmatprep.subr.bf16.mxu1 %v15672_v0 }
 0x9a5   : > { %8670 = vmatpush1.bf16.msra.mxu0 %v15667_v22  ;;  %8713 = vmatpush1.bf16.msra.mxu1 %v15670_v51 }
 0x9a6   : > { %8671 = vmatprep.subr.bf16.mxu0 %v15675_v3  ;;  %8714 = vmatprep.subr.bf16.mxu1 %v15678_v48 }
 0x9a9   : > { %8672 = vmatpush1.bf16.msra.mxu0 %v15673_v16  ;;  %8715 = vmatpush1.bf16.msra.mxu1 %v15676_v19 }
 0x9aa   : > { %8673 = vmatprep.subr.bf16.mxu0 %v15681_v54  ;;  %8716 = vmatprep.subr.bf16.mxu1 %v15684_v63  ;;  %v15719_v63 = vld [vmem:[%s20766_s1 + $0x20] sm:$0xff]  }
 0x9ad   : > { %8674 = vmatpush1.bf16.msra.mxu0 %v15679_v10  ;;  %8717 = vmatpush1.bf16.msra.mxu1 %v15682_v5  ;;  %v15720_v10 = vld [vmem:[%s20766_s1 + $0x28] sm:$0xff]  }
 0x9ae   : > { %8675 = vmatprep.subr.bf16.mxu0 %v15687_v25  ;;  %8718 = vmatprep.subr.bf16.mxu1 %v15690_v18 }
 0x9b1   : > { %8676 = vmatpush1.bf16.msra.mxu0 %v15685_v49  ;;  %8719 = vmatpush1.bf16.msra.mxu1 %v15688_v37 }
 0x9b2   : > { %8747 = vmatprep.subr.bf16.mxu0 %v15693_v11 }
 0x9b4   : > { %8694 = vmatmul.mubr.bf16.vlgmr.msra.gmra.mxu0 %v19414_v4  ;;  %8737 = vmatmul.mubr.bf16.vlgmr.msra.gmra.mxu1 %v19414_v4 }
 0x9b5   : > { %8748 = vmatpush1.bf16.msra.mxu0 %v15691_v52  ;;  %8779 = vmatprep.mubr.bf16.mxu0 %v20765_v6 }
 0x9b6   : > { %8749 = vmatprep.subr.bf16.mxu0 %v15696_v55  ;;  %8854 = vmatprep.mubr.bf16.mxu1 %v20765_v6 }
 0x9b9   : > { %8750 = vmatpush1.bf16.msra.mxu0 %v15694_v60 }
 0x9ba   : > { %8751 = vmatprep.subr.bf16.mxu0 %v15699_v28 }
 0x9bd   : > { %8752 = vmatpush1.bf16.msra.mxu0 %v15697_v14  ;;  %v15726_v14 = vld [vmem:[%s20487_s13 + $0xe4] ss:$16 sps:$4 sm:$0xff]  }
 0x9be   : > { %8753 = vmatprep.subr.bf16.mxu0 %v15702_v56 }
 0x9c1   : > { %8754 = vmatpush1.bf16.msra.mxu0 %v15700_v8 }
 0x9c2   : > { %8755 = vmatprep.subr.bf16.mxu0 %v15705_v59  ;;  %v15721_v59 = vld [vmem:[%s20766_s1 + $0x30] sm:$0xff]  }
 0x9c5   : > { %8756 = vmatpush1.bf16.msra.mxu0 %v15703_v42  ;;  %v15722_v42 = vld [vmem:[%s20766_s1 + $0x38] sm:$0xff]  }
 0x9c6   : > { %8757 = vmatprep.subr.bf16.mxu0 %v15708_v47  ;;  %v15724_v47 = vld [vmem:[%s20487_s13 + $0xe0] ss:$16 sps:$4 sm:$0xff]  }
 0x9c9   : > { %8758 = vmatpush1.bf16.msra.mxu0 %v15706_v43  ;;  %v15729_v43 = vld [vmem:[%s20487_s13 + $0xc4] ss:$16 sps:$4 sm:$0xff]  }
 0x9ca   : > { %8759 = vmatprep.subr.bf16.mxu0 %v15711_v46  ;;  %v15727_v46 = vld [vmem:[%s20487_s13 + $0xc0] ss:$16 sps:$4 sm:$0xff]  }
 0x9cd   : > { %8760 = vmatpush1.bf16.msra.mxu0 %v15709_v44  ;;  %v15732_v44 = vld [vmem:[%s20487_s13 + $0xa4] ss:$16 sps:$4 sm:$0xff]  }
 0x9ce   : > { %8761 = vmatprep.subr.bf16.mxu0 %v15714_v38  ;;  %v15730_v38 = vld [vmem:[%s20487_s13 + $0xa0] ss:$16 sps:$4 sm:$0xff]  }
 0x9d1   : > { %8762 = vmatpush1.bf16.msra.mxu0 %v15712_v12  ;;  %v15735_v12 = vld [vmem:[%s20487_s13 + $0x84] ss:$16 sps:$4 sm:$0xff]  }
 0x9d4   : > { %8780 = vmatmul.mubr.bf16.vlgmr.msra.gmra.mxu0 %v19414_v4 }
 0x9d5   : > { %9075 = vmatprep.mubr.bf16.mxu0 %v20765_v6 }
 0xa14   : > { %v8480_v33 = vpop.f32.mrf.mxu1  ;;  %v8437_v7 = vpop.f32.mrf.mxu0 }
 0xa16   : > { %v8482_v40 = vpop.f32.mrf.mxu1  ;;  %v8439_v45 = vpop.f32.mrf.mxu0 }
 0xa18   : > { %v8484_v50 = vpop.f32.mrf.mxu1  ;;  %v8441_v36 = vpop.f32.mrf.mxu0 }
 0xa19   : > { %v8792_v13 = vpack.c.bf16 %v8484_v50, %v8480_v33  ;;  %v8790_v4 = vpack.c.bf16 %v8441_v36, %v8437_v7  ;;  %v15733_v33 = vld [vmem:[%s20487_s13 + $0x80] ss:$16 sps:$4 sm:$0xff]   ;;  %v15738_v7 = vld [vmem:[%s20487_s13 + $0x64] ss:$16 sps:$4 sm:$0xff]  }
 0xa1a   : > { %v8486_v34 = vpop.f32.mrf.mxu1  ;;  %v8443_v2 = vpop.f32.mrf.mxu0  ;;  %v15742_v50 = vld [vmem:[%s20487_s13 + $0x40] ss:$16 sps:$4 sm:$0xff]   ;;  %v15750_v36 = vld [vmem:[%s20487_s13 + $0x24] ss:$16 sps:$4 sm:$0xff]  }
 0xa1b   : > { %v8793_v53 = vpack.c.bf16 %v8486_v34, %v8482_v40  ;;  %v8791_v30 = vpack.c.bf16 %v8443_v2, %v8439_v45  ;;  %v15736_v40 = vld [vmem:[%s20487_s13 + $0x60] ss:$16 sps:$4 sm:$0xff]   ;;  %v15744_v45 = vld [vmem:[%s20487_s13 + $0x44] ss:$16 sps:$4 sm:$0xff]  }
 0xa1d   : > { %8836 = vmatprep.subr.bf16.mxu1 %v8793_v53  ;;  %v15748_v53 = vld [vmem:[%s20487_s13 + $0x20] ss:$16 sps:$4 sm:$0xff]  }
 0xa1e   : > { %8837 = vmatpush1.bf16.msra.mxu1 %v8792_v13  ;;  %v15756_v13 = vld [vmem:[%s20487_s13 + $0x4] ss:$16 sps:$4 sm:$0xff]  }
 0xa1f   : > { %8887 = vmatprep.subr.bf16.mxu1 %v8791_v30 }
 0xa21   : > { %12749 = vmatmul.mubr.msk.bf16.vlgmr.msra.gmra.mxu1 %vm8818_vm4, %v15715_v20 }
 0xa22   : > { %8888 = vmatpush1.bf16.msra.mxu1 %v8790_v4  ;;  %8905 = vmatprep.mubr.bf16.mxu1 %v20765_v6  ;;  %v15754_v4 = vld [vmem:[%s20487_s13] ss:$16 sps:$4 sm:$0xff]  }
 0xa29   : > { %12751 = vmatmul.mubr.msk.bf16.vlgmr.msra.gmra.mxu1 %vm8818_vm4, %v15716_v23 }
 0xa2a   : > { %8959 = vmatprep.mubr.bf16.mxu1 %v20765_v6 }
 0xa34   : > { %v8523_v17 = vpop.f32.mrf.mxu0  ;;  %v8566_v31 = vpop.f32.mrf.mxu1 }
 0xa36   : > { %v8525_v58 = vpop.f32.mrf.mxu0  ;;  %v8568_v26 = vpop.f32.mrf.mxu1 }
 0xa38   : > { %v8527_v9 = vpop.f32.mrf.mxu0  ;;  %v8570_v1 = vpop.f32.mrf.mxu1 }
 0xa39   : > { %v8794_v35 = vpack.c.bf16 %v8527_v9, %v8523_v17  ;;  %v8796_v32 = vpack.c.bf16 %v8570_v1, %v8566_v31  ;;  %v15741_v17 = vld [vmem:[%s20487_s13 + $0xec] ss:$16 sps:$4 sm:$0xff]   ;;  %v15745_v1 = vld [vmem:[%s20487_s13 + $0xc8] ss:$16 sps:$4 sm:$0xff]  }
 0xa3a   : > { %v8529_v15 = vpop.f32.mrf.mxu0  ;;  %v8572_v62 = vpop.f32.mrf.mxu1  ;;  %v15747_v9 = vld [vmem:[%s20487_s13 + $0xcc] ss:$16 sps:$4 sm:$0xff]  }
 0xa3b   : > { %v8795_v39 = vpack.c.bf16 %v8529_v15, %v8525_v58  ;;  %v8797_v24 = vpack.c.bf16 %v8572_v62, %v8568_v26  ;;  %v15723_v58 = vld [vmem:[%s20766_s1 + $0x40] sm:$0xff]   ;;  %v15739_v26 = vld [vmem:[%s20487_s13 + $0xe8] ss:$16 sps:$4 sm:$0xff]  }
 0xa3c   : > { %v15760_v15 = vld [vmem:[%s20487_s13 + $0x1e0] ss:$16 sps:$4 sm:$0xff]   ;;  %v15762_v62 = vld [vmem:[%s20487_s13 + $0x1e4] ss:$16 sps:$4 sm:$0xff]  }
 0xa3d   : > { %8941 = vmatprep.subr.bf16.mxu1 %v8795_v39  ;;  %v15753_v39 = vld [vmem:[%s20487_s13 + $0xac] ss:$16 sps:$4 sm:$0xff]  }
 0xa3e   : > { %8942 = vmatpush1.bf16.msra.mxu1 %v8794_v35  ;;  %v15751_v35 = vld [vmem:[%s20487_s13 + $0xa8] ss:$16 sps:$4 sm:$0xff]  }
 0xa3f   : > { %8999 = vmatprep.subr.bf16.mxu1 %v8797_v24  ;;  %v15766_v24 = vld [vmem:[%s20487_s13 + $0x1c0] ss:$16 sps:$4 sm:$0xff]  }
 0xa41   : > { %12755 = vmatmul.mubr.msk.bf16.vlgmr.msra.gmra.mxu1 %vm8818_vm4, %v15717_v29  ;;  %v15768_v29 = vld [vmem:[%s20487_s13 + $0x1c4] ss:$16 sps:$4 sm:$0xff]  }
 0xa42   : > { %9000 = vmatpush1.bf16.msra.mxu1 %v8796_v32  ;;  %9017 = vmatprep.mubr.bf16.mxu1 %v20765_v6  ;;  %v15759_v32 = vld [vmem:[%s20487_s13 + $0x8c] ss:$16 sps:$4 sm:$0xff]  }
 0xa49   : > { %12759 = vmatmul.mubr.msk.bf16.vlgmr.msra.gmra.mxu1 %vm8818_vm4, %v15718_v61  ;;  %v15757_v61 = vld [vmem:[%s20487_s13 + $0x88] ss:$16 sps:$4 sm:$0xff]  }
 0xa4a   : > { %9133 = vmatprep.mubr.bf16.mxu1 %v20765_v6 }
 0xa54   : > { %v8609_v27 = vpop.f32.mrf.mxu0  ;;  %v8652_v57 = vpop.f32.mrf.mxu1 }
 0xa56   : > { %v8611_v21 = vpop.f32.mrf.mxu0  ;;  %v8654_v41 = vpop.f32.mrf.mxu1 }
 0xa58   : > { %v8613_v0 = vpop.f32.mrf.mxu0  ;;  %v8656_v22 = vpop.f32.mrf.mxu1 }
 0xa59   : > { %v8798_v19 = vpack.c.bf16 %v8613_v0, %v8609_v27  ;;  %v8800_v54 = vpack.c.bf16 %v8656_v22, %v8652_v57  ;;  %v15765_v27 = vld [vmem:[%s20487_s13 + $0x6c] ss:$16 sps:$4 sm:$0xff]   ;;  %v15763_v57 = vld [vmem:[%s20487_s13 + $0x68] ss:$16 sps:$4 sm:$0xff]   ;;  %v15772_v0 = vld [vmem:[%s20487_s13 + $0x1a0] ss:$16 sps:$4 sm:$0xff]  }
 0xa5a   : > { %v8615_v51 = vpop.f32.mrf.mxu0  ;;  %v8658_v3 = vpop.f32.mrf.mxu1  ;;  %v15774_v22 = vld [vmem:[%s20487_s13 + $0x1a4] ss:$16 sps:$4 sm:$0xff]  }
 0xa5b   : > { %v8799_v48 = vpack.c.bf16 %v8615_v51, %v8611_v21  ;;  %v8801_v16 = vpack.c.bf16 %v8658_v3, %v8654_v41  ;;  %v15771_v21 = vld [vmem:[%s20487_s13 + $0x4c] ss:$16 sps:$4 sm:$0xff]   ;;  %v15769_v41 = vld [vmem:[%s20487_s13 + $0x48] ss:$16 sps:$4 sm:$0xff]  }
 0xa5c   : > { %v15775_v51 = vld [vmem:[%s20487_s13 + $0x28] ss:$16 sps:$4 sm:$0xff]   ;;  %v15777_v3 = vld [vmem:[%s20487_s13 + $0x2c] ss:$16 sps:$4 sm:$0xff]  }
 0xa5d   : > { %9057 = vmatprep.subr.bf16.mxu0 %v8799_v48  ;;  %9115 = vmatprep.subr.bf16.mxu1 %v8801_v16  ;;  %v15778_v48 = vld [vmem:[%s20487_s13 + $0x180] ss:$16 sps:$4 sm:$0xff]   ;;  %v15780_v16 = vld [vmem:[%s20487_s13 + $0x184] ss:$16 sps:$4 sm:$0xff]  }
 0xa5e   : > { %9058 = vmatpush1.bf16.msra.mxu0 %v8798_v19  ;;  %9116 = vmatpush1.bf16.msra.mxu1 %v8800_v54  ;;  %v15781_v19 = vld [vmem:[%s20487_s13 + $0x8] ss:$16 sps:$4 sm:$0xff]   ;;  %v15783_v54 = vld [vmem:[%s20487_s13 + $0xc] ss:$16 sps:$4 sm:$0xff]  }
 0xa61   : > { %12763 = vmatmul.mubr.msk.bf16.vlgmr.msra.gmra.mxu0 %vm8818_vm4, %v15719_v63  ;;  %12767 = vmatmul.mubr.msk.bf16.vlgmr.msra.gmra.mxu1 %vm8818_vm4, %v15720_v10  ;;  %v15789_v63 = vld [vmem:[%s20487_s13 + $0x1ec] ss:$16 sps:$4 sm:$0xff]   ;;  %v15787_v10 = vld [vmem:[%s20487_s13 + $0x1e8] ss:$16 sps:$4 sm:$0xff]  }
 0xa62   : > { %9191 = vmatprep.mubr.bf16.mxu0 %v20765_v6  ;;  %9249 = vmatprep.mubr.bf16.mxu1 %v20765_v6 }
 0xa74   : > { %v8695_v5 = vpop.f32.mrf.mxu0  ;;  %v8738_v25 = vpop.f32.mrf.mxu1 }
 0xa76   : > { %v8697_v18 = vpop.f32.mrf.mxu0  ;;  %v8740_v49 = vpop.f32.mrf.mxu1 }
 0xa78   : > { %v8699_v37 = vpop.f32.mrf.mxu0  ;;  %v8742_v11 = vpop.f32.mrf.mxu1 }
 0xa79   : > { %v8802_v56 = vpack.c.bf16 %v8699_v37, %v8695_v5  ;;  %v8804_v8 = vpack.c.bf16 %v8742_v11, %v8738_v25  ;;  %v15795_v5 = vld [vmem:[%s20487_s13 + $0x1cc] ss:$16 sps:$4 sm:$0xff]   ;;  %v15793_v25 = vld [vmem:[%s20487_s13 + $0x1c8] ss:$16 sps:$4 sm:$0xff]  }
 0xa7a   : > { %v8701_v52 = vpop.f32.mrf.mxu0  ;;  %v8744_v55 = vpop.f32.mrf.mxu1  ;;  %v15807_v37 = vld [vmem:[%s20487_s13 + $0x18c] ss:$16 sps:$4 sm:$0xff]   ;;  %v15805_v11 = vld [vmem:[%s20487_s13 + $0x188] ss:$16 sps:$4 sm:$0xff]  }
 0xa7b   : > { %v8803_v60 = vpack.c.bf16 %v8701_v52, %v8697_v18  ;;  %v8805_v28 = vpack.c.bf16 %v8744_v55, %v8740_v49  ;;  %v15801_v18 = vld [vmem:[%s20487_s13 + $0x1ac] ss:$16 sps:$4 sm:$0xff]   ;;  %v15799_v49 = vld [vmem:[%s20487_s13 + $0x1a8] ss:$16 sps:$4 sm:$0xff]   ;;  %v15786_v52 = vld [vmem:[%s20487_s13 + $0x164] ss:$16 sps:$4 sm:$0xff]  }
 0xa7c   : > { %v15810_v55 = vld [vmem:[%s20487_s13 + $0x16c] ss:$16 sps:$4 sm:$0xff]  }
 0xa7d   : > { %9173 = vmatprep.subr.bf16.mxu0 %v8803_v60  ;;  %9231 = vmatprep.subr.bf16.mxu1 %v8805_v28  ;;  %v15784_v60 = vld [vmem:[%s20487_s13 + $0x160] ss:$16 sps:$4 sm:$0xff]   ;;  %v15808_v28 = vld [vmem:[%s20487_s13 + $0x168] ss:$16 sps:$4 sm:$0xff]  }
 0xa7e   : > { %9174 = vmatpush1.bf16.msra.mxu0 %v8802_v56  ;;  %9232 = vmatpush1.bf16.msra.mxu1 %v8804_v8  ;;  %v15813_v56 = vld [vmem:[%s20487_s13 + $0x14c] ss:$16 sps:$4 sm:$0xff]   ;;  %v15790_v8 = vld [vmem:[%s20487_s13 + $0x140] ss:$16 sps:$4 sm:$0xff]  }
 0xa7f   : > { %9728 = vmatprep.subr.bf16.mxu1 %v15726_v14  ;;  %v15792_v14 = vld [vmem:[%s20487_s13 + $0x144] ss:$16 sps:$4 sm:$0xff]  }
 0xa81   : > { %12771 = vmatmul.mubr.msk.bf16.vlgmr.msra.gmra.mxu0 %vm8818_vm4, %v15721_v59  ;;  %12775 = vmatmul.mubr.msk.bf16.vlgmr.msra.gmra.mxu1 %vm8818_vm4, %v15722_v42  ;;  %v15811_v59 = vld [vmem:[%s20487_s13 + $0x148] ss:$16 sps:$4 sm:$0xff]   ;;  %v15798_v42 = vld [vmem:[%s20487_s13 + $0x124] ss:$16 sps:$4 sm:$0xff]  }
 0xa82   : > { %9307 = vmatprep.mubr.bf16.mxu0 %v20765_v6  ;;  %9729 = vmatpush1.bf16.msra.mxu1 %v15724_v47  ;;  %v15816_v47 = vld [vmem:[%s20487_s13 + $0x12c] ss:$16 sps:$4 sm:$0xff]  }
 0xa83   : > { %9730 = vmatprep.subr.bf16.mxu1 %v15729_v43  ;;  %v15796_v43 = vld [vmem:[%s20487_s13 + $0x120] ss:$16 sps:$4 sm:$0xff]  }
 0xa86   : > { %9731 = vmatpush1.bf16.msra.mxu1 %v15727_v46  ;;  %v15814_v46 = vld [vmem:[%s20487_s13 + $0x128] ss:$16 sps:$4 sm:$0xff]  }
 0xa87   : > { %9732 = vmatprep.subr.bf16.mxu1 %v15732_v44  ;;  %v15804_v44 = vld [vmem:[%s20487_s13 + $0x104] ss:$16 sps:$4 sm:$0xff]  }
 0xa8a   : > { %9733 = vmatpush1.bf16.msra.mxu1 %v15730_v38  ;;  %v15819_v38 = vld [vmem:[%s20487_s13 + $0x10c] ss:$16 sps:$4 sm:$0xff]  }
 0xa8b   : > { %9734 = vmatprep.subr.bf16.mxu1 %v15735_v12  ;;  %v15802_v12 = vld [vmem:[%s20487_s13 + $0x100] ss:$16 sps:$4 sm:$0xff]  }
 0xa8e   : > { %9735 = vmatpush1.bf16.msra.mxu1 %v15733_v33  ;;  %v15817_v33 = vld [vmem:[%s20487_s13 + $0x108] ss:$16 sps:$4 sm:$0xff]  }
 0xa8f   : > { %9736 = vmatprep.subr.bf16.mxu1 %v15738_v7 }
 0xa92   : > { %9737 = vmatpush1.bf16.msra.mxu1 %v15736_v40 }
 0xa93   : > { %9738 = vmatprep.subr.bf16.mxu1 %v15744_v45 }
 0xa94   : > { %v8781_v34 = vpop.f32.mrf.mxu0 }
 0xa96   : > { %v8783_v2 = vpop.f32.mrf.mxu0  ;;  %9739 = vmatpush1.bf16.msra.mxu1 %v15742_v50 }
 0xa97   : > { %9740 = vmatprep.subr.bf16.mxu1 %v15750_v36 }
 0xa98   : > { %v8785_v30 = vpop.f32.mrf.mxu0 }
 0xa99   : > { %v8806_v31 = vpack.c.bf16 %v8785_v30, %v8781_v34 }
 0xa9a   : > { %v8787_v20 = vpop.f32.mrf.mxu0  ;;  %9741 = vmatpush1.bf16.msra.mxu1 %v15748_v53 }
 0xa9b   : > { %v8807_v23 = vpack.c.bf16 %v8787_v20, %v8783_v2  ;;  %9742 = vmatprep.subr.bf16.mxu1 %v15756_v13 }
 0xa9d   : > { %9289 = vmatprep.subr.bf16.mxu0 %v8807_v23 }
 0xa9e   : > { %9290 = vmatpush1.bf16.msra.mxu0 %v8806_v31  ;;  %9743 = vmatpush1.bf16.msra.mxu1 %v15754_v4 }
 0xa9f   : > { %9771 = vmatprep.subr.bf16.mxu0 %v15741_v17  ;;  %9744 = vmatprep.subr.bf16.mxu1 %v15762_v62 }
 0xaa1   : > { %12779 = vmatmul.mubr.msk.bf16.vlgmr.msra.gmra.mxu0 %vm8818_vm4, %v15723_v58 }
 0xaa2   : > { %9772 = vmatpush1.bf16.msra.mxu0 %v15739_v26  ;;  %9745 = vmatpush2.bf16.msra.mxu1 %v15760_v15 }
 0xaa3   : > { %9773 = vmatprep.subr.bf16.mxu0 %v15747_v9  ;;  %9746 = vmatprep.subr.bf16.mxu1 %v15768_v29 }
 0xaa6   : > { %9774 = vmatpush1.bf16.msra.mxu0 %v15745_v1  ;;  %9747 = vmatpush2.bf16.msra.mxu1 %v15766_v24 }
 0xaa7   : > { %9775 = vmatprep.subr.bf16.mxu0 %v15753_v39  ;;  %9748 = vmatprep.subr.bf16.mxu1 %v15774_v22 }
 0xaaa   : > { %9776 = vmatpush1.bf16.msra.mxu0 %v15751_v35  ;;  %9749 = vmatpush2.bf16.msra.mxu1 %v15772_v0 }
 0xaab   : > { %9777 = vmatprep.subr.bf16.mxu0 %v15759_v32  ;;  %9750 = vmatprep.subr.bf16.mxu1 %v15780_v16 }
 0xaae   : > { %9778 = vmatpush1.bf16.msra.mxu0 %v15757_v61  ;;  %9751 = vmatpush2.bf16.msra.mxu1 %v15778_v48 }
 0xaaf   : > { %9779 = vmatprep.subr.bf16.mxu0 %v15765_v27  ;;  %9752 = vmatprep.subr.bf16.mxu1 %v15786_v52 }
 0xab2   : > { %9780 = vmatpush1.bf16.msra.mxu0 %v15763_v57  ;;  %9753 = vmatpush2.bf16.msra.mxu1 %v15784_v60 }
 0xab3   : > { %9781 = vmatprep.subr.bf16.mxu0 %v15771_v21  ;;  %9754 = vmatprep.subr.bf16.mxu1 %v15792_v14 }
 0xab6   : > { %9782 = vmatpush1.bf16.msra.mxu0 %v15769_v41  ;;  %9755 = vmatpush2.bf16.msra.mxu1 %v15790_v8 }
 0xab7   : > { %9783 = vmatprep.subr.bf16.mxu0 %v15777_v3  ;;  %9756 = vmatprep.subr.bf16.mxu1 %v15798_v42 }
 0xaba   : > { %9784 = vmatpush1.bf16.msra.mxu0 %v15775_v51  ;;  %9757 = vmatpush2.bf16.msra.mxu1 %v15796_v43 }
 0xabb   : > { %9785 = vmatprep.subr.bf16.mxu0 %v15783_v54  ;;  %9758 = vmatprep.subr.bf16.mxu1 %v15804_v44 }
 0xabe   : > { %9786 = vmatpush1.bf16.msra.mxu0 %v15781_v19  ;;  %9759 = vmatpush2.bf16.msra.mxu1 %v15802_v12  ;;  %v9322_v12 = vld [vmem:[%s20486_s12] sm:$0x3] }
 0xabf   : > { %9787 = vmatprep.subr.bf16.mxu0 %v15789_v63 }
 0xac2   : > { %9788 = vmatpush2.bf16.msra.mxu0 %v15787_v10 }
 0xac3   : > { %9789 = vmatprep.subr.bf16.mxu0 %v15795_v5  ;;  %v9324_v5 = vlaneseq }
 0xac6   : > { %9790 = vmatpush2.bf16.msra.mxu0 %v15793_v25 }
 0xac7   : > { %9791 = vmatprep.subr.bf16.mxu0 %v15801_v18 }
 0xaca   : > { %9792 = vmatpush2.bf16.msra.mxu0 %v15799_v49 }
 0xacb   : > { %9793 = vmatprep.subr.bf16.mxu0 %v15807_v37 }
 0xace   : > { %9794 = vmatpush2.bf16.msra.mxu0 %v15805_v11 }
 0xacf   : > { %9795 = vmatprep.subr.bf16.mxu0 %v15810_v55  ;;  %v9325_v55 = vshrl.u32 %v9324_v5, 7  ;;  %v15830_v5 = vld [vmem:[%s20480_s6 + $0x60] sm:$0xff]  }
 0xad2   : > { %9796 = vmatpush2.bf16.msra.mxu0 %v15808_v28 }
 0xad3   : > { %9797 = vmatprep.subr.bf16.mxu0 %v15813_v56 }
 0xad6   : > { %9798 = vmatpush2.bf16.msra.mxu0 %v15811_v59 }
 0xad7   : > { %9799 = vmatprep.subr.bf16.mxu0 %v15816_v47  ;;  %v9330_v47 = vsub.s32 1, %v9325_v55 }
 0xada   : > { %9800 = vmatpush2.bf16.msra.mxu0 %v15814_v46  ;;  %v9326_v46 = vsub.s32 0, %v9325_v55  ;;  %v15835_v55 = vld [vmem:[%s20480_s6 + $0x78] sm:$0xff]  }
 0xadb   : > { %9801 = vmatprep.subr.bf16.mxu0 %v15819_v38 }
 0xade   : > { %9802 = vmatpush2.bf16.msra.mxu0 %v15817_v33 }
 0xae1   : > { %v8856_v7 = vpop.f32.mrf.mxu1 }
 0xae3   : > { %v8858_v40 = vpop.f32.mrf.mxu1 }
 0xae5   : > { %v8860_v45 = vpop.f32.mrf.mxu1 }
 0xae7   : > { %v8862_v50 = vpop.f32.mrf.mxu1 }
 0xae9   : > { %v8907_v36 = vpop.f32.mrf.mxu1 }
 0xaea   : > { %v8908_v15 = vadd.f32 %v8907_v36, %v8856_v7  ;;  %v9331_v36 = vrot.slane %v9322_v12, %v9330_v47  ;;  %v15839_v47 = vld [vmem:[%s20489_s15 + $0xf0] ss:$20 sps:$4 sm:$0xff]  }
 0xaeb   : > { %v8909_v34 = vpop.f32.mrf.mxu1 }
 0xaec   : > { %v8910_v62 = vadd.f32 %v8909_v34, %v8858_v40 }
 0xaed   : > { %v8911_v2 = vpop.f32.mrf.mxu1 }
 0xaee   : > { %v8912_v24 = vadd.f32 %v8911_v2, %v8860_v45  ;;  %v9327_v2 = vrot.slane %v9322_v12, %v9326_v46  ;;  %v15844_v46 = vld [vmem:[%s20489_s15 + $0xcc] ss:$20 sps:$4 sm:$0xff]   ;;  %v15866_v12 = vld [vmem:[%s20489_s15 + $0xd0] ss:$20 sps:$4 sm:$0xff]  }
 0xaef   : > { %v8913_v53 = vpop.f32.mrf.mxu1 }
 0xaf0   : > { %v8914_v32 = vadd.f32 %v8913_v53, %v8862_v50 }
 0xb01   : > { %v8961_v13 = vpop.f32.mrf.mxu1 }
 0xb02   : > { %v8970_v29 = vadd.f32 %v8961_v13, %v8908_v15 }
 0xb03   : > { %v8963_v30 = vpop.f32.mrf.mxu1 }
 0xb04   : > { %v8971_v61 = vadd.f32 %v8963_v30, %v8910_v62 }
 0xb05   : > { %v8965_v20 = vpop.f32.mrf.mxu1 }
 0xb06   : > { %v8972_v21 = vadd.f32 %v8965_v20, %v8912_v24  ;;  %v15820_v24 = vld [vmem:[%s20480_s6 + $0x20] sm:$0xff]  }
 0xb07   : > { %v8967_v4 = vpop.f32.mrf.mxu1 }
 0xb08   : > { %v8973_v22 = vadd.f32 %v8967_v4, %v8914_v32 }
 0xb09   : > { %v9019_v23 = vpop.f32.mrf.mxu1 }
 0xb0a   : > { %v9028_v41 = vadd.f32 %v9019_v23, %v8970_v29 }
 0xb0b   : > { %v9021_v17 = vpop.f32.mrf.mxu1 }
 0xb0c   : > { %v9029_v51 = vadd.f32 %v9021_v17, %v8971_v61 }
 0xb0d   : > { %v9023_v31 = vpop.f32.mrf.mxu1 }
 0xb0e   : > { %v9030_v48 = vadd.f32 %v9023_v31, %v8972_v21 }
 0xb0f   : > { %v9025_v26 = vpop.f32.mrf.mxu1 }
 0xb10   : > { %v9031_v10 = vadd.f32 %v9025_v26, %v8973_v22 }
 0xb21   : > { %v9077_v58 = vpop.f32.mrf.mxu0  ;;  %v9135_v1 = vpop.f32.mrf.mxu1 }
 0xb22   : > { %v9086_v16 = vadd.f32 %v9077_v58, %v9028_v41 }
 0xb23   : > { %v9079_v9 = vpop.f32.mrf.mxu0  ;;  %v9137_v35 = vpop.f32.mrf.mxu1 }
 0xb24   : > { %v9087_v63 = vadd.f32 %v9079_v9, %v9029_v51  ;;  %v9144_v18 = vadd.f32 %v9135_v1, %v9086_v16  ;;  %v15826_v16 = vld [vmem:[%s20480_s6 + $0x10] sm:$0xff]  }
 0xb25   : > { %v9081_v39 = vpop.f32.mrf.mxu0  ;;  %v9139_v57 = vpop.f32.mrf.mxu1 }
 0xb26   : > { %v9088_v25 = vadd.f32 %v9081_v39, %v9030_v48  ;;  %v9145_v52 = vadd.f32 %v9137_v35, %v9087_v63  ;;  %v15822_v35 = vld [vmem:[%s20480_s6] sm:$0xff]   ;;  %v15824_v63 = vld [vmem:[%s20480_s6 + $0x30] sm:$0xff]  }
 0xb27   : > { %v9083_v27 = vpop.f32.mrf.mxu0  ;;  %v9141_v3 = vpop.f32.mrf.mxu1 }
 0xb28   : > { %v9089_v11 = vadd.f32 %v9083_v27, %v9031_v10  ;;  %v9146_v60 = vadd.f32 %v9139_v57, %v9088_v25  ;;  %v15827_v10 = vld [vmem:[%s20480_s6 + $0x18] sm:$0xff]  }
 0xb29   : > { %v15825_v25 = vld [vmem:[%s20480_s6 + $0x38] sm:$0xff]  }
 0xb2a   : > { %v9147_v59 = vadd.f32 %v9141_v3, %v9089_v11  ;;  %v15823_v3 = vld [vmem:[%s20480_s6 + $0x8] sm:$0xff]  }
 0xb2b   : > { %v15829_v11 = vld [vmem:[%s20480_s6 + $0x48] sm:$0xff]  }
 0xb41   : > { %v9193_v0 = vpop.f32.mrf.mxu0  ;;  %v9251_v54 = vpop.f32.mrf.mxu1 }
 0xb42   : > { %v9202_v14 = vadd.f32 %v9193_v0, %v9144_v18  ;;  %v15828_v18 = vld [vmem:[%s20480_s6 + $0x40] sm:$0xff]  }
 0xb43   : > { %v9195_v19 = vpop.f32.mrf.mxu0  ;;  %v9253_v37 = vpop.f32.mrf.mxu1 }
 0xb44   : > { %v9203_v28 = vadd.f32 %v9195_v19, %v9145_v52  ;;  %v9260_v33 = vadd.f32 %v9251_v54, %v9202_v14  ;;  %v15821_v19 = vld [vmem:[%s20480_s6 + $0x28] sm:$0xff]   ;;  %v15832_v52 = vld [vmem:[%s20480_s6 + $0x50] sm:$0xff]   ;;  %v15856_v14 = vld [vmem:[%s20489_s15 + $0x124] ss:$20 sps:$4 sm:$0xff]  }
 0xb45   : > { %v9197_v49 = vpop.f32.mrf.mxu0  ;;  %v9255_v8 = vpop.f32.mrf.mxu1 }
 0xb46   : > { %v9204_v42 = vadd.f32 %v9197_v49, %v9146_v60  ;;  %v9261_v38 = vadd.f32 %v9253_v37, %v9203_v28  ;;  %v15831_v49 = vld [vmem:[%s20480_s6 + $0x68] sm:$0xff]   ;;  %v15834_v37 = vld [vmem:[%s20480_s6 + $0x70] sm:$0xff]   ;;  %v15833_v60 = vld [vmem:[%s20480_s6 + $0x58] sm:$0xff]  }
 0xb47   : > { %v9199_v56 = vpop.f32.mrf.mxu0  ;;  %v9257_v40 = vpop.f32.mrf.mxu1  ;;  %v15838_v28 = vld [vmem:[%s20489_s15 + $0x11c] ss:$20 sps:$4 sm:$0xff]  }
 0xb48   : > { %v9205_v44 = vadd.f32 %v9199_v56, %v9147_v59  ;;  %v9262_v45 = vadd.f32 %v9255_v8, %v9204_v42  ;;  %v15836_v56 = vld [vmem:[%s20489_s15 + $0x118] ss:$20 sps:$4 sm:$0xff]   ;;  %v15854_v8 = vld [vmem:[%s20489_s15 + $0x120] ss:$20 sps:$4 sm:$0xff]   ;;  %v15862_v42 = vld [vmem:[%s20489_s15 + $0xfc] ss:$20 sps:$4 sm:$0xff]  }
 0xb49   : > { %v15841_v59 = vld [vmem:[%s20489_s15 + $0xf4] ss:$20 sps:$4 sm:$0xff]  }
 0xb4a   : > { %v9263_v13 = vadd.f32 %v9257_v40, %v9205_v44  ;;  %v15868_v44 = vld [vmem:[%s20489_s15 + $0xd4] ss:$20 sps:$4 sm:$0xff]  }
 0xb4b   : > { %v15845_v40 = vld [vmem:[%s20489_s15 + $0xa0] ss:$20 sps:$4 sm:$0xff]  }
 0xb61   : > { %v9309_v43 = vpop.f32.mrf.mxu0 }
 0xb62   : > { %v9318_v34 = vadd.f32 %v9309_v43, %v9260_v33  ;;  %v15860_v43 = vld [vmem:[%s20489_s15 + $0xf8] ss:$20 sps:$4 sm:$0xff]  }
 0xb63   : > { %v9311_v7 = vpop.f32.mrf.mxu0  ;;  %v15847_v33 = vld [vmem:[%s20489_s15 + $0xa4] ss:$20 sps:$4 sm:$0xff]  }
 0xb64   : > { %v9319_v50 = vadd.f32 %v9311_v7, %v9261_v38  ;;  %v9334_v31 = vadd.f32 %v9327_v2, %v9318_v34  ;;  %v15842_v38 = vld [vmem:[%s20489_s15 + $0xc8] ss:$20 sps:$4 sm:$0xff]   ;;  %v15871_v7 = vld [vmem:[%s20489_s15 + $0xac] ss:$20 sps:$4 sm:$0xff]   ;;  %v15874_v34 = vld [vmem:[%s20489_s15 + $0x84] ss:$20 sps:$4 sm:$0xff]  }
 0xb65   : > { %v9313_v53 = vpop.f32.mrf.mxu0 }
 0xb66   : > { %v9320_v30 = vadd.f32 %v9313_v53, %v9262_v45  ;;  %v9335_v4 = vadd.f32 %v9331_v36, %v9319_v50  ;;  %v9338_v15 = vmax.f32 %v9334_v31, 0.0  ;;  %v15869_v45 = vld [vmem:[%s20489_s15 + $0xa8] ss:$20 sps:$4 sm:$0xff]   ;;  %v15878_v31 = vld [vmem:[%s20489_s15 + $0x30] ss:$20 sps:$4 sm:$0xff]  }
 0xb67   : > { %v9315_v20 = vpop.f32.mrf.mxu0  ;;  %v15850_v50 = vld [vmem:[%s20489_s15 + $0x7c] ss:$20 sps:$4 sm:$0xff]   ;;  %v15853_v53 = vld [vmem:[%s20489_s15 + $0x54] ss:$20 sps:$4 sm:$0xff]  }
 0xb68   : > { %v9336_v23 = vadd.f32 %v9327_v2, %v9320_v30  ;;  %v9321_v17 = vadd.f32 %v9315_v20, %v9263_v13  ;;  %v9339_v9 = vmax.f32 %v9335_v4, 0.0  ;;  %v15872_v2 = vld [vmem:[%s20489_s15 + $0x80] ss:$20 sps:$4 sm:$0xff]   ;;  %v15851_v13 = vld [vmem:[%s20489_s15 + $0x50] ss:$20 sps:$4 sm:$0xff]  }
 0xb69   : > { %v15877_v30 = vld [vmem:[%s20489_s15 + $0x5c] ss:$20 sps:$4 sm:$0xff]   ;;  %v15875_v20 = vld [vmem:[%s20489_s15 + $0x58] ss:$20 sps:$4 sm:$0xff]  }
 0xb6a   : > { %v9337_v58 = vadd.f32 %v9331_v36, %v9321_v17  ;;  %v9340_v26 = vmax.f32 %v9336_v23, 0.0  ;;  %v15848_v36 = vld [vmem:[%s20489_s15 + $0x78] ss:$20 sps:$4 sm:$0xff]   ;;  %v15857_v23 = vld [vmem:[%s20489_s15 + $0x28] ss:$20 sps:$4 sm:$0xff]  }
 0xb6b   : > { %v15859_v4 = vld [vmem:[%s20489_s15 + $0x2c] ss:$20 sps:$4 sm:$0xff]   ;;  %v15880_v17 = vld [vmem:[%s20489_s15 + $0x34] ss:$20 sps:$4 sm:$0xff]  }
 0xb6c   : > { %v9341_v1 = vmax.f32 %v9337_v58, 0.0  ;;  %v9342_v39 = vpack.c.bf16 %v9340_v26, %v9338_v15  ;;  %v15865_v58 = vld [vmem:[%s20489_s15 + $0x4] ss:$20 sps:$4 sm:$0xff]   ;;  %v15863_v26 = vld [vmem:[%s20489_s15] ss:$20 sps:$4 sm:$0xff]  }
 0xb6d   : > { %v15884_v15 = vld [vmem:[%s20489_s15 + $0x128] ss:$20 sps:$4 sm:$0xff]  }
 0xb6e   : > { %v9343_v62 = vpack.c.bf16 %v9341_v1, %v9339_v9  ;;  %v15883_v9 = vld [vmem:[%s20489_s15 + $0xc] ss:$20 sps:$4 sm:$0xff]   ;;  %v15881_v1 = vld [vmem:[%s20489_s15 + $0x8] ss:$20 sps:$4 sm:$0xff]  }
 0xb70   : > { %9760 = vmatprep.mubr.bf16.mxu1 %v9343_v62  ;;  %9803 = vmatprep.mubr.bf16.mxu0 %v9343_v62 }
 0xb71   : > { %9761 = vmatmul.mubr.bf16.vlgmr.msra.gmra.mxu1 %v9342_v39  ;;  %9804 = vmatmul.mubr.bf16.vlgmr.msra.gmra.mxu0 %v9342_v39 }
 0xb72   : > { %14681 = vmatprep.mubr.msk.bf16.mxu0 %vm8818_vm4, %v15822_v35  ;;  %14671 = vmatprep.mubr.msk.bf16.mxu1 %vm8818_vm4, %v15820_v24 }
 0xc31   : > { %v9762_v29 = vpop.f32.mrf.mxu1  ;;  %v9805_v32 = vpop.f32.mrf.mxu0 }
 0xc33   : > { %v9764_v61 = vpop.f32.mrf.mxu1  ;;  %v9807_v27 = vpop.f32.mrf.mxu0 }
 0xc35   : > { %v9766_v57 = vpop.f32.mrf.mxu1  ;;  %v9809_v21 = vpop.f32.mrf.mxu0 }
 0xc36   : > { %v9814_v41 = vpack.c.bf16 %v9766_v57, %v9762_v29  ;;  %v9816_v54 = vpack.c.bf16 %v9809_v21, %v9805_v32 }
 0xc37   : > { %v9768_v0 = vpop.f32.mrf.mxu1  ;;  %v9811_v22 = vpop.f32.mrf.mxu0 }
 0xc38   : > { %v9815_v51 = vpack.c.bf16 %v9768_v0, %v9764_v61  ;;  %14679 = vmatprep.subr.bf16.mxu0 %v9814_v41  ;;  %v9817_v48 = vpack.c.bf16 %v9811_v22, %v9807_v27 }
 0xc39   : > { %14680 = vmatpush3.bf16.msra.mxu0 %v9814_v41 }
 0xc3a   : > { %14669 = vmatprep.subr.bf16.mxu1 %v9815_v51  ;;  %14699 = vmatprep.subr.bf16.mxu0 %v9817_v48 }
 0xc3b   : > { %14670 = vmatpush3.bf16.msra.mxu1 %v9815_v51 }
 0xc3c   : > { %14682 = vmatmul.mubr.msk.bf16.vlgmr.msra.gmra.mxu0 %vm8818_vm4, %v15823_v3  ;;  %14689 = vmatprep.subr.bf16.mxu1 %v9816_v54 }
 0xc3d   : > { %14685 = vmatprep.mubr.msk.bf16.mxu0 %vm8818_vm4, %v15826_v16  ;;  %14700 = vmatpush3.bf16.msra.mxu0 %v9817_v48 }
 0xc3e   : > { %14672 = vmatmul.mubr.msk.bf16.vlgmr.msra.gmra.mxu1 %vm8818_vm4, %v15821_v19  ;;  %10613 = vmatprep.subr.bf16.mxu0 %v15856_v14 }
 0xc3f   : > { %14675 = vmatprep.mubr.msk.bf16.mxu1 %vm8818_vm4, %v15824_v63  ;;  %14690 = vmatpush3.bf16.msra.mxu1 %v9816_v54 }
 0xc40   : > { %10540 = vmatprep.subr.bf16.mxu1 %v15838_v28 }
 0xc44   : > { %14686 = vmatmul.mubr.msk.bf16.gmra.mxu0 %vm8818_vm4, %v15827_v10 }
 0xc45   : > { %14701 = vmatprep.mubr.msk.bf16.mxu0 %vm8818_vm4, %v15830_v5 }
 0xc46   : > { %14676 = vmatmul.mubr.msk.bf16.gmra.mxu1 %vm8818_vm4, %v15825_v25 }
 0xc47   : > { %14691 = vmatprep.mubr.msk.bf16.mxu1 %vm8818_vm4, %v15828_v18 }
 0xc4c   : > { %14702 = vmatmul.mubr.msk.bf16.vlgmr.msra.gmra.mxu0 %vm8818_vm4, %v15831_v49 }
 0xc4d   : > { %14705 = vmatprep.mubr.msk.bf16.mxu0 %vm8818_vm4, %v15834_v37  ;;  %10614 = vmatpush1.bf16.msra.mxu0 %v15854_v8  ;;  %v12900_v8 = vld [vmem:[%s20488_s14] ss:$0 sm:$0xff] }
 0xc4e   : > { %14692 = vmatmul.mubr.msk.bf16.vlgmr.msra.gmra.mxu1 %vm8818_vm4, %v15829_v11  ;;  %10615 = vmatprep.subr.bf16.mxu0 %v15862_v42 }
 0xc4f   : > { %14695 = vmatprep.mubr.msk.bf16.mxu1 %vm8818_vm4, %v15832_v52  ;;  %10541 = vmatpush1.bf16.msra.mxu1 %v15836_v56 }
 0xc50   : > { %10542 = vmatprep.subr.bf16.mxu1 %v15841_v59 }
 0xc51   : > { %10616 = vmatpush1.bf16.msra.mxu0 %v15860_v43 }
 0xc52   : > { %10617 = vmatprep.subr.bf16.mxu0 %v15868_v44 }
 0xc53   : > { %10543 = vmatpush1.bf16.msra.mxu1 %v15839_v47 }
 0xc54   : > { %14706 = vmatmul.mubr.msk.bf16.gmra.mxu0 %vm8818_vm4, %v15835_v55  ;;  %10544 = vmatprep.subr.bf16.mxu1 %v15844_v46 }
 0xc55   : > { %10645 = vmatprep.mubr.bf16.mxu0 %v20765_v6  ;;  %10618 = vmatpush1.bf16.msra.mxu0 %v15866_v12 }
 0xc56   : > { %14696 = vmatmul.mubr.msk.bf16.gmra.mxu1 %vm8818_vm4, %v15833_v60  ;;  %10619 = vmatprep.subr.bf16.mxu0 %v15871_v7 }
 0xc57   : > { %10572 = vmatprep.mubr.bf16.mxu1 %v20765_v6  ;;  %10545 = vmatpush1.bf16.msra.mxu1 %v15842_v38 }
 0xc58   : > { %10546 = vmatprep.subr.bf16.mxu1 %v15847_v33 }
 0xc59   : > { %10620 = vmatpush1.bf16.msra.mxu0 %v15869_v45 }
 0xc5a   : > { %10621 = vmatprep.subr.bf16.mxu0 %v15874_v34 }
 0xc5b   : > { %10547 = vmatpush1.bf16.msra.mxu1 %v15845_v40 }
 0xc5c   : > { %10548 = vmatprep.subr.bf16.mxu1 %v15850_v50 }
 0xc5d   : > { %10622 = vmatpush1.bf16.msra.mxu0 %v15872_v2 }
 0xc5e   : > { %10623 = vmatprep.subr.bf16.mxu0 %v15877_v30 }
 0xc5f   : > { %10549 = vmatpush1.bf16.msra.mxu1 %v15848_v36 }
 0xc60   : > { %10550 = vmatprep.subr.bf16.mxu1 %v15853_v53 }
 0xc61   : > { %10624 = vmatpush1.bf16.msra.mxu0 %v15875_v20  ;;  %v15885_v20 = vld [vmem:[%s20489_s15 + $0x100] ss:$20 sps:$4 sm:$0xff]  }
 0xc62   : > { %10625 = vmatprep.subr.bf16.mxu0 %v15880_v17 }
 0xc63   : > { %10551 = vmatpush1.bf16.msra.mxu1 %v15851_v13 }
 0xc64   : > { %10552 = vmatprep.subr.bf16.mxu1 %v15859_v4 }
 0xc65   : > { %10626 = vmatpush1.bf16.msra.mxu0 %v15878_v31 }
 0xc66   : > { %10627 = vmatprep.subr.bf16.mxu0 %v15883_v9 }
 0xc67   : > { %10553 = vmatpush1.bf16.msra.mxu1 %v15857_v23 }
 0xc68   : > { %10554 = vmatprep.subr.bf16.mxu1 %v15865_v58 }
 0xc69   : > { %10628 = vmatpush1.bf16.msra.mxu0 %v15881_v1 }
 0xc6b   : > { %10555 = vmatpush1.bf16.msra.mxu1 %v15863_v26  ;;  %v15886_v26 = vld [vmem:[%s20489_s15 + $0xd8] ss:$20 sps:$4 sm:$0xff]  }
 0xc6c   : > { %14709 = vmatprep.subr.bf16.mxu1 %v15884_v15 }
 0xcfc   : > { %v14683_v62 = vpop.f32.mrf.mxu0 }
 0xcfe   : > { %v14673_v39 = vpop.f32.mrf.mxu1  ;;  %v9998_v35 = vpop.f32.mrf.mxu0 }
 0xcff   : > { %v10007_v28 = vadd.f32 %v14683_v62, %v14673_v39 }
 0xd00   : > { %v9901_v24 = vpop.f32.mrf.mxu1  ;;  %v14684_v29 = vpop.f32.mrf.mxu0 }
 0xd01   : > { %v9999_v63 = vadd.f32 %v9998_v35, %v9901_v24 }
 0xd02   : > { %v14674_v32 = vpop.f32.mrf.mxu1  ;;  %v10001_v61 = vpop.f32.mrf.mxu0 }
 0xd03   : > { %v10010_v37 = vadd.f32 %v14684_v29, %v14674_v32 }
 0xd04   : > { %v9904_v27 = vpop.f32.mrf.mxu1  ;;  %v14687_v57 = vpop.f32.mrf.mxu0 }
 0xd05   : > { %v10002_v11 = vadd.f32 %v10001_v61, %v9904_v27 }
 0xd06   : > { %v14677_v21 = vpop.f32.mrf.mxu1  ;;  %v10014_v41 = vpop.f32.mrf.mxu0 }
 0xd07   : > { %v10023_v39 = vadd.f32 %v14687_v57, %v14677_v21  ;;  %v15888_v57 = vld [vmem:[%s20489_s15 + $0x88] ss:$20 sps:$4 sm:$0xff]  }
 0xd08   : > { %v9917_v0 = vpop.f32.mrf.mxu1  ;;  %v14688_v22 = vpop.f32.mrf.mxu0 }
 0xd09   : > { %v10015_v2 = vadd.f32 %v10014_v41, %v9917_v0 }
 0xd0a   : > { %v14678_v51 = vpop.f32.mrf.mxu1  ;;  %v10017_v3 = vpop.f32.mrf.mxu0 }
 0xd0b   : > { %v10026_v9 = vadd.f32 %v14688_v22, %v14678_v51 }
 0xd0c   : > { %v9920_v48 = vpop.f32.mrf.mxu1  ;;  %v14703_v16 = vpop.f32.mrf.mxu0 }
 0xd0d   : > { %v10018_v40 = vadd.f32 %v10017_v3, %v9920_v48  ;;  %v15889_v3 = vld [vmem:[%s20489_s15 + $0x60] ss:$20 sps:$4 sm:$0xff]  }
 0xd0e   : > { %v14693_v19 = vpop.f32.mrf.mxu1  ;;  %v10218_v54 = vpop.f32.mrf.mxu0 }
 0xd0f   : > { %v10137_v47 = vadd.f32 %v14693_v19, %v10007_v28  ;;  %v15890_v19 = vld [vmem:[%s20489_s15 + $0x38] ss:$20 sps:$4 sm:$0xff]  }
 0xd10   : > { %v10104_v10 = vpop.f32.mrf.mxu1  ;;  %v14704_v5 = vpop.f32.mrf.mxu0 }
 0xd11   : > { %v10135_v25 = vadd.f32 %v10104_v10, %v9999_v63  ;;  %v10251_v45 = vadd.f32 %v14703_v16, %v10137_v47  ;;  %v15891_v10 = vld [vmem:[%s20489_s15 + $0x10] ss:$20 sps:$4 sm:$0xff]  }
 0xd12   : > { %v14694_v18 = vpop.f32.mrf.mxu1  ;;  %v10221_v49 = vpop.f32.mrf.mxu0 }
 0xd13   : > { %v10249_v52 = vadd.f32 %v10218_v54, %v10135_v25  ;;  %v10138_v14 = vadd.f32 %v14694_v18, %v10010_v37  ;;  %v10266_v23 = vadd.f32 %v12900_v8, %v10251_v45 }
 0xd14   : > { %v10107_v55 = vpop.f32.mrf.mxu1  ;;  %v14707_v60 = vpop.f32.mrf.mxu0 }
 0xd15   : > { %v10136_v56 = vadd.f32 %v10107_v55, %v10002_v11  ;;  %v10264_v43 = vadd.f32 %v12900_v8, %v10249_v52  ;;  %v10252_v38 = vadd.f32 %v14704_v5, %v10138_v14  ;;  %v10274_v1 = vmax.f32 %v10266_v23, 0.0  ;;  %v15904_v5 = vld [vmem:[%s20757_s29] sm:$0xff]  }
 0xd16   : > { %v14697_v59 = vpop.f32.mrf.mxu1  ;;  %v10234_v42 = vpop.f32.mrf.mxu0 }
 0xd17   : > { %v10250_v46 = vadd.f32 %v10221_v49, %v10136_v56  ;;  %v10272_v50 = vmax.f32 %v10264_v43, 0.0  ;;  %v10267_v53 = vadd.f32 %v12900_v8, %v10252_v38  ;;  %v10141_v32 = vadd.f32 %v14697_v59, %v10023_v39 }
 0xd18   : > { %v10120_v44 = vpop.f32.mrf.mxu1  ;;  %v14708_v7 = vpop.f32.mrf.mxu0 }
 0xd19   : > { %v10265_v12 = vadd.f32 %v12900_v8, %v10250_v46  ;;  %v10139_v17 = vadd.f32 %v10120_v44, %v10015_v2  ;;  %v10275_v31 = vmax.f32 %v10267_v53, 0.0  ;;  %v10255_v21 = vadd.f32 %v14707_v60, %v10141_v32  ;;  %v15906_v32 = vld [vmem:[%s20757_s29 + $0x10] sm:$0xff]  }
 0xd1a   : > { %v14698_v33 = vpop.f32.mrf.mxu1  ;;  %v10237_v4 = vpop.f32.mrf.mxu0 }
 0xd1b   : > { %v10273_v36 = vmax.f32 %v10265_v12, 0.0  ;;  %v10253_v62 = vadd.f32 %v10234_v42, %v10139_v17  ;;  %v10281_v35 = vpack.c.bf16 %v10275_v31, %v10274_v1  ;;  %v10142_v24 = vadd.f32 %v14698_v33, %v10026_v9 }
 0xd1c   : > { %v10123_v34 = vpop.f32.mrf.mxu1  ;;  %v10270_v48 = vadd.f32 %v12900_v8, %v10255_v21  ;;  %v15908_v21 = vld [vmem:[%s20757_s29 + $0x60] sm:$0xff]  }
 0xd1d   : > { %v10280_v13 = vpack.c.bf16 %v10273_v36, %v10272_v50  ;;  %v10140_v30 = vadd.f32 %v10123_v34, %v10018_v40  ;;  %v10268_v61 = vadd.f32 %v12900_v8, %v10253_v62  ;;  %v10256_v27 = vadd.f32 %v14708_v7, %v10142_v24  ;;  %v15905_v24 = vld [vmem:[%s20757_s29 + $0x8] sm:$0xff]  }
 0xd1e   : > { %v10278_v54 = vmax.f32 %v10270_v48, 0.0 }
 0xd1f   : > { %10573 = vmatmul.mubr.bf16.vlgmr.msra.gmra.mxu1 %v10280_v13  ;;  %10646 = vmatmul.mubr.bf16.vlgmr.msra.gmra.mxu0 %v10280_v13  ;;  %v10254_v58 = vadd.f32 %v10237_v4, %v10140_v30  ;;  %v10276_v0 = vmax.f32 %v10268_v61, 0.0  ;;  %v10271_v22 = vadd.f32 %v12900_v8, %v10256_v27 }
 0xd20   : > { %10582 = vmatprep.mubr.bf16.mxu1 %v20765_v6  ;;  %14710 = vmatpush3.bf16.msra.mxu1 %v15884_v15  ;;  %v15887_v15 = vld [vmem:[%s20489_s15 + $0xb0] ss:$20 sps:$4 sm:$0xff]  }
 0xd21   : > { %14711 = vmatprep.subr.bf16.mxu1 %v15885_v20  ;;  %10655 = vmatprep.mubr.bf16.mxu0 %v20765_v6  ;;  %v10269_v29 = vadd.f32 %v12900_v8, %v10254_v58  ;;  %v10279_v16 = vmax.f32 %v10271_v22, 0.0 }
 0xd23   : > { %v10277_v41 = vmax.f32 %v10269_v29, 0.0  ;;  %v10283_v63 = vpack.c.bf16 %v10279_v16, %v10278_v54  ;;  %v15909_v54 = vld [vmem:[%s20757_s29 + $0x28] sm:$0xff]  }
 0xd24   : > { %14712 = vmatpush3.bf16.msra.mxu1 %v15885_v20 }
 0xd25   : > { %14713 = vmatprep.subr.bf16.mxu1 %v15886_v26  ;;  %v10282_v51 = vpack.c.bf16 %v10277_v41, %v10276_v0  ;;  %v15907_v41 = vld [vmem:[%s20757_s29 + $0x18] sm:$0xff]  }
 0xd27   : > { %10583 = vmatmul.mubr.bf16.gmra.mxu1 %v10281_v35  ;;  %10656 = vmatmul.mubr.bf16.gmra.mxu0 %v10281_v35 }
 0xd28   : > { %10592 = vmatprep.mubr.bf16.mxu1 %v20765_v6  ;;  %14714 = vmatpush3.bf16.msra.mxu1 %v15886_v26 }
 0xd29   : > { %14715 = vmatprep.subr.bf16.mxu1 %v15887_v15  ;;  %10665 = vmatprep.mubr.bf16.mxu0 %v20765_v6 }
 0xd2c   : > { %14716 = vmatpush3.bf16.msra.mxu1 %v15887_v15 }
 0xd2d   : > { %14717 = vmatprep.subr.bf16.mxu1 %v15888_v57 }
 0xd2f   : > { %10593 = vmatmul.mubr.bf16.gmra.mxu1 %v10282_v51  ;;  %10666 = vmatmul.mubr.bf16.gmra.mxu0 %v10282_v51 }
 0xd30   : > { %10602 = vmatprep.mubr.bf16.mxu1 %v20765_v6  ;;  %14718 = vmatpush3.bf16.msra.mxu1 %v15888_v57 }
 0xd31   : > { %14719 = vmatprep.subr.bf16.mxu1 %v15889_v3  ;;  %10675 = vmatprep.mubr.bf16.mxu0 %v20765_v6  ;;  %v15903_v6 = vld [vmem:[%s20757_s29 + $0x20] sm:$0xff]  }
 0xd34   : > { %14720 = vmatpush3.bf16.msra.mxu1 %v15889_v3 }
 0xd35   : > { %14721 = vmatprep.subr.bf16.mxu1 %v15890_v19 }
 0xd37   : > { %10603 = vmatmul.mubr.bf16.gmra.mxu1 %v10283_v63  ;;  %10676 = vmatmul.mubr.bf16.gmra.mxu0 %v10283_v63 }
 0xd38   : > { %14722 = vmatpush3.bf16.msra.mxu1 %v15890_v19  ;;  %14725 = vmatprep.mubr.bf16.mxu1 %v10280_v13 }
 0xd39   : > { %14723 = vmatprep.subr.bf16.mxu1 %v15891_v10  ;;  %14741 = vmatprep.mubr.msk.bf16.mxu0 %vm5883_vm2, %v15903_v6 }
 0xd3c   : > { %14724 = vmatpush3.bf16.msra.mxu1 %v15891_v10  ;;  %v15910_v10 = vld [vmem:[%s20757_s29 + $0x30] sm:$0xff]  }
 0xd3f   : > { %14726 = vmatmul.mubr.bf16.vlgmr.msra.gmra.mxu1 %v10281_v35 }
 0xd40   : > { %14729 = vmatprep.mubr.bf16.mxu1 %v10282_v51 }
 0xd47   : > { %14730 = vmatmul.mubr.bf16.gmra.mxu1 %v10283_v63 }
 0xd48   : > { %14757 = vmatprep.mubr.msk.bf16.mxu1 %vm5883_vm2, %v15904_v5  ;;  %v15911_v5 = vld [vmem:[%s20757_s29 + $0x38] sm:$0xff]  }
 0xddf   : > { %v10574_v25 = vpop.f32.mrf.mxu1  ;;  %v10647_v18 = vpop.f32.mrf.mxu0 }
 0xde1   : > { %v10576_v49 = vpop.f32.mrf.mxu1  ;;  %v10649_v37 = vpop.f32.mrf.mxu0 }
 0xde3   : > { %v10578_v11 = vpop.f32.mrf.mxu1  ;;  %v10651_v52 = vpop.f32.mrf.mxu0 }
 0xde4   : > { %v10751_v50 = vpack.c.bf16 %v10578_v11, %v10574_v25  ;;  %v20220_v1 = vpack.c.bf16 %v10651_v52, %v10647_v18  ;;  %v15912_v25 = vld [vmem:[%s20757_s29 + $0x68] sm:$0xff]  }
 0xde5   : > { %v10580_v55 = vpop.f32.mrf.mxu1  ;;  %v10653_v60 = vpop.f32.mrf.mxu0  ;;  %v15915_v52 = vld [vmem:[%s20757_s29 + $0x48] sm:$0xff]  }
 0xde6   : > { %v20208_v20 = vpack.c.bf16 %v10580_v55, %v10576_v49  ;;  %v20238_v29 = vpack.c.bf16 %v10653_v60, %v10649_v37  ;;  %v15913_v49 = vld [vmem:[%s20757_s29 + $0x40] sm:$0xff]   ;;  %v15914_v37 = vld [vmem:[%s20757_s29 + $0x70] sm:$0xff]   ;;  %v15916_v55 = vld [vmem:[%s20757_s29 + $0x78] sm:$0xff]  }
 0xde7   : > { %v10584_v28 = vpop.f32.mrf.mxu1  ;;  %v10657_v14 = vpop.f32.mrf.mxu0 }
 0xde9   : > { %v10586_v56 = vpop.f32.mrf.mxu1  ;;  %v20199_v8 = vpop.f32.mrf.mxu0 }
 0xdeb   : > { %v10588_v59 = vpop.f32.mrf.mxu1  ;;  %v10661_v42 = vpop.f32.mrf.mxu0 }
 0xdec   : > { %v10756_v4 = vpack.c.bf16 %v10588_v59, %v10584_v28  ;;  %v20240_v15 = vpack.c.bf16 %v10661_v42, %v10657_v14  ;;  %v15917_v14 = vld [vmem:[%s20757_s29 + $0x50] sm:$0xff]   ;;  %v15919_v42 = vld [vmem:[%s20757_s29 + $0x58] sm:$0xff]  }
 0xded   : > { %v10590_v47 = vpop.f32.mrf.mxu1  ;;  %v10663_v43 = vpop.f32.mrf.mxu0 }
 0xdee   : > { %v20218_v9 = vpack.c.bf16 %v10590_v47, %v10586_v56  ;;  %v20259_v57 = vpack.c.bf16 %v10663_v43, %v20199_v8  ;;  %v15918_v56 = vld [vmem:[%s20757_s29 + $0xa0] sm:$0xff]   ;;  %v15920_v47 = vld [vmem:[%s20757_s29 + $0xa8] sm:$0xff]  }
 0xdef   : > { %v10594_v46 = vpop.f32.mrf.mxu1  ;;  %v10667_v38 = vpop.f32.mrf.mxu0 }
 0xdf1   : > { %v10596_v44 = vpop.f32.mrf.mxu1  ;;  %v10669_v40 = vpop.f32.mrf.mxu0 }
 0xdf3   : > { %v10598_v12 = vpop.f32.mrf.mxu1  ;;  %v10671_v34 = vpop.f32.mrf.mxu0 }
 0xdf4   : > { %v10761_v33 = vpack.c.bf16 %v10598_v12, %v10594_v46  ;;  %v20213_v58 = vpack.c.bf16 %v10671_v34, %v10667_v38  ;;  %v15922_v38 = vld [vmem:[%s20757_s29 + $0xb0] sm:$0xff]   ;;  %v15926_v34 = vld [vmem:[%s20757_s29 + $0xe0] sm:$0xff]  }
 0xdf5   : > { %v10600_v7 = vpop.f32.mrf.mxu1  ;;  %v10673_v30 = vpop.f32.mrf.mxu0 }
 0xdf6   : > { %10779 = vrot.lane.b32.xlu1 %v10761_v33, %s20767_s26  ;;  %v20203_v53 = vpack.c.bf16 %v10600_v7, %v10596_v44  ;;  %v20226_v39 = vpack.c.bf16 %v10673_v30, %v10669_v40  ;;  %v15921_v44 = vld [vmem:[%s20757_s29 + $0x80] sm:$0xff]   ;;  %v15923_v7 = vld [vmem:[%s20757_s29 + $0x88] sm:$0xff]   ;;  %v15924_v40 = vld [vmem:[%s20757_s29 + $0xb8] sm:$0xff]  }
 0xdf7   : > { %v10604_v45 = vpop.f32.mrf.mxu1  ;;  %v10677_v17 = vpop.f32.mrf.mxu0 }
 0xdf9   : > { %v10606_v36 = vpop.f32.mrf.mxu1  ;;  %v10679_v26 = vpop.f32.mrf.mxu0 }
 0xdfa   : > { %10775 = vrot.lane.b32.xlu1 %v10751_v50, %s20767_s26 }
 0xdfb   : > { %v10608_v2 = vpop.f32.mrf.mxu1  ;;  %v10681_v62 = vpop.f32.mrf.mxu0 }
 0xdfc   : > { %v10766_v13 = vpack.c.bf16 %v10608_v2, %v10604_v45  ;;  %v20228_v35 = vpack.c.bf16 %v10681_v62, %v10677_v17 }
 0xdfd   : > { %v10610_v23 = vpop.f32.mrf.mxu1  ;;  %v10683_v61 = vpop.f32.mrf.mxu0 }
 0xdfe   : > { %10781 = vrot.lane.b32.xlu0 %v10766_v13, %s20767_s26  ;;  %10998 = vrot.lane.b32.xlu1 %v20203_v53, %s20767_s26  ;;  %v10767_v31 = vpack.c.bf16 %v10610_v23, %v10606_v36  ;;  %v20250_v27 = vpack.c.bf16 %v10683_v61, %v10679_v26  ;;  %v15925_v36 = vld [vmem:[%s20757_s29 + $0x90] sm:$0xff]   ;;  %v15932_v26 = vld [vmem:[%s20757_s29 + $0xf8] sm:$0xff]  }
 0xdff   : > { %14749 = vmatprep.subr.bf16.mxu1 %v10766_v13  ;;  %v20306_v60 = vpop.f32.mrf.mxu1  ;;  %v15893_v61 = vld [vmem:[%s20491_s17 + $0x10] sm:$0xff]  }
 0xe00   : > { %14750 = vmatpush3.bf16.msra.mxu1 %v10766_v13  ;;  %v15928_v13 = vld [vmem:[%s20757_s29 + $0xe8] sm:$0xff]  }
 0xe01   : > { %14751 = vmatprep.subr.bf16.mxu1 %v10761_v33  ;;  %v20318_v8 = vpop.f32.mrf.mxu1 }
 0xe02   : > { %10777 = vrot.lane.b32.xlu0 %v10756_v4, %s20767_s26  ;;  %10994 = vrot.lane.b32.xlu1 %v20208_v20, %s20767_s26 }
 0xe03   : > { %v14728_v43 = vpop.f32.mrf.mxu1 }
 0xe04   : > { %14752 = vmatpush3.bf16.msra.mxu1 %v10761_v33 }
 0xe05   : > { %14753 = vmatprep.subr.bf16.mxu1 %v10756_v4  ;;  %v10723_v12 = vpop.f32.mrf.mxu1 }
 0xe06   : > { %11000 = vrot.lane.b32.xlu0 %v10767_v31, %s20767_s26  ;;  %11160 = vrot.lane.b32.xlu1 %v20213_v58, %s20767_s26  ;;  %v10755_v62 = vpack.c.bf16 %v10723_v12, %v20318_v8 }
 0xe07   : > { %v14731_v45 = vpop.f32.mrf.mxu1 }
 0xe08   : > { %14754 = vmatpush3.bf16.msra.mxu1 %v10756_v4  ;;  %v15930_v4 = vld [vmem:[%s20757_s29 + $0xf0] sm:$0xff]  }
 0xe09   : > { %14755 = vmatprep.subr.bf16.mxu1 %v10751_v50  ;;  %v10736_v2 = vpop.f32.mrf.mxu1 }
 0xe0a   : > { %10996 = vrot.lane.b32.xlu0 %v20218_v9, %s20767_s26  ;;  %11156 = vrot.lane.b32.xlu1 %v20220_v1, %s20767_s26 }
 0xe0b   : > { %v14732_v30 = vpop.f32.mrf.mxu1 }
 0xe0c   : > { %14756 = vmatpush3.bf16.msra.mxu1 %v10751_v50  ;;  %v10770_v23 = vpack.c.bf16 %v14732_v30, %v14731_v45 }
 0xe0d   : > { %v10739_v17 = vpop.f32.mrf.mxu1 }
 0xe0e   : > { %11162 = vrot.lane.b32.xlu0 %v20228_v35, %s20767_s26  ;;  %11322 = vrot.lane.b32.xlu1 %v20226_v39, %s20767_s26 }
 0xe0f   : > { %14758 = vmatmul.mubr.msk.bf16.vlgmr.msra.gmra.mxu1 %vm5883_vm2, %v15905_v24  ;;  %v15936_v24 = vld [vmem:[%s20757_s29 + $0x108] sm:$0xff]  }
 0xe10   : > { %14761 = vmatprep.mubr.msk.bf16.mxu1 %vm5883_vm2, %v15906_v32  ;;  %v15892_v32 = vld [vmem:[%s20491_s17 + $0x18] sm:$0xff]  }
 0xe12   : > { %11158 = vrot.lane.b32.xlu0 %v20240_v15, %s20767_s26  ;;  %11318 = vrot.lane.b32.xlu1 %v20238_v29, %s20767_s26 }
 0xe16   : > { %11324 = vrot.lane.b32.xlu0 %v20250_v27, %s20767_s26 }
 0xe17   : > { %14762 = vmatmul.mubr.msk.bf16.gmra.mxu1 %vm5883_vm2, %v15907_v41  ;;  %v15895_v41 = vld [vmem:[%s20491_s17] sm:$0xff]  }
 0xe18   : > { %14789 = vmatprep.mubr.msk.bf16.mxu1 %vm5883_vm2, %v15908_v21 }
 0xe1a   : > { %11320 = vrot.lane.b32.xlu0 %v20259_v57, %s20767_s26 }
 0xe68   : > { %v10780_v0 = vpop.permute.xlu1 %10779 }
 0xe6c   : > { %v10776_v3 = vpop.permute.xlu1 %10775 }
 0xe70   : > { %v10782_v22 = vpop.permute.xlu0 %10781  ;;  %v10999_v16 = vpop.permute.xlu1 %10998 }
 0xe71   : > { %14733 = vmatprep.subr.bf16.mxu0 %v10782_v22 }
 0xe72   : > { %14734 = vmatpush3.bf16.msra.mxu0 %v10782_v22 }
 0xe73   : > { %14735 = vmatprep.subr.bf16.mxu0 %v10780_v0 }
 0xe74   : > { %v10778_v51 = vpop.permute.xlu0 %10777  ;;  %v10995_v63 = vpop.permute.xlu1 %10994 }
 0xe76   : > { %14736 = vmatpush3.bf16.msra.mxu0 %v10780_v0 }
 0xe77   : > { %14737 = vmatprep.subr.bf16.mxu0 %v10778_v51 }
 0xe78   : > { %v11001_v48 = vpop.permute.xlu0 %11000  ;;  %v11161_v18 = vpop.permute.xlu1 %11160 }
 0xe79   : > { %14781 = vmatprep.subr.bf16.mxu1 %v11001_v48 }
 0xe7a   : > { %14738 = vmatpush3.bf16.msra.mxu0 %v10778_v51  ;;  %14782 = vmatpush3.bf16.msra.mxu1 %v11001_v48 }
 0xe7b   : > { %14739 = vmatprep.subr.bf16.mxu0 %v10776_v3  ;;  %14783 = vmatprep.subr.bf16.mxu1 %v10999_v16 }
 0xe7c   : > { %v10997_v19 = vpop.permute.xlu0 %10996  ;;  %v11157_v28 = vpop.permute.xlu1 %11156 }
 0xe7e   : > { %14740 = vmatpush3.bf16.msra.mxu0 %v10776_v3  ;;  %14784 = vmatpush3.bf16.msra.mxu1 %v10999_v16 }
 0xe7f   : > { %14765 = vmatprep.subr.bf16.mxu0 %v10767_v31  ;;  %14785 = vmatprep.subr.bf16.mxu1 %v10997_v19 }
 0xe80   : > { %v11163_v6 = vpop.permute.xlu0 %11162  ;;  %v11323_v46 = vpop.permute.xlu1 %11322 }
 0xe81   : > { %14742 = vmatmul.mubr.msk.bf16.vlgmr.msra.gmra.mxu0 %vm5883_vm2, %v15909_v54 }
 0xe82   : > { %14766 = vmatpush3.bf16.msra.mxu0 %v10767_v31  ;;  %14786 = vmatpush3.bf16.msra.mxu1 %v10997_v19  ;;  %v10765_v31 = vpack.c.bf16 %v10739_v17, %v10736_v2 }
 0xe83   : > { %14767 = vmatprep.subr.bf16.mxu0 %v20203_v53  ;;  %14787 = vmatprep.subr.bf16.mxu1 %v10995_v63 }
 0xe84   : > { %14745 = vmatprep.mubr.msk.bf16.mxu0 %vm5883_vm2, %v15910_v10  ;;  %v11159_v11 = vpop.permute.xlu0 %11158  ;;  %v11319_v50 = vpop.permute.xlu1 %11318 }
 0xe86   : > { %14768 = vmatpush3.bf16.msra.mxu0 %v20203_v53  ;;  %14788 = vmatpush3.bf16.msra.mxu1 %v10995_v63  ;;  %v15927_v53 = vld [vmem:[%s20757_s29 + $0x98] sm:$0xff]  }
 0xe87   : > { %14769 = vmatprep.subr.bf16.mxu0 %v20218_v9  ;;  %14813 = vmatprep.subr.bf16.mxu1 %v11163_v6 }
 0xe88   : > { %v11325_v59 = vpop.permute.xlu0 %11324 }
 0xe89   : > { %14746 = vmatmul.mubr.msk.bf16.gmra.mxu0 %vm5883_vm2, %v15911_v5  ;;  %14790 = vmatmul.mubr.msk.bf16.vlgmr.msra.gmra.mxu1 %vm5883_vm2, %v15912_v25 }
 0xe8a   : > { %14770 = vmatpush3.bf16.msra.mxu0 %v20218_v9  ;;  %14814 = vmatpush3.bf16.msra.mxu1 %v11163_v6  ;;  %v15933_v9 = vld [vmem:[%s20757_s29 + $0xd0] sm:$0xff]  }
 0xe8b   : > { %14771 = vmatprep.subr.bf16.mxu0 %v20208_v20  ;;  %14815 = vmatprep.subr.bf16.mxu1 %v11161_v18 }
 0xe8c   : > { %14773 = vmatprep.mubr.msk.bf16.mxu0 %vm5883_vm2, %v15913_v49  ;;  %14793 = vmatprep.mubr.msk.bf16.mxu1 %vm5883_vm2, %v15914_v37  ;;  %v11321_v33 = vpop.permute.xlu0 %11320 }
 0xe8e   : > { %14772 = vmatpush3.bf16.msra.mxu0 %v20208_v20  ;;  %14816 = vmatpush3.bf16.msra.mxu1 %v11161_v18  ;;  %v15929_v20 = vld [vmem:[%s20757_s29 + $0xc0] sm:$0xff]  }
 0xe8f   : > { %14797 = vmatprep.subr.bf16.mxu0 %v20228_v35  ;;  %14817 = vmatprep.subr.bf16.mxu1 %v11159_v11 }
 0xe91   : > { %14774 = vmatmul.mubr.msk.bf16.vlgmr.msra.gmra.mxu0 %vm5883_vm2, %v15915_v52  ;;  %14794 = vmatmul.mubr.msk.bf16.gmra.mxu1 %vm5883_vm2, %v15916_v55 }
 0xe92   : > { %14798 = vmatpush3.bf16.msra.mxu0 %v20228_v35  ;;  %14818 = vmatpush3.bf16.msra.mxu1 %v11159_v11  ;;  %v15935_v35 = vld [vmem:[%s20757_s29 + $0x100] sm:$0xff]  }
 0xe93   : > { %14799 = vmatprep.subr.bf16.mxu0 %v20213_v58  ;;  %14819 = vmatprep.subr.bf16.mxu1 %v11157_v28 }
 0xe94   : > { %14777 = vmatprep.mubr.msk.bf16.mxu0 %vm5883_vm2, %v15917_v14  ;;  %14821 = vmatprep.mubr.msk.bf16.mxu1 %vm5883_vm2, %v15918_v56 }
 0xe96   : > { %14800 = vmatpush3.bf16.msra.mxu0 %v20213_v58  ;;  %14820 = vmatpush3.bf16.msra.mxu1 %v11157_v28  ;;  %v15931_v58 = vld [vmem:[%s20757_s29 + $0xc8] sm:$0xff]  }
 0xe97   : > { %14801 = vmatprep.subr.bf16.mxu0 %v20240_v15  ;;  %14845 = vmatprep.subr.bf16.mxu1 %v11325_v59 }
 0xe99   : > { %14778 = vmatmul.mubr.msk.bf16.gmra.mxu0 %vm5883_vm2, %v15919_v42  ;;  %14822 = vmatmul.mubr.msk.bf16.vlgmr.msra.gmra.mxu1 %vm5883_vm2, %v15920_v47 }
 0xe9a   : > { %14802 = vmatpush3.bf16.msra.mxu0 %v20240_v15  ;;  %14846 = vmatpush3.bf16.msra.mxu1 %v11325_v59  ;;  %v15938_v15 = vld [vmem:[%s20757_s29 + $0x118] sm:$0xff]  }
 0xe9b   : > { %14803 = vmatprep.subr.bf16.mxu0 %v20220_v1  ;;  %14847 = vmatprep.subr.bf16.mxu1 %v11323_v46 }
 0xe9c   : > { %14805 = vmatprep.mubr.msk.bf16.mxu0 %vm5883_vm2, %v15921_v44  ;;  %14825 = vmatprep.mubr.msk.bf16.mxu1 %vm5883_vm2, %v15922_v38 }
 0xe9e   : > { %14804 = vmatpush3.bf16.msra.mxu0 %v20220_v1  ;;  %14848 = vmatpush3.bf16.msra.mxu1 %v11323_v46  ;;  %v10760_v1 = vpack.c.bf16 %v14728_v43, %v20306_v60 }
 0xe9f   : > { %14829 = vmatprep.subr.bf16.mxu0 %v20250_v27  ;;  %14849 = vmatprep.subr.bf16.mxu1 %v11321_v33 }
 0xea1   : > { %14806 = vmatmul.mubr.msk.bf16.vlgmr.msra.gmra.mxu0 %vm5883_vm2, %v15923_v7  ;;  %14826 = vmatmul.mubr.msk.bf16.gmra.mxu1 %vm5883_vm2, %v15924_v40 }
 0xea2   : > { %14830 = vmatpush3.bf16.msra.mxu0 %v20250_v27  ;;  %14850 = vmatpush3.bf16.msra.mxu1 %v11321_v33  ;;  %v15894_v27 = vld [vmem:[%s20491_s17 + $0x8] sm:$0xff]  }
 0xea3   : > { %14831 = vmatprep.subr.bf16.mxu0 %v20226_v39  ;;  %14851 = vmatprep.subr.bf16.mxu1 %v11319_v50 }
 0xea4   : > { %14809 = vmatprep.mubr.msk.bf16.mxu0 %vm5883_vm2, %v15925_v36  ;;  %14853 = vmatprep.mubr.msk.bf16.mxu1 %vm5883_vm2, %v15926_v34 }
 0xea6   : > { %14832 = vmatpush3.bf16.msra.mxu0 %v20226_v39  ;;  %14852 = vmatpush3.bf16.msra.mxu1 %v11319_v50  ;;  %v15934_v39 = vld [vmem:[%s20757_s29 + $0xd8] sm:$0xff]  }
 0xea7   : > { %14833 = vmatprep.subr.bf16.mxu0 %v20259_v57  ;;  %14877 = vmatprep.subr.bf16.mxu1 %v15892_v32 }
 0xea9   : > { %14810 = vmatmul.mubr.msk.bf16.gmra.mxu0 %vm5883_vm2, %v15927_v53  ;;  %14854 = vmatmul.mubr.msk.bf16.vlgmr.msra.gmra.mxu1 %vm5883_vm2, %v15928_v13 }
 0xeaa   : > { %14834 = vmatpush3.bf16.msra.mxu0 %v20259_v57  ;;  %14837 = vmatprep.mubr.msk.bf16.mxu0 %vm5883_vm2, %v15929_v20 }
 0xeab   : > { %14835 = vmatprep.subr.bf16.mxu0 %v20238_v29  ;;  %14857 = vmatprep.mubr.msk.bf16.mxu1 %vm5883_vm2, %v15930_v4 }
 0xeac   : > { %14878 = vmatpush3.bf16.msra.mxu1 %v15892_v32 }
 0xead   : > { %14879 = vmatprep.subr.bf16.mxu1 %v15893_v61 }
 0xeae   : > { %14836 = vmatpush3.bf16.msra.mxu0 %v20238_v29  ;;  %v15937_v29 = vld [vmem:[%s20757_s29 + $0x110] sm:$0xff]  }
 0xeaf   : > { %14861 = vmatprep.subr.bf16.mxu0 %v10770_v23 }
 0xeb0   : > { %14880 = vmatpush3.bf16.msra.mxu1 %v15893_v61 }
 0xeb1   : > { %14838 = vmatmul.mubr.msk.bf16.vlgmr.msra.gmra.mxu0 %vm5883_vm2, %v15931_v58  ;;  %14858 = vmatmul.mubr.msk.bf16.gmra.mxu1 %vm5883_vm2, %v15932_v26 }
 0xeb2   : > { %14862 = vmatpush3.bf16.msra.mxu0 %v10770_v23  ;;  %14841 = vmatprep.mubr.msk.bf16.mxu0 %vm5883_vm2, %v15933_v9 }
 0xeb3   : > { %14863 = vmatprep.subr.bf16.mxu0 %v10765_v31  ;;  %14881 = vmatprep.subr.bf16.mxu1 %v15894_v27 }
 0xeb4   : > { %14882 = vmatpush3.bf16.msra.mxu1 %v15894_v27 }
 0xeb5   : > { %14883 = vmatprep.subr.bf16.mxu1 %v15895_v41 }
 0xeb6   : > { %14864 = vmatpush3.bf16.msra.mxu0 %v10765_v31 }
 0xeb7   : > { %14865 = vmatprep.subr.bf16.mxu0 %v10760_v1 }
 0xeb8   : > { %14884 = vmatpush3.bf16.msra.mxu1 %v15895_v41 }
 0xeb9   : > { %14842 = vmatmul.mubr.msk.bf16.gmra.mxu0 %vm5883_vm2, %v15934_v39 }
 0xeba   : > { %14866 = vmatpush3.bf16.msra.mxu0 %v10760_v1  ;;  %14869 = vmatprep.mubr.msk.bf16.mxu0 %vm5883_vm2, %v15935_v35 }
 0xebb   : > { %14867 = vmatprep.subr.bf16.mxu0 %v10755_v62 }
 0xebe   : > { %14868 = vmatpush3.bf16.msra.mxu0 %v10755_v62 }
 0xec1   : > { %14870 = vmatmul.mubr.msk.bf16.vlgmr.msra.gmra.mxu0 %vm5883_vm2, %v15936_v24 }
 0xec2   : > { %14873 = vmatprep.mubr.msk.bf16.mxu0 %vm5883_vm2, %v15937_v29 }
 0xec9   : > { %14874 = vmatmul.mubr.msk.bf16.gmra.mxu0 %vm5883_vm2, %v15938_v15 }
 0xecf   : > { %v14759_v57 = vpop.f32.mrf.mxu1 }
 0xed1   : > { %v10886_v21 = vpop.f32.mrf.mxu1 }
 0xed3   : > { %v14760_v0 = vpop.f32.mrf.mxu1 }
 0xed5   : > { %v10889_v22 = vpop.f32.mrf.mxu1 }
 0xed7   : > { %v20427_v51 = vpop.f32.mrf.mxu1 }
 0xed9   : > { %v10902_v3 = vpop.f32.mrf.mxu1 }
 0xedb   : > { %v20429_v19 = vpop.f32.mrf.mxu1 }
 0xedd   : > { %v20431_v10 = vpop.f32.mrf.mxu1 }
 0xf41   : > { %v14743_v48 = vpop.f32.mrf.mxu0 }
 0xf42   : > { %v10895_v58 = vadd.f32 %v14759_v57, %v14743_v48 }
 0xf43   : > { %v10821_v16 = vpop.f32.mrf.mxu0 }
 0xf44   : > { %v10887_v31 = vadd.f32 %v10886_v21, %v10821_v16 }
 0xf45   : > { %v14744_v54 = vpop.f32.mrf.mxu0 }
 0xf46   : > { %v10898_v9 = vadd.f32 %v14760_v0, %v14744_v54 }
 0xf47   : > { %v10824_v63 = vpop.f32.mrf.mxu0 }
 0xf48   : > { %v10890_v24 = vadd.f32 %v10889_v22, %v10824_v63 }
 0xf49   : > { %v14747_v6 = vpop.f32.mrf.mxu0  ;;  %v14791_v5 = vpop.f32.mrf.mxu1 }
 0xf4a   : > { %v10911_v21 = vadd.f32 %v20427_v51, %v14747_v6 }
 0xf4b   : > { %v10837_v25 = vpop.f32.mrf.mxu0  ;;  %v11040_v18 = vpop.f32.mrf.mxu1 }
 0xf4d   : > { %v14748_v49 = vpop.f32.mrf.mxu0  ;;  %v14792_v37 = vpop.f32.mrf.mxu1 }
 0xf4e   : > { %v10914_v0 = vadd.f32 %v20429_v19, %v14748_v49 }
 0xf4f   : > { %v10840_v11 = vpop.f32.mrf.mxu0  ;;  %v11043_v52 = vpop.f32.mrf.mxu1 }
 0xf50   : > { %v10906_v63 = vadd.f32 %v20431_v10, %v10840_v11 }
 0xf51   : > { %v14775_v55 = vpop.f32.mrf.mxu0  ;;  %v20433_v60 = vpop.f32.mrf.mxu1 }
 0xf52   : > { %v10984_v62 = vadd.f32 %v14775_v55, %v10895_v58 }
 0xf53   : > { %v10951_v28 = vpop.f32.mrf.mxu0  ;;  %v11056_v14 = vpop.f32.mrf.mxu1 }
 0xf54   : > { %v10982_v1 = vadd.f32 %v10951_v28, %v10887_v31  ;;  %v11073_v27 = vadd.f32 %v14791_v5, %v10984_v62 }
 0xf55   : > { %v14776_v56 = vpop.f32.mrf.mxu0  ;;  %v20435_v8 = vpop.f32.mrf.mxu1 }
 0xf56   : > { %v10985_v29 = vadd.f32 %v14776_v56, %v10898_v9  ;;  %v11071_v61 = vadd.f32 %v11040_v18, %v10982_v1 }
 0xf57   : > { %v10954_v59 = vpop.f32.mrf.mxu0  ;;  %v20437_v42 = vpop.f32.mrf.mxu1 }
 0xf58   : > { %v10983_v32 = vadd.f32 %v10954_v59, %v10890_v24 }
 0xf59   : > { %v14779_v47 = vpop.f32.mrf.mxu0  ;;  %v14823_v43 = vpop.f32.mrf.mxu1 }
 0xf5a   : > { %v11072_v54 = vadd.f32 %v11043_v52, %v10983_v32  ;;  %v10988_v22 = vadd.f32 %v14779_v47, %v10911_v21 }
 0xf5b   : > { %v10967_v46 = vpop.f32.mrf.mxu0  ;;  %v11202_v44 = vpop.f32.mrf.mxu1 }
 0xf5d   : > { %v14780_v38 = vpop.f32.mrf.mxu0  ;;  %v14824_v12 = vpop.f32.mrf.mxu1 }
 0xf5e   : > { %v10989_v5 = vadd.f32 %v14780_v38, %v10914_v0 }
 0xf5f   : > { %v10970_v33 = vpop.f32.mrf.mxu0  ;;  %v11205_v7 = vpop.f32.mrf.mxu1 }
 0xf60   : > { %v11078_v47 = vadd.f32 %v20435_v8, %v10989_v5 }
 0xf61   : > { %v14807_v40 = vpop.f32.mrf.mxu0  ;;  %v20439_v45 = vpop.f32.mrf.mxu1 }
 0xf62   : > { %20768 = vst [vmem:[#allocation30_spill] sm:$0xff] %v20439_v45  ;;  %v11074_v45 = vadd.f32 %v14792_v37, %v10985_v29  ;;  %v11146_v57 = vadd.f32 %v14807_v40, %v11073_v27  ;;  %v11077_v40 = vadd.f32 %v20433_v60, %v10988_v22 }
 0xf63   : > { %v11113_v50 = vpop.f32.mrf.mxu0  ;;  %v20441_v36 = vpop.f32.mrf.mxu1 }
 0xf64   : > { %20769 = vst [vmem:[#allocation40_spill] sm:$0xff] %v20441_v36  ;;  %v11144_v36 = vadd.f32 %v11113_v50, %v11071_v61 }
 0xf65   : > { %v14808_v34 = vpop.f32.mrf.mxu0  ;;  %v20443_v53 = vpop.f32.mrf.mxu1 }
 0xf66   : > { %20770 = vst [vmem:[#allocation41_spill] sm:$0xff] %v20443_v53  ;;  %v11147_v55 = vadd.f32 %v14808_v34, %v11074_v45  ;;  %v11233_v59 = vadd.f32 %v11202_v44, %v11144_v36 }
 0xf67   : > { %v11116_v2 = vpop.f32.mrf.mxu0  ;;  %v20445_v20 = vpop.f32.mrf.mxu1 }
 0xf68   : > { %20771 = vst [vmem:[#allocation42_spill] sm:$0xff] %v20445_v20  ;;  %v10903_v20 = vadd.f32 %v10902_v3, %v10837_v25  ;;  %v11145_v56 = vadd.f32 %v11116_v2, %v11072_v54  ;;  %v10987_v3 = vadd.f32 %v10970_v33, %v10906_v63  ;;  %v11235_v25 = vadd.f32 %v14823_v43, %v11146_v57 }
 0xf69   : > { %v14811_v13 = vpop.f32.mrf.mxu0  ;;  %v14855_v17 = vpop.f32.mrf.mxu1  ;;  %v11236_v51 = vadd.f32 %v14824_v12, %v11147_v55 }
 0xf6a   : > { %v10986_v16 = vadd.f32 %v10967_v46, %v10903_v20  ;;  %v11234_v10 = vadd.f32 %v11205_v7, %v11145_v56  ;;  %v11150_v45 = vadd.f32 %v14811_v13, %v11077_v40  ;;  %v11076_v38 = vadd.f32 %v20437_v42, %v10987_v3  ;;  %v12977_v42 = vld [vmem:[%s20490_s16] ss:$0 sm:$0xff] }
 0xf6b   : > { %v11129_v30 = vpop.f32.mrf.mxu0  ;;  %v11364_v35 = vpop.f32.mrf.mxu1  ;;  %v20772_v60 = vld [vmem:[#allocation40_spill] sm:$0xff] }
 0xf6c   : > { %v11075_v50 = vadd.f32 %v11056_v14, %v10986_v16 }
 0xf6d   : > { %v14812_v4 = vpop.f32.mrf.mxu0  ;;  %v14856_v53 = vpop.f32.mrf.mxu1  ;;  %v20774_v9 = vld [vmem:[#allocation41_spill] sm:$0xff] }
 0xf6e   : > { %v11148_v46 = vadd.f32 %v11129_v30, %v11075_v50  ;;  %v11151_v33 = vadd.f32 %v14812_v4, %v11078_v47 }
 0xf6f   : > { %v11132_v23 = vpop.f32.mrf.mxu0  ;;  %v11367_v18 = vpop.f32.mrf.mxu1  ;;  %v20775_v62 = vld [vmem:[#allocation42_spill] sm:$0xff] }
 0xf70   : > { %v11149_v14 = vadd.f32 %v11132_v23, %v11076_v38  ;;  %v11237_v20 = vadd.f32 %v20772_v60, %v11148_v46  ;;  %v11240_v13 = vadd.f32 %v20774_v9, %v11151_v33 }
 0xf71   : > { %v14839_v26 = vpop.f32.mrf.mxu0  ;;  %v14859_v52 = vpop.f32.mrf.mxu1 }
 0xf72   : > { %v11308_v19 = vadd.f32 %v14839_v26, %v11235_v25  ;;  %v20773_v26 = vld [vmem:[#allocation30_spill] sm:$0xff] }
 0xf73   : > { %v11275_v39 = vpop.f32.mrf.mxu0  ;;  %v11380_v2 = vpop.f32.mrf.mxu1  ;;  %v11239_v8 = vadd.f32 %v20773_v26, %v11150_v45 }
 0xf74   : > { %v11306_v6 = vadd.f32 %v11275_v39, %v11233_v59  ;;  %v11397_v12 = vadd.f32 %v14855_v17, %v11308_v19  ;;  %v11238_v39 = vadd.f32 %v20775_v62, %v11149_v14 }
 0xf75   : > { %v14840_v15 = vpop.f32.mrf.mxu0  ;;  %v14860_v24 = vpop.f32.mrf.mxu1 }
 0xf76   : > { %v11309_v11 = vadd.f32 %v14840_v15, %v11236_v51  ;;  %v11395_v36 = vadd.f32 %v11364_v35, %v11306_v6 }
 0xf77   : > { %v11278_v41 = vpop.f32.mrf.mxu0  ;;  %v11383_v55 = vpop.f32.mrf.mxu1 }
 0xf78   : > { %v11307_v43 = vadd.f32 %v11278_v41, %v11234_v10  ;;  %v11398_v31 = vadd.f32 %v14856_v53, %v11309_v11 }
 0xf79   : > { %v14843_v48 = vpop.f32.mrf.mxu0 }
 0xf7a   : > { %v11396_v4 = vadd.f32 %v11367_v18, %v11307_v43  ;;  %v11312_v17 = vadd.f32 %v14843_v48, %v11239_v8 }
 0xf7b   : > { %v11291_v28 = vpop.f32.mrf.mxu0 }
 0xf7c   : > { %v11310_v1 = vadd.f32 %v11291_v28, %v11237_v20  ;;  %v11401_v16 = vadd.f32 %v14859_v52, %v11312_v17 }
 0xf7d   : > { %v14844_v37 = vpop.f32.mrf.mxu0 }
 0xf7e   : > { %v11313_v53 = vadd.f32 %v14844_v37, %v11240_v13  ;;  %v11399_v57 = vadd.f32 %v11380_v2, %v11310_v1 }
 0xf7f   : > { %v11294_v49 = vpop.f32.mrf.mxu0 }
 0xf80   : > { %v11311_v41 = vadd.f32 %v11294_v49, %v11238_v39  ;;  %v11402_v48 = vadd.f32 %v14860_v24, %v11313_v53 }
 0xf81   : > { %v14871_v44 = vpop.f32.mrf.mxu0 }
 0xf82   : > { %v11470_v30 = vadd.f32 %v14871_v44, %v11397_v12  ;;  %v11400_v3 = vadd.f32 %v11383_v55, %v11311_v41  ;;  %v12978_v44 = vld [vmem:[%s20492_s18] ss:$0 sm:$0xff] }
 0xf83   : > { %v11437_v34 = vpop.f32.mrf.mxu0 }
 0xf84   : > { %v11468_v58 = vadd.f32 %v11437_v34, %v11395_v36  ;;  %v11485_v61 = vadd.f32 %v12977_v42, %v11470_v30 }
 0xf85   : > { %v14872_v7 = vpop.f32.mrf.mxu0 }
 0xf86   : > { %v11471_v23 = vadd.f32 %v14872_v7, %v11398_v31  ;;  %v11483_v29 = vadd.f32 %v12977_v42, %v11468_v58  ;;  %v11493_v18 = vmax.f32 %v11485_v61, 0.0 }
 0xf87   : > { %v11440_v35 = vpop.f32.mrf.mxu0 }
 0xf88   : > { %v11486_v15 = vadd.f32 %v12977_v42, %v11471_v23  ;;  %v11469_v32 = vadd.f32 %v11440_v35, %v11396_v4  ;;  %v11491_v22 = vmax.f32 %v11483_v29, 0.0 }
 0xf89   : > { %v14875_v27 = vpop.f32.mrf.mxu0 }
 0xf8a   : > { %v11484_v21 = vadd.f32 %v12977_v42, %v11469_v32  ;;  %v11494_v0 = vmax.f32 %v11486_v15, 0.0  ;;  %v11474_v5 = vadd.f32 %v14875_v27, %v11401_v16 }
 0xf8b   : > { %v11453_v54 = vpop.f32.mrf.mxu0 }
 0xf8c   : > { %v11492_v63 = vmax.f32 %v11484_v21, 0.0  ;;  %v11472_v28 = vadd.f32 %v11453_v54, %v11399_v57  ;;  %v11500_v37 = vpack.c.bf16 %v11494_v0, %v11493_v18  ;;  %v11489_v19 = vadd.f32 %v12977_v42, %v11474_v5 }
 0xf8d   : > { %v14876_v56 = vpop.f32.mrf.mxu0 }
 0xf8e   : > { %v11499_v59 = vpack.c.bf16 %v11492_v63, %v11491_v22  ;;  %v11475_v25 = vadd.f32 %v14876_v56, %v11402_v48  ;;  %v11487_v51 = vadd.f32 %v12977_v42, %v11472_v28  ;;  %v11497_v10 = vmax.f32 %v11489_v19, 0.0 }
 0xf8f   : > { %v11456_v50 = vpop.f32.mrf.mxu0 }
 0xf90   : > { %v11490_v6 = vadd.f32 %v12977_v42, %v11475_v25  ;;  %v11473_v40 = vadd.f32 %v11456_v50, %v11400_v3  ;;  %14885 = vmatprep.mubr.msk.bf16.mxu1 %vm5883_vm2, %v11499_v59  ;;  %v11495_v47 = vmax.f32 %v11487_v51, 0.0 }
 0xf91   : > { %14886 = vmatmul.mubr.msk.bf16.vlgmr.msra.gmra.mxu1 %vm5883_vm2, %v11500_v37 }
 0xf92   : > { %v11488_v49 = vadd.f32 %v12977_v42, %v11473_v40  ;;  %v11498_v52 = vmax.f32 %v11490_v6, 0.0 }
 0xf94   : > { %v11496_v46 = vmax.f32 %v11488_v49, 0.0  ;;  %v11502_v45 = vpack.c.bf16 %v11498_v52, %v11497_v10 }
 0xf96   : > { %v11501_v11 = vpack.c.bf16 %v11496_v46, %v11495_v47 }
 0xf98   : > { %14889 = vmatprep.mubr.msk.bf16.mxu1 %vm5883_vm2, %v11501_v11 }
 0xf99   : > { %14890 = vmatmul.mubr.msk.bf16.gmra.mxu1 %vm5883_vm2, %v11502_v45 }
0x1051   : > { %v14887_v38 = vpop.f32.mrf.mxu1 }
0x1052   : > { %v11597_v36 = vadd.f32 %v14887_v38, %v12978_v44 }
0x1053   : > { %v11588_v33 = vpop.f32.mrf.mxu1 }
0x1054   : > { %v11589_v34 = vadd.f32 %v12978_v44, %v11588_v33 }
0x1055   : > { %v14888_v43 = vpop.f32.mrf.mxu1 }
0x1056   : > { %v11600_v14 = vadd.f32 %v14888_v43, %v12978_v44 }
0x1057   : > { %v11591_v12 = vpop.f32.mrf.mxu1 }
0x1058   : > { %v13015_v2 = vpack.c.bf16 %v11600_v14, %v11597_v36  ;;  %v11592_v60 = vadd.f32 %v12978_v44, %v11591_v12 }
0x1059   : > { %v14891_v20 = vpop.f32.mrf.mxu1 }
0x105a   : > { %13027 = vst [vmem:[%s602_s21 + $0x8] sm:$0xff] %v13015_v2   ;;  %v13010_v31 = vpack.c.bf16 %v11592_v60, %v11589_v34  ;;  %v11613_v8 = vadd.f32 %v14891_v20, %v12978_v44 }
0x105b   : > { %v11604_v58 = vpop.f32.mrf.mxu1 }
0x105c   : > { %13011 = vst [vmem:[%s602_s21] sm:$0xff] %v13010_v31   ;;  %v11605_v9 = vadd.f32 %v12978_v44, %v11604_v58 }
0x105d   : > { %v14892_v26 = vpop.f32.mrf.mxu1 }
0x105e   : > { %v11616_v30 = vadd.f32 %v14892_v26, %v12978_v44 }
0x105f   : > { %v11607_v7 = vpop.f32.mrf.mxu1 }
0x1060   : > { %v13025_v13 = vpack.c.bf16 %v11616_v30, %v11613_v8  ;;  %v11608_v1 = vadd.f32 %v12978_v44, %v11607_v7 }
0x1062   : > { %13029 = vst [vmem:[%s602_s21 + $0x18] sm:$0xff] %v13025_v13   ;;  %v13020_v42 = vpack.c.bf16 %v11608_v1, %v11605_v9 }
0x1064   : > { %13028 = vst [vmem:[%s602_s21 + $0x10] sm:$0xff] %v13020_v42  }
0x1065 PF: > { %s29_s0 = sadd.s32 1, %s15945_s0  }
0x1066   : > { %p26_p4 = scmp.ge.s32.totalorder %s29_s0, 4  }
0x1068   :  { %28 = sbr.rel (!%p26_p4) target bundleno = 5 (0x5), region = 159 }

</bundles_post_ra>
